<compile_context>
chip_gen: v7x
topology: tpu7x:2x2x1
jax: 0.10.0
libtpu: 0.0.40
codegen_flags: <defaults>
</compile_context>

<pallas_src>
import math
import functools

import jax
import jax.numpy as jnp
import numpy as np
from jax.experimental import pallas as pl
from jax.experimental.pallas import tpu as pltpu


def _pick_tile(n, cap=256):
    """Largest tile <= cap that divides n (256 fills the v6e/v7x MXU; 128 on v5e)."""
    t = min(n, cap)
    while n % t != 0:
        t //= 2
    return max(t, 1)


# ----------------------------------------------------------------------------
# Kernel 1: QKV projection + fused RMS-norm / rotary / scaling epilogue
# ----------------------------------------------------------------------------
def _qkv_project_kernel(lam_ref, x_ref, w_ref, cos_ref, sin_ref,
                        q_ref, k_ref, v_ref, *, num_heads, head_dim, scale, eps):
    H, D = num_heads, head_dim
    hdim = H * D

    # MXU matmul: bf16 operands, f32 accumulation.
    x = x_ref[...].astype(jnp.bfloat16)                       # (tm, dim)
    acc = jnp.dot(x, w_ref[...], preferred_element_type=jnp.float32)  # (tm, 3*hdim) f32

    cos = cos_ref[...]                                         # (tm, D//2) f32
    sin = sin_ref[...]
    lam = lam_ref[0]                                           # scalar from SMEM

    def rms(t):                                                # f32 norm (no bf16 VPU on v5e)
        return t * jax.lax.rsqrt(jnp.mean(t * t, axis=-1, keepdims=True) + eps)

    def rope(t):                                               # half-truncate rotary
        t1 = t[:, : D // 2]
        t2 = t[:, D // 2:]
        return jnp.concatenate([t1 * cos + t2 * sin, -t1 * sin + t2 * cos], axis=-1)

    for h in range(H):                                         # static, unrolled
        qh = acc[:, h * D:(h + 1) * D]
        kh = acc[:, hdim + h * D: hdim + (h + 1) * D]
        vh = acc[:, 2 * hdim + h * D: 2 * hdim + (h + 1) * D]
        # q is pre-scaled by 1/sqrt(D) here so the flash kernel never scales scores.
        q_ref[h] = (rope(rms(qh)) * scale).astype(q_ref.dtype)
        k_ref[h] = rope(rms(kh)).astype(k_ref.dtype)
        v_ref[h] = (lam * vh).astype(v_ref.dtype)


def qkv_project(x, w_qkv_t, rot_cos, rot_sin, lambdas, *, num_heads, head_dim):
    T, dim = x.shape
    H, D = num_heads, head_dim
    hdim3 = w_qkv_t.shape[1]
    assert hdim3 == 3 * H * D
    tm = _pick_tile(T)
    kernel = functools.partial(
        _qkv_project_kernel, num_heads=H, head_dim=D,
        scale=1.0 / math.sqrt(D), eps=float(jnp.finfo(jnp.float32).eps))
    # TODO(synk): for production-size `dim`, add a K-reduction grid axis instead of
    # keeping the full (dim, 3*hdim) weight block resident (v7x has 64 MiB VMEM).
    return pl.pallas_call(
        kernel,
        out_shape=[jax.ShapeDtypeStruct((H, T, D), jnp.bfloat16)] * 3,
        grid_spec=pltpu.PrefetchScalarGridSpec(
            num_scalar_prefetch=0,
            grid=(T // tm,),
            in_specs=[
                pl.BlockSpec(memory_space=pltpu.MemorySpace.SMEM),   # lambdas (1,)
                pl.BlockSpec((tm, dim), lambda i: (i, 0)),           # x
                pl.BlockSpec((dim, hdim3), lambda i: (0, 0)),        # W_qkv^T (bf16)
                pl.BlockSpec((tm, D // 2), lambda i: (i, 0)),        # cos
                pl.BlockSpec((tm, D // 2), lambda i: (i, 0)),        # sin
            ],
            out_specs=[pl.BlockSpec((H, tm, D), lambda i: (0, i, 0))] * 3,
        ),
        compiler_params=pltpu.CompilerParams(dimension_semantics=("parallel",)),
    )(lambdas, x, w_qkv_t, rot_cos, rot_sin)


# ----------------------------------------------------------------------------
# Kernel 2: flash attention, causal, online softmax
# ----------------------------------------------------------------------------
def _flash_causal_kernel(q_ref, k_ref, v_ref, o_ref, m_sc, l_sc, acc_sc, *, tq, tk):
    qi = pl.program_id(1)
    ki = pl.program_id(2)

    @pl.when(ki == 0)
    def _():
        m_sc[...] = jnp.full(m_sc.shape, -jnp.inf, jnp.float32)
        l_sc[...] = jnp.zeros(l_sc.shape, jnp.float32)
        acc_sc[...] = jnp.zeros(acc_sc.shape, jnp.float32)

    q_start = qi * tq
    k_start = ki * tk
    on_or_below = k_start <= q_start + (tq - 1)      # tile not entirely above diagonal
    touches_diag = k_start + (tk - 1) > q_start      # only these tiles need the mask

    def step(apply_mask):
        q = q_ref[0]                                  # (tq, D) bf16, pre-scaled
        k = k_ref[0]                                  # (tk, D) bf16
        s = jax.lax.dot_general(q, k, (((1,), (1,)), ((), ())),
                                preferred_element_type=jnp.float32)   # (tq, tk) f32
        if apply_mask:
            q_pos = q_start + jax.lax.broadcasted_iota(jnp.int32, (tq, tk), 0)
            k_pos = k_start + jax.lax.broadcasted_iota(jnp.int32, (tq, tk), 1)
            s = jnp.where(q_pos >= k_pos, s, -1e30)
        m_prev = m_sc[...]
        m_new = jnp.maximum(m_prev, s.max(axis=-1, keepdims=True))
        alpha = jnp.exp(m_prev - m_new)               # softmax state stays f32
        p = jnp.exp(s - m_new)
        l_sc[...] = alpha * l_sc[...] + p.sum(axis=-1, keepdims=True)
        acc_sc[...] = alpha * acc_sc[...] + jnp.dot(
            p.astype(jnp.bfloat16), v_ref[0], preferred_element_type=jnp.float32)
        m_sc[...] = m_new

    @pl.when(on_or_below & touches_diag)
    def _():
        step(True)

    @pl.when(on_or_below & jnp.logical_not(touches_diag))
    def _():
        step(False)

    @pl.when(ki == pl.num_programs(2) - 1)
    def _():
        o_ref[0] = (acc_sc[...] *
                    pl.reciprocal(l_sc[...], approx=True)).astype(o_ref.dtype)


def flash_causal_attention(q, k, v):
    # q, k, v: (H, T, D) bf16 — already normalized / rotated / scaled.
    H, T, D = q.shape
    tq = _pick_tile(T)
    tk = tq                     # required by the clamped K/V index map below
    kernel = functools.partial(_flash_causal_kernel, tq=tq, tk=tk)

    # Clamp the K/V block index to the query block: above-diagonal tiles map to an
    # unchanged block index, so Pallas skips their DMA entirely (not just compute).
    def kv_index(h, qi, ki):
        return (h, jnp.minimum(ki, qi), 0)

    # TODO(synk): FlexAttention BlockMask with arbitrary sparsity is not translated;
    # the kernel implements a dense causal mask.
    return pl.pallas_call(
        kernel,
        out_shape=jax.ShapeDtypeStruct((H, T, D), q.dtype),
        grid_spec=pltpu.PrefetchScalarGridSpec(
            num_scalar_prefetch=0,
            grid=(H, T // tq, T // tk),
            in_specs=[pl.BlockSpec((1, tq, D), lambda h, qi, ki: (h, qi, 0)),
                      pl.BlockSpec((1, tk, D), kv_index),
                      pl.BlockSpec((1, tk, D), kv_index)],
            out_specs=pl.BlockSpec((1, tq, D), lambda h, qi, ki: (h, qi, 0)),
            scratch_shapes=[pltpu.VMEM((tq, 1), jnp.float32),
                            pltpu.VMEM((tq, 1), jnp.float32),
                            pltpu.VMEM((tq, D), jnp.float32)]),
        compiler_params=pltpu.CompilerParams(
            dimension_semantics=("parallel", "parallel", "arbitrary")),
    )(q, k, v)


# ----------------------------------------------------------------------------
# Kernel 3: head-merge + output projection (heads as reduction grid axis)
# ----------------------------------------------------------------------------
def _proj_kernel(y_ref, w_ref, o_ref, acc_ref):
    h = pl.program_id(1)

    @pl.when(h == 0)
    def _():
        acc_ref[...] = jnp.zeros(acc_ref.shape, jnp.float32)

    acc_ref[...] += jnp.dot(y_ref[0], w_ref[0], preferred_element_type=jnp.float32)

    @pl.when(h == pl.num_programs(1) - 1)
    def _():
        o_ref[...] = acc_ref[...].astype(o_ref.dtype)


def head_merge_project(y, w_proj_h, out_dtype):
    # y: (H, T, D) bf16; w_proj_h: (H, D, dim) bf16; out: (T, dim) out_dtype.
    H, T, D = y.shape
    dim = w_proj_h.shape[-1]
    tm = _pick_tile(T)
    return pl.pallas_call(
        _proj_kernel,
        out_shape=jax.ShapeDtypeStruct((T, dim), out_dtype),
        grid_spec=pltpu.PrefetchScalarGridSpec(
            num_scalar_prefetch=0,
            grid=(T // tm, H),
            in_specs=[pl.BlockSpec((1, tm, D), lambda i, h: (h, i, 0)),
                      pl.BlockSpec((1, D, dim), lambda i, h: (h, 0, 0))],
            out_specs=pl.BlockSpec((tm, dim), lambda i, h: (i, 0)),
            scratch_shapes=[pltpu.VMEM((tm, dim), jnp.float32)]),
        compiler_params=pltpu.CompilerParams(
            dimension_semantics=("parallel", "arbitrary")),
    )(y, w_proj_h)


# ----------------------------------------------------------------------------
# Parameter preparation (done once, off the hot path) and forward pass
# ----------------------------------------------------------------------------
def make_rotary(head_dim, max_seq_len):
    # half-truncate RoPE (modded-nanogpt Rotary): base 1024, half the dims frozen.
    angular_freq = (1.0 / 1024.0) ** jnp.linspace(0, 1, head_dim // 4, dtype=jnp.float32)
    angular_freq = jnp.concatenate(
        [angular_freq, jnp.zeros(head_dim // 4, dtype=jnp.float32)])
    t = jnp.arange(max_seq_len, dtype=jnp.float32)
    theta = jnp.einsum("i,j->ij", t, angular_freq)            # (max_seq_len, D//2)
    return jnp.cos(theta), jnp.sin(theta)


def prepare_params(raw, seq_len):
    """Pre-transpose / pre-cast weights once so the hot path is pure pallas_calls."""
    H, D = raw["num_heads"], raw["head_dim"]
    hdim = H * D
    dim = raw["qkv_w"].shape[-1]
    w_qkv_t = raw["qkv_w"].reshape(3 * hdim, dim).T.astype(jnp.bfloat16)   # (dim, 3*hdim)
    w_proj_h = raw["c_proj_w"].T.reshape(H, D, dim).astype(jnp.bfloat16)   # (H, D, dim)
    return dict(
        num_heads=H, head_dim=D,
        w_qkv_t=w_qkv_t, w_proj_h=w_proj_h,
        lambdas=raw["lambdas"].astype(jnp.float32),
        rot_cos=raw["rot_cos"][:seq_len], rot_sin=raw["rot_sin"][:seq_len])


def causal_self_attention(x, params):
    """Forward pass. x: (B, T, dim), B must be 1."""
    B, T, dim = x.shape
    assert B == 1, "Must use batch size = 1 (FlexAttention constraint)"
    H, D = params["num_heads"], params["head_dim"]
    q, k, v = qkv_project(x[0], params["w_qkv_t"], params["rot_cos"],
                          params["rot_sin"], params["lambdas"],
                          num_heads=H, head_dim=D)                 # (H,T,D) bf16 each
    y = flash_causal_attention(q, k, v)                            # (H,T,D) bf16
    out = head_merge_project(y, params["w_proj_h"], out_dtype=x.dtype)  # (T,dim) f32
    return out[None]


# ----------------------------------------------------------------------------
# Pure-JAX f32 reference (sanity check only)
# ----------------------------------------------------------------------------
def reference(x, raw):
    B, T, dim = x.shape
    H, D = raw["num_heads"], raw["head_dim"]
    hdim = H * D
    w = raw["qkv_w"].reshape(3 * hdim, dim)
    qkv = (x[0] @ w.T).reshape(T, 3, H, D)
    q, k, v = qkv[:, 0], qkv[:, 1], qkv[:, 2]
    eps = jnp.finfo(x.dtype).eps

    def rn(t):
        return t * jax.lax.rsqrt(jnp.mean(t * t, axis=-1, keepdims=True) + eps)

    cos = raw["rot_cos"][:T][:, None, :]
    sin = raw["rot_sin"][:T][:, None, :]

    def rot(t):
        t1, t2 = jnp.split(t, 2, axis=-1)
        return jnp.concatenate([t1 * cos + t2 * sin, -t1 * sin + t2 * cos], axis=-1)

    q = rot(rn(q))
    k = rot(rn(k))
    v = raw["lambdas"][0] * v
    scale = 1.0 / math.sqrt(D)
    s = jnp.einsum("thd,shd->hts", q, k) * scale
    mask = jnp.tril(jnp.ones((T, T), dtype=bool))
    p = jax.nn.softmax(jnp.where(mask[None], s, -jnp.inf), axis=-1)
    y = jnp.einsum("hts,shd->thd", p, v).reshape(T, hdim)
    return (y @ raw["c_proj_w"].T)[None]


# ----------------------------------------------------------------------------
if __name__ == "__main__":
    dim, num_heads, head_dim = 64, 4, 16
    T, max_seq_len = 128, 128
    hdim = num_heads * head_dim

    key = jax.random.PRNGKey(0)
    k1, k2, k3 = jax.random.split(key, 3)

    std = 0.5 * dim ** (-0.5)
    bound = 3 ** 0.5 * std
    qkv_w = jax.random.uniform(k1, (3, hdim, dim), jnp.float32, -bound, bound)
    # NOTE: the PyTorch module zero-inits c_proj.weight; use a deterministic random
    # init here so the numerical check against the reference is non-trivial.
    c_proj_w = 0.2 * jax.random.normal(k2, (dim, hdim), jnp.float32)
    rot_cos, rot_sin = make_rotary(head_dim, max_seq_len)

    raw = dict(num_heads=num_heads, head_dim=head_dim, qkv_w=qkv_w,
               lambdas=jnp.array([0.5], jnp.float32), c_proj_w=c_proj_w,
               rot_cos=rot_cos, rot_sin=rot_sin)
    params = prepare_params(raw, seq_len=T)

    x = jax.random.normal(k3, (1, T, dim), jnp.float32)

    out = causal_self_attention(x, params)
    jax.block_until_ready(out)

    ref = reference(x, raw)
    assert out.shape == (1, T, dim)
    np.testing.assert_allclose(np.asarray(out), np.asarray(ref),
                               rtol=5e-2, atol=5e-2)
    print("KERNEL_OK")
</pallas_src>

<mosaic_0001>
module attributes {stable_mosaic.version = 11 : i64} {
  func.func @_qkv_project_kernel(%arg0: i32, %arg1: memref<1xf32, #tpu.memory_space<smem>>, %arg2: memref<128x64xf32, #tpu.memory_space<vmem>>, %arg3: memref<64x192xbf16, #tpu.memory_space<vmem>>, %arg4: memref<128x8xf32, #tpu.memory_space<vmem>>, %arg5: memref<128x8xf32, #tpu.memory_space<vmem>>, %arg6: memref<4x128x16xbf16, #tpu.memory_space<vmem>>, %arg7: memref<4x128x16xbf16, #tpu.memory_space<vmem>>, %arg8: memref<4x128x16xbf16, #tpu.memory_space<vmem>>) attributes {dimension_semantics = [#tpu.dimension_semantics<parallel>], iteration_bounds = array<i64: 1>, scalar_prefetch = 0 : i64, scratch_operands = 0 : i64, tpu.core_type = #tpu.core_type<tc>, window_params = [{transform_indices = @transform_0, window_bounds = array<i64: 1>}, {transform_indices = @transform_1, window_bounds = array<i64: 128, 64>}, {pipeline_mode = #tpu.pipeline_mode<synchronous>, transform_indices = @transform_2, window_bounds = array<i64: 64, 192>}, {transform_indices = @transform_3, window_bounds = array<i64: 128, 8>}, {transform_indices = @transform_4, window_bounds = array<i64: 128, 8>}, {transform_indices = @transform_5, window_bounds = array<i64: 4, 128, 16>}, {transform_indices = @transform_6, window_bounds = array<i64: 4, 128, 16>}, {transform_indices = @transform_7, window_bounds = array<i64: 4, 128, 16>}]} {
    %c0 = arith.constant 0 : index
    %c0_0 = arith.constant 0 : index
    %0 = vector.load %arg2[%c0, %c0_0] : memref<128x64xf32, #tpu.memory_space<vmem>>, vector<128x64xf32>
    %1 = arith.truncf %0 : vector<128x64xf32> to vector<128x64xbf16>
    %c0_1 = arith.constant 0 : index
    %c0_2 = arith.constant 0 : index
    %2 = vector.load %arg3[%c0_1, %c0_2] : memref<64x192xbf16, #tpu.memory_space<vmem>>, vector<64x192xbf16>
    %cst = arith.constant dense<0.000000e+00> : vector<128x192xf32>
    %3 = tpu.matmul %1, %2, %cst {dimension_numbers = #tpu.dot_dimension_numbers<[1], [0], [0], [1], [0, 0, 1, 1], [], []>} : vector<128x64xbf16>, vector<64x192xbf16>, vector<128x192xf32> -> vector<128x192xf32>
    %c0_3 = arith.constant 0 : index
    %c0_4 = arith.constant 0 : index
    %4 = vector.load %arg4[%c0_3, %c0_4] : memref<128x8xf32, #tpu.memory_space<vmem>>, vector<128x8xf32>
    %c0_5 = arith.constant 0 : index
    %c0_6 = arith.constant 0 : index
    %5 = vector.load %arg5[%c0_5, %c0_6] : memref<128x8xf32, #tpu.memory_space<vmem>>, vector<128x8xf32>
    %c0_7 = arith.constant 0 : index
    %6 = memref.load %arg1[%c0_7] : memref<1xf32, #tpu.memory_space<smem>>
    %7 = vector.extract_strided_slice %3 {offsets = [0, 0], sizes = [128, 16], strides = [1, 1]} : vector<128x192xf32> to vector<128x16xf32>
    %8 = vector.extract_strided_slice %3 {offsets = [0, 64], sizes = [128, 16], strides = [1, 1]} : vector<128x192xf32> to vector<128x16xf32>
    %9 = vector.extract_strided_slice %3 {offsets = [0, 128], sizes = [128, 16], strides = [1, 1]} : vector<128x192xf32> to vector<128x16xf32>
    %10 = arith.mulf %7, %7 : vector<128x16xf32>
    %cst_8 = arith.constant dense<0.000000e+00> : vector<128xf32>
    %11 = vector.multi_reduction <add>, %10, %cst_8 [1] : vector<128x16xf32> to vector<128xf32>
    %12 = vector.shape_cast %11 : vector<128xf32> to vector<128x1xf32>
    %cst_9 = arith.constant 1.600000e+01 : f32
    %13 = vector.broadcast %cst_9 : f32 to vector<128x1xf32>
    %14 = arith.divf %12, %13 : vector<128x1xf32>
    %cst_10 = arith.constant 1.1920929E-7 : f32
    %15 = vector.broadcast %cst_10 : f32 to vector<128x1xf32>
    %16 = arith.addf %14, %15 : vector<128x1xf32>
    %17 = math.rsqrt %16 : vector<128x1xf32>
    %18 = vector.broadcast %17 : vector<128x1xf32> to vector<128x16xf32>
    %19 = arith.mulf %7, %18 : vector<128x16xf32>
    %20 = vector.extract_strided_slice %19 {offsets = [0, 0], sizes = [128, 8], strides = [1, 1]} : vector<128x16xf32> to vector<128x8xf32>
    %21 = vector.extract_strided_slice %19 {offsets = [0, 8], sizes = [128, 8], strides = [1, 1]} : vector<128x16xf32> to vector<128x8xf32>
    %22 = arith.mulf %20, %4 : vector<128x8xf32>
    %23 = arith.mulf %21, %5 : vector<128x8xf32>
    %24 = arith.addf %22, %23 : vector<128x8xf32>
    %cst_11 = arith.constant 0.000000e+00 : f32
    %25 = vector.broadcast %cst_11 : f32 to vector<128x8xf32>
    %26 = arith.subf %25, %20 : vector<128x8xf32>
    %27 = arith.mulf %26, %5 : vector<128x8xf32>
    %28 = arith.mulf %21, %4 : vector<128x8xf32>
    %29 = arith.addf %27, %28 : vector<128x8xf32>
    %30 = tpu.concatenate %24, %29 in 1 : vector<128x8xf32>, vector<128x8xf32> -> vector<128x16xf32>
    %cst_12 = arith.constant 2.500000e-01 : f32
    %31 = vector.broadcast %cst_12 : f32 to vector<128x16xf32>
    %32 = arith.mulf %30, %31 : vector<128x16xf32>
    %33 = arith.truncf %32 : vector<128x16xf32> to vector<128x16xbf16>
    %c0_13 = arith.constant 0 : index
    %c0_14 = arith.constant 0 : index
    %c0_15 = arith.constant 0 : index
    %34 = vector.load %arg6[%c0_13, %c0_14, %c0_15] : memref<4x128x16xbf16, #tpu.memory_space<vmem>>, vector<1x128x16xbf16>
    %35 = vector.shape_cast %34 : vector<1x128x16xbf16> to vector<128x16xbf16>
    %36 = vector.shape_cast %33 : vector<128x16xbf16> to vector<1x128x16xbf16>
    tpu.vector_store %arg6[%c0_13, %c0_14, %c0_15], %36 {strides = array<i32>} : memref<4x128x16xbf16, #tpu.memory_space<vmem>>, vector<1x128x16xbf16>,
    %37 = arith.mulf %8, %8 : vector<128x16xf32>
    %cst_16 = arith.constant dense<0.000000e+00> : vector<128xf32>
    %38 = vector.multi_reduction <add>, %37, %cst_16 [1] : vector<128x16xf32> to vector<128xf32>
    %39 = vector.shape_cast %38 : vector<128xf32> to vector<128x1xf32>
    %cst_17 = arith.constant 1.600000e+01 : f32
    %40 = vector.broadcast %cst_17 : f32 to vector<128x1xf32>
    %41 = arith.divf %39, %40 : vector<128x1xf32>
    %cst_18 = arith.constant 1.1920929E-7 : f32
    %42 = vector.broadcast %cst_18 : f32 to vector<128x1xf32>
    %43 = arith.addf %41, %42 : vector<128x1xf32>
    %44 = math.rsqrt %43 : vector<128x1xf32>
    %45 = vector.broadcast %44 : vector<128x1xf32> to vector<128x16xf32>
    %46 = arith.mulf %8, %45 : vector<128x16xf32>
    %47 = vector.extract_strided_slice %46 {offsets = [0, 0], sizes = [128, 8], strides = [1, 1]} : vector<128x16xf32> to vector<128x8xf32>
    %48 = vector.extract_strided_slice %46 {offsets = [0, 8], sizes = [128, 8], strides = [1, 1]} : vector<128x16xf32> to vector<128x8xf32>
    %49 = arith.mulf %47, %4 : vector<128x8xf32>
    %50 = arith.mulf %48, %5 : vector<128x8xf32>
    %51 = arith.addf %49, %50 : vector<128x8xf32>
    %cst_19 = arith.constant 0.000000e+00 : f32
    %52 = vector.broadcast %cst_19 : f32 to vector<128x8xf32>
    %53 = arith.subf %52, %47 : vector<128x8xf32>
    %54 = arith.mulf %53, %5 : vector<128x8xf32>
    %55 = arith.mulf %48, %4 : vector<128x8xf32>
    %56 = arith.addf %54, %55 : vector<128x8xf32>
    %57 = tpu.concatenate %51, %56 in 1 : vector<128x8xf32>, vector<128x8xf32> -> vector<128x16xf32>
    %58 = arith.truncf %57 : vector<128x16xf32> to vector<128x16xbf16>
    %c0_20 = arith.constant 0 : index
    %c0_21 = arith.constant 0 : index
    %c0_22 = arith.constant 0 : index
    %59 = vector.load %arg7[%c0_20, %c0_21, %c0_22] : memref<4x128x16xbf16, #tpu.memory_space<vmem>>, vector<1x128x16xbf16>
    %60 = vector.shape_cast %59 : vector<1x128x16xbf16> to vector<128x16xbf16>
    %61 = vector.shape_cast %58 : vector<128x16xbf16> to vector<1x128x16xbf16>
    tpu.vector_store %arg7[%c0_20, %c0_21, %c0_22], %61 {strides = array<i32>} : memref<4x128x16xbf16, #tpu.memory_space<vmem>>, vector<1x128x16xbf16>,
    %62 = vector.broadcast %6 : f32 to vector<128x16xf32>
    %63 = arith.mulf %62, %9 : vector<128x16xf32>
    %64 = arith.truncf %63 : vector<128x16xf32> to vector<128x16xbf16>
    %c0_23 = arith.constant 0 : index
    %c0_24 = arith.constant 0 : index
    %c0_25 = arith.constant 0 : index
    %65 = vector.load %arg8[%c0_23, %c0_24, %c0_25] : memref<4x128x16xbf16, #tpu.memory_space<vmem>>, vector<1x128x16xbf16>
    %66 = vector.shape_cast %65 : vector<1x128x16xbf16> to vector<128x16xbf16>
    %67 = vector.shape_cast %64 : vector<128x16xbf16> to vector<1x128x16xbf16>
    tpu.vector_store %arg8[%c0_23, %c0_24, %c0_25], %67 {strides = array<i32>} : memref<4x128x16xbf16, #tpu.memory_space<vmem>>, vector<1x128x16xbf16>,
    %68 = vector.extract_strided_slice %3 {offsets = [0, 16], sizes = [128, 16], strides = [1, 1]} : vector<128x192xf32> to vector<128x16xf32>
    %69 = vector.extract_strided_slice %3 {offsets = [0, 80], sizes = [128, 16], strides = [1, 1]} : vector<128x192xf32> to vector<128x16xf32>
    %70 = vector.extract_strided_slice %3 {offsets = [0, 144], sizes = [128, 16], strides = [1, 1]} : vector<128x192xf32> to vector<128x16xf32>
    %71 = arith.mulf %68, %68 : vector<128x16xf32>
    %cst_26 = arith.constant dense<0.000000e+00> : vector<128xf32>
    %72 = vector.multi_reduction <add>, %71, %cst_26 [1] : vector<128x16xf32> to vector<128xf32>
    %73 = vector.shape_cast %72 : vector<128xf32> to vector<128x1xf32>
    %cst_27 = arith.constant 1.600000e+01 : f32
    %74 = vector.broadcast %cst_27 : f32 to vector<128x1xf32>
    %75 = arith.divf %73, %74 : vector<128x1xf32>
    %cst_28 = arith.constant 1.1920929E-7 : f32
    %76 = vector.broadcast %cst_28 : f32 to vector<128x1xf32>
    %77 = arith.addf %75, %76 : vector<128x1xf32>
    %78 = math.rsqrt %77 : vector<128x1xf32>
    %79 = vector.broadcast %78 : vector<128x1xf32> to vector<128x16xf32>
    %80 = arith.mulf %68, %79 : vector<128x16xf32>
    %81 = vector.extract_strided_slice %80 {offsets = [0, 0], sizes = [128, 8], strides = [1, 1]} : vector<128x16xf32> to vector<128x8xf32>
    %82 = vector.extract_strided_slice %80 {offsets = [0, 8], sizes = [128, 8], strides = [1, 1]} : vector<128x16xf32> to vector<128x8xf32>
    %83 = arith.mulf %81, %4 : vector<128x8xf32>
    %84 = arith.mulf %82, %5 : vector<128x8xf32>
    %85 = arith.addf %83, %84 : vector<128x8xf32>
    %cst_29 = arith.constant 0.000000e+00 : f32
    %86 = vector.broadcast %cst_29 : f32 to vector<128x8xf32>
    %87 = arith.subf %86, %81 : vector<128x8xf32>
    %88 = arith.mulf %87, %5 : vector<128x8xf32>
    %89 = arith.mulf %82, %4 : vector<128x8xf32>
    %90 = arith.addf %88, %89 : vector<128x8xf32>
    %91 = tpu.concatenate %85, %90 in 1 : vector<128x8xf32>, vector<128x8xf32> -> vector<128x16xf32>
    %cst_30 = arith.constant 2.500000e-01 : f32
    %92 = vector.broadcast %cst_30 : f32 to vector<128x16xf32>
    %93 = arith.mulf %91, %92 : vector<128x16xf32>
    %94 = arith.truncf %93 : vector<128x16xf32> to vector<128x16xbf16>
    %c1 = arith.constant 1 : index
    %c0_31 = arith.constant 0 : index
    %c0_32 = arith.constant 0 : index
    %95 = vector.load %arg6[%c1, %c0_31, %c0_32] : memref<4x128x16xbf16, #tpu.memory_space<vmem>>, vector<1x128x16xbf16>
    %96 = vector.shape_cast %95 : vector<1x128x16xbf16> to vector<128x16xbf16>
    %97 = vector.shape_cast %94 : vector<128x16xbf16> to vector<1x128x16xbf16>
    tpu.vector_store %arg6[%c1, %c0_31, %c0_32], %97 {strides = array<i32>} : memref<4x128x16xbf16, #tpu.memory_space<vmem>>, vector<1x128x16xbf16>,
    %98 = arith.mulf %69, %69 : vector<128x16xf32>
    %cst_33 = arith.constant dense<0.000000e+00> : vector<128xf32>
    %99 = vector.multi_reduction <add>, %98, %cst_33 [1] : vector<128x16xf32> to vector<128xf32>
    %100 = vector.shape_cast %99 : vector<128xf32> to vector<128x1xf32>
    %cst_34 = arith.constant 1.600000e+01 : f32
    %101 = vector.broadcast %cst_34 : f32 to vector<128x1xf32>
    %102 = arith.divf %100, %101 : vector<128x1xf32>
    %cst_35 = arith.constant 1.1920929E-7 : f32
    %103 = vector.broadcast %cst_35 : f32 to vector<128x1xf32>
    %104 = arith.addf %102, %103 : vector<128x1xf32>
    %105 = math.rsqrt %104 : vector<128x1xf32>
    %106 = vector.broadcast %105 : vector<128x1xf32> to vector<128x16xf32>
    %107 = arith.mulf %69, %106 : vector<128x16xf32>
    %108 = vector.extract_strided_slice %107 {offsets = [0, 0], sizes = [128, 8], strides = [1, 1]} : vector<128x16xf32> to vector<128x8xf32>
    %109 = vector.extract_strided_slice %107 {offsets = [0, 8], sizes = [128, 8], strides = [1, 1]} : vector<128x16xf32> to vector<128x8xf32>
    %110 = arith.mulf %108, %4 : vector<128x8xf32>
    %111 = arith.mulf %109, %5 : vector<128x8xf32>
    %112 = arith.addf %110, %111 : vector<128x8xf32>
    %cst_36 = arith.constant 0.000000e+00 : f32
    %113 = vector.broadcast %cst_36 : f32 to vector<128x8xf32>
    %114 = arith.subf %113, %108 : vector<128x8xf32>
    %115 = arith.mulf %114, %5 : vector<128x8xf32>
    %116 = arith.mulf %109, %4 : vector<128x8xf32>
    %117 = arith.addf %115, %116 : vector<128x8xf32>
    %118 = tpu.concatenate %112, %117 in 1 : vector<128x8xf32>, vector<128x8xf32> -> vector<128x16xf32>
    %119 = arith.truncf %118 : vector<128x16xf32> to vector<128x16xbf16>
    %c1_37 = arith.constant 1 : index
    %c0_38 = arith.constant 0 : index
    %c0_39 = arith.constant 0 : index
    %120 = vector.load %arg7[%c1_37, %c0_38, %c0_39] : memref<4x128x16xbf16, #tpu.memory_space<vmem>>, vector<1x128x16xbf16>
    %121 = vector.shape_cast %120 : vector<1x128x16xbf16> to vector<128x16xbf16>
    %122 = vector.shape_cast %119 : vector<128x16xbf16> to vector<1x128x16xbf16>
    tpu.vector_store %arg7[%c1_37, %c0_38, %c0_39], %122 {strides = array<i32>} : memref<4x128x16xbf16, #tpu.memory_space<vmem>>, vector<1x128x16xbf16>,
    %123 = vector.broadcast %6 : f32 to vector<128x16xf32>
    %124 = arith.mulf %123, %70 : vector<128x16xf32>
    %125 = arith.truncf %124 : vector<128x16xf32> to vector<128x16xbf16>
    %c1_40 = arith.constant 1 : index
    %c0_41 = arith.constant 0 : index
    %c0_42 = arith.constant 0 : index
    %126 = vector.load %arg8[%c1_40, %c0_41, %c0_42] : memref<4x128x16xbf16, #tpu.memory_space<vmem>>, vector<1x128x16xbf16>
    %127 = vector.shape_cast %126 : vector<1x128x16xbf16> to vector<128x16xbf16>
    %128 = vector.shape_cast %125 : vector<128x16xbf16> to vector<1x128x16xbf16>
    tpu.vector_store %arg8[%c1_40, %c0_41, %c0_42], %128 {strides = array<i32>} : memref<4x128x16xbf16, #tpu.memory_space<vmem>>, vector<1x128x16xbf16>,
    %129 = vector.extract_strided_slice %3 {offsets = [0, 32], sizes = [128, 16], strides = [1, 1]} : vector<128x192xf32> to vector<128x16xf32>
    %130 = vector.extract_strided_slice %3 {offsets = [0, 96], sizes = [128, 16], strides = [1, 1]} : vector<128x192xf32> to vector<128x16xf32>
    %131 = vector.extract_strided_slice %3 {offsets = [0, 160], sizes = [128, 16], strides = [1, 1]} : vector<128x192xf32> to vector<128x16xf32>
    %132 = arith.mulf %129, %129 : vector<128x16xf32>
    %cst_43 = arith.constant dense<0.000000e+00> : vector<128xf32>
    %133 = vector.multi_reduction <add>, %132, %cst_43 [1] : vector<128x16xf32> to vector<128xf32>
    %134 = vector.shape_cast %133 : vector<128xf32> to vector<128x1xf32>
    %cst_44 = arith.constant 1.600000e+01 : f32
    %135 = vector.broadcast %cst_44 : f32 to vector<128x1xf32>
    %136 = arith.divf %134, %135 : vector<128x1xf32>
    %cst_45 = arith.constant 1.1920929E-7 : f32
    %137 = vector.broadcast %cst_45 : f32 to vector<128x1xf32>
    %138 = arith.addf %136, %137 : vector<128x1xf32>
    %139 = math.rsqrt %138 : vector<128x1xf32>
    %140 = vector.broadcast %139 : vector<128x1xf32> to vector<128x16xf32>
    %141 = arith.mulf %129, %140 : vector<128x16xf32>
    %142 = vector.extract_strided_slice %141 {offsets = [0, 0], sizes = [128, 8], strides = [1, 1]} : vector<128x16xf32> to vector<128x8xf32>
    %143 = vector.extract_strided_slice %141 {offsets = [0, 8], sizes = [128, 8], strides = [1, 1]} : vector<128x16xf32> to vector<128x8xf32>
    %144 = arith.mulf %142, %4 : vector<128x8xf32>
    %145 = arith.mulf %143, %5 : vector<128x8xf32>
    %146 = arith.addf %144, %145 : vector<128x8xf32>
    %cst_46 = arith.constant 0.000000e+00 : f32
    %147 = vector.broadcast %cst_46 : f32 to vector<128x8xf32>
    %148 = arith.subf %147, %142 : vector<128x8xf32>
    %149 = arith.mulf %148, %5 : vector<128x8xf32>
    %150 = arith.mulf %143, %4 : vector<128x8xf32>
    %151 = arith.addf %149, %150 : vector<128x8xf32>
    %152 = tpu.concatenate %146, %151 in 1 : vector<128x8xf32>, vector<128x8xf32> -> vector<128x16xf32>
    %cst_47 = arith.constant 2.500000e-01 : f32
    %153 = vector.broadcast %cst_47 : f32 to vector<128x16xf32>
    %154 = arith.mulf %152, %153 : vector<128x16xf32>
    %155 = arith.truncf %154 : vector<128x16xf32> to vector<128x16xbf16>
    %c2 = arith.constant 2 : index
    %c0_48 = arith.constant 0 : index
    %c0_49 = arith.constant 0 : index
    %156 = vector.load %arg6[%c2, %c0_48, %c0_49] : memref<4x128x16xbf16, #tpu.memory_space<vmem>>, vector<1x128x16xbf16>
    %157 = vector.shape_cast %156 : vector<1x128x16xbf16> to vector<128x16xbf16>
    %158 = vector.shape_cast %155 : vector<128x16xbf16> to vector<1x128x16xbf16>
    tpu.vector_store %arg6[%c2, %c0_48, %c0_49], %158 {strides = array<i32>} : memref<4x128x16xbf16, #tpu.memory_space<vmem>>, vector<1x128x16xbf16>,
    %159 = arith.mulf %130, %130 : vector<128x16xf32>
    %cst_50 = arith.constant dense<0.000000e+00> : vector<128xf32>
    %160 = vector.multi_reduction <add>, %159, %cst_50 [1] : vector<128x16xf32> to vector<128xf32>
    %161 = vector.shape_cast %160 : vector<128xf32> to vector<128x1xf32>
    %cst_51 = arith.constant 1.600000e+01 : f32
    %162 = vector.broadcast %cst_51 : f32 to vector<128x1xf32>
    %163 = arith.divf %161, %162 : vector<128x1xf32>
    %cst_52 = arith.constant 1.1920929E-7 : f32
    %164 = vector.broadcast %cst_52 : f32 to vector<128x1xf32>
    %165 = arith.addf %163, %164 : vector<128x1xf32>
    %166 = math.rsqrt %165 : vector<128x1xf32>
    %167 = vector.broadcast %166 : vector<128x1xf32> to vector<128x16xf32>
    %168 = arith.mulf %130, %167 : vector<128x16xf32>
    %169 = vector.extract_strided_slice %168 {offsets = [0, 0], sizes = [128, 8], strides = [1, 1]} : vector<128x16xf32> to vector<128x8xf32>
    %170 = vector.extract_strided_slice %168 {offsets = [0, 8], sizes = [128, 8], strides = [1, 1]} : vector<128x16xf32> to vector<128x8xf32>
    %171 = arith.mulf %169, %4 : vector<128x8xf32>
    %172 = arith.mulf %170, %5 : vector<128x8xf32>
    %173 = arith.addf %171, %172 : vector<128x8xf32>
    %cst_53 = arith.constant 0.000000e+00 : f32
    %174 = vector.broadcast %cst_53 : f32 to vector<128x8xf32>
    %175 = arith.subf %174, %169 : vector<128x8xf32>
    %176 = arith.mulf %175, %5 : vector<128x8xf32>
    %177 = arith.mulf %170, %4 : vector<128x8xf32>
    %178 = arith.addf %176, %177 : vector<128x8xf32>
    %179 = tpu.concatenate %173, %178 in 1 : vector<128x8xf32>, vector<128x8xf32> -> vector<128x16xf32>
    %180 = arith.truncf %179 : vector<128x16xf32> to vector<128x16xbf16>
    %c2_54 = arith.constant 2 : index
    %c0_55 = arith.constant 0 : index
    %c0_56 = arith.constant 0 : index
    %181 = vector.load %arg7[%c2_54, %c0_55, %c0_56] : memref<4x128x16xbf16, #tpu.memory_space<vmem>>, vector<1x128x16xbf16>
    %182 = vector.shape_cast %181 : vector<1x128x16xbf16> to vector<128x16xbf16>
    %183 = vector.shape_cast %180 : vector<128x16xbf16> to vector<1x128x16xbf16>
    tpu.vector_store %arg7[%c2_54, %c0_55, %c0_56], %183 {strides = array<i32>} : memref<4x128x16xbf16, #tpu.memory_space<vmem>>, vector<1x128x16xbf16>,
    %184 = vector.broadcast %6 : f32 to vector<128x16xf32>
    %185 = arith.mulf %184, %131 : vector<128x16xf32>
    %186 = arith.truncf %185 : vector<128x16xf32> to vector<128x16xbf16>
    %c2_57 = arith.constant 2 : index
    %c0_58 = arith.constant 0 : index
    %c0_59 = arith.constant 0 : index
    %187 = vector.load %arg8[%c2_57, %c0_58, %c0_59] : memref<4x128x16xbf16, #tpu.memory_space<vmem>>, vector<1x128x16xbf16>
    %188 = vector.shape_cast %187 : vector<1x128x16xbf16> to vector<128x16xbf16>
    %189 = vector.shape_cast %186 : vector<128x16xbf16> to vector<1x128x16xbf16>
    tpu.vector_store %arg8[%c2_57, %c0_58, %c0_59], %189 {strides = array<i32>} : memref<4x128x16xbf16, #tpu.memory_space<vmem>>, vector<1x128x16xbf16>,
    %190 = vector.extract_strided_slice %3 {offsets = [0, 48], sizes = [128, 16], strides = [1, 1]} : vector<128x192xf32> to vector<128x16xf32>
    %191 = vector.extract_strided_slice %3 {offsets = [0, 112], sizes = [128, 16], strides = [1, 1]} : vector<128x192xf32> to vector<128x16xf32>
    %192 = vector.extract_strided_slice %3 {offsets = [0, 176], sizes = [128, 16], strides = [1, 1]} : vector<128x192xf32> to vector<128x16xf32>
    %193 = arith.mulf %190, %190 : vector<128x16xf32>
    %cst_60 = arith.constant dense<0.000000e+00> : vector<128xf32>
    %194 = vector.multi_reduction <add>, %193, %cst_60 [1] : vector<128x16xf32> to vector<128xf32>
    %195 = vector.shape_cast %194 : vector<128xf32> to vector<128x1xf32>
    %cst_61 = arith.constant 1.600000e+01 : f32
    %196 = vector.broadcast %cst_61 : f32 to vector<128x1xf32>
    %197 = arith.divf %195, %196 : vector<128x1xf32>
    %cst_62 = arith.constant 1.1920929E-7 : f32
    %198 = vector.broadcast %cst_62 : f32 to vector<128x1xf32>
    %199 = arith.addf %197, %198 : vector<128x1xf32>
    %200 = math.rsqrt %199 : vector<128x1xf32>
    %201 = vector.broadcast %200 : vector<128x1xf32> to vector<128x16xf32>
    %202 = arith.mulf %190, %201 : vector<128x16xf32>
    %203 = vector.extract_strided_slice %202 {offsets = [0, 0], sizes = [128, 8], strides = [1, 1]} : vector<128x16xf32> to vector<128x8xf32>
    %204 = vector.extract_strided_slice %202 {offsets = [0, 8], sizes = [128, 8], strides = [1, 1]} : vector<128x16xf32> to vector<128x8xf32>
    %205 = arith.mulf %203, %4 : vector<128x8xf32>
    %206 = arith.mulf %204, %5 : vector<128x8xf32>
    %207 = arith.addf %205, %206 : vector<128x8xf32>
    %cst_63 = arith.constant 0.000000e+00 : f32
    %208 = vector.broadcast %cst_63 : f32 to vector<128x8xf32>
    %209 = arith.subf %208, %203 : vector<128x8xf32>
    %210 = arith.mulf %209, %5 : vector<128x8xf32>
    %211 = arith.mulf %204, %4 : vector<128x8xf32>
    %212 = arith.addf %210, %211 : vector<128x8xf32>
    %213 = tpu.concatenate %207, %212 in 1 : vector<128x8xf32>, vector<128x8xf32> -> vector<128x16xf32>
    %cst_64 = arith.constant 2.500000e-01 : f32
    %214 = vector.broadcast %cst_64 : f32 to vector<128x16xf32>
    %215 = arith.mulf %213, %214 : vector<128x16xf32>
    %216 = arith.truncf %215 : vector<128x16xf32> to vector<128x16xbf16>
    %c3 = arith.constant 3 : index
    %c0_65 = arith.constant 0 : index
    %c0_66 = arith.constant 0 : index
    %217 = vector.load %arg6[%c3, %c0_65, %c0_66] : memref<4x128x16xbf16, #tpu.memory_space<vmem>>, vector<1x128x16xbf16>
    %218 = vector.shape_cast %217 : vector<1x128x16xbf16> to vector<128x16xbf16>
    %219 = vector.shape_cast %216 : vector<128x16xbf16> to vector<1x128x16xbf16>
    tpu.vector_store %arg6[%c3, %c0_65, %c0_66], %219 {strides = array<i32>} : memref<4x128x16xbf16, #tpu.memory_space<vmem>>, vector<1x128x16xbf16>,
    %220 = arith.mulf %191, %191 : vector<128x16xf32>
    %cst_67 = arith.constant dense<0.000000e+00> : vector<128xf32>
    %221 = vector.multi_reduction <add>, %220, %cst_67 [1] : vector<128x16xf32> to vector<128xf32>
    %222 = vector.shape_cast %221 : vector<128xf32> to vector<128x1xf32>
    %cst_68 = arith.constant 1.600000e+01 : f32
    %223 = vector.broadcast %cst_68 : f32 to vector<128x1xf32>
    %224 = arith.divf %222, %223 : vector<128x1xf32>
    %cst_69 = arith.constant 1.1920929E-7 : f32
    %225 = vector.broadcast %cst_69 : f32 to vector<128x1xf32>
    %226 = arith.addf %224, %225 : vector<128x1xf32>
    %227 = math.rsqrt %226 : vector<128x1xf32>
    %228 = vector.broadcast %227 : vector<128x1xf32> to vector<128x16xf32>
    %229 = arith.mulf %191, %228 : vector<128x16xf32>
    %230 = vector.extract_strided_slice %229 {offsets = [0, 0], sizes = [128, 8], strides = [1, 1]} : vector<128x16xf32> to vector<128x8xf32>
    %231 = vector.extract_strided_slice %229 {offsets = [0, 8], sizes = [128, 8], strides = [1, 1]} : vector<128x16xf32> to vector<128x8xf32>
    %232 = arith.mulf %230, %4 : vector<128x8xf32>
    %233 = arith.mulf %231, %5 : vector<128x8xf32>
    %234 = arith.addf %232, %233 : vector<128x8xf32>
    %cst_70 = arith.constant 0.000000e+00 : f32
    %235 = vector.broadcast %cst_70 : f32 to vector<128x8xf32>
    %236 = arith.subf %235, %230 : vector<128x8xf32>
    %237 = arith.mulf %236, %5 : vector<128x8xf32>
    %238 = arith.mulf %231, %4 : vector<128x8xf32>
    %239 = arith.addf %237, %238 : vector<128x8xf32>
    %240 = tpu.concatenate %234, %239 in 1 : vector<128x8xf32>, vector<128x8xf32> -> vector<128x16xf32>
    %241 = arith.truncf %240 : vector<128x16xf32> to vector<128x16xbf16>
    %c3_71 = arith.constant 3 : index
    %c0_72 = arith.constant 0 : index
    %c0_73 = arith.constant 0 : index
    %242 = vector.load %arg7[%c3_71, %c0_72, %c0_73] : memref<4x128x16xbf16, #tpu.memory_space<vmem>>, vector<1x128x16xbf16>
    %243 = vector.shape_cast %242 : vector<1x128x16xbf16> to vector<128x16xbf16>
    %244 = vector.shape_cast %241 : vector<128x16xbf16> to vector<1x128x16xbf16>
    tpu.vector_store %arg7[%c3_71, %c0_72, %c0_73], %244 {strides = array<i32>} : memref<4x128x16xbf16, #tpu.memory_space<vmem>>, vector<1x128x16xbf16>,
    %245 = vector.broadcast %6 : f32 to vector<128x16xf32>
    %246 = arith.mulf %245, %192 : vector<128x16xf32>
    %247 = arith.truncf %246 : vector<128x16xf32> to vector<128x16xbf16>
    %c3_74 = arith.constant 3 : index
    %c0_75 = arith.constant 0 : index
    %c0_76 = arith.constant 0 : index
    %248 = vector.load %arg8[%c3_74, %c0_75, %c0_76] : memref<4x128x16xbf16, #tpu.memory_space<vmem>>, vector<1x128x16xbf16>
    %249 = vector.shape_cast %248 : vector<1x128x16xbf16> to vector<128x16xbf16>
    %250 = vector.shape_cast %247 : vector<128x16xbf16> to vector<1x128x16xbf16>
    tpu.vector_store %arg8[%c3_74, %c0_75, %c0_76], %250 {strides = array<i32>} : memref<4x128x16xbf16, #tpu.memory_space<vmem>>, vector<1x128x16xbf16>,
    return
  }
  func.func @transform_0(%arg0: i32) -> i32 {
    %c0_i32 = arith.constant 0 : i32
    %c0_i32_0 = arith.constant 0 : i32
    return %c0_i32 : i32
  }
  func.func @transform_1(%arg0: i32) -> (i32, i32) {
    %c0_i32 = arith.constant 0 : i32
    %c0_i32_0 = arith.constant 0 : i32
    return %arg0, %c0_i32 : i32, i32
  }
  func.func @transform_2(%arg0: i32) -> (i32, i32) {
    %c0_i32 = arith.constant 0 : i32
    %c0_i32_0 = arith.constant 0 : i32
    %c0_i32_1 = arith.constant 0 : i32
    return %c0_i32, %c0_i32_0 : i32, i32
  }
  func.func @transform_3(%arg0: i32) -> (i32, i32) {
    %c0_i32 = arith.constant 0 : i32
    %c0_i32_0 = arith.constant 0 : i32
    return %arg0, %c0_i32 : i32, i32
  }
  func.func @transform_4(%arg0: i32) -> (i32, i32) {
    %c0_i32 = arith.constant 0 : i32
    %c0_i32_0 = arith.constant 0 : i32
    return %arg0, %c0_i32 : i32, i32
  }
  func.func @transform_5(%arg0: i32) -> (i32, i32, i32) {
    %c0_i32 = arith.constant 0 : i32
    %c0_i32_0 = arith.constant 0 : i32
    %c0_i32_1 = arith.constant 0 : i32
    return %c0_i32, %arg0, %c0_i32_0 : i32, i32, i32
  }
  func.func @transform_6(%arg0: i32) -> (i32, i32, i32) {
    %c0_i32 = arith.constant 0 : i32
    %c0_i32_0 = arith.constant 0 : i32
    %c0_i32_1 = arith.constant 0 : i32
    return %c0_i32, %arg0, %c0_i32_0 : i32, i32, i32
  }
  func.func @transform_7(%arg0: i32) -> (i32, i32, i32) {
    %c0_i32 = arith.constant 0 : i32
    %c0_i32_0 = arith.constant 0 : i32
    %c0_i32_1 = arith.constant 0 : i32
    return %c0_i32, %arg0, %c0_i32_0 : i32, i32, i32
  }
}

</mosaic_0001>

<bundles_post_ra>
// kernel: tpu_custom_call.1
= control target key start
LH: loop header
LB: loop body
LE: loop exit
PB: predicated region body
PF: predicated region fallthrough
CT: control target
= control target key end

     0   :  { %v8302_v1 = vmov 0   ;;  %s8303_s21 = smov 8   ;;  %vm97_vm0 = vcmask 523264   ;;  %s8304_s17 = smov 64   ;;  %vm927_vm1 = vcmask 125952   ;;  %vm284_vm2 = vcmask 130048   ;;  %s15005_s2 = inlined_call_operand.vmem [shape: bf16[64,192], index: 2, kind: input, shape index: {}]   ;;  %s15006_s4 = inlined_call_operand.vmem [shape: f32[128,8], index: 4, kind: input, shape index: {}]   ;;  %s15007_s1 = inlined_call_operand.vmem [shape: f32[128,64], index: 1, kind: input, shape index: {}]   ;;  %s15008_s3 = inlined_call_operand.vmem [shape: f32[128,8], index: 3, kind: input, shape index: {}]   ;;  %s15009_s0 = inlined_call_operand.<no memory space> [shape: f32[1], index: 0, kind: input, shape index: {}]   ;;  %s15010_s7 = inlined_call_operand.vmem [shape: bf16[4,128,16], index: 7, kind: output, shape index: {2}]   ;;  %s15011_s5 = inlined_call_operand.vmem [shape: bf16[4,128,16], index: 5, kind: output, shape index: {0}]   ;;  %s15012_s6 = inlined_call_operand.vmem [shape: bf16[4,128,16], index: 6, kind: output, shape index: {1}]  }
   0x1   :  { %v7822_v0 = vld [vmem:[%s15005_s2 + $0x4] ss:$8 sps:$4 sm:$0xff]   ;;  %154 = vmatprep.mubr.bf16.mxu0 %v8302_v1  ;;  %194 = vmatprep.mubr.bf16.mxu1 %v8302_v1  ;;  %v7824_v2 = vld [vmem:[%s15005_s2] ss:$8 sps:$4 sm:$0xff]   ;;  %v7825_v3 = vld [vmem:[%s15005_s2 + $0x14] ss:$8 sps:$4 sm:$0xff]  }
   0x2   :  { %122 = vmatprep.subr.bf16.mxu0 %v7822_v0  ;;  %7478 = vmatprep.subr.bf16.mxu1 %v7822_v0  ;;  %v7827_v4 = vld [vmem:[%s15005_s2 + $0x10] ss:$8 sps:$4 sm:$0xff]   ;;  %v7828_v5 = vld [vmem:[%s15005_s2 + $0x24] ss:$8 sps:$4 sm:$0xff]   ;;  %v7830_v6 = vld [vmem:[%s15005_s2 + $0x20] ss:$8 sps:$4 sm:$0xff]  }
   0x3   :  { %123 = vmatpush1.bf16.msra.mxu0 %v7824_v2  ;;  %7482 = vmatpush1.bf16.msra.mxu1 %v7824_v2  ;;  %v8381_v7 = vld [vmem:[%s15006_s4 + $0x8] sm:$0xff]  ;;  %v7831_v8 = vld [vmem:[%s15005_s2 + $0x34] ss:$8 sps:$4 sm:$0xff]   ;;  %v8389_v9 = vld [vmem:[%s15006_s4] sm:$0xff]  ;;  %s8305_s20 = smov 72   ;;  %s8306_s8 = smov 112  }
   0x4   :  { %124 = vmatprep.subr.bf16.mxu0 %v7825_v3  ;;  %7479 = vmatprep.subr.bf16.mxu1 %v7825_v3  ;;  %v7833_v10 = vld [vmem:[%s15005_s2 + $0x30] ss:$8 sps:$4 sm:$0xff]   ;;  %v25_v11 = vld [vmem:[%s15007_s1] sm:$0xff]  ;;  %v26_v14 = vld [vmem:[%s15007_s1 + $0x8] sm:$0xff]  ;;  %s8307_s9 = smov 120   ;;  %vm830_vm3 = vcmask 64512  }
   0x5   :  { %432 = vrot.lane.b32.xlu1 %v8381_v7, %s8303_s21  ;;  %430 = vrot.lane.b32.xlu0 %v8389_v9, %s8303_s21  ;;  %v8404_v12 = vld [vmem:[%s15006_s4 + $0x10] sm:$0xff]  ;;  %v8409_v13 = vld [vmem:[%s15006_s4 + $0x20] sm:$0xff]  ;;  %v41_v17 = vpack.c.bf16 %v26_v14, %v25_v11  ;;  %s8309_s18 = smov 24   ;;  %s8310_s26 = smov 48  }
   0x6   :  { %v33_v15 = vld [vmem:[%s15007_s1 + $0x40] sm:$0xff]  ;;  %v34_v16 = vld [vmem:[%s15007_s1 + $0x48] sm:$0xff]  ;;  %v8427_v19 = vld [vmem:[%s15006_s4 + $0x18] sm:$0xff]  ;;  %s8311_s15 = smov 80   ;;  %s8312_s22 = smov 88  }
   0x7   :  { %125 = vmatpush1.bf16.msra.mxu0 %v7827_v4  ;;  %7483 = vmatpush1.bf16.msra.mxu1 %v7827_v4  ;;  %v45_v18 = vpack.c.bf16 %v34_v16, %v33_v15  ;;  %v8432_v20 = vld [vmem:[%s15006_s4 + $0x30] sm:$0xff]  ;;  %v8446_v22 = vld [vmem:[%s15006_s4 + $0x28] sm:$0xff]  ;;  %v8451_v23 = vld [vmem:[%s15006_s4 + $0x40] sm:$0xff]  ;;  %s8313_s24 = smov 56   ;;  %s8314_s25 = smov 96  }
   0x8   :  { %126 = vmatprep.subr.bf16.mxu0 %v7828_v5  ;;  %7480 = vmatprep.subr.bf16.mxu1 %v7828_v5  ;;  %v27_v21 = vld [vmem:[%s15007_s1 + $0x10] sm:$0xff]  ;;  %v28_v24 = vld [vmem:[%s15007_s1 + $0x18] sm:$0xff]  ;;  %v8487_v31 = vld [vmem:[%s15006_s4 + $0x48] sm:$0xff]  ;;  %s8315_s16 = smov 32   ;;  %s8316_s30 = smov 40  }
   0x9   :  { %434 = vrot.lane.b32.xlu1 %v8404_v12, %s8303_s21  ;;  %438 = vrot.lane.b32.xlu0 %v8409_v13, %s8303_s21  ;;  %v35_v25 = vld [vmem:[%s15007_s1 + $0x50] sm:$0xff]  ;;  %v36_v26 = vld [vmem:[%s15007_s1 + $0x58] sm:$0xff]  ;;  %v42_v27 = vpack.c.bf16 %v28_v24, %v27_v21  ;;  %s8317_s27 = smov 104  }
   0xa   :  { %v8471_v28 = vld [vmem:[%s15006_s4 + $0x38] sm:$0xff]  ;;  %v46_v29 = vpack.c.bf16 %v36_v26, %v35_v25  ;;  %v8476_v30 = vld [vmem:[%s15006_s4 + $0x50] sm:$0xff]  ;;  %v8492_v32 = vld [vmem:[%s15006_s4 + $0x60] sm:$0xff] }
   0xb   :  { %127 = vmatpush1.bf16.msra.mxu0 %v7830_v6  ;;  %7484 = vmatpush1.bf16.msra.mxu1 %v7830_v6  ;;  %v29_v33 = vld [vmem:[%s15007_s1 + $0x20] sm:$0xff]  ;;  %v30_v34 = vld [vmem:[%s15007_s1 + $0x28] sm:$0xff]  ;;  %v8515_v37 = vld [vmem:[%s15006_s4 + $0x58] sm:$0xff] }
   0xc   :  { %128 = vmatprep.subr.bf16.mxu0 %v7831_v8  ;;  %7481 = vmatprep.subr.bf16.mxu1 %v7831_v8  ;;  %v37_v35 = vld [vmem:[%s15007_s1 + $0x60] sm:$0xff]  ;;  %v38_v36 = vld [vmem:[%s15007_s1 + $0x68] sm:$0xff]  ;;  %v8520_v38 = vld [vmem:[%s15006_s4 + $0x70] sm:$0xff]  ;;  %v43_v39 = vpack.c.bf16 %v30_v34, %v29_v33 }
   0xd   :  { %436 = vrot.lane.b32.xlu1 %v8427_v19, %s8303_s21  ;;  %442 = vrot.lane.b32.xlu0 %v8432_v20, %s8303_s21  ;;  %v47_v40 = vpack.c.bf16 %v38_v36, %v37_v35  ;;  %v8529_v41 = vld [vmem:[%s15006_s4 + $0x68] sm:$0xff]  ;;  %v8534_v42 = vld [vmem:[%s15008_s3] sm:$0xff] }
   0xe   :  { %v31_v43 = vld [vmem:[%s15007_s1 + $0x30] sm:$0xff]  ;;  %v32_v44 = vld [vmem:[%s15007_s1 + $0x38] sm:$0xff]  ;;  %v8573_v51 = vld [vmem:[%s15008_s3 + $0x8] sm:$0xff] }
   0xf   :  { %129 = vmatpush1.bf16.msra.mxu0 %v7833_v10  ;;  %7485 = vmatpush1.bf16.msra.mxu1 %v7833_v10  ;;  %v39_v45 = vld [vmem:[%s15007_s1 + $0x70] sm:$0xff]  ;;  %v40_v46 = vld [vmem:[%s15007_s1 + $0x78] sm:$0xff]  ;;  %v44_v49 = vpack.c.bf16 %v32_v44, %v31_v43  ;;  %v8578_v52 = vld [vmem:[%s15008_s3 + $0x20] sm:$0xff] }
  0x10   :  { %v8559_v47 = vld [vmem:[%s15006_s4 + $0x78] sm:$0xff]  ;;  %v8564_v48 = vld [vmem:[%s15008_s3 + $0x10] sm:$0xff]  ;;  %v48_v50 = vpack.c.bf16 %v40_v46, %v39_v45  ;;  %v8603_v55 = vld [vmem:[%s15008_s3 + $0x28] sm:$0xff] }
  0x11   :  { %440 = vrot.lane.b32.xlu1 %v8446_v22, %s8303_s21  ;;  %446 = vrot.lane.b32.xlu0 %v8451_v23, %s8303_s21  ;;  %v8589_v53 = vld [vmem:[%s15008_s3 + $0x18] sm:$0xff]  ;;  %v8594_v54 = vld [vmem:[%s15008_s3 + $0x30] sm:$0xff] }
  0x12   :  { %7038 = vmatmul.mubr.msk.bf16.vlgmr.msra.gmra.mrb[0].mxu0 %vm97_vm0, %v41_v17  ;;  %7042 = vmatmul.mubr.msk.bf16.vlgmr.msra.gmra.mrb[0].mxu1 %vm97_vm0, %v45_v18  ;;  %v8608_v56 = vld [vmem:[%s15008_s3 + $0x40] sm:$0xff]  ;;  %v8617_v57 = vld [vmem:[%s15008_s3 + $0x38] sm:$0xff]  ;;  %v8622_v58 = vld [vmem:[%s15008_s3 + $0x50] sm:$0xff] }
  0x13   :  { %164 = vmatprep.mubr.bf16.mxu0 %v8302_v1  ;;  %204 = vmatprep.mubr.bf16.mxu1 %v8302_v1  ;;  %v8631_v59 = vld [vmem:[%s15008_s3 + $0x48] sm:$0xff]  ;;  %v8636_v60 = vld [vmem:[%s15008_s3 + $0x60] sm:$0xff]  ;;  %v8645_v61 = vld [vmem:[%s15008_s3 + $0x58] sm:$0xff] }
  0x14   :  { %v8650_v62 = vld [vmem:[%s15008_s3 + $0x70] sm:$0xff]  ;;  %v8659_v63 = vld [vmem:[%s15008_s3 + $0x68] sm:$0xff]  ;;  %v8668_v0 = vld [vmem:[%s15008_s3 + $0x78] sm:$0xff] }
  0x15   :  { %444 = vrot.lane.b32.xlu1 %v8471_v28, %s8303_s21  ;;  %450 = vrot.lane.b32.xlu0 %v8476_v30, %s8303_s21 }
  0x19   :  { %448 = vrot.lane.b32.xlu1 %v8487_v31, %s8303_s21  ;;  %454 = vrot.lane.b32.xlu0 %v8492_v32, %s8303_s21 }
  0x1a   :  { %7039 = vmatmul.mubr.msk.bf16.gmra.mrb[4].mxu0 %vm97_vm0, %v42_v27  ;;  %7043 = vmatmul.mubr.msk.bf16.gmra.mrb[4].mxu1 %vm97_vm0, %v46_v29 }
  0x1b   :  { %174 = vmatprep.mubr.bf16.mxu0 %v8302_v1  ;;  %214 = vmatprep.mubr.bf16.mxu1 %v8302_v1 }
  0x1d   :  { %452 = vrot.lane.b32.xlu1 %v8515_v37, %s8303_s21  ;;  %458 = vrot.lane.b32.xlu0 %v8520_v38, %s8303_s21 }
  0x21   :  { %456 = vrot.lane.b32.xlu1 %v8529_v41, %s8303_s21  ;;  %622 = vrot.lane.b32.xlu0 %v8534_v42, %s8303_s21 }
  0x22   :  { %7040 = vmatmul.mubr.msk.bf16.gmra.mrb[8].mxu0 %vm97_vm0, %v43_v39  ;;  %7044 = vmatmul.mubr.msk.bf16.gmra.mrb[8].mxu1 %vm97_vm0, %v47_v40 }
  0x23   :  { %184 = vmatprep.mubr.bf16.mxu0 %v8302_v1  ;;  %224 = vmatprep.mubr.bf16.mxu1 %v8302_v1  ;;  %v8775_v1 = vstv %s15009_s0  ;;  %s8308_s0 = smov 16  }
  0x25   :  { %460 = vrot.lane.b32.xlu1 %v8559_v47, %s8303_s21  ;;  %626 = vrot.lane.b32.xlu0 %v8564_v48, %s8303_s21 }
  0x29   :  { %624 = vrot.lane.b32.xlu1 %v8573_v51, %s8303_s21  ;;  %630 = vrot.lane.b32.xlu0 %v8578_v52, %s8303_s21 }
  0x2a   :  { %7041 = vmatmul.mubr.msk.bf16.gmra.mrb[12].mxu0 %vm97_vm0, %v44_v49  ;;  %7045 = vmatmul.mubr.msk.bf16.gmra.mrb[12].mxu1 %vm97_vm0, %v48_v50 }
  0x2d   :  { %628 = vrot.lane.b32.xlu1 %v8589_v53, %s8303_s21  ;;  %634 = vrot.lane.b32.xlu0 %v8594_v54, %s8303_s21 }
  0x31   :  { %632 = vrot.lane.b32.xlu1 %v8603_v55, %s8303_s21  ;;  %638 = vrot.lane.b32.xlu0 %v8608_v56, %s8303_s21 }
  0x35   :  { %636 = vrot.lane.b32.xlu1 %v8617_v57, %s8303_s21  ;;  %642 = vrot.lane.b32.xlu0 %v8622_v58, %s8303_s21 }
  0x39   :  { %640 = vrot.lane.b32.xlu1 %v8631_v59, %s8303_s21  ;;  %646 = vrot.lane.b32.xlu0 %v8636_v60, %s8303_s21 }
  0x3d   :  { %644 = vrot.lane.b32.xlu1 %v8645_v61, %s8303_s21  ;;  %650 = vrot.lane.b32.xlu0 %v8650_v62, %s8303_s21 }
  0x41   :  { %648 = vrot.lane.b32.xlu1 %v8659_v63, %s8303_s21  ;;  %1120 = vrot.lane.b32.xlu0 %v8534_v42, %s8304_s17 }
  0x45   :  { %652 = vrot.lane.b32.xlu1 %v8668_v0, %s8303_s21  ;;  %1128 = vrot.lane.b32.xlu0 %v8578_v52, %s8304_s17 }
  0x49   :  { %1122 = vrot.lane.b32.xlu1 %v8573_v51, %s8304_s17  ;;  %1132 = vrot.lane.b32.xlu0 %v8594_v54, %s8304_s17 }
  0x4d   :  { %1124 = vrot.lane.b32.xlu1 %v8564_v48, %s8304_s17  ;;  %1136 = vrot.lane.b32.xlu0 %v8608_v56, %s8304_s17 }
  0x51   :  { %1126 = vrot.lane.b32.xlu1 %v8589_v53, %s8304_s17  ;;  %1140 = vrot.lane.b32.xlu0 %v8622_v58, %s8304_s17 }
  0x55   :  { %1130 = vrot.lane.b32.xlu1 %v8603_v55, %s8304_s17  ;;  %1144 = vrot.lane.b32.xlu0 %v8636_v60, %s8304_s17 }
  0x59   :  { %1134 = vrot.lane.b32.xlu1 %v8617_v57, %s8304_s17  ;;  %1148 = vrot.lane.b32.xlu0 %v8650_v62, %s8304_s17 }
  0x5d   :  { %1138 = vrot.lane.b32.xlu1 %v8631_v59, %s8304_s17  ;;  %1184 = vrot.lane.b32.xlu0 %v8389_v9, %s8305_s20 }
  0x61   :  { %1142 = vrot.lane.b32.xlu1 %v8645_v61, %s8304_s17  ;;  %1188 = vrot.lane.b32.xlu0 %v8404_v12, %s8305_s20 }
  0x65   :  { %1146 = vrot.lane.b32.xlu1 %v8659_v63, %s8304_s17  ;;  %1192 = vrot.lane.b32.xlu0 %v8409_v13, %s8305_s20 }
  0x69   :  { %1150 = vrot.lane.b32.xlu1 %v8668_v0, %s8304_s17  ;;  %1196 = vrot.lane.b32.xlu0 %v8432_v20, %s8305_s20 }
  0x6d   :  { %1186 = vrot.lane.b32.xlu1 %v8381_v7, %s8305_s20  ;;  %1200 = vrot.lane.b32.xlu0 %v8451_v23, %s8305_s20 }
  0x71   :  { %1190 = vrot.lane.b32.xlu1 %v8427_v19, %s8305_s20  ;;  %1204 = vrot.lane.b32.xlu0 %v8476_v30, %s8305_s20 }
  0x75   :  { %1194 = vrot.lane.b32.xlu1 %v8446_v22, %s8305_s20  ;;  %1208 = vrot.lane.b32.xlu0 %v8492_v32, %s8305_s20 }
  0x79   :  { %1198 = vrot.lane.b32.xlu1 %v8471_v28, %s8305_s20  ;;  %1212 = vrot.lane.b32.xlu0 %v8520_v38, %s8305_s20 }
  0x7d   :  { %1202 = vrot.lane.b32.xlu1 %v8487_v31, %s8305_s20  ;;  %1344 = vrot.lane.b32.xlu0 %v8389_v9, %s8304_s17 }
  0x81   :  { %1206 = vrot.lane.b32.xlu1 %v8515_v37, %s8305_s20  ;;  %1348 = vrot.lane.b32.xlu0 %v8404_v12, %s8304_s17 }
  0x85   :  { %1210 = vrot.lane.b32.xlu1 %v8529_v41, %s8305_s20  ;;  %1352 = vrot.lane.b32.xlu0 %v8409_v13, %s8304_s17 }
  0x89   :  { %1214 = vrot.lane.b32.xlu1 %v8559_v47, %s8305_s20  ;;  %1356 = vrot.lane.b32.xlu0 %v8432_v20, %s8304_s17 }
  0x8d   :  { %1346 = vrot.lane.b32.xlu1 %v8381_v7, %s8304_s17  ;;  %1360 = vrot.lane.b32.xlu0 %v8451_v23, %s8304_s17 }
  0x91   :  { %1350 = vrot.lane.b32.xlu1 %v8427_v19, %s8304_s17  ;;  %1364 = vrot.lane.b32.xlu0 %v8476_v30, %s8304_s17 }
  0x95   :  { %1354 = vrot.lane.b32.xlu1 %v8446_v22, %s8304_s17  ;;  %1368 = vrot.lane.b32.xlu0 %v8492_v32, %s8304_s17  ;;  %v8829_v22 = vpop.permute.xlu1 %432 }
  0x99   :  { %1358 = vrot.lane.b32.xlu1 %v8471_v28, %s8304_s17  ;;  %1372 = vrot.lane.b32.xlu0 %v8520_v38, %s8304_s17  ;;  %v8880_v40 = vpop.permute.xlu1 %434 }
  0x9d   :  { %1362 = vrot.lane.b32.xlu1 %v8487_v31, %s8304_s17  ;;  %1408 = vrot.lane.b32.xlu0 %v8534_v42, %s8305_s20 }
  0xa1   :  { %1366 = vrot.lane.b32.xlu1 %v8515_v37, %s8304_s17  ;;  %1412 = vrot.lane.b32.xlu0 %v8564_v48, %s8305_s20 }
  0xa5   :  { %1370 = vrot.lane.b32.xlu1 %v8529_v41, %s8304_s17 }
  0xa9   :  { %1374 = vrot.lane.b32.xlu1 %v8559_v47, %s8304_s17 }
  0xad   :  { %1410 = vrot.lane.b32.xlu1 %v8573_v51, %s8305_s20 }
  0xe5   :  { %v8777_v2 = vpop.f32.mrb[0].mxu0  ;;  %v8779_v3 = vpop.f32.mrb[0].mxu1 }
  0xe6   :  { %15239 = vst [vmem:[#allocation3_spill] sm:$0xff] %v8777_v2  ;;  %15240 = vst [vmem:[#allocation4_spill] sm:$0xff] %v8779_v3  ;;  %v8783_v4 = vmul.f32 %v8777_v2, %v8777_v2  ;;  %v158_v5 = vpop.f32.mrb[1].mxu0  ;;  %v198_v6 = vpop.f32.mrb[1].mxu1  ;;  %v8793_v11 = vmul.f32 %v8779_v3, %v8779_v3 }
  0xe7   :  { %v1777_v7 = vmul.f32 %v8775_v1, %v158_v5  ;;  %v8786_v8 = vpop.f32.mrb[2].mxu0  ;;  %v1785_v9 = vmul.f32 %v8775_v1, %v198_v6  ;;  %v8789_v10 = vpop.f32.mrb[2].mxu1 }
  0xe8   :  { %15241 = vst [vmem:[#allocation5_spill] sm:$0xff] %v8783_v4  ;;  %15242 = vst [vmem:[#allocation6_spill] sm:$0xff] %v8786_v8  ;;  %v8797_v12 = vmul.f32 %v8786_v8, %v8786_v8  ;;  %960 = vrot.lane.b32.xlu0 %v8783_v4, %s8304_s17  ;;  %v162_v13 = vpop.f32.mrb[3].mxu0  ;;  %v202_v14 = vpop.f32.mrb[3].mxu1  ;;  %v8825_v21 = vmul.f32 %v8789_v10, %v8789_v10 }
  0xe9   :  { %15243 = vst [vmem:[#allocation7_spill] sm:$0xff] %v8789_v10  ;;  %15244 = vst [vmem:[#allocation8_spill] sm:$0xff] %v8793_v11  ;;  %v8801_v15 = vpack.c.bf16 %v1777_v7, %v1777_v7  ;;  %v8803_v16 = vpack.c.bf16 %v1785_v9, %v1785_v9  ;;  %v1778_v17 = vmul.f32 %v8775_v1, %v162_v13  ;;  %v8908_v9 = vpop.permute.xlu1 %436 }
  0xea   :  { %15245 = vst [vmem:[#allocation9_spill] sm:$0xff] %v8797_v12  ;;  %v1786_v18 = vmul.f32 %v8775_v1, %v202_v14  ;;  %962 = vrot.lane.b32.xlu1 %v8797_v12, %s8304_s17  ;;  %15250 = vst [vmem:[#allocation14_spill] sm:$0xff] %v8825_v21  ;;  %v8922_v14 = vpop.permute.xlu0 %430 }
  0xeb   :  { %15246 = vst [vmem:[#allocation10_spill] sm:$0xff] %v8801_v15  ;;  %15247 = vst [vmem:[#allocation11_spill] sm:$0xff] %v8803_v16  ;;  %v8819_v19 = vpack.c.bf16 %v1778_v17, %v1778_v17 }
  0xec   :  { %1857 = vst.msk [vmem:[%s15010_s7] sm:$0xf] %vm927_vm1, %v8801_v15  ;;  %1865 = vst.msk [vmem:[%s15010_s7 + $0x20] sm:$0xf] %vm927_vm1, %v8803_v16  ;;  %v8821_v20 = vpack.c.bf16 %v1786_v18, %v1786_v18  ;;  %976 = vrot.lane.b32.xlu0 %v8793_v11, %s8304_s17 }
  0xed   :  { %15248 = vst [vmem:[#allocation12_spill] sm:$0xff] %v8819_v19  ;;  %1858 = vst.msk [vmem:[%s15010_s7 + $0x4] sm:$0xf] %vm927_vm1, %v8819_v19  ;;  %v8841_v23 = vpop.f32.mrb[4].mxu0  ;;  %v8845_v25 = vpop.f32.mrb[4].mxu1 }
  0xee   :  { %15249 = vst [vmem:[#allocation13_spill] sm:$0xff] %v8821_v20  ;;  %1866 = vst.msk [vmem:[%s15010_s7 + $0x24] sm:$0xf] %vm927_vm1, %v8821_v20  ;;  %978 = vrot.lane.b32.xlu1 %v8825_v21, %s8304_s17  ;;  %v168_v24 = vpop.f32.mrb[5].mxu0  ;;  %v208_v28 = vpop.f32.mrb[5].mxu1 }
  0xef   :  { %15251 = vst [vmem:[#allocation15_spill] sm:$0xff] %v8841_v23  ;;  %15252 = vst [vmem:[#allocation16_spill] sm:$0xff] %v8845_v25  ;;  %v1779_v26 = vmul.f32 %v8775_v1, %v168_v24  ;;  %v8848_v27 = vpop.f32.mrb[6].mxu0  ;;  %v1787_v30 = vmul.f32 %v8775_v1, %v208_v28  ;;  %v8851_v31 = vpop.f32.mrb[6].mxu1 }
  0xf0   :  { %15253 = vst [vmem:[#allocation17_spill] sm:$0xff] %v8848_v27  ;;  %v172_v29 = vpop.f32.mrb[7].mxu0  ;;  %15254 = vst [vmem:[#allocation18_spill] sm:$0xff] %v8851_v31  ;;  %v212_v34 = vpop.f32.mrb[7].mxu1 }
  0xf1   :  { %v8853_v32 = vpack.c.bf16 %v1779_v26, %v1779_v26  ;;  %v1780_v33 = vmul.f32 %v8775_v1, %v172_v29  ;;  %v8856_v35 = vpack.c.bf16 %v1787_v30, %v1787_v30  ;;  %v1788_v36 = vmul.f32 %v8775_v1, %v212_v34  ;;  %v8929_v17 = vpop.permute.xlu1 %440  ;;  %v8931_v18 = vpop.permute.xlu0 %438 }
  0xf2   :  { %15267 = vst [vmem:[#allocation31_spill] sm:$0xff] %v8931_v18  ;;  %v285_v26 = vsel %vm284_vm2, %v8783_v4, 0.0  ;;  %v309_v30 = vsel %vm284_vm2, %v8793_v11, 0.0 }
  0xf3   :  { %15255 = vst [vmem:[#allocation19_spill] sm:$0xff] %v8853_v32  ;;  %15256 = vst [vmem:[#allocation20_spill] sm:$0xff] %v8856_v35  ;;  %v8864_v37 = vpack.c.bf16 %v1780_v33, %v1780_v33  ;;  %v8871_v38 = vpack.c.bf16 %v1788_v36, %v1788_v36  ;;  %v8945_v33 = vmul.f32 %v8841_v23, %v8841_v23  ;;  %v312_v36 = vsel %vm284_vm2, %v8825_v21, 0.0 }
  0xf4   :  { %1859 = vst.msk [vmem:[%s15010_s7 + $0x8] sm:$0xf] %vm927_vm1, %v8853_v32  ;;  %1867 = vst.msk [vmem:[%s15010_s7 + $0x28] sm:$0xf] %vm927_vm1, %v8856_v35 }
  0xf5   :  { %15257 = vst [vmem:[#allocation21_spill] sm:$0xff] %v8864_v37  ;;  %15258 = vst [vmem:[#allocation22_spill] sm:$0xff] %v8871_v38  ;;  %v8878_v39 = vpop.f32.mrb[8].mxu0  ;;  %v8890_v44 = vpop.f32.mrb[8].mxu1 }
  0xf6   :  { %1860 = vst.msk [vmem:[%s15010_s7 + $0xc] sm:$0xf] %vm927_vm1, %v8864_v37  ;;  %15259 = vst [vmem:[#allocation23_spill] sm:$0xff] %v8878_v39  ;;  %v178_v41 = vpop.f32.mrb[9].mxu0  ;;  %v218_v46 = vpop.f32.mrb[9].mxu1 }
  0xf7   :  { %1868 = vst.msk [vmem:[%s15010_s7 + $0x2c] sm:$0xf] %vm927_vm1, %v8871_v38  ;;  %v1781_v42 = vmul.f32 %v8775_v1, %v178_v41  ;;  %v8888_v43 = vpop.f32.mrb[10].mxu0  ;;  %15261 = vst [vmem:[#allocation25_spill] sm:$0xff] %v8890_v44  ;;  %v1789_v49 = vmul.f32 %v8775_v1, %v218_v46  ;;  %v8896_v50 = vpop.f32.mrb[10].mxu1  ;;  %v288_v41 = vsel %vm284_vm2, %v8797_v12, 0.0 }
  0xf8   :  { %15260 = vst [vmem:[#allocation24_spill] sm:$0xff] %v8888_v43  ;;  %v182_v45 = vpop.f32.mrb[11].mxu0  ;;  %15263 = vst [vmem:[#allocation27_spill] sm:$0xff] %v8896_v50  ;;  %v222_v51 = vpop.f32.mrb[11].mxu1 }
  0xf9   :  { %v8892_v47 = vpack.c.bf16 %v1781_v42, %v1781_v42  ;;  %v1782_v48 = vmul.f32 %v8775_v1, %v182_v45  ;;  %v8905_v6 = vpack.c.bf16 %v1789_v49, %v1789_v49  ;;  %v1790_v7 = vmul.f32 %v8775_v1, %v222_v51  ;;  %v8933_v24 = vpop.permute.xlu1 %444  ;;  %v8937_v28 = vpop.permute.xlu0 %442  ;;  %15270 = vst [vmem:[#allocation34_spill] sm:$0xff] %v8945_v33 }
  0xfa   :  { %15268 = vst [vmem:[#allocation32_spill] sm:$0xff] %v8933_v24  ;;  %15269 = vst [vmem:[#allocation33_spill] sm:$0xff] %v8937_v28  ;;  %v291_v42 = vsel %vm284_vm2, %v8945_v33, 0.0 }
  0xfb   :  { %15262 = vst [vmem:[#allocation26_spill] sm:$0xff] %v8892_v47  ;;  %1861 = vst.msk [vmem:[%s15010_s7 + $0x10] sm:$0xf] %vm927_vm1, %v8892_v47  ;;  %v8903_v5 = vpack.c.bf16 %v1782_v48, %v1782_v48  ;;  %v8920_v13 = vpack.c.bf16 %v1790_v7, %v1790_v7  ;;  %v8999_v47 = vmul.f32 %v8848_v27, %v8848_v27 }
  0xfc   :  { %15265 = vst [vmem:[#allocation29_spill] sm:$0xff] %v8905_v6  ;;  %1869 = vst.msk [vmem:[%s15010_s7 + $0x30] sm:$0xf] %vm927_vm1, %v8905_v6 }
  0xfd   :  { %15264 = vst [vmem:[#allocation28_spill] sm:$0xff] %v8903_v5  ;;  %1862 = vst.msk [vmem:[%s15010_s7 + $0x14] sm:$0xf] %vm927_vm1, %v8903_v5  ;;  %v8939_v29 = vpop.permute.xlu1 %448  ;;  %v8947_v34 = vpop.permute.xlu0 %446 }
  0xfe   :  { %15266 = vst [vmem:[#allocation30_spill] sm:$0xff] %v8920_v13  ;;  %1870 = vst.msk [vmem:[%s15010_s7 + $0x34] sm:$0xf] %vm927_vm1, %v8920_v13  ;;  %v8959_v48 = vpop.f32.mrb[12].mxu0  ;;  %v8969_v13 = vpop.f32.mrb[12].mxu1 }
  0xff   :  { %15271 = vst [vmem:[#allocation35_spill] sm:$0xff] %v8959_v48  ;;  %v188_v51 = vpop.f32.mrb[13].mxu0  ;;  %15275 = vst [vmem:[#allocation39_spill] sm:$0xff] %v8969_v13  ;;  %v228_v6 = vpop.f32.mrb[13].mxu1 }
 0x100   :  { %v8963_v7 = vpop.f32.mrb[14].mxu0  ;;  %v8975_v35 = vpop.f32.mrb[14].mxu1  ;;  %15283 = vst [vmem:[#allocation47_spill] sm:$0xff] %v8999_v47 }
 0x101   :  { %v8955_v45 = vpop.permute.xlu1 %452  ;;  %v8957_v46 = vpop.permute.xlu0 %450  ;;  %15273 = vst [vmem:[#allocation37_spill] sm:$0xff] %v8963_v7  ;;  %15278 = vst [vmem:[#allocation42_spill] sm:$0xff] %v8975_v35 }
 0x102   :  { %v232_v16 = vpop.f32.mrb[15].mxu1 }
 0x105   :  { %v8961_v49 = vpop.permute.xlu1 %456 }
 0x106   :  { %15272 = vst [vmem:[#allocation36_spill] sm:$0xff] %v8961_v49 }
 0x109   :  { %v8977_v20 = vpop.permute.xlu1 %460 }
 0x10a   :  { %15279 = vst [vmem:[#allocation43_spill] sm:$0xff] %v8977_v20 }
 0x10b   :  { %286 = vadd.xlane.f32.xlu0 %v285_v26  ;;  %v192_v26 = vpop.f32.mrb[15].mxu0 }
 0x10f   :  { %310 = vadd.xlane.f32.xlu0 %v309_v30  ;;  %v8965_v30 = vpop.permute.xlu0 %454 }
 0x110   :  { %15274 = vst [vmem:[#allocation38_spill] sm:$0xff] %v8965_v30 }
 0x112   :  { %313 = vadd.xlane.f32.xlu1 %v312_v36  ;;  %v1783_v36 = vmul.f32 %v8775_v1, %v188_v51  ;;  %v1791_v51 = vmul.f32 %v8775_v1, %v228_v6  ;;  %v9019_v6 = vmul.f32 %v8851_v31, %v8851_v31 }
 0x113   :  { %289 = vadd.xlane.f32.xlu0 %v288_v41  ;;  %v1784_v41 = vmul.f32 %v8775_v1, %v192_v26  ;;  %v1792_v26 = vmul.f32 %v8775_v1, %v232_v16  ;;  %v9011_v1 = vpop.permute.xlu1 %624 }
 0x114   :  { %15284 = vst [vmem:[#allocation48_spill] sm:$0xff] %v9019_v6  ;;  %v318_v28 = vsel %vm284_vm2, %v9019_v6, 0.0 }
 0x115   :  { %v8973_v38 = vpack.c.bf16 %v1784_v41, %v1784_v41  ;;  %v8993_v41 = vpack.c.bf16 %v1791_v51, %v1791_v51  ;;  %v8995_v5 = vpack.c.bf16 %v1792_v26, %v1792_v26  ;;  %v9025_v51 = vmul.f32 %v8845_v25, %v8845_v25 }
 0x116   :  { %292 = vadd.xlane.f32.xlu1 %v291_v42  ;;  %v8971_v42 = vpack.c.bf16 %v1783_v36, %v1783_v36  ;;  %v8991_v36 = vpop.permute.xlu0 %458 }
 0x117   :  { %15277 = vst [vmem:[#allocation41_spill] sm:$0xff] %v8973_v38  ;;  %1864 = vst.msk [vmem:[%s15010_s7 + $0x1c] sm:$0xf] %vm927_vm1, %v8973_v38  ;;  %v9029_v26 = vpop.permute.xlu1 %628 }
 0x118   :  { %15276 = vst [vmem:[#allocation40_spill] sm:$0xff] %v8971_v42  ;;  %1863 = vst.msk [vmem:[%s15010_s7 + $0x18] sm:$0xf] %vm927_vm1, %v8971_v42 }
 0x119   :  { %15280 = vst [vmem:[#allocation44_spill] sm:$0xff] %v8991_v36  ;;  %15281 = vst [vmem:[#allocation45_spill] sm:$0xff] %v8993_v41  ;;  %v315_v36 = vsel %vm284_vm2, %v9025_v51, 0.0 }
 0x11a   :  { %15282 = vst [vmem:[#allocation46_spill] sm:$0xff] %v8995_v5  ;;  %1871 = vst.msk [vmem:[%s15010_s7 + $0x38] sm:$0xf] %vm927_vm1, %v8993_v41  ;;  %v9015_v16 = vpop.permute.xlu0 %622 }
 0x11b   :  { %1872 = vst.msk [vmem:[%s15010_s7 + $0x3c] sm:$0xf] %vm927_vm1, %v8995_v5  ;;  %15285 = vst [vmem:[#allocation49_spill] sm:$0xff] %v9025_v51  ;;  %v9035_v41 = vpop.permute.xlu1 %632 }
 0x11c   :  { %15286 = vst [vmem:[#allocation50_spill] sm:$0xff] %v9035_v41 }
 0x11e   :  { %v9033_v5 = vpop.permute.xlu0 %626 }
 0x11f   :  { %v9039_v42 = vpop.permute.xlu1 %636 }
 0x120   :  { %15288 = vst [vmem:[#allocation52_spill] sm:$0xff] %v9039_v42  ;;  %v294_v42 = vsel %vm284_vm2, %v8999_v47, 0.0 }
 0x122   :  { %v9037_v38 = vpop.permute.xlu0 %630 }
 0x123   :  { %15287 = vst [vmem:[#allocation51_spill] sm:$0xff] %v9037_v38  ;;  %v9043_v32 = vpop.permute.xlu1 %640 }
 0x126   :  { %v9041_v37 = vpop.permute.xlu0 %634 }
 0x127   :  { %966 = vrot.lane.b32.xlu1 %v8999_v47, %s8304_s17  ;;  %15289 = vst [vmem:[#allocation53_spill] sm:$0xff] %v9041_v37  ;;  %v9047_v15 = vpop.permute.xlu1 %644 }
 0x129   :  { %964 = vrot.lane.b32.xlu0 %v8945_v33, %s8304_s17 }
 0x12a   :  { %v9045_v19 = vpop.permute.xlu0 %638 }
 0x12b   :  { %982 = vrot.lane.b32.xlu1 %v9019_v6, %s8304_s17  ;;  %v9051_v21 = vpop.permute.xlu1 %648  ;;  %v9081_v6 = vmul.f32 %v8888_v43, %v8888_v43 }
 0x12c   :  { %15290 = vst [vmem:[#allocation54_spill] sm:$0xff] %v9051_v21 }
 0x12d   :  { %980 = vrot.lane.b32.xlu0 %v9025_v51, %s8304_s17  ;;  %15300 = vst [vmem:[#allocation64_spill] sm:$0xff] %v9081_v6 }
 0x12e   :  { %v9049_v11 = vpop.permute.xlu0 %642 }
 0x12f   :  { %v9059_v37 = vpop.permute.xlu1 %652 }
 0x130   :  { %15292 = vst [vmem:[#allocation56_spill] sm:$0xff] %v9059_v37 }
 0x132   :  { %v9055_v20 = vpop.permute.xlu0 %646 }
 0x133   :  { %15291 = vst [vmem:[#allocation55_spill] sm:$0xff] %v9055_v20  ;;  %v9065_v38 = vpop.permute.xlu1 %1122 }
 0x134   :  { %15294 = vst [vmem:[#allocation58_spill] sm:$0xff] %v9065_v38 }
 0x136   :  { %v9063_v24 = vpop.permute.xlu0 %650 }
 0x137   :  { %15293 = vst [vmem:[#allocation57_spill] sm:$0xff] %v9063_v24  ;;  %v9069_v51 = vpop.permute.xlu1 %1124 }
 0x138   :  { %15296 = vst [vmem:[#allocation60_spill] sm:$0xff] %v9069_v51 }
 0x13a   :  { %v9067_v21 = vpop.permute.xlu0 %1120 }
 0x13b   :  { %15295 = vst [vmem:[#allocation59_spill] sm:$0xff] %v9067_v21 }
 0x13e   :  { %v9075_v20 = vpop.permute.xlu0 %1128 }
 0x13f   :  { %15298 = vst [vmem:[#allocation62_spill] sm:$0xff] %v9075_v20  ;;  %v9095_v20 = vmul.f32 %v8896_v50, %v8896_v50 }
 0x141   :  { %15303 = vst [vmem:[#allocation67_spill] sm:$0xff] %v9095_v20 }
 0x142   :  { %v9091_v51 = vpop.permute.xlu0 %1132 }
 0x143   :  { %15302 = vst [vmem:[#allocation66_spill] sm:$0xff] %v9091_v51 }
 0x146   :  { %v9103_v38 = vpop.permute.xlu0 %1136 }
 0x147   :  { %15305 = vst [vmem:[#allocation69_spill] sm:$0xff] %v9103_v38 }
 0x14a   :  { %v9107_v24 = vpop.permute.xlu0 %1140 }
 0x14b   :  { %15307 = vst [vmem:[#allocation71_spill] sm:$0xff] %v9107_v24 }
 0x14c   :  { %316 = vadd.xlane.f32.xlu0 %v315_v36  ;;  %v9073_v36 = vmul.f32 %v8878_v39, %v8878_v39 }
 0x14e   :  { %15297 = vst [vmem:[#allocation61_spill] sm:$0xff] %v9073_v36  ;;  %v9111_v51 = vpop.permute.xlu0 %1144  ;;  %v297_v18 = vsel %vm284_vm2, %v9073_v36, 0.0 }
 0x14f   :  { %295 = vadd.xlane.f32.xlu1 %v294_v42  ;;  %v9077_v42 = vpop.permute.xlu1 %1126  ;;  %15309 = vst [vmem:[#allocation73_spill] sm:$0xff] %v9111_v51  ;;  %v300_v51 = vsel %vm284_vm2, %v9081_v6, 0.0 }
 0x150   :  { %15299 = vst [vmem:[#allocation63_spill] sm:$0xff] %v9077_v42 }
 0x152   :  { %v9115_v30 = vpop.permute.xlu0 %1148 }
 0x153   :  { %319 = vadd.xlane.f32.xlu1 %v318_v28  ;;  %v9085_v28 = vmul.f32 %v8890_v44, %v8890_v44  ;;  %v9099_v42 = vpop.permute.xlu1 %1130  ;;  %15311 = vst [vmem:[#allocation75_spill] sm:$0xff] %v9115_v30 }
 0x154   :  { %15304 = vst [vmem:[#allocation68_spill] sm:$0xff] %v9099_v42 }
 0x155   :  { %15301 = vst [vmem:[#allocation65_spill] sm:$0xff] %v9085_v28 }
 0x156   :  { %v9119_v42 = vpop.permute.xlu0 %1184 }
 0x157   :  { %v9105_v21 = vpop.permute.xlu1 %1134  ;;  %15313 = vst [vmem:[#allocation77_spill] sm:$0xff] %v9119_v42 }
 0x158   :  { %15306 = vst [vmem:[#allocation70_spill] sm:$0xff] %v9105_v21  ;;  %v321_v21 = vsel %vm284_vm2, %v9085_v28, 0.0 }
 0x15a   :  { %v9127_v24 = vpop.permute.xlu0 %1188 }
 0x15b   :  { %v9109_v37 = vpop.permute.xlu1 %1138  ;;  %15315 = vst [vmem:[#allocation79_spill] sm:$0xff] %v9127_v24 }
 0x15c   :  { %15308 = vst [vmem:[#allocation72_spill] sm:$0xff] %v9109_v37 }
 0x15f   :  { %v9113_v41 = vpop.permute.xlu1 %1142 }
 0x160   :  { %15310 = vst [vmem:[#allocation74_spill] sm:$0xff] %v9113_v41  ;;  %v324_v41 = vsel %vm284_vm2, %v9095_v20, 0.0 }
 0x162   :  { %968 = vrot.lane.b32.xlu0 %v9073_v36, %s8304_s17 }
 0x163   :  { %v9117_v49 = vpop.permute.xlu1 %1146 }
 0x164   :  { %970 = vrot.lane.b32.xlu1 %v9081_v6, %s8304_s17  ;;  %15312 = vst [vmem:[#allocation76_spill] sm:$0xff] %v9117_v49  ;;  %v9133_v49 = vpop.permute.xlu0 %1192 }
 0x165   :  { %15317 = vst [vmem:[#allocation81_spill] sm:$0xff] %v9133_v49 }
 0x166   :  { %984 = vrot.lane.b32.xlu0 %v9085_v28, %s8304_s17 }
 0x167   :  { %v9123_v38 = vpop.permute.xlu1 %1150 }
 0x168   :  { %986 = vrot.lane.b32.xlu1 %v9095_v20, %s8304_s17  ;;  %15314 = vst [vmem:[#allocation78_spill] sm:$0xff] %v9123_v38  ;;  %v9139_v38 = vpop.permute.xlu0 %1196 }
 0x169   :  { %15319 = vst [vmem:[#allocation83_spill] sm:$0xff] %v9139_v38 }
 0x16b   :  { %v9131_v30 = vpop.permute.xlu1 %1186 }
 0x16c   :  { %15316 = vst [vmem:[#allocation80_spill] sm:$0xff] %v9131_v30  ;;  %v9143_v24 = vpop.permute.xlu0 %1200 }
 0x16d   :  { %15321 = vst [vmem:[#allocation85_spill] sm:$0xff] %v9143_v24 }
 0x170   :  { %v9161_v38 = vpop.permute.xlu0 %1204 }
 0x171   :  { %15326 = vst [vmem:[#allocation90_spill] sm:$0xff] %v9161_v38 }
 0x174   :  { %v9175_v49 = vpop.permute.xlu0 %1208 }
 0x175   :  { %15329 = vst [vmem:[#allocation93_spill] sm:$0xff] %v9175_v49 }
 0x178   :  { %v9179_v38 = vpop.permute.xlu0 %1212 }
 0x179   :  { %15331 = vst [vmem:[#allocation95_spill] sm:$0xff] %v9179_v38 }
 0x17c   :  { %v9183_v42 = vpop.permute.xlu0 %1344 }
 0x17d   :  { %15333 = vst [vmem:[#allocation97_spill] sm:$0xff] %v9183_v42 }
 0x180   :  { %v9187_v20 = vpop.permute.xlu0 %1348 }
 0x181   :  { %15335 = vst [vmem:[#allocation99_spill] sm:$0xff] %v9187_v20 }
 0x185   :  { %298 = vadd.xlane.f32.xlu0 %v297_v18  ;;  %v9137_v18 = vpop.permute.xlu1 %1190 }
 0x186   :  { %15318 = vst [vmem:[#allocation82_spill] sm:$0xff] %v9137_v18 }
 0x189   :  { %322 = vadd.xlane.f32.xlu0 %v321_v21  ;;  %v9141_v37 = vpop.permute.xlu1 %1194  ;;  %v9147_v21 = vmul.f32 %v8959_v48, %v8959_v48 }
 0x18a   :  { %15320 = vst [vmem:[#allocation84_spill] sm:$0xff] %v9141_v37  ;;  %v9167_v37 = vmul.f32 %v8975_v35, %v8975_v35 }
 0x18b   :  { %15322 = vst [vmem:[#allocation86_spill] sm:$0xff] %v9147_v21  ;;  %v303_v35 = vsel %vm284_vm2, %v9147_v21, 0.0 }
 0x18c   :  { %301 = vadd.xlane.f32.xlu1 %v300_v51  ;;  %v9153_v51 = vmul.f32 %v8963_v7, %v8963_v7  ;;  %15327 = vst [vmem:[#allocation91_spill] sm:$0xff] %v9167_v37 }
 0x18d   :  { %v9149_v30 = vpop.permute.xlu1 %1198 }
 0x18e   :  { %15323 = vst [vmem:[#allocation87_spill] sm:$0xff] %v9149_v30  ;;  %15324 = vst [vmem:[#allocation88_spill] sm:$0xff] %v9153_v51  ;;  %v306_v20 = vsel %vm284_vm2, %v9153_v51, 0.0 }
 0x190   :  { %325 = vadd.xlane.f32.xlu1 %v324_v41  ;;  %v9157_v41 = vmul.f32 %v8969_v13, %v8969_v13 }
 0x191   :  { %v9171_v30 = vpop.permute.xlu1 %1202 }
 0x192   :  { %15325 = vst [vmem:[#allocation89_spill] sm:$0xff] %v9157_v41  ;;  %15328 = vst [vmem:[#allocation92_spill] sm:$0xff] %v9171_v30  ;;  %v9191_v30 = vpop.permute.xlu0 %1352  ;;  %v327_v38 = vsel %vm284_vm2, %v9157_v41, 0.0 }
 0x193   :  { %15337 = vst [vmem:[#allocation101_spill] sm:$0xff] %v9191_v30  ;;  %v330_v30 = vsel %vm284_vm2, %v9167_v37, 0.0 }
 0x195   :  { %v9177_v18 = vpop.permute.xlu1 %1206 }
 0x196   :  { %15330 = vst [vmem:[#allocation94_spill] sm:$0xff] %v9177_v18  ;;  %v9197_v18 = vpop.permute.xlu0 %1356 }
 0x197   :  { %15339 = vst [vmem:[#allocation103_spill] sm:$0xff] %v9197_v18 }
 0x199   :  { %v9181_v24 = vpop.permute.xlu1 %1210 }
 0x19a   :  { %15332 = vst [vmem:[#allocation96_spill] sm:$0xff] %v9181_v24 }
 0x19d   :  { %v9185_v28 = vpop.permute.xlu1 %1214 }
 0x19e   :  { %15334 = vst [vmem:[#allocation98_spill] sm:$0xff] %v9185_v28 }
 0x19f   :  { %972 = vrot.lane.b32.xlu0 %v9147_v21, %s8304_s17 }
 0x1a1   :  { %974 = vrot.lane.b32.xlu1 %v9153_v51, %s8304_s17  ;;  %v9189_v13 = vpop.permute.xlu1 %1346 }
 0x1a2   :  { %15336 = vst [vmem:[#allocation100_spill] sm:$0xff] %v9189_v13  ;;  %v9205_v13 = vpop.permute.xlu0 %1360 }
 0x1a3   :  { %988 = vrot.lane.b32.xlu0 %v9157_v41, %s8304_s17  ;;  %15341 = vst [vmem:[#allocation105_spill] sm:$0xff] %v9205_v13 }
 0x1a5   :  { %990 = vrot.lane.b32.xlu1 %v9167_v37, %s8304_s17  ;;  %v9195_v49 = vpop.permute.xlu1 %1350 }
 0x1a6   :  { %15338 = vst [vmem:[#allocation102_spill] sm:$0xff] %v9195_v49 }
 0x1a9   :  { %v9201_v42 = vpop.permute.xlu1 %1354 }
 0x1aa   :  { %15340 = vst [vmem:[#allocation104_spill] sm:$0xff] %v9201_v42 }
 0x1ad   :  { %v9209_v49 = vpop.permute.xlu1 %1358 }
 0x1ae   :  { %15342 = vst [vmem:[#allocation106_spill] sm:$0xff] %v9209_v49 }
 0x1b1   :  { %v9213_v18 = vpop.permute.xlu1 %1362 }
 0x1b2   :  { %15344 = vst [vmem:[#allocation108_spill] sm:$0xff] %v9213_v18 }
 0x1c2   :  { %304 = vadd.xlane.f32.xlu0 %v303_v35  ;;  %v9211_v35 = vpop.permute.xlu0 %1364 }
 0x1c3   :  { %15343 = vst [vmem:[#allocation107_spill] sm:$0xff] %v9211_v35 }
 0x1c6   :  { %328 = vadd.xlane.f32.xlu0 %v327_v38  ;;  %v9215_v28 = vpop.permute.xlu0 %1368  ;;  %v9217_v38 = vpop.permute.xlu1 %1366 }
 0x1c7   :  { %15345 = vst [vmem:[#allocation109_spill] sm:$0xff] %v9215_v28  ;;  %15346 = vst [vmem:[#allocation110_spill] sm:$0xff] %v9217_v38 }
 0x1c9   :  { %307 = vadd.xlane.f32.xlu1 %v306_v20 }
 0x1ca   :  { %v9221_v20 = vpop.permute.xlu0 %1372  ;;  %v9225_v42 = vpop.permute.xlu1 %1370 }
 0x1cb   :  { %15347 = vst [vmem:[#allocation111_spill] sm:$0xff] %v9221_v20  ;;  %15348 = vst [vmem:[#allocation112_spill] sm:$0xff] %v9225_v42 }
 0x1cd   :  { %331 = vadd.xlane.f32.xlu1 %v330_v30 }
 0x1ce   :  { %v9231_v30 = vpop.permute.xlu0 %1408  ;;  %v9235_v49 = vpop.permute.xlu1 %1374 }
 0x1cf   :  { %15349 = vst [vmem:[#allocation113_spill] sm:$0xff] %v9235_v49 }
 0x1dc   :  { %1416 = vrot.lane.b32.xlu0 %v8578_v52, %s8305_s20  ;;  %v9241_v52 = vpop.permute.xlu0 %1412 }
 0x1dd   :  { %15350 = vst [vmem:[#allocation114_spill] sm:$0xff] %v9241_v52 }
 0x1de   :  { %1414 = vrot.lane.b32.xlu1 %v8589_v53, %s8305_s20  ;;  %v9245_v53 = vpop.permute.xlu1 %1410 }
 0x1df   :  { %15351 = vst [vmem:[#allocation115_spill] sm:$0xff] %v9245_v53 }
 0x1e0   :  { %1420 = vrot.lane.b32.xlu0 %v8594_v54, %s8305_s20  ;;  %v961_v54 = vpop.permute.xlu0 %960 }
 0x1e2   :  { %1418 = vrot.lane.b32.xlu1 %v8603_v55, %s8305_s20  ;;  %v963_v55 = vpop.permute.xlu1 %962 }
 0x1e3   :  { %v1011_v13 = vsel %vm284_vm2, %v963_v55, 0.0 }
 0x1e4   :  { %1424 = vrot.lane.b32.xlu0 %v8608_v56, %s8305_s20  ;;  %v977_v56 = vpop.permute.xlu0 %976 }
 0x1e5   :  { %v1032_v28 = vsel %vm284_vm2, %v977_v56, 0.0 }
 0x1e6   :  { %1422 = vrot.lane.b32.xlu1 %v8617_v57, %s8305_s20  ;;  %v979_v57 = vpop.permute.xlu1 %978 }
 0x1e8   :  { %1428 = vrot.lane.b32.xlu0 %v8622_v58, %s8305_s20  ;;  %v287_v58 = vpop.xlane.xlu0 %286 }
 0x1ea   :  { %1426 = vrot.lane.b32.xlu1 %v8631_v59, %s8305_s20  ;;  %v314_v59 = vpop.xlane.xlu1 %313 }
 0x1ec   :  { %1432 = vrot.lane.b32.xlu0 %v8636_v60, %s8305_s20  ;;  %v311_v60 = vpop.xlane.xlu0 %310 }
 0x1ee   :  { %1430 = vrot.lane.b32.xlu1 %v8645_v61, %s8305_s20  ;;  %v9267_v61 = vpop.xlane.xlu1 %292 }
 0x1f0   :  { %1436 = vrot.lane.b32.xlu0 %v8650_v62, %s8305_s20  ;;  %v290_v62 = vpop.xlane.xlu0 %289 }
 0x1f2   :  { %1434 = vrot.lane.b32.xlu1 %v8659_v63, %s8305_s20  ;;  %v967_v63 = vpop.permute.xlu1 %966 }
 0x1f4   :  { %1873 = vrot.lane.b32.xlu0 %v8783_v4, %s8306_s8 }
 0x1f6   :  { %1438 = vrot.lane.b32.xlu1 %v8668_v0, %s8305_s20  ;;  %v965_v0 = vpop.permute.xlu0 %964 }
 0x1f8   :  { %1877 = vrot.lane.b32.xlu0 %v8945_v33, %s8306_s8  ;;  %v983_v33 = vpop.permute.xlu1 %982 }
 0x1fa   :  { %1875 = vrot.lane.b32.xlu1 %v8797_v12, %s8306_s8  ;;  %v981_v4 = vpop.permute.xlu0 %980 }
 0x1fb   :  { %v1038_v24 = vsel %vm284_vm2, %v981_v4, 0.0 }
 0x1fc   :  { %1881 = vrot.lane.b32.xlu0 %v9073_v36, %s8306_s8  ;;  %v296_v49 = vpop.xlane.xlu1 %295  ;;  %v1008_v36 = vsel %vm284_vm2, %v961_v54, 0.0 }
 0x1fe   :  { %1879 = vrot.lane.b32.xlu1 %v8999_v47, %s8306_s8  ;;  %v9271_v12 = vpop.xlane.xlu0 %316 }
 0x200   :  { %v320_v20 = vpop.xlane.xlu1 %319 }
 0x202   :  { %1883 = vrot.lane.b32.xlu1 %v9081_v6, %s8306_s8  ;;  %v969_v42 = vpop.permute.xlu0 %968  ;;  %v1014_v6 = vsel %vm284_vm2, %v965_v0, 0.0 }
 0x204   :  { %v971_v47 = vpop.permute.xlu1 %970 }
 0x206   :  { %v985_v38 = vpop.permute.xlu0 %984 }
 0x207   :  { %v1044_v55 = vsel %vm284_vm2, %v985_v38, 0.0 }
 0x208   :  { %v987_v35 = vpop.permute.xlu1 %986 }
 0x212   :  { %v9276_v18 = vpop.xlane.xlu0 %298 }
 0x216   :  { %v9284_v56 = vpop.xlane.xlu0 %322 }
 0x219   :  { %v9280_v54 = vpop.xlane.xlu1 %301 }
 0x21a   :  { %v973_v4 = vpop.permute.xlu0 %972 }
 0x21b   :  { %1009 = vadd.xlane.f32.xlu0 %v1008_v36  ;;  %v1035_v36 = vsel %vm284_vm2, %v979_v57, 0.0  ;;  %v335_v57 = vmul.f32 0.0625, %v290_v62 }
 0x21d   :  { %v9287_v0 = vpop.xlane.xlu1 %325 }
 0x21e   :  { %v989_v52 = vpop.permute.xlu0 %988 }
 0x21f   :  { %1033 = vadd.xlane.f32.xlu0 %v1032_v28  ;;  %v1017_v28 = vsel %vm284_vm2, %v967_v63, 0.0  ;;  %v1050_v38 = vsel %vm284_vm2, %v989_v52, 0.0 }
 0x221   :  { %v975_v63 = vpop.permute.xlu1 %974 }
 0x223   :  { %1015 = vadd.xlane.f32.xlu0 %v1014_v6  ;;  %v1041_v6 = vsel %vm284_vm2, %v983_v33, 0.0  ;;  %v1026_v33 = vsel %vm284_vm2, %v973_v4, 0.0 }
 0x226   :  { %1012 = vadd.xlane.f32.xlu1 %v1011_v13  ;;  %v1020_v13 = vsel %vm284_vm2, %v969_v42, 0.0  ;;  %v351_v42 = vadd.f32 1.1920929e-07, %v335_v57 }
 0x227   :  { %1039 = vadd.xlane.f32.xlu0 %v1038_v24  ;;  %v1023_v24 = vsel %vm284_vm2, %v971_v47, 0.0  ;;  %v342_v47 = vmul.f32 0.0625, %v311_v60 }
 0x228   :  { %7834 = vrsqrt.f32 %v351_v42 }
 0x22a   :  { %1036 = vadd.xlane.f32.xlu1 %v1035_v36  ;;  %v1047_v36 = vsel %vm284_vm2, %v987_v35, 0.0 }
 0x22b   :  { %1018 = vadd.xlane.f32.xlu0 %v1017_v28  ;;  %v334_v28 = vmul.f32 0.0625, %v287_v58  ;;  %v358_v58 = vadd.f32 1.1920929e-07, %v342_v47 }
 0x22d   :  { %v350_v53 = vadd.f32 1.1920929e-07, %v334_v28 }
 0x22e   :  { %1042 = vadd.xlane.f32.xlu1 %v1041_v6  ;;  %v343_v6 = vmul.f32 0.0625, %v314_v59  ;;  %v337_v59 = vmul.f32 0.0625, %v296_v49 }
 0x22f   :  { %1021 = vadd.xlane.f32.xlu0 %v1020_v13  ;;  %v1029_v13 = vsel %vm284_vm2, %v975_v63, 0.0  ;;  %7836 = vrsqrt.f32 %v350_v53  ;;  %v345_v63 = vmul.f32 0.0625, %v320_v20 }
 0x230   :  { %v359_v62 = vadd.f32 1.1920929e-07, %v343_v6  ;;  %v353_v60 = vadd.f32 1.1920929e-07, %v337_v59  ;;  %v347_v59 = vmul.f32 0.0625, %v9287_v0 }
 0x231   :  { %v361_v42 = vadd.f32 1.1920929e-07, %v345_v63 }
 0x232   :  { %1024 = vadd.xlane.f32.xlu1 %v1023_v24  ;;  %v991_v24 = vpop.permute.xlu1 %990  ;;  %7838 = vrsqrt.f32 %v359_v62  ;;  %v7835_v4 = vpop.eup %7834  ;;  %v338_v62 = vmul.f32 0.0625, %v9276_v18  ;;  %v346_v18 = vmul.f32 0.0625, %v9284_v56 }
 0x233   :  { %1045 = vadd.xlane.f32.xlu0 %v1044_v55  ;;  %v1053_v35 = vsel %vm284_vm2, %v991_v24, 0.0  ;;  %7840 = vrsqrt.f32 %v358_v58  ;;  %v336_v55 = vmul.f32 0.0625, %v9267_v61  ;;  %v339_v24 = vmul.f32 0.0625, %v9280_v54 }
 0x234   :  { %7842 = vrsqrt.f32 %v353_v60  ;;  %v362_v56 = vadd.f32 1.1920929e-07, %v346_v18  ;;  %v15353_v18 = vld [vmem:[#allocation36_spill] sm:$0xff] }
 0x235   :  { %v352_v28 = vadd.f32 1.1920929e-07, %v336_v55  ;;  %v355_v58 = vadd.f32 1.1920929e-07, %v339_v24 }
 0x236   :  { %1048 = vadd.xlane.f32.xlu1 %v1047_v36  ;;  %v9299_v36 = vmul.f32 %v7835_v4, %v8786_v8  ;;  %v354_v4 = vadd.f32 1.1920929e-07, %v338_v62 }
 0x237   :  { %1027 = vadd.xlane.f32.xlu0 %v1026_v33  ;;  %v344_v33 = vmul.f32 0.0625, %v9271_v12  ;;  %7844 = vrsqrt.f32 %v352_v28 }
 0x238   :  { %v479_v61 = vmul.f32 %v8829_v22, %v9299_v36  ;;  %7846 = vrsqrt.f32 %v361_v42 }
 0x239   :  { %v7837_v57 = vpop.eup %7836  ;;  %v360_v20 = vadd.f32 1.1920929e-07, %v344_v33 }
 0x23a   :  { %1030 = vadd.xlane.f32.xlu1 %v1029_v13  ;;  %v9303_v53 = vmul.f32 %v7837_v57, %v8777_v2  ;;  %v363_v57 = vadd.f32 1.1920929e-07, %v347_v59 }
 0x23b   :  { %1051 = vadd.xlane.f32.xlu0 %v1050_v38  ;;  %7848 = vrsqrt.f32 %v360_v20  ;;  %v671_v38 = vmul.f32 %v9011_v1, %v9299_v36 }
 0x23c   :  { %v7839_v52 = vpop.eup %7838  ;;  %v478_v12 = vmul.f32 %v8922_v14, %v9303_v53  ;;  %7850 = vrsqrt.f32 %v355_v58 }
 0x23d   :  { %v7841_v6 = vpop.eup %7840  ;;  %v9306_v49 = vmul.f32 %v7839_v52, %v8789_v10  ;;  %7852 = vrsqrt.f32 %v354_v4 }
 0x23e   :  { %1054 = vadd.xlane.f32.xlu1 %v1053_v35  ;;  %v9311_v13 = vmul.f32 %v7841_v6, %v8779_v3  ;;  %v7843_v14 = vpop.eup %7842  ;;  %7854 = vrsqrt.f32 %v363_v57 }
 0x23f   :  { %v487_v47 = vmul.f32 %v8939_v29, %v9306_v49  ;;  %v670_v29 = vmul.f32 %v9015_v16, %v9303_v53  ;;  %v679_v1 = vmul.f32 %v9043_v32, %v9306_v49  ;;  %7856 = vrsqrt.f32 %v362_v56 }
 0x240   :  { %v486_v22 = vmul.f32 %v8947_v34, %v9311_v13  ;;  %v9332_v34 = vmul.f32 %v7843_v14, %v8848_v27  ;;  %v678_v16 = vmul.f32 %v9045_v19, %v9311_v13 }
 0x241   :  { %v7845_v35 = vpop.eup %7844 }
 0x242   :  { %v7847_v54 = vpop.eup %7846  ;;  %v9339_v55 = vmul.f32 %v7845_v35, %v8841_v23  ;;  %v481_v32 = vmul.f32 %v8908_v9, %v9332_v34 }
 0x243   :  { %v9345_v60 = vmul.f32 %v7847_v54, %v8851_v31 }
 0x244   :  { %v480_v19 = vmul.f32 %v8880_v40, %v9339_v55  ;;  %v673_v40 = vmul.f32 %v9029_v26, %v9332_v34 }
 0x245   :  { %v7849_v0 = vpop.eup %7848  ;;  %v489_v33 = vmul.f32 %v8955_v45, %v9345_v60  ;;  %v672_v45 = vmul.f32 %v9033_v5, %v9339_v55 }
 0x246   :  { %v9351_v63 = vmul.f32 %v7849_v0, %v8845_v25 }
 0x248   :  { %v488_v9 = vmul.f32 %v8957_v46, %v9351_v63  ;;  %v680_v5 = vmul.f32 %v9049_v11, %v9351_v63  ;;  %v15352_v11 = vld [vmem:[#allocation31_spill] sm:$0xff] }
 0x24f   :  { %512 = vrot.lane.b32.xlu1 %v479_v61, %s8307_s9  ;;  %v305_v28 = vpop.xlane.xlu0 %304  ;;  %v7851_v61 = vpop.eup %7850 }
 0x250   :  { %v340_v20 = vmul.f32 0.0625, %v305_v28  ;;  %v9369_v46 = vmul.f32 %v7851_v61, %v8888_v43 }
 0x251   :  { %510 = vrot.lane.b32.xlu0 %v478_v12, %s8307_s9 }
 0x252   :  { %v356_v14 = vadd.f32 1.1920929e-07, %v340_v20 }
 0x253   :  { %528 = vrot.lane.b32.xlu1 %v487_v47, %s8307_s9  ;;  %v329_v12 = vpop.xlane.xlu0 %328  ;;  %v7853_v47 = vpop.eup %7852 }
 0x254   :  { %v7855_v26 = vpop.eup %7854  ;;  %v348_v62 = vmul.f32 0.0625, %v329_v12 }
 0x255   :  { %526 = vrot.lane.b32.xlu0 %v486_v22, %s8307_s9  ;;  %v7857_v35 = vpop.eup %7856  ;;  %v9381_v59 = vmul.f32 %v7855_v26, %v8896_v50  ;;  %v15363_v26 = vld [vmem:[#allocation32_spill] sm:$0xff] }
 0x256   :  { %v308_v52 = vpop.xlane.xlu1 %307  ;;  %v9387_v54 = vmul.f32 %v7857_v35, %v8890_v44 }
 0x257   :  { %704 = vrot.lane.b32.xlu1 %v671_v38, %s8307_s9  ;;  %v341_v6 = vmul.f32 0.0625, %v308_v52  ;;  %v681_v38 = vmul.f32 %v9047_v15, %v9345_v60  ;;  %v483_v15 = vmul.f32 %v8929_v17, %v9369_v46  ;;  %v15354_v17 = vld [vmem:[#allocation38_spill] sm:$0xff]  ;;  %v9398_v57 = vpop.permute.xlu0 %1416 }
 0x258   :  { %v490_v0 = vmul.f32 %v15354_v17, %v9387_v54 }
 0x259   :  { %702 = vrot.lane.b32.xlu0 %v670_v29, %s8307_s9  ;;  %v357_v22 = vadd.f32 1.1920929e-07, %v341_v6  ;;  %v9375_v29 = vmul.f32 %v7853_v47, %v8878_v39 }
 0x25a   :  { %v332_v42 = vpop.xlane.xlu1 %331 }
 0x25b   :  { %720 = vrot.lane.b32.xlu1 %v679_v1, %s8307_s9  ;;  %v349_v24 = vmul.f32 0.0625, %v332_v42  ;;  %7858 = vrsqrt.f32 %v357_v22  ;;  %v364_v1 = vadd.f32 1.1920929e-07, %v348_v62  ;;  %v482_v4 = vmul.f32 %v15352_v11, %v9375_v29  ;;  %v15358_v42 = vld [vmem:[#allocation54_spill] sm:$0xff]  ;;  %v9414_v20 = vpop.permute.xlu0 %1420  ;;  %v15364_v62 = vld [vmem:[#allocation39_spill] sm:$0xff] }
 0x25c   :  { %7860 = vrsqrt.f32 %v356_v14  ;;  %v15367_v11 = vld [vmem:[#allocation43_spill] sm:$0xff] }
 0x25d   :  { %718 = vrot.lane.b32.xlu0 %v678_v16, %s8307_s9  ;;  %v365_v58 = vadd.f32 1.1920929e-07, %v349_v24  ;;  %v491_v16 = vmul.f32 %v15353_v18, %v9381_v59  ;;  %v15361_v24 = vld [vmem:[#allocation42_spill] sm:$0xff]  ;;  %v15368_v18 = vld [vmem:[#allocation44_spill] sm:$0xff] }
 0x25e   :  { %v9409_v6 = vpop.permute.xlu1 %1414 }
 0x25f   :  { %516 = vrot.lane.b32.xlu1 %v481_v32, %s8307_s9  ;;  %7862 = vrsqrt.f32 %v365_v58  ;;  %v15355_v32 = vld [vmem:[#allocation50_spill] sm:$0xff]  ;;  %v15366_v58 = vld [vmem:[#allocation33_spill] sm:$0xff] }
 0x260   :  { %7864 = vrsqrt.f32 %v364_v1  ;;  %v675_v56 = vmul.f32 %v15355_v32, %v9369_v46  ;;  %v9436_v1 = vpop.permute.xlu0 %1424 }
 0x261   :  { %514 = vrot.lane.b32.xlu0 %v480_v19, %s8307_s9  ;;  %v15356_v19 = vld [vmem:[#allocation51_spill] sm:$0xff] }
 0x262   :  { %v674_v28 = vmul.f32 %v15356_v19, %v9375_v29  ;;  %v9431_v35 = vpop.permute.xlu1 %1418 }
 0x263   :  { %532 = vrot.lane.b32.xlu1 %v489_v33, %s8307_s9 }
 0x265   :  { %530 = vrot.lane.b32.xlu0 %v488_v9, %s8307_s9  ;;  %v7859_v52 = vpop.eup %7858 }
 0x266   :  { %v7861_v33 = vpop.eup %7860  ;;  %v9407_v9 = vmul.f32 %v7859_v52, %v8963_v7  ;;  %v9444_v17 = vpop.permute.xlu1 %1422  ;;  %v15370_v52 = vld [vmem:[#allocation53_spill] sm:$0xff] }
 0x267   :  { %708 = vrot.lane.b32.xlu1 %v673_v40, %s8307_s9  ;;  %v683_v40 = vmul.f32 %v15358_v42, %v9381_v59  ;;  %v9417_v12 = vmul.f32 %v7861_v33, %v8959_v48 }
 0x268   :  { %15357 = vst [vmem:[#allocation31_spill] sm:$0xff] %v9407_v9  ;;  %v485_v14 = vmul.f32 %v15363_v26, %v9407_v9  ;;  %v15373_v26 = vld [vmem:[#allocation14_spill] sm:$0xff] }
 0x269   :  { %706 = vrot.lane.b32.xlu0 %v672_v45, %s8307_s9  ;;  %v7863_v61 = vpop.eup %7862  ;;  %15359 = vst [vmem:[#allocation36_spill] sm:$0xff] %v9417_v12  ;;  %v15360_v45 = vld [vmem:[#allocation55_spill] sm:$0xff]  ;;  %v676_v19 = vmul.f32 %v15370_v52, %v9417_v12 }
 0x26a   :  { %v682_v47 = vmul.f32 %v15360_v45, %v9387_v54  ;;  %v7865_v22 = vpop.eup %7864  ;;  %v9457_v42 = vpop.permute.xlu1 %1426 }
 0x26b   :  { %724 = vrot.lane.b32.xlu1 %v681_v38, %s8307_s9  ;;  %v9423_v38 = vmul.f32 %v7863_v61, %v15361_v24 }
 0x26d   :  { %722 = vrot.lane.b32.xlu0 %v680_v5, %s8307_s9  ;;  %15362 = vst [vmem:[#allocation38_spill] sm:$0xff] %v9423_v38  ;;  %v9429_v5 = vmul.f32 %v7865_v22, %v15364_v62 }
 0x26f   :  { %520 = vrot.lane.b32.xlu1 %v483_v15, %s8307_s9  ;;  %15365 = vst [vmem:[#allocation50_spill] sm:$0xff] %v9429_v5  ;;  %v484_v15 = vmul.f32 %v15366_v58, %v9417_v12 }
 0x271   :  { %518 = vrot.lane.b32.xlu0 %v482_v4, %s8307_s9  ;;  %v493_v4 = vmul.f32 %v15367_v11, %v9423_v38 }
 0x273   :  { %536 = vrot.lane.b32.xlu1 %v491_v16, %s8307_s9  ;;  %v492_v16 = vmul.f32 %v15368_v18, %v9429_v5  ;;  %v15378_v18 = vld [vmem:[#allocation67_spill] sm:$0xff] }
 0x275   :  { %534 = vrot.lane.b32.xlu0 %v490_v0, %s8307_s9  ;;  %v15369_v0 = vld [vmem:[#allocation52_spill] sm:$0xff] }
 0x276   :  { %v677_v32 = vmul.f32 %v15369_v0, %v9407_v9  ;;  %v15380_v0 = vld [vmem:[#allocation65_spill] sm:$0xff] }
 0x277   :  { %712 = vrot.lane.b32.xlu1 %v675_v56, %s8307_s9  ;;  %v9449_v56 = vpop.permute.xlu0 %1428 }
 0x279   :  { %710 = vrot.lane.b32.xlu0 %v674_v28, %s8307_s9  ;;  %v15371_v28 = vld [vmem:[#allocation56_spill] sm:$0xff] }
 0x27a   :  { %v685_v33 = vmul.f32 %v15371_v28, %v9423_v38 }
 0x27b   :  { %728 = vrot.lane.b32.xlu1 %v683_v40, %s8307_s9  ;;  %v15372_v40 = vld [vmem:[#allocation57_spill] sm:$0xff]  ;;  %v9462_v45 = vpop.permute.xlu0 %1432 }
 0x27c   :  { %v684_v61 = vmul.f32 %v15372_v40, %v9429_v5 }
 0x27d   :  { %726 = vrot.lane.b32.xlu0 %v682_v47, %s8307_s9  ;;  %v9467_v47 = vpop.permute.xlu1 %1430 }
 0x27f   :  { %524 = vrot.lane.b32.xlu1 %v485_v14, %s8307_s9  ;;  %v9471_v22 = vpop.permute.xlu0 %1436  ;;  %v15374_v14 = vld [vmem:[#allocation8_spill] sm:$0xff] }
 0x281   :  { %522 = vrot.lane.b32.xlu0 %v484_v15, %s8307_s9  ;;  %v9477_v58 = vpop.permute.xlu1 %1434  ;;  %v15375_v15 = vld [vmem:[#allocation48_spill] sm:$0xff] }
 0x283   :  { %540 = vrot.lane.b32.xlu1 %v493_v4, %s8307_s9  ;;  %v9481_v11 = vpop.permute.xlu0 %1873  ;;  %v15377_v4 = vld [vmem:[#allocation49_spill] sm:$0xff] }
 0x284   :  { %15376 = vst [vmem:[#allocation51_spill] sm:$0xff] %v9481_v11 }
 0x285   :  { %538 = vrot.lane.b32.xlu0 %v492_v16, %s8307_s9  ;;  %v9487_v16 = vpop.permute.xlu1 %1438 }
 0x286   :  { %15379 = vst [vmem:[#allocation54_spill] sm:$0xff] %v9487_v16 }
 0x287   :  { %716 = vrot.lane.b32.xlu1 %v677_v32, %s8307_s9  ;;  %v9491_v32 = vpop.permute.xlu0 %1877 }
 0x288   :  { %15381 = vst [vmem:[#allocation55_spill] sm:$0xff] %v9491_v32 }
 0x289   :  { %714 = vrot.lane.b32.xlu0 %v676_v19, %s8307_s9  ;;  %v9497_v52 = vpop.permute.xlu1 %1875 }
 0x28a   :  { %15382 = vst [vmem:[#allocation32_spill] sm:$0xff] %v9497_v52 }
 0x28b   :  { %732 = vrot.lane.b32.xlu1 %v685_v33, %s8307_s9  ;;  %v9499_v19 = vpop.permute.xlu0 %1881 }
 0x28c   :  { %15383 = vst [vmem:[#allocation33_spill] sm:$0xff] %v9499_v19 }
 0x28d   :  { %730 = vrot.lane.b32.xlu0 %v684_v61, %s8307_s9  ;;  %v9501_v33 = vpop.permute.xlu1 %1879 }
 0x28e   :  { %15384 = vst [vmem:[#allocation43_spill] sm:$0xff] %v9501_v33 }
 0x28f   :  { %1887 = vrot.lane.b32.xlu1 %v9153_v51, %s8306_s8 }
 0x291   :  { %1885 = vrot.lane.b32.xlu0 %v9147_v21, %s8306_s8 }
 0x293   :  { %1891 = vrot.lane.b32.xlu1 %v15373_v26, %s8306_s8  ;;  %v9503_v26 = vpop.permute.xlu1 %1883 }
 0x294   :  { %15385 = vst [vmem:[#allocation44_spill] sm:$0xff] %v9503_v26 }
 0x295   :  { %1889 = vrot.lane.b32.xlu0 %v15374_v14, %s8306_s8 }
 0x297   :  { %1895 = vrot.lane.b32.xlu1 %v15375_v15, %s8306_s8 }
 0x299   :  { %1893 = vrot.lane.b32.xlu0 %v15377_v4, %s8306_s8 }
 0x29b   :  { %1899 = vrot.lane.b32.xlu1 %v15378_v18, %s8306_s8 }
 0x29d   :  { %1897 = vrot.lane.b32.xlu0 %v15380_v0, %s8306_s8 }
 0x29f   :  { %1903 = vrot.lane.b32.xlu1 %v9167_v37, %s8306_s8 }
 0x2a1   :  { %1901 = vrot.lane.b32.xlu0 %v9157_v41, %s8306_s8 }
 0x2a8   :  { %v1010_v28 = vpop.xlane.xlu0 %1009 }
 0x2a9   :  { %v1056_v40 = vmul.f32 0.0625, %v1010_v28 }
 0x2ab   :  { %v1072_v61 = vadd.f32 1.1920929e-07, %v1056_v40 }
 0x2ac   :  { %v1034_v18 = vpop.xlane.xlu0 %1033 }
 0x2ad   :  { %7866 = vrsqrt.f32 %v1072_v61  ;;  %v1064_v15 = vmul.f32 0.0625, %v1034_v18  ;;  %v15387_v18 = vld [vmem:[#allocation77_spill] sm:$0xff] }
 0x2af   :  { %v1080_v0 = vadd.f32 1.1920929e-07, %v1064_v15 }
 0x2b0   :  { %v1016_v51 = vpop.xlane.xlu0 %1015 }
 0x2b1   :  { %7868 = vrsqrt.f32 %v1080_v0 }
 0x2b3   :  { %v1013_v37 = vpop.xlane.xlu1 %1012 }
 0x2b4   :  { %v1057_v4 = vmul.f32 0.0625, %v1013_v37  ;;  %v1040_v41 = vpop.xlane.xlu0 %1039 }
 0x2b6   :  { %v1073_v14 = vadd.f32 1.1920929e-07, %v1057_v4 }
 0x2b7   :  { %v7867_v21 = vpop.eup %7866  ;;  %v1037_v52 = vpop.xlane.xlu1 %1036 }
 0x2b8   :  { %v9506_v19 = vmul.f32 %v7867_v21, %v8777_v2  ;;  %7870 = vrsqrt.f32 %v1073_v14  ;;  %v1065_v28 = vmul.f32 0.0625, %v1037_v52  ;;  %v1019_v40 = vpop.xlane.xlu0 %1018  ;;  %v15388_v21 = vld [vmem:[#allocation85_spill] sm:$0xff] }
 0x2ba   :  { %15386 = vst [vmem:[#allocation52_spill] sm:$0xff] %v9506_v19  ;;  %v1081_v33 = vadd.f32 1.1920929e-07, %v1065_v28  ;;  %v1232_v61 = vmul.f32 %v15387_v18, %v9506_v19  ;;  %v1456_v18 = vmul.f32 %v9231_v30, %v9506_v19  ;;  %v1059_v30 = vmul.f32 0.0625, %v1019_v40 }
 0x2bb   :  { %v7869_v26 = vpop.eup %7868  ;;  %v1043_v15 = vpop.xlane.xlu1 %1042 }
 0x2bc   :  { %v9511_v0 = vmul.f32 %v7869_v26, %v8779_v3  ;;  %7872 = vrsqrt.f32 %v1081_v33  ;;  %1264 = vrot.lane.b32.xlu0 %v1232_v61, %s8307_s9  ;;  %v9514_v37 = vpop.xlane.xlu0 %1021  ;;  %v1058_v61 = vmul.f32 0.0625, %v1016_v51  ;;  %v1075_v38 = vadd.f32 1.1920929e-07, %v1059_v30 }
 0x2bd   :  { %v1067_v16 = vmul.f32 0.0625, %v1043_v15  ;;  %v574_v30 = vsub.f32 0.0, %v9303_v53 }
 0x2be   :  { %v1240_v4 = vmul.f32 %v15388_v21, %v9511_v0  ;;  %v15389_v21 = vld [vmem:[#allocation80_spill] sm:$0xff]  ;;  %v1464_v32 = vmul.f32 %v9436_v1, %v9511_v0  ;;  %v1074_v51 = vadd.f32 1.1920929e-07, %v1058_v61  ;;  %v15391_v61 = vld [vmem:[#allocation115_spill] sm:$0xff] }
 0x2bf   :  { %v9518_v14 = vpop.xlane.xlu1 %1024 }
 0x2c0   :  { %1280 = vrot.lane.b32.xlu0 %v1240_v4, %s8307_s9  ;;  %v9521_v52 = vpop.xlane.xlu0 %1045  ;;  %7874 = vrsqrt.f32 %v1074_v51 }
 0x2c1   :  { %7876 = vrsqrt.f32 %v1075_v38  ;;  %v9570_v38 = vld [vmem:[%s15006_s4] sm:$0xff] }
 0x2c2   :  { %v7871_v28 = vpop.eup %7870  ;;  %15395 = vst [vmem:[#allocation77_spill] sm:$0xff] %v9570_v38 }
 0x2c3   :  { %v9526_v26 = vmul.f32 %v7871_v28, %v8786_v8  ;;  %v9528_v33 = vpop.xlane.xlu1 %1048  ;;  %v1066_v8 = vmul.f32 0.0625, %v1040_v41 }
 0x2c4   :  { %1488 = vrot.lane.b32.xlu0 %v1456_v18, %s8307_s9  ;;  %v9531_v3 = vpop.xlane.xlu0 %1027 }
 0x2c5   :  { %v1233_v2 = vmul.f32 %v15389_v21, %v9526_v26  ;;  %v15390_v21 = vld [vmem:[#allocation92_spill] sm:$0xff]  ;;  %v1082_v40 = vadd.f32 1.1920929e-07, %v1066_v8  ;;  %v1457_v41 = vmul.f32 %v15391_v61, %v9526_v26  ;;  %v575_v8 = vsub.f32 0.0, %v9299_v36 }
 0x2c6   :  { %v7873_v4 = vpop.eup %7872 }
 0x2c7   :  { %v9538_v11 = vmul.f32 %v7873_v4, %v8789_v10  ;;  %1266 = vrot.lane.b32.xlu1 %v1233_v2, %s8307_s9  ;;  %v9541_v28 = vpop.xlane.xlu1 %1030  ;;  %7878 = vrsqrt.f32 %v1082_v40 }
 0x2c8   :  { %1504 = vrot.lane.b32.xlu0 %v1464_v32, %s8307_s9  ;;  %v9544_v18 = vpop.xlane.xlu0 %1051  ;;  %v1083_v32 = vadd.f32 1.1920929e-07, %v1067_v16  ;;  %v590_v16 = vmul.f32 %v9570_v38, %v574_v30  ;;  %v9585_v30 = vld [vmem:[%s15006_s4 + $0x40] sm:$0xff] }
 0x2c9   :  { %v1241_v19 = vmul.f32 %v15390_v21, %v9538_v11  ;;  %v582_v21 = vsub.f32 0.0, %v9311_v13  ;;  %15397 = vst [vmem:[#allocation80_spill] sm:$0xff] %v9585_v30 }
 0x2ca   :  { %7880 = vrsqrt.f32 %v1083_v32 }
 0x2cb   :  { %1282 = vrot.lane.b32.xlu1 %v1241_v19, %s8307_s9  ;;  %v9549_v1 = vpop.xlane.xlu1 %1054  ;;  %v1465_v19 = vmul.f32 %v9457_v42, %v9538_v11  ;;  %v9577_v42 = vld [vmem:[%s15006_s4 + $0x8] sm:$0xff] }
 0x2cc   :  { %v9551_v2 = vpop.permute.xlu0 %510  ;;  %15396 = vst [vmem:[#allocation85_spill] sm:$0xff] %v9577_v42  ;;  %v591_v32 = vmul.f32 %v9577_v42, %v575_v8 }
 0x2cf   :  { %1490 = vrot.lane.b32.xlu1 %v1457_v41, %s8307_s9  ;;  %v9556_v4 = vpop.permute.xlu1 %512  ;;  %v7875_v41 = vpop.eup %7874 }
 0x2d0   :  { %15392 = vst [vmem:[#allocation53_spill] sm:$0xff] %v9556_v4  ;;  %v9559_v15 = vpop.permute.xlu0 %526 }
 0x2d1   :  { %15393 = vst [vmem:[#allocation56_spill] sm:$0xff] %v9559_v15  ;;  %v9589_v15 = vmul.f32 %v7875_v41, %v8841_v23  ;;  %v1060_v41 = vmul.f32 0.0625, %v9514_v37  ;;  %v15399_v23 = vld [vmem:[#allocation79_spill] sm:$0xff] }
 0x2d3   :  { %1506 = vrot.lane.b32.xlu1 %v1465_v19, %s8307_s9  ;;  %v9565_v51 = vpop.permute.xlu1 %528  ;;  %v583_v19 = vsub.f32 0.0, %v9306_v49 }
 0x2d4   :  { %15394 = vst [vmem:[#allocation57_spill] sm:$0xff] %v9565_v51  ;;  %v703_v40 = vpop.permute.xlu0 %702  ;;  %v7877_v51 = vpop.eup %7876 }
 0x2d5   :  { %v750_v61 = vadd.f32 %v703_v40, %v590_v16  ;;  %v598_v16 = vmul.f32 %v9585_v30, %v582_v21  ;;  %v7879_v8 = vpop.eup %7878  ;;  %v1234_v30 = vmul.f32 %v15399_v23, %v9589_v15  ;;  %v15401_v23 = vld [vmem:[#allocation90_spill] sm:$0xff] }
 0x2d7   :  { %782 = vrot.lane.b32.xlu0 %v750_v61, %s8303_s21  ;;  %v705_v10 = vpop.permute.xlu1 %704  ;;  %v9595_v61 = vld [vmem:[%s15006_s4 + $0x48] sm:$0xff] }
 0x2d8   :  { %v751_v40 = vadd.f32 %v705_v10, %v591_v32  ;;  %v719_v38 = vpop.permute.xlu0 %718  ;;  %15398 = vst [vmem:[#allocation92_spill] sm:$0xff] %v9595_v61  ;;  %v599_v42 = vmul.f32 %v9595_v61, %v583_v19  ;;  %v9600_v10 = vmul.f32 %v7877_v51, %v8848_v27  ;;  %v1068_v19 = vmul.f32 0.0625, %v9521_v52 }
 0x2d9   :  { %v758_v4 = vadd.f32 %v719_v38, %v598_v16  ;;  %v7881_v16 = vpop.eup %7880 }
 0x2da   :  { %784 = vrot.lane.b32.xlu1 %v751_v40, %s8303_s21  ;;  %v9606_v40 = vmul.f32 %v7879_v8, %v8845_v25  ;;  %v9616_v37 = vmul.f32 %v7881_v16, %v8851_v31  ;;  %v15400_v8 = vld [vmem:[#allocation82_spill] sm:$0xff] }
 0x2db   :  { %798 = vrot.lane.b32.xlu0 %v758_v4, %s8303_s21  ;;  %v721_v21 = vpop.permute.xlu1 %720  ;;  %v1061_v4 = vmul.f32 0.0625, %v9518_v14  ;;  %v1235_v25 = vmul.f32 %v15400_v8, %v9600_v10  ;;  %v15402_v31 = vld [vmem:[#allocation94_spill] sm:$0xff] }
 0x2dc   :  { %v759_v32 = vadd.f32 %v721_v21, %v599_v42  ;;  %v9603_v38 = vpop.permute.xlu0 %514  ;;  %v1076_v42 = vadd.f32 1.1920929e-07, %v1060_v41  ;;  %v1084_v41 = vadd.f32 1.1920929e-07, %v1068_v19  ;;  %v1243_v27 = vmul.f32 %v15402_v31, %v9616_v37  ;;  %v15403_v8 = vld [vmem:[#allocation114_spill] sm:$0xff] }
 0x2dd   :  { %v1077_v14 = vadd.f32 1.1920929e-07, %v1061_v4  ;;  %v1458_v61 = vmul.f32 %v15403_v8, %v9589_v15  ;;  %v576_v4 = vsub.f32 0.0, %v9339_v55  ;;  %v1466_v31 = vmul.f32 %v9449_v56, %v9606_v40  ;;  %v9658_v8 = vld [vmem:[%s15006_s4 + $0x18] sm:$0xff] }
 0x2de   :  { %800 = vrot.lane.b32.xlu1 %v759_v32, %s8303_s21  ;;  %v1242_v32 = vmul.f32 %v15401_v23, %v9606_v40  ;;  %7882 = vrsqrt.f32 %v1076_v42  ;;  %v1459_v42 = vmul.f32 %v9409_v6, %v9600_v10  ;;  %v577_v19 = vsub.f32 0.0, %v9332_v34  ;;  %15406 = vst [vmem:[#allocation82_spill] sm:$0xff] %v9658_v8 }
 0x2df   :  { %1268 = vrot.lane.b32.xlu0 %v1234_v30, %s8307_s9  ;;  %v9613_v51 = vpop.permute.xlu1 %516  ;;  %v1069_v30 = vmul.f32 0.0625, %v9528_v33  ;;  %7884 = vrsqrt.f32 %v1077_v14  ;;  %v1467_v56 = vmul.f32 %v9467_v47, %v9616_v37 }
 0x2e0   :  { %v9619_v21 = vpop.permute.xlu0 %530  ;;  %7886 = vrsqrt.f32 %v1084_v41 }
 0x2e2   :  { %1270 = vrot.lane.b32.xlu1 %v1235_v25, %s8307_s9  ;;  %v1085_v25 = vadd.f32 1.1920929e-07, %v1069_v30 }
 0x2e3   :  { %1284 = vrot.lane.b32.xlu0 %v1242_v32, %s8307_s9  ;;  %v9628_v16 = vpop.permute.xlu1 %532  ;;  %v584_v32 = vsub.f32 0.0, %v9351_v63 }
 0x2e4   :  { %v707_v52 = vpop.permute.xlu0 %706  ;;  %7888 = vrsqrt.f32 %v1085_v25  ;;  %v593_v25 = vmul.f32 %v9658_v8, %v577_v19 }
 0x2e6   :  { %1286 = vrot.lane.b32.xlu1 %v1243_v27, %s8307_s9  ;;  %v9646_v27 = vld [vmem:[%s15006_s4 + $0x10] sm:$0xff] }
 0x2e7   :  { %1492 = vrot.lane.b32.xlu0 %v1458_v61, %s8307_s9  ;;  %v709_v33 = vpop.permute.xlu1 %708  ;;  %15404 = vst [vmem:[#allocation115_spill] sm:$0xff] %v9646_v27  ;;  %v592_v61 = vmul.f32 %v9646_v27, %v576_v4  ;;  %v585_v4 = vsub.f32 0.0, %v9345_v60 }
 0x2e8   :  { %v723_v23 = vpop.permute.xlu0 %722  ;;  %v7883_v41 = vpop.eup %7882 }
 0x2e9   :  { %v752_v30 = vadd.f32 %v707_v52, %v592_v61  ;;  %v7885_v27 = vpop.eup %7884  ;;  %v9675_v19 = vmul.f32 %v7883_v41, %v8878_v39  ;;  %v1062_v41 = vmul.f32 0.0625, %v9531_v3  ;;  %v1070_v3 = vmul.f32 0.0625, %v9544_v18 }
 0x2ea   :  { %1494 = vrot.lane.b32.xlu1 %v1459_v42, %s8307_s9  ;;  %v9666_v42 = vld [vmem:[%s15006_s4 + $0x50] sm:$0xff] }
 0x2eb   :  { %1508 = vrot.lane.b32.xlu0 %v1466_v31, %s8307_s9  ;;  %v725_v6 = vpop.permute.xlu1 %724  ;;  %15407 = vst [vmem:[#allocation90_spill] sm:$0xff] %v9666_v42  ;;  %v600_v47 = vmul.f32 %v9666_v42, %v584_v32  ;;  %v753_v31 = vadd.f32 %v709_v33, %v593_v25  ;;  %v15409_v42 = vld [vmem:[#allocation81_spill] sm:$0xff] }
 0x2ec   :  { %v9651_v14 = vpop.permute.xlu0 %518 }
 0x2ed   :  { %15405 = vst [vmem:[#allocation79_spill] sm:$0xff] %v9651_v14  ;;  %v760_v8 = vadd.f32 %v723_v23, %v600_v47  ;;  %v9680_v14 = vld [vmem:[%s15006_s4 + $0x58] sm:$0xff] }
 0x2ee   :  { %1510 = vrot.lane.b32.xlu1 %v1467_v56, %s8307_s9  ;;  %v7887_v56 = vpop.eup %7886  ;;  %15408 = vst [vmem:[#allocation94_spill] sm:$0xff] %v9680_v14  ;;  %v601_v32 = vmul.f32 %v9680_v14, %v585_v4  ;;  %v1236_v4 = vmul.f32 %v15409_v42, %v9675_v19 }
 0x2ef   :  { %786 = vrot.lane.b32.xlu0 %v752_v30, %s8303_s21  ;;  %v9670_v52 = vpop.permute.xlu1 %520  ;;  %v9688_v30 = vmul.f32 %v7885_v27, %v8888_v43  ;;  %v7889_v47 = vpop.eup %7888  ;;  %v9692_v39 = vmul.f32 %v7887_v56, %v8890_v44  ;;  %v15411_v43 = vld [vmem:[#allocation93_spill] sm:$0xff] }
 0x2f0   :  { %v9672_v61 = vpop.permute.xlu0 %534  ;;  %v761_v23 = vadd.f32 %v725_v6, %v601_v32  ;;  %v9700_v27 = vmul.f32 %v7889_v47, %v8896_v50  ;;  %v15410_v32 = vld [vmem:[#allocation84_spill] sm:$0xff]  ;;  %v1086_v47 = vadd.f32 1.1920929e-07, %v1070_v3  ;;  %v579_v3 = vsub.f32 0.0, %v9369_v46 }
 0x2f1   :  { %v1237_v56 = vmul.f32 %v15410_v32, %v9688_v30  ;;  %v1244_v42 = vmul.f32 %v15411_v43, %v9692_v39  ;;  %v1460_v32 = vmul.f32 %v9398_v57, %v9675_v19  ;;  %v9728_v57 = vld [vmem:[%s15006_s4 + $0x20] sm:$0xff] }
 0x2f2   :  { %788 = vrot.lane.b32.xlu1 %v753_v31, %s8303_s21  ;;  %v1078_v31 = vadd.f32 1.1920929e-07, %v1062_v41  ;;  %v15412_v41 = vld [vmem:[#allocation96_spill] sm:$0xff]  ;;  %15414 = vst [vmem:[#allocation81_spill] sm:$0xff] %v9728_v57 }
 0x2f3   :  { %802 = vrot.lane.b32.xlu0 %v760_v8, %s8303_s21  ;;  %v9685_v33 = vpop.permute.xlu1 %536  ;;  %v1063_v8 = vmul.f32 0.0625, %v9541_v28  ;;  %v1071_v28 = vmul.f32 0.0625, %v9549_v1  ;;  %v1245_v18 = vmul.f32 %v15412_v41, %v9700_v27  ;;  %v1461_v1 = vmul.f32 %v9431_v35, %v9688_v30 }
 0x2f4   :  { %v711_v25 = vpop.permute.xlu0 %710  ;;  %7890 = vrsqrt.f32 %v1078_v31  ;;  %v1468_v31 = vmul.f32 %v9462_v45, %v9692_v39  ;;  %v1469_v35 = vmul.f32 %v9477_v58, %v9700_v27 }
 0x2f5   :  { %v1087_v43 = vadd.f32 1.1920929e-07, %v1071_v28 }
 0x2f6   :  { %804 = vrot.lane.b32.xlu1 %v761_v23, %s8303_s21  ;;  %v1079_v23 = vadd.f32 1.1920929e-07, %v1063_v8  ;;  %v578_v8 = vsub.f32 0.0, %v9375_v29 }
 0x2f7   :  { %1272 = vrot.lane.b32.xlu0 %v1236_v4, %s8307_s9  ;;  %v713_v44 = vpop.permute.xlu1 %712 }
 0x2f8   :  { %v727_v6 = vpop.permute.xlu0 %726  ;;  %7892 = vrsqrt.f32 %v1079_v23  ;;  %v586_v23 = vsub.f32 0.0, %v9387_v54 }
 0x2f9   :  { %7894 = vrsqrt.f32 %v1086_v47 }
 0x2fa   :  { %1274 = vrot.lane.b32.xlu1 %v1237_v56, %s8307_s9  ;;  %7896 = vrsqrt.f32 %v1087_v43  ;;  %v587_v43 = vsub.f32 0.0, %v9381_v59 }
 0x2fb   :  { %1288 = vrot.lane.b32.xlu0 %v1244_v42, %s8307_s9  ;;  %v729_v56 = vpop.permute.xlu1 %728  ;;  %v594_v42 = vmul.f32 %v9728_v57, %v578_v8  ;;  %v9750_v8 = vld [vmem:[%s15006_s4 + $0x60] sm:$0xff] }
 0x2fc   :  { %v9712_v4 = vpop.permute.xlu0 %522  ;;  %15418 = vst [vmem:[#allocation116_spill] sm:$0xff] %v9750_v8  ;;  %v602_v58 = vmul.f32 %v9750_v8, %v586_v23 }
 0x2fd   :  { %15413 = vst [vmem:[#allocation114_spill] sm:$0xff] %v9712_v4  ;;  %v754_v45 = vadd.f32 %v711_v25, %v594_v42 }
 0x2fe   :  { %1290 = vrot.lane.b32.xlu1 %v1245_v18, %s8307_s9  ;;  %v7891_v41 = vpop.eup %7890  ;;  %v9742_v18 = vld [vmem:[%s15006_s4 + $0x28] sm:$0xff]  ;;  %v762_v42 = vadd.f32 %v727_v6, %v602_v58 }
 0x2ff   :  { %1496 = vrot.lane.b32.xlu0 %v1460_v32, %s8307_s9  ;;  %v9737_v47 = vpop.permute.xlu1 %524  ;;  %15417 = vst [vmem:[#allocation96_spill] sm:$0xff] %v9742_v18  ;;  %v595_v32 = vmul.f32 %v9742_v18, %v579_v3 }
 0x300   :  { %v9732_v28 = vpop.permute.xlu0 %538  ;;  %15416 = vst [vmem:[#allocation93_spill] sm:$0xff] %v9737_v47  ;;  %v15437_v47 = vld [vmem:[#allocation72_spill] sm:$0xff] }
 0x301   :  { %15415 = vst [vmem:[#allocation84_spill] sm:$0xff] %v9732_v28  ;;  %v755_v25 = vadd.f32 %v713_v44, %v595_v32  ;;  %v15422_v32 = vld [vmem:[#allocation83_spill] sm:$0xff] }
 0x302   :  { %1498 = vrot.lane.b32.xlu1 %v1461_v1, %s8307_s9  ;;  %v7893_v1 = vpop.eup %7892 }
 0x303   :  { %1512 = vrot.lane.b32.xlu0 %v1468_v31, %s8307_s9  ;;  %v9755_v31 = vmul.f32 %v7891_v41, %v8959_v48  ;;  %v7895_v50 = vpop.eup %7894  ;;  %v9764_v23 = vpop.permute.xlu1 %540  ;;  %v9768_v44 = vmul.f32 %v7893_v1, %v8963_v7 }
 0x304   :  { %v715_v3 = vpop.permute.xlu0 %714  ;;  %15420 = vst [vmem:[#allocation118_spill] sm:$0xff] %v9764_v23  ;;  %v7897_v6 = vpop.eup %7896  ;;  %v9771_v41 = vmul.f32 %v7895_v50, %v15364_v62  ;;  %v15426_v50 = vld [vmem:[#allocation98_spill] sm:$0xff]  ;;  %v15436_v23 = vld [vmem:[#allocation69_spill] sm:$0xff] }
 0x305   :  { %v1238_v58 = vmul.f32 %v15422_v32, %v9755_v31 }
 0x306   :  { %1514 = vrot.lane.b32.xlu1 %v1469_v35, %s8307_s9  ;;  %v9760_v35 = vld [vmem:[%s15006_s4 + $0x68] sm:$0xff]  ;;  %15421 = vst [vmem:[#allocation119_spill] sm:$0xff] %v9771_v41 }
 0x307   :  { %790 = vrot.lane.b32.xlu0 %v754_v45, %s8303_s21  ;;  %15419 = vst [vmem:[#allocation117_spill] sm:$0xff] %v9760_v35  ;;  %v603_v14 = vmul.f32 %v9760_v35, %v587_v43  ;;  %v717_v7 = vpop.permute.xlu1 %716 }
 0x308   :  { %v731_v43 = vpop.permute.xlu0 %730 }
 0x309   :  { %v763_v45 = vadd.f32 %v729_v56, %v603_v14  ;;  %v15425_v14 = vld [vmem:[#allocation95_spill] sm:$0xff] }
 0x30a   :  { %792 = vrot.lane.b32.xlu1 %v755_v25, %s8303_s21  ;;  %v9778_v25 = vmul.f32 %v7897_v6, %v15361_v24  ;;  %v1246_v56 = vmul.f32 %v15425_v14, %v9771_v41  ;;  %v1462_v6 = vmul.f32 %v9414_v20, %v9755_v31  ;;  %v1470_v14 = vmul.f32 %v9471_v22, %v9771_v41  ;;  %v9804_v20 = vld [vmem:[%s15006_s4 + $0x30] sm:$0xff] }
 0x30b   :  { %806 = vrot.lane.b32.xlu0 %v762_v42, %s8303_s21  ;;  %v15424_v42 = vld [vmem:[#allocation87_spill] sm:$0xff] }
 0x30c   :  { %15423 = vst [vmem:[#allocation83_spill] sm:$0xff] %v9778_v25  ;;  %v1239_v1 = vmul.f32 %v15424_v42, %v9768_v44  ;;  %v9788_v32 = vpop.permute.xlu0 %1885  ;;  %v733_v42 = vpop.permute.xlu1 %732  ;;  %15427 = vst [vmem:[#allocation87_spill] sm:$0xff] %v9804_v20 }
 0x30e   :  { %808 = vrot.lane.b32.xlu1 %v763_v45, %s8303_s21  ;;  %v1247_v45 = vmul.f32 %v15426_v50, %v9778_v25 }
 0x30f   :  { %1276 = vrot.lane.b32.xlu0 %v1238_v58, %s8307_s9  ;;  %v580_v58 = vsub.f32 0.0, %v9417_v12  ;;  %v1337_v12 = vsub.f32 0.0, %v9538_v11 }
 0x310   :  { %v9813_v62 = vpop.permute.xlu1 %1887 }
 0x311   :  { %v596_v50 = vmul.f32 %v9804_v20, %v580_v58  ;;  %v15430_v58 = vld [vmem:[#allocation38_spill] sm:$0xff] }
 0x312   :  { %1278 = vrot.lane.b32.xlu1 %v1239_v1, %s8307_s9  ;;  %v1463_v1 = vmul.f32 %v9444_v17, %v9768_v44  ;;  %v15428_v17 = vld [vmem:[#allocation54_spill] sm:$0xff]  ;;  %v589_v35 = vsub.f32 0.0, %v15430_v58  ;;  %v1176_v58 = vmul.f32 %v15436_v23, %v9511_v0 }
 0x313   :  { %1292 = vrot.lane.b32.xlu0 %v1246_v56, %s8307_s9  ;;  %v581_v56 = vsub.f32 0.0, %v9407_v9  ;;  %v1471_v22 = vmul.f32 %v15428_v17, %v9778_v25  ;;  %v756_v24 = vadd.f32 %v715_v3, %v596_v50  ;;  %v15440_v25 = vld [vmem:[#allocation51_spill] sm:$0xff] }
 0x316   :  { %1294 = vrot.lane.b32.xlu1 %v1247_v45, %s8307_s9  ;;  %v588_v45 = vsub.f32 0.0, %v9429_v5  ;;  %v1177_v5 = vmul.f32 %v15437_v47, %v9538_v11 }
 0x317   :  { %1500 = vrot.lane.b32.xlu0 %v1462_v6, %s8307_s9  ;;  %v9808_v6 = vpop.permute.xlu0 %1889 }
 0x31a   :  { %1502 = vrot.lane.b32.xlu1 %v1463_v1, %s8307_s9  ;;  %v9818_v1 = vld [vmem:[%s15006_s4 + $0x38] sm:$0xff] }
 0x31b   :  { %1516 = vrot.lane.b32.xlu0 %v1470_v14, %s8307_s9  ;;  %15429 = vst [vmem:[#allocation95_spill] sm:$0xff] %v9818_v1  ;;  %v597_v48 = vmul.f32 %v9818_v1, %v581_v56  ;;  %v9826_v14 = vld [vmem:[%s15006_s4 + $0x70] sm:$0xff]  ;;  %v9830_v8 = vpop.permute.xlu0 %1893  ;;  %v9835_v56 = vld [vmem:[%s15006_s4 + $0x78] sm:$0xff]  ;;  %v9839_v1 = vpop.permute.xlu1 %1891 }
 0x31c   :  { %15431 = vst [vmem:[#allocation98_spill] sm:$0xff] %v9826_v14  ;;  %v604_v3 = vmul.f32 %v9826_v14, %v588_v45  ;;  %15432 = vst [vmem:[#allocation54_spill] sm:$0xff] %v9835_v56 }
 0x31d   :  { %v757_v50 = vadd.f32 %v717_v7, %v597_v48 }
 0x31e   :  { %1518 = vrot.lane.b32.xlu1 %v1471_v22, %s8307_s9  ;;  %v764_v17 = vadd.f32 %v731_v43, %v604_v3  ;;  %v605_v22 = vmul.f32 %v9835_v56, %v589_v35  ;;  %v15434_v56 = vld [vmem:[#allocation59_spill] sm:$0xff] }
 0x31f   :  { %794 = vrot.lane.b32.xlu0 %v756_v24, %s8303_s21  ;;  %v9843_v48 = vpop.permute.xlu0 %1897  ;;  %v9845_v7 = vpop.permute.xlu1 %1895 }
 0x320   :  { %v765_v45 = vadd.f32 %v733_v42, %v605_v22 }
 0x322   :  { %796 = vrot.lane.b32.xlu1 %v757_v50, %s8303_s21  ;;  %v15433_v50 = vld [vmem:[#allocation52_spill] sm:$0xff] }
 0x323   :  { %810 = vrot.lane.b32.xlu0 %v764_v17, %s8303_s21  ;;  %v9847_v24 = vpop.permute.xlu0 %1901  ;;  %v9849_v43 = vpop.permute.xlu1 %1899  ;;  %v1168_v20 = vmul.f32 %v15434_v56, %v15433_v50  ;;  %v15435_v17 = vld [vmem:[#allocation58_spill] sm:$0xff]  ;;  %v1328_v57 = vsub.f32 0.0, %v15433_v50  ;;  %v1329_v56 = vsub.f32 0.0, %v9526_v26  ;;  %v1336_v50 = vsub.f32 0.0, %v9511_v0 }
 0x324   :  { %v1169_v42 = vmul.f32 %v15435_v17, %v9526_v26  ;;  %v1921_v26 = vsel %vm284_vm2, %v15440_v25, 0.0 }
 0x326   :  { %812 = vrot.lane.b32.xlu1 %v765_v45, %s8303_s21 }
 0x327   :  { %v9851_v14 = vpop.permute.xlu1 %1903 }
 0x32e   :  { %v1265_v3 = vpop.permute.xlu0 %1264 }
 0x32f   :  { %v9857_v45 = vadd.f32 %v1265_v3, %v1168_v20  ;;  %v15438_v3 = vld [vmem:[#allocation97_spill] sm:$0xff] }
 0x332   :  { %v1281_v35 = vpop.permute.xlu0 %1280 }
 0x333   :  { %v9869_v4 = vadd.f32 %v1281_v35, %v1176_v58 }
 0x336   :  { %v1489_v9 = vpop.permute.xlu0 %1488 }
 0x339   :  { %v1267_v22 = vpop.permute.xlu1 %1266 }
 0x33a   :  { %v9859_v18 = vadd.f32 %v1267_v22, %v1169_v42  ;;  %v1392_v42 = vmul.f32 %v15438_v3, %v1328_v57  ;;  %v15439_v22 = vld [vmem:[#allocation100_spill] sm:$0xff]  ;;  %v15441_v57 = vld [vmem:[#allocation105_spill] sm:$0xff] }
 0x33b   :  { %v1393_v28 = vmul.f32 %v15439_v22, %v1329_v56  ;;  %v1400_v35 = vmul.f32 %v15441_v57, %v1336_v50  ;;  %v15443_v22 = vld [vmem:[#allocation55_spill] sm:$0xff] }
 0x33c   :  { %v9881_v41 = vadd.f32 %v1489_v9, %v1392_v42  ;;  %v1927_v11 = vsel %vm284_vm2, %v15443_v22, 0.0  ;;  %v9894_v9 = vld [vmem:[%s15008_s3] sm:$0xff] }
 0x33d   :  { %v1283_v17 = vpop.permute.xlu1 %1282 }
 0x33e   :  { %v9871_v20 = vadd.f32 %v1283_v17, %v1177_v5  ;;  %v1505_v5 = vpop.permute.xlu0 %1504  ;;  %v15442_v17 = vld [vmem:[#allocation108_spill] sm:$0xff] }
 0x33f   :  { %v1401_v3 = vmul.f32 %v15442_v17, %v1337_v12  ;;  %v9898_v25 = vadd.f32 %v1505_v5, %v1400_v35  ;;  %v15444_v5 = vld [vmem:[#allocation43_spill] sm:$0xff]  ;;  %v15445_v35 = vld [vmem:[#allocation32_spill] sm:$0xff] }
 0x340   :  { %v1930_v57 = vsel %vm284_vm2, %v15444_v5, 0.0  ;;  %v1924_v17 = vsel %vm284_vm2, %v15445_v35, 0.0  ;;  %v9929_v35 = vld [vmem:[%s15008_s3 + $0x48] sm:$0xff] }
 0x341   :  { %v1491_v47 = vpop.permute.xlu1 %1490  ;;  %15448 = vst [vmem:[#allocation52_spill] sm:$0xff] %v9929_v35  ;;  %v407_v50 = vmul.f32 %v9929_v35, %v9306_v49 }
 0x342   :  { %v9883_v58 = vadd.f32 %v1491_v47, %v1393_v28  ;;  %1922 = vadd.xlane.f32.xlu0 %v1921_v26  ;;  %v398_v28 = vmul.f32 %v9894_v9, %v9303_v53  ;;  %v9908_v47 = vld [vmem:[%s15008_s3 + $0x8] sm:$0xff] }
 0x343   :  { %v399_v26 = vmul.f32 %v9908_v47, %v9299_v36  ;;  %v15446_v36 = vld [vmem:[#allocation53_spill] sm:$0xff] }
 0x344   :  { %v558_v12 = vadd.f32 %v9551_v2, %v398_v28  ;;  %v9919_v2 = vld [vmem:[%s15008_s3 + $0x40] sm:$0xff]  ;;  %v15447_v28 = vld [vmem:[#allocation56_spill] sm:$0xff] }
 0x345   :  { %v1507_v56 = vpop.permute.xlu1 %1506  ;;  %v559_v22 = vadd.f32 %v15446_v36, %v399_v26  ;;  %v15450_v26 = vld [vmem:[#allocation44_spill] sm:$0xff]  ;;  %v15451_v36 = vld [vmem:[#allocation57_spill] sm:$0xff] }
 0x346   :  { %v9900_v42 = vadd.f32 %v1507_v56, %v1401_v3  ;;  %1928 = vadd.xlane.f32.xlu0 %v1927_v11  ;;  %v406_v3 = vmul.f32 %v9919_v2, %v9311_v13 }
 0x348   :  { %v566_v5 = vadd.f32 %v15447_v28, %v406_v3  ;;  %v567_v28 = vadd.f32 %v15451_v36, %v407_v50  ;;  %v1945_v36 = vsel %vm284_vm2, %v9808_v6, 0.0  ;;  %v15455_v6 = vld [vmem:[#allocation74_spill] sm:$0xff] }
 0x349   :  { %v783_v53 = vpop.permute.xlu0 %782 }
 0x34a   :  { %v831_v56 = vsel %vm830_vm3, %v558_v12, %v783_v53  ;;  %1931 = vadd.xlane.f32.xlu0 %v1930_v57  ;;  %1925 = vadd.xlane.f32.xlu1 %v1924_v17  ;;  %v15449_v53 = vld [vmem:[#allocation33_spill] sm:$0xff]  ;;  %v1936_v17 = vsel %vm284_vm2, %v15450_v26, 0.0 }
 0x34b   :  { %v847_v11 = vmul.f32 0.25, %v831_v56  ;;  %v1933_v57 = vsel %vm284_vm2, %v15449_v53, 0.0 }
 0x34c   :  { %v785_v0 = vpop.permute.xlu1 %784 }
 0x34d   :  { %v7334_v23 = vpack.c.bf16 %v847_v11, %v847_v11  ;;  %v832_v13 = vsel %vm830_vm3, %v559_v22, %v785_v0  ;;  %v799_v12 = vpop.permute.xlu0 %798 }
 0x34e   :  { %v848_v3 = vmul.f32 0.25, %v832_v13  ;;  %v839_v56 = vsel %vm830_vm3, %v566_v5, %v799_v12  ;;  %1934 = vadd.xlane.f32.xlu0 %v1933_v57  ;;  %1937 = vadd.xlane.f32.xlu1 %v1936_v17  ;;  %v1939_v13 = vsel %vm284_vm2, %v9788_v32, 0.0  ;;  %v1942_v5 = vsel %vm284_vm2, %v9813_v62, 0.0  ;;  %v15453_v32 = vld [vmem:[#allocation63_spill] sm:$0xff] }
 0x34f   :  { %928 = vst.msk [vmem:[%s15011_s5] sm:$0xf] %vm927_vm1, %v7334_v23  ;;  %v855_v49 = vmul.f32 0.25, %v839_v56  ;;  %v15452_v23 = vld [vmem:[#allocation60_spill] sm:$0xff]  ;;  %v1171_v57 = vmul.f32 %v15453_v32, %v9600_v10 }
 0x350   :  { %v7335_v0 = vpack.c.bf16 %v848_v3, %v848_v3  ;;  %v801_v22 = vpop.permute.xlu1 %800  ;;  %v1170_v12 = vmul.f32 %v15452_v23, %v9589_v15  ;;  %v1954_v23 = vsel %vm284_vm2, %v9845_v7, 0.0  ;;  %v1957_v7 = vsel %vm284_vm2, %v9843_v48, 0.0 }
 0x351   :  { %v7342_v11 = vpack.c.bf16 %v855_v49, %v855_v49  ;;  %v840_v53 = vsel %vm830_vm3, %v567_v28, %v801_v22  ;;  %v1269_v35 = vpop.permute.xlu0 %1268  ;;  %v1948_v28 = vsel %vm284_vm2, %v9839_v1, 0.0  ;;  %v1330_v49 = vsub.f32 0.0, %v9589_v15 }
 0x352   :  { %929 = vst.msk [vmem:[%s15011_s5 + $0x4] sm:$0xf] %vm927_vm1, %v7335_v0  ;;  %v856_v50 = vmul.f32 0.25, %v840_v53  ;;  %1940 = vadd.xlane.f32.xlu0 %v1939_v13  ;;  %1943 = vadd.xlane.f32.xlu1 %v1942_v5  ;;  %v9961_v17 = vadd.f32 %v1269_v35, %v1170_v12  ;;  %v15454_v0 = vld [vmem:[#allocation71_spill] sm:$0xff]  ;;  %v1331_v1 = vsub.f32 0.0, %v9600_v10  ;;  %v1951_v15 = vsel %vm284_vm2, %v9830_v8, 0.0 }
 0x353   :  { %936 = vst.msk [vmem:[%s15011_s5 + $0x20] sm:$0xf] %vm927_vm1, %v7342_v11  ;;  %v1178_v22 = vmul.f32 %v15454_v0, %v9606_v40  ;;  %v1179_v11 = vmul.f32 %v15455_v6, %v9616_v37  ;;  %v15456_v12 = vld [vmem:[#allocation99_spill] sm:$0xff]  ;;  %v15457_v10 = vld [vmem:[#allocation102_spill] sm:$0xff] }
 0x354   :  { %v7343_v62 = vpack.c.bf16 %v856_v50, %v856_v50  ;;  %v1271_v26 = vpop.permute.xlu1 %1270  ;;  %v1394_v32 = vmul.f32 %v15456_v12, %v1330_v49  ;;  %v1960_v49 = vsel %vm284_vm2, %v9849_v43, 0.0  ;;  %v15458_v6 = vld [vmem:[#allocation107_spill] sm:$0xff]  ;;  %v10018_v43 = vld [vmem:[%s15008_s3 + $0x18] sm:$0xff] }
 0x355   :  { %v9963_v3 = vadd.f32 %v1271_v26, %v1171_v57  ;;  %v1285_v56 = vpop.permute.xlu0 %1284  ;;  %v1338_v26 = vsub.f32 0.0, %v9606_v40 }
 0x356   :  { %937 = vst.msk [vmem:[%s15011_s5 + $0x24] sm:$0xf] %vm927_vm1, %v7343_v62  ;;  %1946 = vadd.xlane.f32.xlu0 %v1945_v36  ;;  %1949 = vadd.xlane.f32.xlu1 %v1948_v28  ;;  %v9981_v13 = vadd.f32 %v1285_v56, %v1178_v22  ;;  %v1395_v62 = vmul.f32 %v15457_v10, %v1331_v1  ;;  %v1339_v56 = vsub.f32 0.0, %v9616_v37  ;;  %v10006_v22 = vld [vmem:[%s15008_s3 + $0x10] sm:$0xff]  ;;  %v15459_v1 = vld [vmem:[#allocation110_spill] sm:$0xff] }
 0x357   :  { %v7522_v35 = vpack.i.bf16 %v9963_v3, %v9961_v17  ;;  %v400_v40 = vmul.f32 %v10006_v22, %v9339_v55  ;;  %v10033_v10 = vld [vmem:[%s15008_s3 + $0x50] sm:$0xff] }
 0x358   :  { %v1287_v53 = vpop.permute.xlu1 %1286  ;;  %v1403_v48 = vmul.f32 %v15459_v1, %v1339_v56 }
 0x359   :  { %v9983_v5 = vadd.f32 %v1287_v53, %v1179_v11  ;;  %v1493_v50 = vpop.permute.xlu0 %1492  ;;  %v1402_v11 = vmul.f32 %v15458_v6, %v1338_v26  ;;  %v560_v53 = vadd.f32 %v9603_v38, %v400_v40  ;;  %v1966_v38 = vsel %vm284_vm2, %v9851_v14, 0.0 }
 0x35a   :  { %1952 = vadd.xlane.f32.xlu0 %v1951_v15  ;;  %1955 = vadd.xlane.f32.xlu1 %v1954_v23  ;;  %v9995_v28 = vadd.f32 %v1493_v50, %v1394_v32  ;;  %v401_v50 = vmul.f32 %v10018_v43, %v9332_v34  ;;  %v1963_v32 = vsel %vm284_vm2, %v9847_v24, 0.0  ;;  %v408_v34 = vmul.f32 %v10033_v10, %v9351_v63 }
 0x35b   :  { %v7527_v57 = vpack.i.bf16 %v9983_v5, %v9981_v13 }
 0x35c   :  { %v1495_v36 = vpop.permute.xlu1 %1494  ;;  %v561_v26 = vadd.f32 %v9613_v51, %v401_v50  ;;  %v568_v14 = vadd.f32 %v9619_v21, %v408_v34 }
 0x35d   :  { %v9997_v8 = vadd.f32 %v1495_v36, %v1395_v62  ;;  %v1509_v0 = vpop.permute.xlu0 %1508 }
 0x35e   :  { %1958 = vadd.xlane.f32.xlu0 %v1957_v7  ;;  %1961 = vadd.xlane.f32.xlu1 %v1960_v49  ;;  %v10022_v15 = vadd.f32 %v1509_v0, %v1402_v11  ;;  %v10045_v0 = vld [vmem:[%s15008_s3 + $0x58] sm:$0xff] }
 0x35f   :  { %v7532_v37 = vpack.i.bf16 %v9997_v8, %v9995_v28  ;;  %v409_v63 = vmul.f32 %v10045_v0, %v9345_v60 }
 0x360   :  { %v1511_v55 = vpop.permute.xlu1 %1510 }
 0x361   :  { %v10024_v23 = vadd.f32 %v1511_v55, %v1403_v48  ;;  %v787_v12 = vpop.permute.xlu0 %786  ;;  %v569_v11 = vadd.f32 %v9628_v16, %v409_v63  ;;  %v15460_v16 = vld [vmem:[#allocation62_spill] sm:$0xff] }
 0x362   :  { %v833_v62 = vsel %vm830_vm3, %v560_v53, %v787_v12  ;;  %1964 = vadd.xlane.f32.xlu0 %v1963_v32  ;;  %1967 = vadd.xlane.f32.xlu1 %v1966_v38  ;;  %v1172_v12 = vmul.f32 %v15460_v16, %v9675_v19  ;;  %v15461_v32 = vld [vmem:[#allocation68_spill] sm:$0xff]  ;;  %v1341_v16 = vsub.f32 0.0, %v9700_v27 }
 0x363   :  { %v7537_v24 = vpack.i.bf16 %v10024_v23, %v10022_v15  ;;  %v849_v56 = vmul.f32 0.25, %v833_v62  ;;  %v1173_v38 = vmul.f32 %v15461_v32, %v9688_v30  ;;  %v15472_v15 = vld [vmem:[#allocation66_spill] sm:$0xff] }
 0x364   :  { %v789_v36 = vpop.permute.xlu1 %788 }
 0x365   :  { %v7336_v7 = vpack.c.bf16 %v849_v56, %v849_v56  ;;  %v834_v49 = vsel %vm830_vm3, %v561_v26, %v789_v36  ;;  %v803_v40 = vpop.permute.xlu0 %802  ;;  %v1332_v36 = vsub.f32 0.0, %v9675_v19 }
 0x366   :  { %v850_v51 = vmul.f32 0.25, %v834_v49  ;;  %v841_v6 = vsel %vm830_vm3, %v568_v14, %v803_v40  ;;  %v15463_v40 = vld [vmem:[#allocation76_spill] sm:$0xff] }
 0x367   :  { %930 = vst.msk [vmem:[%s15011_s5 + $0x8] sm:$0xf] %vm927_vm1, %v7336_v7  ;;  %v857_v21 = vmul.f32 0.25, %v841_v6  ;;  %v15462_v7 = vld [vmem:[#allocation73_spill] sm:$0xff]  ;;  %v1333_v6 = vsub.f32 0.0, %v9688_v30  ;;  %v1340_v30 = vsub.f32 0.0, %v9692_v39 }
 0x368   :  { %v7337_v1 = vpack.c.bf16 %v850_v51, %v850_v51  ;;  %v805_v48 = vpop.permute.xlu1 %804  ;;  %v1180_v49 = vmul.f32 %v15462_v7, %v9692_v39  ;;  %v1181_v51 = vmul.f32 %v15463_v40, %v9700_v27  ;;  %v15466_v39 = vld [vmem:[#allocation109_spill] sm:$0xff]  ;;  %v15467_v27 = vld [vmem:[#allocation112_spill] sm:$0xff] }
 0x369   :  { %v7344_v53 = vpack.c.bf16 %v857_v21, %v857_v21  ;;  %v842_v60 = vsel %vm830_vm3, %v569_v11, %v805_v48  ;;  %v1273_v50 = vpop.permute.xlu0 %1272  ;;  %v10126_v40 = vld [vmem:[%s15008_s3 + $0x28] sm:$0xff] }
 0x36a   :  { %931 = vst.msk [vmem:[%s15011_s5 + $0xc] sm:$0xf] %vm927_vm1, %v7337_v1  ;;  %v858_v55 = vmul.f32 0.25, %v842_v60  ;;  %v10069_v26 = vadd.f32 %v1273_v50, %v1172_v12  ;;  %v15465_v50 = vld [vmem:[#allocation104_spill] sm:$0xff] }
 0x36b   :  { %938 = vst.msk [vmem:[%s15011_s5 + $0x28] sm:$0xf] %vm927_vm1, %v7344_v53  ;;  %v15464_v53 = vld [vmem:[#allocation101_spill] sm:$0xff] }
 0x36c   :  { %v7345_v34 = vpack.c.bf16 %v858_v55, %v858_v55  ;;  %v1275_v62 = vpop.permute.xlu1 %1274  ;;  %v1396_v60 = vmul.f32 %v15464_v53, %v1332_v36  ;;  %v1397_v55 = vmul.f32 %v15465_v50, %v1333_v6  ;;  %v15468_v36 = vld [vmem:[#allocation79_spill] sm:$0xff] }
 0x36d   :  { %v10071_v56 = vadd.f32 %v1275_v62, %v1173_v38  ;;  %v1289_v14 = vpop.permute.xlu0 %1288  ;;  %v10106_v62 = vld [vmem:[%s15008_s3 + $0x20] sm:$0xff] }
 0x36e   :  { %939 = vst.msk [vmem:[%s15011_s5 + $0x2c] sm:$0xf] %vm927_vm1, %v7345_v34  ;;  %v10085_v21 = vadd.f32 %v1289_v14, %v1180_v49  ;;  %v402_v17 = vmul.f32 %v10106_v62, %v9375_v29  ;;  %v1405_v14 = vmul.f32 %v15467_v27, %v1341_v16  ;;  %v15469_v49 = vpack.i.bf16 %v9859_v18, %v9857_v45  ;;  %v10137_v6 = vld [vmem:[%s15008_s3 + $0x60] sm:$0xff] }
 0x36f   :  { %v7542_v63 = vpack.i.bf16 %v10071_v56, %v10069_v26  ;;  %v410_v18 = vmul.f32 %v10137_v6, %v9387_v54 }
 0x370   :  { %v1291_v11 = vpop.permute.xlu1 %1290  ;;  %v562_v7 = vadd.f32 %v15468_v36, %v402_v17 }
 0x371   :  { %v10087_v1 = vadd.f32 %v1291_v11, %v1181_v51  ;;  %v1497_v48 = vpop.permute.xlu0 %1496  ;;  %v403_v51 = vmul.f32 %v10126_v40, %v9369_v46  ;;  %v570_v53 = vadd.f32 %v9672_v61, %v410_v18  ;;  %v1335_v18 = vsub.f32 0.0, %v9768_v44 }
 0x372   :  { %v10099_v32 = vadd.f32 %v1497_v48, %v1396_v60  ;;  %v15470_v60 = vpack.i.bf16 %v9871_v20, %v9869_v4  ;;  %v15471_v20 = vpack.i.bf16 %v9883_v58, %v9881_v41  ;;  %v1174_v41 = vmul.f32 %v15472_v15, %v9755_v31  ;;  %v15473_v58 = vld [vmem:[#allocation70_spill] sm:$0xff] }
 0x373   :  { %v7547_v19 = vpack.i.bf16 %v10087_v1, %v10085_v21  ;;  %7523 = vrot.lane.b32.xlu1 %v7522_v35, %s8304_s17  ;;  %v1404_v35 = vmul.f32 %v15466_v39, %v1340_v30  ;;  %v563_v11 = vadd.f32 %v9670_v52, %v403_v51  ;;  %v10157_v52 = vld [vmem:[%s15008_s3 + $0x68] sm:$0xff]  ;;  %v1175_v23 = vmul.f32 %v15473_v58, %v9768_v44  ;;  %v15484_v1 = vld [vmem:[#allocation114_spill] sm:$0xff] }
 0x374   :  { %v1499_v12 = vpop.permute.xlu1 %1498  ;;  %v411_v50 = vmul.f32 %v10157_v52, %v9381_v59  ;;  %v15474_v39 = vpack.i.bf16 %v9900_v42, %v9898_v25  ;;  %v15477_v25 = vld [vmem:[#allocation83_spill] sm:$0xff]  ;;  %v15478_v42 = vld [vmem:[#allocation78_spill] sm:$0xff] }
 0x375   :  { %v10101_v38 = vadd.f32 %v1499_v12, %v1397_v55  ;;  %v1513_v34 = vpop.permute.xlu0 %1512  ;;  %v1343_v44 = vsub.f32 0.0, %v15477_v25 }
 0x376   :  { %v10130_v13 = vadd.f32 %v1513_v34, %v1404_v35  ;;  %v571_v30 = vadd.f32 %v9685_v33, %v411_v50  ;;  %v15480_v50 = vld [vmem:[#allocation106_spill] sm:$0xff] }
 0x377   :  { %v7552_v3 = vpack.i.bf16 %v10101_v38, %v10099_v32  ;;  %7528 = vrot.lane.b32.xlu1 %v7527_v57, %s8304_s17 }
 0x378   :  { %7503 = vrot.lane.b32.xlu0 %v15469_v49, %s8304_s17  ;;  %v1515_v29 = vpop.permute.xlu1 %1514  ;;  %v15475_v49 = vld [vmem:[#allocation119_spill] sm:$0xff] }
 0x379   :  { %v10132_v5 = vadd.f32 %v1515_v29, %v1405_v14  ;;  %v791_v57 = vpop.permute.xlu0 %790  ;;  %v15476_v29 = vld [vmem:[#allocation75_spill] sm:$0xff] }
 0x37a   :  { %v835_v45 = vsel %vm830_vm3, %v562_v7, %v791_v57  ;;  %v1182_v51 = vmul.f32 %v15476_v29, %v15475_v49  ;;  %v1183_v57 = vmul.f32 %v15478_v42, %v15477_v25 }
 0x37b   :  { %v7557_v46 = vpack.i.bf16 %v10132_v5, %v10130_v13  ;;  %v851_v48 = vmul.f32 0.25, %v835_v45  ;;  %7533 = vrot.lane.b32.xlu1 %v7532_v37, %s8305_s20 }
 0x37c   :  { %7508 = vrot.lane.b32.xlu0 %v15470_v60, %s8304_s17  ;;  %v793_v54 = vpop.permute.xlu1 %792 }
 0x37d   :  { %v7338_v55 = vpack.c.bf16 %v851_v48, %v851_v48  ;;  %v836_v28 = vsel %vm830_vm3, %v563_v11, %v793_v54  ;;  %v807_v8 = vpop.permute.xlu0 %806 }
 0x37e   :  { %v852_v37 = vmul.f32 0.25, %v836_v28  ;;  %v843_v61 = vsel %vm830_vm3, %v570_v53, %v807_v8  ;;  %v15479_v53 = vld [vmem:[#allocation103_spill] sm:$0xff]  ;;  %v1342_v28 = vsub.f32 0.0, %v15475_v49  ;;  %v15489_v49 = vld [vmem:[#allocation38_spill] sm:$0xff] }
 0x37f   :  { %932 = vst.msk [vmem:[%s15011_s5 + $0x10] sm:$0xf] %vm927_vm1, %v7338_v55  ;;  %v859_v4 = vmul.f32 0.25, %v843_v61  ;;  %7538 = vrot.lane.b32.xlu1 %v7537_v24, %s8305_s20  ;;  %v1399_v55 = vmul.f32 %v15480_v50, %v1335_v18  ;;  %v15481_v61 = vld [vmem:[#allocation36_spill] sm:$0xff]  ;;  %v15494_v50 = vld [vmem:[#allocation115_spill] sm:$0xff] }
 0x380   :  { %v7339_v59 = vpack.c.bf16 %v852_v37, %v852_v37  ;;  %7513 = vrot.lane.b32.xlu0 %v15471_v20, %s8305_s20  ;;  %v809_v16 = vpop.permute.xlu1 %808  ;;  %v10223_v37 = vld [vmem:[%s15008_s3 + $0x30] sm:$0xff] }
 0x381   :  { %v7346_v12 = vpack.c.bf16 %v859_v4, %v859_v4  ;;  %v844_v33 = vsel %vm830_vm3, %v571_v30, %v809_v16  ;;  %v1277_v34 = vpop.permute.xlu0 %1276  ;;  %v404_v30 = vmul.f32 %v10223_v37, %v15481_v61  ;;  %v15483_v16 = vld [vmem:[#allocation113_spill] sm:$0xff]  ;;  %v15502_v61 = vld [vmem:[#allocation90_spill] sm:$0xff] }
 0x382   :  { %933 = vst.msk [vmem:[%s15011_s5 + $0x14] sm:$0xf] %vm927_vm1, %v7339_v59  ;;  %v860_v17 = vmul.f32 0.25, %v844_v33  ;;  %v1318_v27 = vadd.f32 %v1277_v34, %v1174_v41  ;;  %v15482_v59 = vld [vmem:[#allocation111_spill] sm:$0xff]  ;;  %v1407_v21 = vmul.f32 %v15483_v16, %v1343_v44  ;;  %v10238_v33 = vld [vmem:[%s15008_s3 + $0x38] sm:$0xff]  ;;  %v15497_v44 = vld [vmem:[#allocation96_spill] sm:$0xff] }
 0x383   :  { %940 = vst.msk [vmem:[%s15011_s5 + $0x30] sm:$0xf] %vm927_vm1, %v7346_v12  ;;  %2035 = vrot.lane.b32.xlu1 %v9908_v47, %s8308_s0  ;;  %v1334_v47 = vsub.f32 0.0, %v9755_v31  ;;  %v1406_v20 = vmul.f32 %v15482_v59, %v1342_v28  ;;  %v15485_v34 = vld [vmem:[#allocation31_spill] sm:$0xff]  ;;  %v15496_v28 = vld [vmem:[#allocation81_spill] sm:$0xff]  ;;  %v15506_v16 = vld [vmem:[#allocation98_spill] sm:$0xff] }
 0x384   :  { %v7347_v24 = vpack.c.bf16 %v860_v17, %v860_v17  ;;  %7518 = vrot.lane.b32.xlu0 %v15474_v39, %s8305_s20  ;;  %v1279_v35 = vpop.permute.xlu1 %1278  ;;  %v405_v17 = vmul.f32 %v10238_v33, %v15485_v34 }
 0x385   :  { %v1319_v14 = vadd.f32 %v1279_v35, %v1175_v23  ;;  %v1293_v36 = vpop.permute.xlu0 %1292  ;;  %v1398_v60 = vmul.f32 %v15479_v53, %v1334_v47  ;;  %v10245_v23 = vld [vmem:[%s15008_s3 + $0x70] sm:$0xff] }
 0x386   :  { %941 = vst.msk [vmem:[%s15011_s5 + $0x34] sm:$0xf] %vm927_vm1, %v7347_v24  ;;  %v1326_v11 = vadd.f32 %v1293_v36, %v1182_v51  ;;  %v15486_v24 = vld [vmem:[#allocation50_spill] sm:$0xff] }
 0x387   :  { %v7562_v7 = vpack.i.bf16 %v1319_v14, %v1318_v27  ;;  %2037 = vrot.lane.b32.xlu1 %v10006_v22, %s8308_s0  ;;  %v412_v32 = vmul.f32 %v10245_v23, %v15486_v24  ;;  %v15488_v14 = vld [vmem:[#allocation84_spill] sm:$0xff] }
 0x388   :  { %7543 = vrot.lane.b32.xlu0 %v7542_v63, %s8304_s17  ;;  %v1295_v45 = vpop.permute.xlu1 %1294 }
 0x389   :  { %v1327_v31 = vadd.f32 %v1295_v45, %v1183_v57  ;;  %v1501_v48 = vpop.permute.xlu0 %1500  ;;  %v572_v36 = vadd.f32 %v15488_v14, %v412_v32  ;;  %v15490_v45 = vld [vmem:[#allocation118_spill] sm:$0xff] }
 0x38a   :  { %v1542_v56 = vadd.f32 %v1501_v48, %v1398_v60 }
 0x38b   :  { %v7567_v54 = vpack.i.bf16 %v1327_v31, %v1326_v11  ;;  %7563 = vrot.lane.b32.xlu1 %v7562_v7, %s8304_s17  ;;  %v10260_v7 = vld [vmem:[%s15008_s3 + $0x78] sm:$0xff] }
 0x38c   :  { %7548 = vrot.lane.b32.xlu0 %v7547_v19, %s8304_s17  ;;  %v1503_v26 = vpop.permute.xlu1 %1502  ;;  %v564_v19 = vadd.f32 %v15484_v1, %v404_v30  ;;  %v413_v29 = vmul.f32 %v10260_v7, %v15489_v49  ;;  %v15503_v30 = vld [vmem:[#allocation94_spill] sm:$0xff] }
 0x38d   :  { %v1543_v63 = vadd.f32 %v1503_v26, %v1399_v55  ;;  %v1517_v8 = vpop.permute.xlu0 %1516  ;;  %v15495_v55 = vld [vmem:[#allocation82_spill] sm:$0xff]  ;;  %v15498_v26 = vld [vmem:[#allocation87_spill] sm:$0xff] }
 0x38e   :  { %v1550_v15 = vadd.f32 %v1517_v8, %v1406_v20  ;;  %v573_v11 = vadd.f32 %v15490_v45, %v413_v29  ;;  %v15501_v8 = vld [vmem:[#allocation92_spill] sm:$0xff]  ;;  %v15505_v20 = vld [vmem:[#allocation117_spill] sm:$0xff]  ;;  %v15507_v1 = vld [vmem:[#allocation54_spill] sm:$0xff] }
 0x38f   :  { %v7572_v4 = vpack.i.bf16 %v1543_v63, %v1542_v56  ;;  %7568 = vrot.lane.b32.xlu1 %v7567_v54, %s8304_s17  ;;  %v15493_v54 = vld [vmem:[#allocation85_spill] sm:$0xff]  ;;  %v15499_v56 = vld [vmem:[#allocation95_spill] sm:$0xff]  ;;  %v15500_v63 = vld [vmem:[#allocation80_spill] sm:$0xff] }
 0x390   :  { %7553 = vrot.lane.b32.xlu0 %v7552_v3, %s8305_s20  ;;  %v1519_v12 = vpop.permute.xlu1 %1518  ;;  %v15487_v3 = vld [vmem:[#allocation93_spill] sm:$0xff] }
 0x391   :  { %v1551_v41 = vadd.f32 %v1519_v12, %v1407_v21  ;;  %v795_v58 = vpop.permute.xlu0 %794  ;;  %v565_v39 = vadd.f32 %v15487_v3, %v405_v17 }
 0x392   :  { %v837_v38 = vsel %vm830_vm3, %v564_v19, %v795_v58 }
 0x393   :  { %v7577_v35 = vpack.i.bf16 %v1551_v41, %v1550_v15  ;;  %v853_v27 = vmul.f32 0.25, %v837_v38  ;;  %7573 = vrot.lane.b32.xlu1 %v7572_v4, %s8305_s20  ;;  %v15504_v4 = vld [vmem:[#allocation116_spill] sm:$0xff] }
 0x394   :  { %7558 = vrot.lane.b32.xlu0 %v7557_v46, %s8305_s20  ;;  %v797_v47 = vpop.permute.xlu1 %796 }
 0x395   :  { %v7340_v51 = vpack.c.bf16 %v853_v27, %v853_v27  ;;  %v838_v25 = vsel %vm830_vm3, %v565_v39, %v797_v47  ;;  %v811_v42 = vpop.permute.xlu0 %810 }
 0x396   :  { %v854_v57 = vmul.f32 0.25, %v838_v25  ;;  %v845_v18 = vsel %vm830_vm3, %v572_v36, %v811_v42 }
 0x397   :  { %934 = vst.msk [vmem:[%s15011_s5 + $0x18] sm:$0xf] %vm927_vm1, %v7340_v51  ;;  %v861_v13 = vmul.f32 0.25, %v845_v18  ;;  %7578 = vrot.lane.b32.xlu1 %v7577_v35, %s8305_s20 }
 0x398   :  { %v7341_v5 = vpack.c.bf16 %v854_v57, %v854_v57  ;;  %v813_v46 = vpop.permute.xlu1 %812  ;;  %2033 = vrot.lane.b32.xlu0 %v9894_v9, %s8308_s0  ;;  %v15491_v9 = vld [vmem:[#allocation52_spill] sm:$0xff] }
 0x399   :  { %v7348_v31 = vpack.c.bf16 %v861_v13, %v861_v13  ;;  %v846_v48 = vsel %vm830_vm3, %v573_v11, %v813_v46 }
 0x39a   :  { %935 = vst.msk [vmem:[%s15011_s5 + $0x1c] sm:$0xf] %vm927_vm1, %v7341_v5  ;;  %v862_v53 = vmul.f32 0.25, %v846_v48 }
 0x39b   :  { %942 = vst.msk [vmem:[%s15011_s5 + $0x38] sm:$0xf] %vm927_vm1, %v7348_v31  ;;  %2039 = vrot.lane.b32.xlu1 %v10018_v43, %s8308_s0 }
 0x39c   :  { %v7349_v60 = vpack.c.bf16 %v862_v53, %v862_v53  ;;  %2041 = vrot.lane.b32.xlu0 %v10106_v62, %s8308_s0 }
 0x39e   :  { %943 = vst.msk [vmem:[%s15011_s5 + $0x3c] sm:$0xf] %vm927_vm1, %v7349_v60 }
 0x39f   :  { %2043 = vrot.lane.b32.xlu1 %v10126_v40, %s8308_s0 }
 0x3a0   :  { %2045 = vrot.lane.b32.xlu0 %v10223_v37, %s8308_s0 }
 0x3a3   :  { %2047 = vrot.lane.b32.xlu1 %v10238_v33, %s8308_s0 }
 0x3a4   :  { %2049 = vrot.lane.b32.xlu0 %v9919_v2, %s8308_s0  ;;  %v15492_v2 = vld [vmem:[#allocation77_spill] sm:$0xff] }
 0x3a7   :  { %2051 = vrot.lane.b32.xlu1 %v15491_v9, %s8308_s0 }
 0x3a8   :  { %2053 = vrot.lane.b32.xlu0 %v10033_v10, %s8308_s0 }
 0x3ab   :  { %2055 = vrot.lane.b32.xlu1 %v10045_v0, %s8308_s0 }
 0x3ac   :  { %2057 = vrot.lane.b32.xlu0 %v10137_v6, %s8308_s0 }
 0x3af   :  { %2059 = vrot.lane.b32.xlu1 %v10157_v52, %s8308_s0 }
 0x3b0   :  { %2061 = vrot.lane.b32.xlu0 %v10245_v23, %s8308_s0 }
 0x3b3   :  { %2063 = vrot.lane.b32.xlu1 %v10260_v7, %s8308_s0 }
 0x3b4   :  { %2097 = vrot.lane.b32.xlu0 %v15492_v2, %s8309_s18 }
 0x3b7   :  { %2099 = vrot.lane.b32.xlu1 %v15493_v54, %s8309_s18 }
 0x3b8   :  { %2101 = vrot.lane.b32.xlu0 %v15494_v50, %s8309_s18 }
 0x3bb   :  { %2103 = vrot.lane.b32.xlu1 %v15495_v55, %s8309_s18 }
 0x3bc   :  { %2105 = vrot.lane.b32.xlu0 %v15496_v28, %s8309_s18 }
 0x3bf   :  { %2107 = vrot.lane.b32.xlu1 %v15497_v44, %s8309_s18 }
 0x3c0   :  { %2109 = vrot.lane.b32.xlu0 %v15498_v26, %s8309_s18 }
 0x3c3   :  { %2111 = vrot.lane.b32.xlu1 %v15499_v56, %s8309_s18 }
 0x3c4   :  { %2113 = vrot.lane.b32.xlu0 %v15500_v63, %s8309_s18 }
 0x3c7   :  { %2115 = vrot.lane.b32.xlu1 %v15501_v8, %s8309_s18 }
 0x3c8   :  { %2117 = vrot.lane.b32.xlu0 %v15502_v61, %s8309_s18 }
 0x3cb   :  { %2119 = vrot.lane.b32.xlu1 %v15503_v30, %s8309_s18 }
 0x3cc   :  { %2121 = vrot.lane.b32.xlu0 %v15504_v4, %s8309_s18 }
 0x3cf   :  { %v10339_v59 = vpop.xlane.xlu0 %1922  ;;  %2123 = vrot.lane.b32.xlu1 %v15505_v20, %s8309_s18 }
 0x3d0   :  { %2125 = vrot.lane.b32.xlu0 %v15506_v16, %s8309_s18 }
 0x3d3   :  { %v10345_v21 = vpop.xlane.xlu0 %1928  ;;  %2127 = vrot.lane.b32.xlu1 %v15507_v1, %s8309_s18 }
 0x3d7   :  { %v10349_v19 = vpop.xlane.xlu0 %1931  ;;  %v10351_v12 = vpop.xlane.xlu1 %1925 }
 0x3db   :  { %v10353_v34 = vpop.xlane.xlu0 %1934  ;;  %v10355_v17 = vpop.xlane.xlu1 %1937 }
 0x3df   :  { %v10357_v15 = vpop.xlane.xlu0 %1940  ;;  %v10359_v41 = vpop.xlane.xlu1 %1943 }
 0x3e3   :  { %v10361_v58 = vpop.xlane.xlu0 %1946  ;;  %v10363_v24 = vpop.xlane.xlu1 %1949 }
 0x3e7   :  { %v10365_v32 = vpop.xlane.xlu0 %1952  ;;  %v10367_v38 = vpop.xlane.xlu1 %1955 }
 0x3eb   :  { %v10369_v3 = vpop.xlane.xlu0 %1958  ;;  %v10371_v39 = vpop.xlane.xlu1 %1961 }
 0x3ef   :  { %v10373_v35 = vpop.xlane.xlu0 %1964  ;;  %v10375_v27 = vpop.xlane.xlu1 %1967 }
 0x3f3   :  { %v7504_v14 = vpop.permute.xlu0 %7503  ;;  %v7524_v36 = vpop.permute.xlu1 %7523 }
 0x3f4   :  { %v7506_v29 = vunpack.i.h.bf16 %v7504_v14  ;;  %v7505_v51 = vunpack.i.l.bf16 %v7504_v14  ;;  %v7526_v25 = vunpack.i.h.bf16 %v7524_v36  ;;  %v7525_v42 = vunpack.i.l.bf16 %v7524_v36 }
 0x3f7   :  { %v7509_v47 = vpop.permute.xlu0 %7508  ;;  %v7529_v49 = vpop.permute.xlu1 %7528 }
 0x3f8   :  { %v7511_v46 = vunpack.i.h.bf16 %v7509_v47  ;;  %v7510_v31 = vunpack.i.l.bf16 %v7509_v47  ;;  %v7531_v48 = vunpack.i.h.bf16 %v7529_v49  ;;  %v7530_v53 = vunpack.i.l.bf16 %v7529_v49 }
 0x3fb   :  { %v7514_v57 = vpop.permute.xlu0 %7513  ;;  %v7534_v18 = vpop.permute.xlu1 %7533 }
 0x3fc   :  { %v7516_v45 = vunpack.i.h.bf16 %v7514_v57  ;;  %v7515_v11 = vunpack.i.l.bf16 %v7514_v57  ;;  %v7536_v13 = vunpack.i.h.bf16 %v7534_v18  ;;  %v7535_v5 = vunpack.i.l.bf16 %v7534_v18 }
 0x3fe   :  { %v1681_v60 = vsel %vm830_vm3, %v7506_v29, %v7516_v45  ;;  %v1680_v9 = vsel %vm830_vm3, %v7505_v51, %v7515_v11  ;;  %v1682_v2 = vsel %vm830_vm3, %v7525_v42, %v7535_v5  ;;  %v1683_v54 = vsel %vm830_vm3, %v7526_v25, %v7536_v13 }
 0x3ff   :  { %v7351_v50 = vpack.c.bf16 %v1681_v60, %v1681_v60  ;;  %v7350_v55 = vpack.c.bf16 %v1680_v9, %v1680_v9  ;;  %v7352_v28 = vpack.c.bf16 %v1682_v2, %v1682_v2  ;;  %v7353_v44 = vpack.c.bf16 %v1683_v54, %v1683_v54  ;;  %v7519_v26 = vpop.permute.xlu0 %7518  ;;  %v7539_v56 = vpop.permute.xlu1 %7538 }
 0x400   :  { %v7521_v63 = vunpack.i.h.bf16 %v7519_v26  ;;  %v7520_v8 = vunpack.i.l.bf16 %v7519_v26  ;;  %v7541_v61 = vunpack.i.h.bf16 %v7539_v56  ;;  %v7540_v30 = vunpack.i.l.bf16 %v7539_v56 }
 0x401   :  { %1761 = vst.msk [vmem:[%s15012_s6 + $0x4] sm:$0xf] %vm927_vm1, %v7351_v50  ;;  %1760 = vst.msk [vmem:[%s15012_s6] sm:$0xf] %vm927_vm1, %v7350_v55 }
 0x402   :  { %1762 = vst.msk [vmem:[%s15012_s6 + $0x8] sm:$0xf] %vm927_vm1, %v7352_v28  ;;  %1763 = vst.msk [vmem:[%s15012_s6 + $0xc] sm:$0xf] %vm927_vm1, %v7353_v44  ;;  %v1689_v4 = vsel %vm830_vm3, %v7511_v46, %v7521_v63  ;;  %v1688_v20 = vsel %vm830_vm3, %v7510_v31, %v7520_v8  ;;  %v1690_v16 = vsel %vm830_vm3, %v7530_v53, %v7540_v30 }
 0x403   :  { %v1691_v1 = vsel %vm830_vm3, %v7531_v48, %v7541_v61  ;;  %v7359_v14 = vpack.c.bf16 %v1689_v4, %v1689_v4  ;;  %v7358_v36 = vpack.c.bf16 %v1688_v20, %v1688_v20  ;;  %v7360_v47 = vpack.c.bf16 %v1690_v16, %v1690_v16  ;;  %v7544_v29 = vpop.permute.xlu0 %7543  ;;  %v10401_v51 = vpop.permute.xlu1 %2035 }
 0x404   :  { %v7361_v49 = vpack.c.bf16 %v1691_v1, %v1691_v1  ;;  %v7546_v45 = vunpack.i.h.bf16 %v7544_v29  ;;  %v7545_v11 = vunpack.i.l.bf16 %v7544_v29 }
 0x405   :  { %1769 = vst.msk [vmem:[%s15012_s6 + $0x24] sm:$0xf] %vm927_vm1, %v7359_v14  ;;  %1768 = vst.msk [vmem:[%s15012_s6 + $0x20] sm:$0xf] %vm927_vm1, %v7358_v36 }
 0x406   :  { %1770 = vst.msk [vmem:[%s15012_s6 + $0x28] sm:$0xf] %vm927_vm1, %v7360_v47  ;;  %1771 = vst.msk [vmem:[%s15012_s6 + $0x2c] sm:$0xf] %vm927_vm1, %v7361_v49 }
 0x407   :  { %v7549_v25 = vpop.permute.xlu0 %7548  ;;  %v10419_v42 = vpop.permute.xlu1 %2037 }
 0x408   :  { %v7551_v2 = vunpack.i.h.bf16 %v7549_v25  ;;  %v7550_v54 = vunpack.i.l.bf16 %v7549_v25 }
 0x40b   :  { %v7554_v57 = vpop.permute.xlu0 %7553  ;;  %v7564_v18 = vpop.permute.xlu1 %7563 }
 0x40c   :  { %v7556_v13 = vunpack.i.h.bf16 %v7554_v57  ;;  %v7555_v5 = vunpack.i.l.bf16 %v7554_v57  ;;  %v7566_v61 = vunpack.i.h.bf16 %v7564_v18  ;;  %v7565_v30 = vunpack.i.l.bf16 %v7564_v18 }
 0x40e   :  { %v1685_v46 = vsel %vm830_vm3, %v7546_v45, %v7556_v13  ;;  %v1684_v31 = vsel %vm830_vm3, %v7545_v11, %v7555_v5  ;;  %v1969_v45 = vmul.f32 0.0625, %v10339_v59 }
 0x40f   :  { %v7355_v48 = vpack.c.bf16 %v1685_v46, %v1685_v46  ;;  %v7354_v53 = vpack.c.bf16 %v1684_v31, %v1684_v31  ;;  %v7559_v60 = vpop.permute.xlu0 %7558  ;;  %v7569_v9 = vpop.permute.xlu1 %7568 }
 0x410   :  { %v7561_v50 = vunpack.i.h.bf16 %v7559_v60  ;;  %v7560_v55 = vunpack.i.l.bf16 %v7559_v60  ;;  %v7571_v29 = vunpack.i.h.bf16 %v7569_v9  ;;  %v7570_v25 = vunpack.i.l.bf16 %v7569_v9 }
 0x411   :  { %1765 = vst.msk [vmem:[%s15012_s6 + $0x14] sm:$0xf] %vm927_vm1, %v7355_v48  ;;  %1764 = vst.msk [vmem:[%s15012_s6 + $0x10] sm:$0xf] %vm927_vm1, %v7354_v53  ;;  %v1985_v59 = vadd.f32 1.1920929e-07, %v1969_v45  ;;  %v1971_v53 = vmul.f32 0.0625, %v10345_v21 }
 0x412   :  { %v1693_v28 = vsel %vm830_vm3, %v7551_v2, %v7561_v50  ;;  %v1692_v44 = vsel %vm830_vm3, %v7550_v54, %v7560_v55  ;;  %v1970_v2 = vmul.f32 0.0625, %v10351_v12  ;;  %v1973_v21 = vmul.f32 0.0625, %v10353_v34 }
 0x413   :  { %v7363_v26 = vpack.c.bf16 %v1693_v28, %v1693_v28  ;;  %v7362_v56 = vpack.c.bf16 %v1692_v44, %v1692_v44  ;;  %v10433_v63 = vpop.permute.xlu0 %2033  ;;  %v7574_v8 = vpop.permute.xlu1 %7573  ;;  %7898 = vrsqrt.f32 %v1985_v59  ;;  %v1987_v54 = vadd.f32 1.1920929e-07, %v1971_v53 }
 0x414   :  { %v7576_v4 = vunpack.i.h.bf16 %v7574_v8  ;;  %v7575_v20 = vunpack.i.l.bf16 %v7574_v8  ;;  %v1972_v28 = vmul.f32 0.0625, %v10349_v19  ;;  %v1986_v44 = vadd.f32 1.1920929e-07, %v1970_v2 }
 0x415   :  { %1773 = vst.msk [vmem:[%s15012_s6 + $0x34] sm:$0xf] %vm927_vm1, %v7363_v26  ;;  %1772 = vst.msk [vmem:[%s15012_s6 + $0x30] sm:$0xf] %vm927_vm1, %v7362_v56  ;;  %7900 = vrsqrt.f32 %v1987_v54  ;;  %v1989_v26 = vadd.f32 1.1920929e-07, %v1973_v21  ;;  %v1975_v56 = vmul.f32 0.0625, %v10357_v15 }
 0x416   :  { %v1686_v16 = vsel %vm830_vm3, %v7565_v30, %v7575_v20  ;;  %v1687_v1 = vsel %vm830_vm3, %v7566_v61, %v7576_v4  ;;  %v1988_v12 = vadd.f32 1.1920929e-07, %v1972_v28  ;;  %7902 = vrsqrt.f32 %v1986_v44  ;;  %v15510_v44 = vld [vmem:[#allocation6_spill] sm:$0xff] }
 0x417   :  { %v7356_v14 = vpack.c.bf16 %v1686_v16, %v1686_v16  ;;  %v7357_v36 = vpack.c.bf16 %v1687_v1, %v1687_v1  ;;  %v10445_v47 = vpop.permute.xlu0 %2041  ;;  %v7579_v49 = vpop.permute.xlu1 %7578  ;;  %v1974_v30 = vmul.f32 0.0625, %v10355_v17  ;;  %7904 = vrsqrt.f32 %v1989_v26 }
 0x418   :  { %v7581_v57 = vunpack.i.h.bf16 %v7579_v49  ;;  %v7580_v18 = vunpack.i.l.bf16 %v7579_v49  ;;  %v1991_v34 = vadd.f32 1.1920929e-07, %v1975_v56  ;;  %v1977_v4 = vmul.f32 0.0625, %v10361_v58  ;;  %v15508_v49 = vld [vmem:[#allocation3_spill] sm:$0xff] }
 0x419   :  { %1766 = vst.msk [vmem:[%s15012_s6 + $0x18] sm:$0xf] %vm927_vm1, %v7356_v14  ;;  %1767 = vst.msk [vmem:[%s15012_s6 + $0x1c] sm:$0xf] %vm927_vm1, %v7357_v36  ;;  %7906 = vrsqrt.f32 %v1988_v12  ;;  %v1990_v1 = vadd.f32 1.1920929e-07, %v1974_v30  ;;  %v1976_v15 = vmul.f32 0.0625, %v10359_v41 }
 0x41a   :  { %v1694_v11 = vsel %vm830_vm3, %v7570_v25, %v7580_v18  ;;  %v1695_v13 = vsel %vm830_vm3, %v7571_v29, %v7581_v57  ;;  %7908 = vrsqrt.f32 %v1991_v34  ;;  %v1993_v14 = vadd.f32 1.1920929e-07, %v1977_v4  ;;  %v15511_v56 = vld [vmem:[#allocation23_spill] sm:$0xff] }
 0x41b   :  { %v7364_v5 = vpack.c.bf16 %v1694_v11, %v1694_v11  ;;  %v7365_v46 = vpack.c.bf16 %v1695_v13, %v1695_v13  ;;  %v10458_v31 = vpop.permute.xlu0 %2045  ;;  %v10460_v48 = vpop.permute.xlu1 %2039  ;;  %v1979_v36 = vmul.f32 0.0625, %v10365_v32  ;;  %7910 = vrsqrt.f32 %v1990_v1 }
 0x41c   :  { %v1992_v58 = vadd.f32 1.1920929e-07, %v1976_v15  ;;  %v1978_v18 = vmul.f32 0.0625, %v10363_v24  ;;  %7912 = vrsqrt.f32 %v1993_v14  ;;  %v1981_v41 = vmul.f32 0.0625, %v10369_v3 }
 0x41d   :  { %1774 = vst.msk [vmem:[%s15012_s6 + $0x38] sm:$0xf] %vm927_vm1, %v7364_v5  ;;  %1775 = vst.msk [vmem:[%s15012_s6 + $0x3c] sm:$0xf] %vm927_vm1, %v7365_v46  ;;  %v7899_v20 = vpop.eup %7898  ;;  %v1995_v11 = vadd.f32 1.1920929e-07, %v1979_v36  ;;  %v15509_v5 = vld [vmem:[#allocation15_spill] sm:$0xff] }
 0x41e   :  { %v10496_v29 = vmul.f32 %v7899_v20, %v15508_v49  ;;  %7914 = vrsqrt.f32 %v1992_v58  ;;  %v1994_v2 = vadd.f32 1.1920929e-07, %v1978_v18  ;;  %v1980_v24 = vmul.f32 0.0625, %v10367_v38  ;;  %v15512_v36 = vld [vmem:[#allocation35_spill] sm:$0xff] }
 0x41f   :  { %v10471_v60 = vpop.permute.xlu0 %2049  ;;  %v10473_v9 = vpop.permute.xlu1 %2043  ;;  %7916 = vrsqrt.f32 %v1995_v11  ;;  %v1997_v21 = vadd.f32 1.1920929e-07, %v1981_v41  ;;  %v1983_v3 = vmul.f32 0.0625, %v10373_v35  ;;  %v1982_v35 = vmul.f32 0.0625, %v10371_v39 }
 0x420   :  { %v7901_v17 = vpop.eup %7900  ;;  %7918 = vrsqrt.f32 %v1994_v2  ;;  %v1996_v38 = vadd.f32 1.1920929e-07, %v1980_v24  ;;  %v15514_v2 = vld [vmem:[#allocation4_spill] sm:$0xff] }
 0x421   :  { %v7903_v13 = vpop.eup %7902  ;;  %v10504_v32 = vmul.f32 %v7901_v17, %v15509_v5  ;;  %7920 = vrsqrt.f32 %v1997_v21  ;;  %v1999_v15 = vadd.f32 1.1920929e-07, %v1983_v3 }
 0x422   :  { %v7905_v46 = vpop.eup %7904  ;;  %v10513_v26 = vmul.f32 %v7903_v13, %v15510_v44  ;;  %7922 = vrsqrt.f32 %v1996_v38  ;;  %v1998_v13 = vadd.f32 1.1920929e-07, %v1982_v35  ;;  %v15517_v35 = vld [vmem:[#allocation37_spill] sm:$0xff]  ;;  %v10711_v44 = vld [vmem:[%s15008_s3 + $0x8] sm:$0xff] }
 0x423   :  { %v10477_v50 = vpop.permute.xlu0 %2053  ;;  %v10479_v55 = vpop.permute.xlu1 %2047  ;;  %v10516_v12 = vmul.f32 %v7905_v46, %v15511_v56  ;;  %7924 = vrsqrt.f32 %v1999_v15  ;;  %v1984_v46 = vmul.f32 0.0625, %v10375_v27  ;;  %v10702_v56 = vld [vmem:[%s15006_s4 + $0x78] sm:$0xff]  ;;  %15541 = vst [vmem:[#allocation60_spill] sm:$0xff] %v10711_v44 }
 0x424   :  { %v7907_v28 = vpop.eup %7906  ;;  %7926 = vrsqrt.f32 %v1998_v13  ;;  %v15518_v13 = vld [vmem:[#allocation25_spill] sm:$0xff]  ;;  %15540 = vst [vmem:[#allocation57_spill] sm:$0xff] %v10702_v56 }
 0x425   :  { %v7909_v30 = vpop.eup %7908  ;;  %v2000_v27 = vadd.f32 1.1920929e-07, %v1984_v46 }
 0x426   :  { %v7911_v14 = vpop.eup %7910  ;;  %v10523_v17 = vmul.f32 %v7909_v30, %v15512_v36  ;;  %v10693_v36 = vld [vmem:[%s15006_s4 + $0x68] sm:$0xff] }
 0x427   :  { %v10483_v8 = vpop.permute.xlu0 %2057  ;;  %v10485_v61 = vpop.permute.xlu1 %2051  ;;  %7928 = vrsqrt.f32 %v2000_v27  ;;  %15539 = vst [vmem:[#allocation44_spill] sm:$0xff] %v10693_v36 }
 0x428   :  { %v7913_v18 = vpop.eup %7912 }
 0x429   :  { %v10534_v24 = vmul.f32 %v7913_v18, %v15514_v2  ;;  %v10679_v2 = vld [vmem:[%s15006_s4 + $0x58] sm:$0xff] }
 0x42a   :  { %15537 = vst [vmem:[#allocation56_spill] sm:$0xff] %v10679_v2 }
 0x42b   :  { %v10489_v16 = vpop.permute.xlu0 %2061  ;;  %v10491_v19 = vpop.permute.xlu1 %2055 }
 0x42f   :  { %v2098_v25 = vpop.permute.xlu0 %2097  ;;  %v10498_v57 = vpop.permute.xlu1 %2059 }
 0x430   :  { %v2145_v45 = vmul.f32 %v2098_v25, %v10496_v29  ;;  %v15513_v25 = vld [vmem:[#allocation17_spill] sm:$0xff] }
 0x431   :  { %v10526_v58 = vmul.f32 %v7907_v28, %v15513_v25  ;;  %v10686_v25 = vld [vmem:[%s15008_s3] sm:$0xff] }
 0x432   :  { %2177 = vrot.lane.b32.xlu0 %v2145_v45, %s8307_s9  ;;  %15538 = vst [vmem:[#allocation33_spill] sm:$0xff] %v10686_v25 }
 0x433   :  { %v2102_v59 = vpop.permute.xlu0 %2101  ;;  %v10507_v53 = vpop.permute.xlu1 %2063 }
 0x434   :  { %v2147_v54 = vmul.f32 %v2102_v59, %v10504_v32  ;;  %v7915_v59 = vpop.eup %7914 }
 0x435   :  { %v7917_v3 = vpop.eup %7916  ;;  %v10547_v15 = vmul.f32 %v7915_v59, %v15517_v35  ;;  %v15521_v35 = vld [vmem:[#allocation18_spill] sm:$0xff] }
 0x436   :  { %2181 = vrot.lane.b32.xlu0 %v2147_v54, %s8307_s9  ;;  %v15515_v54 = vld [vmem:[#allocation24_spill] sm:$0xff]  ;;  %v7919_v38 = vpop.eup %7918 }
 0x437   :  { %v2106_v34 = vpop.permute.xlu0 %2105  ;;  %v2100_v4 = vpop.permute.xlu1 %2099  ;;  %v10537_v21 = vmul.f32 %v7911_v14, %v15515_v54  ;;  %v10672_v54 = vld [vmem:[%s15006_s4 + $0x70] sm:$0xff] }
 0x438   :  { %v2149_v20 = vmul.f32 %v2106_v34, %v10516_v12  ;;  %v2146_v1 = vmul.f32 %v2100_v4, %v10513_v26  ;;  %v7921_v14 = vpop.eup %7920  ;;  %15536 = vst [vmem:[#allocation53_spill] sm:$0xff] %v10672_v54 }
 0x439   :  { %v10554_v46 = vmul.f32 %v7921_v14, %v15518_v13 }
 0x43a   :  { %2185 = vrot.lane.b32.xlu0 %v2149_v20, %s8307_s9  ;;  %2179 = vrot.lane.b32.xlu1 %v2146_v1, %s8307_s9  ;;  %v15516_v20 = vld [vmem:[#allocation16_spill] sm:$0xff] }
 0x43b   :  { %v2110_v45 = vpop.permute.xlu0 %2109  ;;  %v2104_v11 = vpop.permute.xlu1 %2103  ;;  %v10544_v1 = vmul.f32 %v7917_v3, %v15516_v20  ;;  %v15519_v3 = vld [vmem:[#allocation7_spill] sm:$0xff] }
 0x43c   :  { %v2151_v41 = vmul.f32 %v2110_v45, %v10523_v17  ;;  %v2148_v39 = vmul.f32 %v2104_v11, %v10526_v58 }
 0x43e   :  { %2189 = vrot.lane.b32.xlu0 %v2151_v41, %s8307_s9  ;;  %2183 = vrot.lane.b32.xlu1 %v2148_v39, %s8307_s9  ;;  %v7923_v39 = vpop.eup %7922 }
 0x43f   :  { %v2114_v28 = vpop.permute.xlu0 %2113  ;;  %v2108_v30 = vpop.permute.xlu1 %2107  ;;  %v10567_v14 = vmul.f32 %v7923_v39, %v15521_v35  ;;  %v10658_v35 = vld [vmem:[%s15006_s4 + $0x60] sm:$0xff] }
 0x440   :  { %v2153_v34 = vmul.f32 %v2114_v28, %v10534_v24  ;;  %v2150_v4 = vmul.f32 %v2108_v30, %v10537_v21  ;;  %v10557_v28 = vmul.f32 %v7919_v38, %v15519_v3  ;;  %v7925_v59 = vpop.eup %7924  ;;  %15534 = vst [vmem:[#allocation43_spill] sm:$0xff] %v10658_v35 }
 0x441   :  { %v7927_v38 = vpop.eup %7926 }
 0x442   :  { %2193 = vrot.lane.b32.xlu0 %v2153_v34, %s8307_s9  ;;  %2187 = vrot.lane.b32.xlu1 %v2150_v4, %s8307_s9  ;;  %v7929_v39 = vpop.eup %7928 }
 0x443   :  { %v2118_v18 = vpop.permute.xlu0 %2117  ;;  %v2112_v45 = vpop.permute.xlu1 %2111 }
 0x444   :  { %v2155_v11 = vmul.f32 %v2118_v18, %v10544_v1  ;;  %v2152_v41 = vmul.f32 %v2112_v45, %v10547_v15  ;;  %v15520_v45 = vld [vmem:[#allocation39_spill] sm:$0xff] }
 0x445   :  { %v10564_v27 = vmul.f32 %v7925_v59, %v15520_v45  ;;  %v10665_v45 = vld [vmem:[%s15006_s4 + $0x48] sm:$0xff] }
 0x446   :  { %2197 = vrot.lane.b32.xlu0 %v2155_v11, %s8307_s9  ;;  %2191 = vrot.lane.b32.xlu1 %v2152_v41, %s8307_s9  ;;  %15535 = vst [vmem:[#allocation32_spill] sm:$0xff] %v10665_v45 }
 0x447   :  { %v2122_v30 = vpop.permute.xlu0 %2121  ;;  %v2116_v34 = vpop.permute.xlu1 %2115 }
 0x448   :  { %v2157_v4 = vmul.f32 %v2122_v30, %v10554_v46  ;;  %v2154_v18 = vmul.f32 %v2116_v34, %v10557_v28  ;;  %v15522_v30 = vld [vmem:[#allocation27_spill] sm:$0xff] }
 0x449   :  { %v10574_v20 = vmul.f32 %v7927_v38, %v15522_v30  ;;  %v10594_v38 = vld [vmem:[%s15006_s4 + $0x10] sm:$0xff]  ;;  %v10651_v30 = vld [vmem:[%s15006_s4 + $0x38] sm:$0xff] }
 0x44a   :  { %2201 = vrot.lane.b32.xlu0 %v2157_v4, %s8307_s9  ;;  %2195 = vrot.lane.b32.xlu1 %v2154_v18, %s8307_s9  ;;  %v15523_v4 = vld [vmem:[#allocation42_spill] sm:$0xff]  ;;  %15525 = vst [vmem:[#allocation58_spill] sm:$0xff] %v10594_v38  ;;  %15533 = vst [vmem:[#allocation55_spill] sm:$0xff] %v10651_v30 }
 0x44b   :  { %v2126_v11 = vpop.permute.xlu0 %2125  ;;  %v2120_v41 = vpop.permute.xlu1 %2119  ;;  %v10580_v18 = vmul.f32 %v7929_v39, %v15523_v4  ;;  %v10609_v39 = vld [vmem:[%s15006_s4 + $0x8] sm:$0xff]  ;;  %v10644_v4 = vld [vmem:[%s15006_s4 + $0x50] sm:$0xff] }
 0x44c   :  { %v2159_v3 = vmul.f32 %v2126_v11, %v10564_v27  ;;  %v2156_v13 = vmul.f32 %v2120_v41, %v10567_v14  ;;  %v10585_v11 = vld [vmem:[%s15006_s4] sm:$0xff]  ;;  %15527 = vst [vmem:[#allocation72_spill] sm:$0xff] %v10609_v39  ;;  %15532 = vst [vmem:[#allocation108_spill] sm:$0xff] %v10644_v4 }
 0x44d   :  { %15524 = vst [vmem:[#allocation59_spill] sm:$0xff] %v10585_v11  ;;  %v10602_v41 = vld [vmem:[%s15006_s4 + $0x20] sm:$0xff] }
 0x44e   :  { %2205 = vrot.lane.b32.xlu0 %v2159_v3, %s8307_s9  ;;  %2199 = vrot.lane.b32.xlu1 %v2156_v13, %s8307_s9  ;;  %15526 = vst [vmem:[#allocation69_spill] sm:$0xff] %v10602_v41 }
 0x44f   :  { %v2124_v59 = vpop.permute.xlu1 %2123 }
 0x450   :  { %v2158_v34 = vmul.f32 %v2124_v59, %v10574_v20  ;;  %v10616_v59 = vld [vmem:[%s15006_s4 + $0x30] sm:$0xff] }
 0x451   :  { %15528 = vst [vmem:[#allocation97_spill] sm:$0xff] %v10616_v59 }
 0x452   :  { %2257 = vrot.lane.b32.xlu0 %v10585_v11, %s8308_s0  ;;  %2203 = vrot.lane.b32.xlu1 %v2158_v34, %s8307_s9  ;;  %v10623_v34 = vld [vmem:[%s15006_s4 + $0x18] sm:$0xff] }
 0x453   :  { %v2128_v3 = vpop.permute.xlu1 %2127  ;;  %15529 = vst [vmem:[#allocation100_spill] sm:$0xff] %v10623_v34 }
 0x454   :  { %v2160_v13 = vmul.f32 %v2128_v3, %v10580_v18  ;;  %v10630_v3 = vld [vmem:[%s15006_s4 + $0x40] sm:$0xff] }
 0x455   :  { %15530 = vst [vmem:[#allocation51_spill] sm:$0xff] %v10630_v3 }
 0x456   :  { %2261 = vrot.lane.b32.xlu0 %v10594_v38, %s8308_s0  ;;  %2207 = vrot.lane.b32.xlu1 %v2160_v13, %s8307_s9  ;;  %v10637_v13 = vld [vmem:[%s15006_s4 + $0x28] sm:$0xff] }
 0x457   :  { %15531 = vst [vmem:[#allocation105_spill] sm:$0xff] %v10637_v13 }
 0x45a   :  { %2265 = vrot.lane.b32.xlu0 %v10602_v41, %s8308_s0  ;;  %2259 = vrot.lane.b32.xlu1 %v10609_v39, %s8308_s0 }
 0x45e   :  { %2269 = vrot.lane.b32.xlu0 %v10616_v59, %s8308_s0  ;;  %2263 = vrot.lane.b32.xlu1 %v10623_v34, %s8308_s0 }
 0x462   :  { %2273 = vrot.lane.b32.xlu0 %v10630_v3, %s8308_s0  ;;  %2267 = vrot.lane.b32.xlu1 %v10637_v13, %s8308_s0 }
 0x466   :  { %2277 = vrot.lane.b32.xlu0 %v10644_v4, %s8308_s0  ;;  %2271 = vrot.lane.b32.xlu1 %v10651_v30, %s8308_s0 }
 0x46a   :  { %2281 = vrot.lane.b32.xlu0 %v10658_v35, %s8308_s0  ;;  %2275 = vrot.lane.b32.xlu1 %v10665_v45, %s8308_s0 }
 0x46e   :  { %2285 = vrot.lane.b32.xlu0 %v10672_v54, %s8308_s0  ;;  %2279 = vrot.lane.b32.xlu1 %v10679_v2, %s8308_s0 }
 0x472   :  { %2321 = vrot.lane.b32.xlu0 %v10686_v25, %s8309_s18  ;;  %2283 = vrot.lane.b32.xlu1 %v10693_v36, %s8308_s0 }
 0x476   :  { %2325 = vrot.lane.b32.xlu0 %v10006_v22, %s8309_s18  ;;  %2287 = vrot.lane.b32.xlu1 %v10702_v56, %s8308_s0  ;;  %v10722_v22 = vld [vmem:[%s15008_s3 + $0x40] sm:$0xff] }
 0x477   :  { %15542 = vst [vmem:[#allocation63_spill] sm:$0xff] %v10722_v22 }
 0x47a   :  { %2329 = vrot.lane.b32.xlu0 %v10106_v62, %s8309_s18  ;;  %2323 = vrot.lane.b32.xlu1 %v10711_v44, %s8309_s18 }
 0x47e   :  { %2333 = vrot.lane.b32.xlu0 %v10223_v37, %s8309_s18  ;;  %2327 = vrot.lane.b32.xlu1 %v10018_v43, %s8309_s18  ;;  %v10737_v43 = vld [vmem:[%s15008_s3 + $0x48] sm:$0xff] }
 0x47f   :  { %15543 = vst [vmem:[#allocation71_spill] sm:$0xff] %v10737_v43 }
 0x482   :  { %2337 = vrot.lane.b32.xlu0 %v10722_v22, %s8309_s18  ;;  %2331 = vrot.lane.b32.xlu1 %v10126_v40, %s8309_s18 }
 0x486   :  { %2341 = vrot.lane.b32.xlu0 %v10033_v10, %s8309_s18  ;;  %2335 = vrot.lane.b32.xlu1 %v10238_v33, %s8309_s18 }
 0x48a   :  { %2345 = vrot.lane.b32.xlu0 %v10137_v6, %s8309_s18  ;;  %2339 = vrot.lane.b32.xlu1 %v10737_v43, %s8309_s18 }
 0x48e   :  { %2349 = vrot.lane.b32.xlu0 %v10245_v23, %s8309_s18  ;;  %2343 = vrot.lane.b32.xlu1 %v10045_v0, %s8309_s18 }
 0x492   :  { %2347 = vrot.lane.b32.xlu1 %v10157_v52, %s8309_s18 }
 0x496   :  { %2351 = vrot.lane.b32.xlu1 %v10260_v7, %s8309_s18 }
 0x4a4   :  { %v10749_v10 = vpop.permute.xlu0 %2177 }
 0x4a8   :  { %v10751_v62 = vpop.permute.xlu0 %2181 }
 0x4ac   :  { %v10753_v40 = vpop.permute.xlu0 %2185  ;;  %v10755_v6 = vpop.permute.xlu1 %2179 }
 0x4b0   :  { %v10757_v37 = vpop.permute.xlu0 %2189  ;;  %v10759_v33 = vpop.permute.xlu1 %2183 }
 0x4b4   :  { %v10761_v23 = vpop.permute.xlu0 %2193  ;;  %v10763_v0 = vpop.permute.xlu1 %2187 }
 0x4b8   :  { %v10765_v52 = vpop.permute.xlu0 %2197  ;;  %v10767_v5 = vpop.permute.xlu1 %2191 }
 0x4bc   :  { %v10769_v7 = vpop.permute.xlu0 %2201  ;;  %v10771_v49 = vpop.permute.xlu1 %2195 }
 0x4c0   :  { %v10773_v56 = vpop.permute.xlu0 %2205  ;;  %v10775_v54 = vpop.permute.xlu1 %2199 }
 0x4c4   :  { %v10777_v36 = vpop.permute.xlu0 %2257  ;;  %v10779_v35 = vpop.permute.xlu1 %2203 }
 0x4c8   :  { %v10781_v2 = vpop.permute.xlu0 %2261  ;;  %v10783_v4 = vpop.permute.xlu1 %2207 }
 0x4cc   :  { %v10785_v45 = vpop.permute.xlu0 %2265  ;;  %v10787_v3 = vpop.permute.xlu1 %2259 }
 0x4d0   :  { %v10789_v30 = vpop.permute.xlu0 %2269  ;;  %v10791_v59 = vpop.permute.xlu1 %2263 }
 0x4d1   :  { %15544 = vst [vmem:[#allocation74_spill] sm:$0xff] %v10791_v59 }
 0x4d4   :  { %v10793_v13 = vpop.permute.xlu0 %2273  ;;  %v10795_v41 = vpop.permute.xlu1 %2267 }
 0x4d5   :  { %15545 = vst [vmem:[#allocation99_spill] sm:$0xff] %v10793_v13  ;;  %15546 = vst [vmem:[#allocation102_spill] sm:$0xff] %v10795_v41 }
 0x4d8   :  { %v10797_v34 = vpop.permute.xlu0 %2277  ;;  %v10799_v38 = vpop.permute.xlu1 %2271 }
 0x4d9   :  { %15547 = vst [vmem:[#allocation107_spill] sm:$0xff] %v10799_v38 }
 0x4dc   :  { %v10801_v39 = vpop.permute.xlu0 %2281  ;;  %v10803_v11 = vpop.permute.xlu1 %2275 }
 0x4dd   :  { %15548 = vst [vmem:[#allocation110_spill] sm:$0xff] %v10801_v39  ;;  %15549 = vst [vmem:[#allocation62_spill] sm:$0xff] %v10803_v11 }
 0x4e0   :  { %v10805_v43 = vpop.permute.xlu0 %2285  ;;  %v10807_v22 = vpop.permute.xlu1 %2279 }
 0x4e1   :  { %15550 = vst [vmem:[#allocation68_spill] sm:$0xff] %v10805_v43  ;;  %15551 = vst [vmem:[#allocation73_spill] sm:$0xff] %v10807_v22 }
 0x4e4   :  { %v2322_v25 = vpop.permute.xlu0 %2321  ;;  %v10809_v44 = vpop.permute.xlu1 %2283 }
 0x4e5   :  { %15552 = vst [vmem:[#allocation76_spill] sm:$0xff] %v10809_v44  ;;  %v2369_v59 = vmul.f32 %v2322_v25, %v10496_v29 }
 0x4e7   :  { %2401 = vrot.lane.b32.xlu0 %v2369_v59, %s8307_s9 }
 0x4e8   :  { %v2326_v41 = vpop.permute.xlu0 %2325  ;;  %v10813_v13 = vpop.permute.xlu1 %2287 }
 0x4e9   :  { %15553 = vst [vmem:[#allocation101_spill] sm:$0xff] %v10813_v13  ;;  %v2371_v38 = vmul.f32 %v2326_v41, %v10504_v32 }
 0x4eb   :  { %2405 = vrot.lane.b32.xlu0 %v2371_v38, %s8307_s9 }
 0x4ec   :  { %v2330_v39 = vpop.permute.xlu0 %2329  ;;  %v2324_v11 = vpop.permute.xlu1 %2323 }
 0x4ed   :  { %v2373_v43 = vmul.f32 %v2330_v39, %v10516_v12  ;;  %v2370_v22 = vmul.f32 %v2324_v11, %v10513_v26 }
 0x4ef   :  { %2409 = vrot.lane.b32.xlu0 %v2373_v43, %s8307_s9  ;;  %2403 = vrot.lane.b32.xlu1 %v2370_v22, %s8307_s9 }
 0x4f0   :  { %v2334_v25 = vpop.permute.xlu0 %2333  ;;  %v2328_v44 = vpop.permute.xlu1 %2327 }
 0x4f1   :  { %v2375_v59 = vmul.f32 %v2334_v25, %v10523_v17  ;;  %v2372_v13 = vmul.f32 %v2328_v44, %v10526_v58 }
 0x4f3   :  { %2413 = vrot.lane.b32.xlu0 %v2375_v59, %s8307_s9  ;;  %2407 = vrot.lane.b32.xlu1 %v2372_v13, %s8307_s9 }
 0x4f4   :  { %v2338_v38 = vpop.permute.xlu0 %2337  ;;  %v2332_v41 = vpop.permute.xlu1 %2331 }
 0x4f5   :  { %v2377_v39 = vmul.f32 %v2338_v38, %v10534_v24  ;;  %v2374_v11 = vmul.f32 %v2332_v41, %v10537_v21 }
 0x4f7   :  { %2417 = vrot.lane.b32.xlu0 %v2377_v39, %s8307_s9  ;;  %2411 = vrot.lane.b32.xlu1 %v2374_v11, %s8307_s9 }
 0x4f8   :  { %v2342_v22 = vpop.permute.xlu0 %2341  ;;  %v2336_v43 = vpop.permute.xlu1 %2335 }
 0x4f9   :  { %v2379_v25 = vmul.f32 %v2342_v22, %v10544_v1  ;;  %v2376_v44 = vmul.f32 %v2336_v43, %v10547_v15 }
 0x4fb   :  { %2421 = vrot.lane.b32.xlu0 %v2379_v25, %s8307_s9  ;;  %2415 = vrot.lane.b32.xlu1 %v2376_v44, %s8307_s9  ;;  %v2081_v25 = vmul.f32 %v10433_v63, %v10496_v29 }
 0x4fc   :  { %v2346_v13 = vpop.permute.xlu0 %2345  ;;  %v2340_v59 = vpop.permute.xlu1 %2339 }
 0x4fd   :  { %v2381_v38 = vmul.f32 %v2346_v13, %v10554_v46  ;;  %v2378_v41 = vmul.f32 %v2340_v59, %v10557_v28  ;;  %v2225_v13 = vadd.f32 %v10749_v10, %v2081_v25  ;;  %v2085_v10 = vmul.f32 %v10445_v47, %v10516_v12 }
 0x4fe   :  { %v2089_v25 = vmul.f32 %v10471_v60, %v10534_v24 }
 0x4ff   :  { %2425 = vrot.lane.b32.xlu0 %v2381_v38, %s8307_s9  ;;  %2419 = vrot.lane.b32.xlu1 %v2378_v41, %s8307_s9  ;;  %v2083_v38 = vmul.f32 %v10419_v42, %v10504_v32  ;;  %v2229_v42 = vadd.f32 %v10753_v40, %v2085_v10  ;;  %v2086_v40 = vmul.f32 %v10473_v9, %v10537_v21 }
 0x500   :  { %v2350_v39 = vpop.permute.xlu0 %2349  ;;  %v2344_v11 = vpop.permute.xlu1 %2343 }
 0x501   :  { %v2383_v22 = vmul.f32 %v2350_v39, %v10564_v27  ;;  %v2380_v43 = vmul.f32 %v2344_v11, %v10567_v14  ;;  %v2227_v39 = vadd.f32 %v10751_v62, %v2083_v38  ;;  %v2082_v11 = vmul.f32 %v10401_v51, %v10513_v26 }
 0x502   :  { %v2084_v62 = vmul.f32 %v10460_v48, %v10526_v58  ;;  %v2230_v48 = vadd.f32 %v10763_v0, %v2086_v40  ;;  %v2095_v0 = vmul.f32 %v10489_v16, %v10564_v27  ;;  %v2248_v40 = vsub.f32 0.0, %v10547_v15 }
 0x503   :  { %2429 = vrot.lane.b32.xlu0 %v2383_v22, %s8307_s9  ;;  %2423 = vrot.lane.b32.xlu1 %v2380_v43, %s8307_s9  ;;  %v2226_v22 = vadd.f32 %v10755_v6, %v2082_v11  ;;  %v2087_v43 = vmul.f32 %v10458_v31, %v10523_v17  ;;  %v2233_v31 = vadd.f32 %v10761_v23, %v2089_v25  ;;  %v2251_v25 = vsub.f32 0.0, %v10544_v1 }
 0x504   :  { %v2348_v44 = vpop.permute.xlu1 %2347  ;;  %v2228_v47 = vadd.f32 %v10759_v33, %v2084_v62  ;;  %v2091_v6 = vmul.f32 %v10477_v50, %v10544_v1  ;;  %v2093_v33 = vmul.f32 %v10483_v8, %v10554_v46  ;;  %v2090_v23 = vmul.f32 %v10485_v61, %v10557_v28  ;;  %v15556_v62 = vld [vmem:[#allocation102_spill] sm:$0xff] }
 0x505   :  { %v2382_v59 = vmul.f32 %v2348_v44, %v10574_v20  ;;  %v2231_v51 = vadd.f32 %v10757_v37, %v2087_v43  ;;  %v2088_v37 = vmul.f32 %v10479_v55, %v10547_v15  ;;  %v2239_v8 = vadd.f32 %v10773_v56, %v2095_v0  ;;  %v15555_v43 = vld [vmem:[#allocation99_spill] sm:$0xff] }
 0x506   :  { %v2235_v60 = vadd.f32 %v10765_v52, %v2091_v6  ;;  %v2237_v50 = vadd.f32 %v10769_v7, %v2093_v33  ;;  %v2234_v55 = vadd.f32 %v10771_v49, %v2090_v23  ;;  %v2094_v52 = vmul.f32 %v10498_v57, %v10574_v20 }
 0x507   :  { %2481 = vrot.lane.b32.xlu0 %v2225_v13, %s8306_s8  ;;  %2427 = vrot.lane.b32.xlu1 %v2382_v59, %s8307_s9  ;;  %v2232_v9 = vadd.f32 %v10767_v5, %v2088_v37  ;;  %v2092_v5 = vmul.f32 %v10491_v19, %v10567_v14  ;;  %v2096_v19 = vmul.f32 %v10507_v53, %v10580_v18  ;;  %v2241_v56 = vsub.f32 0.0, %v10496_v29 }
 0x508   :  { %v2352_v41 = vpop.permute.xlu1 %2351  ;;  %v2238_v16 = vadd.f32 %v10779_v35, %v2094_v52  ;;  %v2243_v7 = vsub.f32 0.0, %v10504_v32  ;;  %v2245_v53 = vsub.f32 0.0, %v10516_v12  ;;  %v2242_v59 = vsub.f32 0.0, %v10513_v26  ;;  %v15554_v12 = vld [vmem:[#allocation74_spill] sm:$0xff] }
 0x509   :  { %v2384_v63 = vmul.f32 %v2352_v41, %v10580_v18  ;;  %v2236_v61 = vadd.f32 %v10775_v54, %v2092_v5  ;;  %v2240_v49 = vadd.f32 %v10783_v4, %v2096_v19  ;;  %v2305_v54 = vmul.f32 %v10777_v36, %v2241_v56  ;;  %v15561_v19 = vld [vmem:[#allocation73_spill] sm:$0xff] }
 0x50a   :  { %v2307_v13 = vmul.f32 %v10781_v2, %v2243_v7  ;;  %v2309_v38 = vmul.f32 %v10785_v45, %v2245_v53  ;;  %v2306_v29 = vmul.f32 %v10787_v3, %v2242_v59  ;;  %v2247_v32 = vsub.f32 0.0, %v10523_v17  ;;  %v15563_v59 = vld [vmem:[#allocation101_spill] sm:$0xff] }
 0x50b   :  { %2485 = vrot.lane.b32.xlu0 %v2227_v39, %s8306_s8  ;;  %2431 = vrot.lane.b32.xlu1 %v2384_v63, %s8307_s9  ;;  %v2244_v2 = vsub.f32 0.0, %v10526_v58  ;;  %v2249_v3 = vsub.f32 0.0, %v10534_v24  ;;  %v2250_v33 = vsub.f32 0.0, %v10557_v28 }
 0x50c   :  { %v2311_v11 = vmul.f32 %v10789_v30, %v2247_v32  ;;  %v15568_v32 = vld [vmem:[#allocation86_spill] sm:$0xff] }
 0x50d   :  { %v2308_v10 = vmul.f32 %v15554_v12, %v2244_v2  ;;  %v2313_v58 = vmul.f32 %v15555_v43, %v2249_v3  ;;  %v15569_v2 = vld [vmem:[#allocation47_spill] sm:$0xff]  ;;  %v15573_v12 = vld [vmem:[#allocation88_spill] sm:$0xff] }
 0x50e   :  { %v15577_v3 = vld [vmem:[#allocation48_spill] sm:$0xff] }
 0x50f   :  { %2489 = vrot.lane.b32.xlu0 %v2229_v42, %s8306_s8  ;;  %2483 = vrot.lane.b32.xlu1 %v2226_v22, %s8306_s8  ;;  %v2246_v42 = vsub.f32 0.0, %v10537_v21  ;;  %v2315_v21 = vmul.f32 %v10797_v34, %v2251_v25 }
 0x513   :  { %2493 = vrot.lane.b32.xlu0 %v2231_v51, %s8306_s8  ;;  %2487 = vrot.lane.b32.xlu1 %v2228_v47, %s8306_s8  ;;  %v2310_v51 = vmul.f32 %v15556_v62, %v2246_v42  ;;  %v15578_v42 = vld [vmem:[#allocation67_spill] sm:$0xff] }
 0x517   :  { %2497 = vrot.lane.b32.xlu0 %v2233_v31, %s8306_s8  ;;  %2491 = vrot.lane.b32.xlu1 %v2230_v48, %s8306_s8  ;;  %v15557_v48 = vld [vmem:[#allocation107_spill] sm:$0xff] }
 0x518   :  { %v2312_v6 = vmul.f32 %v15557_v48, %v2248_v40 }
 0x51b   :  { %2501 = vrot.lane.b32.xlu0 %v2235_v60, %s8306_s8  ;;  %2495 = vrot.lane.b32.xlu1 %v2232_v9, %s8306_s8  ;;  %v2253_v9 = vsub.f32 0.0, %v10554_v46 }
 0x51f   :  { %2505 = vrot.lane.b32.xlu0 %v2237_v50, %s8306_s8  ;;  %2499 = vrot.lane.b32.xlu1 %v2234_v55, %s8306_s8  ;;  %v15558_v50 = vld [vmem:[#allocation110_spill] sm:$0xff] }
 0x520   :  { %v2317_v15 = vmul.f32 %v15558_v50, %v2253_v9  ;;  %v15559_v55 = vld [vmem:[#allocation62_spill] sm:$0xff] }
 0x521   :  { %v2314_v0 = vmul.f32 %v15559_v55, %v2250_v33 }
 0x523   :  { %2509 = vrot.lane.b32.xlu0 %v2239_v8, %s8306_s8  ;;  %2503 = vrot.lane.b32.xlu1 %v2236_v61, %s8306_s8  ;;  %v2255_v8 = vsub.f32 0.0, %v10564_v27  ;;  %v2252_v61 = vsub.f32 0.0, %v10567_v14 }
 0x527   :  { %2507 = vrot.lane.b32.xlu1 %v2238_v16, %s8306_s8  ;;  %v15560_v16 = vld [vmem:[#allocation68_spill] sm:$0xff] }
 0x528   :  { %v2319_v28 = vmul.f32 %v15560_v16, %v2255_v8 }
 0x52b   :  { %2511 = vrot.lane.b32.xlu1 %v2240_v49, %s8306_s8  ;;  %v2316_v49 = vmul.f32 %v15561_v19, %v2252_v61 }
 0x559   :  { %v2402_v57 = vpop.permute.xlu0 %2401 }
 0x55a   :  { %v2449_v44 = vadd.f32 %v2402_v57, %v2305_v54  ;;  %v2254_v57 = vsub.f32 0.0, %v10574_v20 }
 0x55c   :  { %2545 = vrot.lane.b32.xlu0 %v2449_v44, %s8307_s9 }
 0x55d   :  { %v2406_v35 = vpop.permute.xlu0 %2405 }
 0x55e   :  { %v2451_v4 = vadd.f32 %v2406_v35, %v2307_v13  ;;  %v15562_v13 = vld [vmem:[#allocation76_spill] sm:$0xff]  ;;  %v2256_v35 = vsub.f32 0.0, %v10580_v18  ;;  %v15567_v18 = vld [vmem:[#allocation9_spill] sm:$0xff] }
 0x55f   :  { %v2318_v27 = vmul.f32 %v15562_v13, %v2254_v57 }
 0x560   :  { %2549 = vrot.lane.b32.xlu0 %v2451_v4, %s8307_s9  ;;  %v2320_v4 = vmul.f32 %v15563_v59, %v2256_v35 }
 0x561   :  { %v2410_v36 = vpop.permute.xlu0 %2409  ;;  %v2404_v41 = vpop.permute.xlu1 %2403 }
 0x562   :  { %v2453_v39 = vadd.f32 %v2410_v36, %v2309_v38  ;;  %v2450_v63 = vadd.f32 %v2404_v41, %v2306_v29  ;;  %v15564_v38 = vld [vmem:[#allocation5_spill] sm:$0xff]  ;;  %v15565_v36 = vld [vmem:[#allocation34_spill] sm:$0xff] }
 0x563   :  { %v15566_v41 = vld [vmem:[#allocation61_spill] sm:$0xff] }
 0x564   :  { %2553 = vrot.lane.b32.xlu0 %v2453_v39, %s8307_s9  ;;  %2547 = vrot.lane.b32.xlu1 %v2450_v63, %s8307_s9  ;;  %v15570_v39 = vld [vmem:[#allocation8_spill] sm:$0xff] }
 0x565   :  { %v2414_v26 = vpop.permute.xlu0 %2413  ;;  %v2408_v45 = vpop.permute.xlu1 %2407  ;;  %v15571_v63 = vld [vmem:[#allocation64_spill] sm:$0xff] }
 0x566   :  { %v2455_v22 = vadd.f32 %v2414_v26, %v2311_v11  ;;  %v2452_v17 = vadd.f32 %v2408_v45, %v2308_v10  ;;  %v15572_v11 = vld [vmem:[#allocation49_spill] sm:$0xff]  ;;  %v15575_v26 = vld [vmem:[#allocation14_spill] sm:$0xff] }
 0x567   :  { %v15574_v10 = vld [vmem:[#allocation65_spill] sm:$0xff] }
 0x568   :  { %2557 = vrot.lane.b32.xlu0 %v2455_v22, %s8307_s9  ;;  %2551 = vrot.lane.b32.xlu1 %v2452_v17, %s8307_s9  ;;  %v15576_v45 = vld [vmem:[#allocation89_spill] sm:$0xff]  ;;  %v15579_v17 = vld [vmem:[#allocation91_spill] sm:$0xff] }
 0x569   :  { %v2418_v30 = vpop.permute.xlu0 %2417  ;;  %v2412_v47 = vpop.permute.xlu1 %2411 }
 0x56a   :  { %v2457_v31 = vadd.f32 %v2418_v30, %v2313_v58  ;;  %v2454_v24 = vadd.f32 %v2412_v47, %v2310_v51 }
 0x56c   :  { %2561 = vrot.lane.b32.xlu0 %v2457_v31, %s8307_s9  ;;  %2555 = vrot.lane.b32.xlu1 %v2454_v24, %s8307_s9 }
 0x56d   :  { %v2422_v37 = vpop.permute.xlu0 %2421  ;;  %v2416_v60 = vpop.permute.xlu1 %2415 }
 0x56e   :  { %v2459_v23 = vadd.f32 %v2422_v37, %v2315_v21  ;;  %v2456_v1 = vadd.f32 %v2416_v60, %v2312_v6 }
 0x570   :  { %2565 = vrot.lane.b32.xlu0 %v2459_v23, %s8307_s9  ;;  %2559 = vrot.lane.b32.xlu1 %v2456_v1, %s8307_s9 }
 0x571   :  { %v2426_v34 = vpop.permute.xlu0 %2425  ;;  %v2420_v5 = vpop.permute.xlu1 %2419 }
 0x572   :  { %v2461_v52 = vadd.f32 %v2426_v34, %v2317_v15  ;;  %v2458_v46 = vadd.f32 %v2420_v5, %v2314_v0 }
 0x574   :  { %2569 = vrot.lane.b32.xlu0 %v2461_v52, %s8307_s9  ;;  %2563 = vrot.lane.b32.xlu1 %v2458_v46, %s8307_s9 }
 0x575   :  { %v2430_v56 = vpop.permute.xlu0 %2429  ;;  %v2424_v54 = vpop.permute.xlu1 %2423 }
 0x576   :  { %v2463_v7 = vadd.f32 %v2430_v56, %v2319_v28  ;;  %v2460_v44 = vadd.f32 %v2424_v54, %v2316_v49 }
 0x578   :  { %2573 = vrot.lane.b32.xlu0 %v2463_v7, %s8307_s9  ;;  %2567 = vrot.lane.b32.xlu1 %v2460_v44, %s8307_s9 }
 0x579   :  { %v2428_v14 = vpop.permute.xlu1 %2427  ;;  %v2482_v22 = vpop.permute.xlu0 %2481 }
 0x57a   :  { %v2462_v53 = vadd.f32 %v2428_v14, %v2318_v27 }
 0x57c   :  { %2706 = vrot.lane.b32.xlu0 %v15564_v38, %s8310_s26  ;;  %2571 = vrot.lane.b32.xlu1 %v2462_v53, %s8307_s9 }
 0x57d   :  { %v2432_v20 = vpop.permute.xlu1 %2431  ;;  %v2486_v43 = vpop.permute.xlu0 %2485 }
 0x57e   :  { %v2464_v29 = vadd.f32 %v2432_v20, %v2320_v4 }
 0x580   :  { %2710 = vrot.lane.b32.xlu0 %v15565_v36, %s8310_s26  ;;  %2575 = vrot.lane.b32.xlu1 %v2464_v29, %s8307_s9 }
 0x581   :  { %v2484_v58 = vpop.permute.xlu1 %2483  ;;  %v2490_v62 = vpop.permute.xlu0 %2489 }
 0x584   :  { %2714 = vrot.lane.b32.xlu0 %v15566_v41, %s8310_s26  ;;  %2708 = vrot.lane.b32.xlu1 %v15567_v18, %s8310_s26 }
 0x585   :  { %v2488_v51 = vpop.permute.xlu1 %2487  ;;  %v2494_v30 = vpop.permute.xlu0 %2493 }
 0x588   :  { %2718 = vrot.lane.b32.xlu0 %v15568_v32, %s8310_s26  ;;  %2712 = vrot.lane.b32.xlu1 %v15569_v2, %s8310_s26 }
 0x589   :  { %v2492_v47 = vpop.permute.xlu1 %2491  ;;  %v2498_v25 = vpop.permute.xlu0 %2497 }
 0x58c   :  { %2722 = vrot.lane.b32.xlu0 %v15570_v39, %s8310_s26  ;;  %2716 = vrot.lane.b32.xlu1 %v15571_v63, %s8310_s26 }
 0x58d   :  { %v2496_v40 = vpop.permute.xlu1 %2495  ;;  %v2502_v31 = vpop.permute.xlu0 %2501 }
 0x590   :  { %2726 = vrot.lane.b32.xlu0 %v15572_v11, %s8310_s26  ;;  %2720 = vrot.lane.b32.xlu1 %v15573_v12, %s8310_s26 }
 0x591   :  { %v2500_v24 = vpop.permute.xlu1 %2499  ;;  %v2506_v21 = vpop.permute.xlu0 %2505 }
 0x594   :  { %2730 = vrot.lane.b32.xlu0 %v15574_v10, %s8310_s26  ;;  %2724 = vrot.lane.b32.xlu1 %v15575_v26, %s8310_s26  ;;  %v15613_v26 = vld [vmem:[#allocation18_spill] sm:$0xff] }
 0x595   :  { %v10989_v48 = vpop.permute.xlu1 %2503  ;;  %v10991_v6 = vpop.permute.xlu0 %2509 }
 0x598   :  { %2734 = vrot.lane.b32.xlu0 %v15576_v45, %s8310_s26  ;;  %2728 = vrot.lane.b32.xlu1 %v15577_v3, %s8310_s26 }
 0x599   :  { %v10993_v37 = vpop.permute.xlu1 %2507 }
 0x59c   :  { %2732 = vrot.lane.b32.xlu1 %v15578_v42, %s8310_s26 }
 0x59d   :  { %v10996_v23 = vpop.permute.xlu1 %2511 }
 0x5a0   :  { %2736 = vrot.lane.b32.xlu1 %v15579_v17, %s8310_s26 }
 0x5ce   :  { %v2546_v60 = vpop.permute.xlu0 %2545 }
 0x5cf   :  { %v2593_v9 = vsel %vm830_vm3, %v2482_v22, %v2546_v60 }
 0x5d0   :  { %v2609_v33 = vmul.f32 0.25, %v2593_v9 }
 0x5d2   :  { %v7382_v1 = vpack.c.bf16 %v2609_v33, %v2609_v33  ;;  %v2550_v50 = vpop.permute.xlu0 %2549 }
 0x5d3   :  { %v2595_v15 = vsel %vm830_vm3, %v2486_v43, %v2550_v50 }
 0x5d4   :  { %7110 = vst.msk [vmem:[%s15011_s5 + $0x40] sm:$0xf] %vm927_vm1, %v7382_v1  ;;  %v2611_v55 = vmul.f32 0.25, %v2595_v15 }
 0x5d6   :  { %v7384_v0 = vpack.c.bf16 %v2611_v55, %v2611_v55  ;;  %v2554_v34 = vpop.permute.xlu0 %2553  ;;  %v2548_v5 = vpop.permute.xlu1 %2547 }
 0x5d7   :  { %v2597_v8 = vsel %vm830_vm3, %v2490_v62, %v2554_v34  ;;  %v2594_v61 = vsel %vm830_vm3, %v2484_v58, %v2548_v5 }
 0x5d8   :  { %7112 = vst.msk [vmem:[%s15011_s5 + $0x48] sm:$0xf] %vm927_vm1, %v7384_v0  ;;  %v2613_v52 = vmul.f32 0.25, %v2597_v8  ;;  %v2610_v46 = vmul.f32 0.25, %v2594_v61 }
 0x5da   :  { %v7386_v16 = vpack.c.bf16 %v2613_v52, %v2613_v52  ;;  %v7383_v28 = vpack.c.bf16 %v2610_v46, %v2610_v46  ;;  %v2558_v19 = vpop.permute.xlu0 %2557  ;;  %v2552_v49 = vpop.permute.xlu1 %2551 }
 0x5db   :  { %v2599_v56 = vsel %vm830_vm3, %v2494_v30, %v2558_v19  ;;  %v2596_v54 = vsel %vm830_vm3, %v2488_v51, %v2552_v49 }
 0x5dc   :  { %7114 = vst.msk [vmem:[%s15011_s5 + $0x50] sm:$0xf] %vm927_vm1, %v7386_v16  ;;  %7111 = vst.msk [vmem:[%s15011_s5 + $0x44] sm:$0xf] %vm927_vm1, %v7383_v28  ;;  %v2615_v57 = vmul.f32 0.25, %v2599_v56  ;;  %v2612_v7 = vmul.f32 0.25, %v2596_v54 }
 0x5de   :  { %v7388_v44 = vpack.c.bf16 %v2615_v57, %v2615_v57  ;;  %v7385_v13 = vpack.c.bf16 %v2612_v7, %v2612_v7  ;;  %v2562_v27 = vpop.permute.xlu0 %2561  ;;  %v2556_v14 = vpop.permute.xlu1 %2555 }
 0x5df   :  { %v2601_v35 = vsel %vm830_vm3, %v2498_v25, %v2562_v27  ;;  %v2598_v53 = vsel %vm830_vm3, %v2492_v47, %v2556_v14 }
 0x5e0   :  { %7116 = vst.msk [vmem:[%s15011_s5 + $0x58] sm:$0xf] %vm927_vm1, %v7388_v44  ;;  %7113 = vst.msk [vmem:[%s15011_s5 + $0x4c] sm:$0xf] %vm927_vm1, %v7385_v13  ;;  %v2617_v59 = vmul.f32 0.25, %v2601_v35  ;;  %v2614_v4 = vmul.f32 0.25, %v2598_v53 }
 0x5e2   :  { %v7390_v20 = vpack.c.bf16 %v2617_v59, %v2617_v59  ;;  %v7387_v29 = vpack.c.bf16 %v2614_v4, %v2614_v4  ;;  %v2566_v22 = vpop.permute.xlu0 %2565  ;;  %v2560_v43 = vpop.permute.xlu1 %2559 }
 0x5e3   :  { %v2603_v58 = vsel %vm830_vm3, %v2502_v31, %v2566_v22  ;;  %v2600_v62 = vsel %vm830_vm3, %v2496_v40, %v2560_v43 }
 0x5e4   :  { %7118 = vst.msk [vmem:[%s15011_s5 + $0x60] sm:$0xf] %vm927_vm1, %v7390_v20  ;;  %7115 = vst.msk [vmem:[%s15011_s5 + $0x54] sm:$0xf] %vm927_vm1, %v7387_v29  ;;  %v2619_v51 = vmul.f32 0.25, %v2603_v58  ;;  %v2616_v30 = vmul.f32 0.25, %v2600_v62 }
 0x5e6   :  { %v7392_v47 = vpack.c.bf16 %v2619_v51, %v2619_v51  ;;  %v7389_v25 = vpack.c.bf16 %v2616_v30, %v2616_v30  ;;  %v2570_v60 = vpop.permute.xlu0 %2569  ;;  %v2564_v9 = vpop.permute.xlu1 %2563 }
 0x5e7   :  { %v2605_v31 = vsel %vm830_vm3, %v2506_v21, %v2570_v60  ;;  %v2602_v40 = vsel %vm830_vm3, %v2500_v24, %v2564_v9 }
 0x5e8   :  { %7120 = vst.msk [vmem:[%s15011_s5 + $0x68] sm:$0xf] %vm927_vm1, %v7392_v47  ;;  %7117 = vst.msk [vmem:[%s15011_s5 + $0x5c] sm:$0xf] %vm927_vm1, %v7389_v25  ;;  %v2621_v33 = vmul.f32 0.25, %v2605_v31  ;;  %v2618_v1 = vmul.f32 0.25, %v2602_v40 }
 0x5ea   :  { %v7394_v50 = vpack.c.bf16 %v2621_v33, %v2621_v33  ;;  %v7391_v15 = vpack.c.bf16 %v2618_v1, %v2618_v1  ;;  %v2574_v55 = vpop.permute.xlu0 %2573  ;;  %v2568_v0 = vpop.permute.xlu1 %2567 }
 0x5eb   :  { %v2607_v21 = vsel %vm830_vm3, %v10991_v6, %v2574_v55  ;;  %v2604_v24 = vsel %vm830_vm3, %v10989_v48, %v2568_v0  ;;  %v15580_v55 = vld [vmem:[#allocation60_spill] sm:$0xff]  ;;  %v11102_v0 = vld [vmem:[%s15008_s3 + $0x10] sm:$0xff] }
 0x5ec   :  { %7122 = vst.msk [vmem:[%s15011_s5 + $0x70] sm:$0xf] %vm927_vm1, %v7394_v50  ;;  %7119 = vst.msk [vmem:[%s15011_s5 + $0x64] sm:$0xf] %vm927_vm1, %v7391_v15  ;;  %v2623_v34 = vmul.f32 0.25, %v2607_v21  ;;  %v2620_v5 = vmul.f32 0.25, %v2604_v24 }
 0x5ed   :  { %v15581_v21 = vld [vmem:[#allocation33_spill] sm:$0xff]  ;;  %v11111_v24 = vld [vmem:[%s15008_s3 + $0x18] sm:$0xff] }
 0x5ee   :  { %v7396_v8 = vpack.c.bf16 %v2623_v34, %v2623_v34  ;;  %v7393_v61 = vpack.c.bf16 %v2620_v5, %v2620_v5  ;;  %v2707_v52 = vpop.permute.xlu0 %2706  ;;  %v2572_v46 = vpop.permute.xlu1 %2571  ;;  %v11118_v34 = vld [vmem:[%s15008_s3 + $0x20] sm:$0xff]  ;;  %v11125_v5 = vld [vmem:[%s15008_s3 + $0x28] sm:$0xff] }
 0x5ef   :  { %v2606_v6 = vsel %vm830_vm3, %v10993_v37, %v2572_v46  ;;  %v2754_v48 = vsel %vm284_vm2, %v2707_v52, 0.0  ;;  %v15582_v52 = vld [vmem:[#allocation63_spill] sm:$0xff] }
 0x5f0   :  { %7124 = vst.msk [vmem:[%s15011_s5 + $0x78] sm:$0xf] %vm927_vm1, %v7396_v8  ;;  %7121 = vst.msk [vmem:[%s15011_s5 + $0x6c] sm:$0xf] %vm927_vm1, %v7393_v61  ;;  %v2622_v16 = vmul.f32 0.25, %v2606_v6  ;;  %2755 = vadd.xlane.f32.xlu0 %v2754_v48  ;;  %v11132_v8 = vld [vmem:[%s15008_s3 + $0x30] sm:$0xff] }
 0x5f1   :  { %v11139_v61 = vld [vmem:[%s15008_s3 + $0x38] sm:$0xff]  ;;  %v15583_v46 = vld [vmem:[#allocation71_spill] sm:$0xff]  ;;  %v11150_v6 = vld [vmem:[%s15008_s3 + $0x50] sm:$0xff] }
 0x5f2   :  { %v7395_v28 = vpack.c.bf16 %v2622_v16, %v2622_v16  ;;  %v2711_v19 = vpop.permute.xlu0 %2710  ;;  %v2576_v49 = vpop.permute.xlu1 %2575  ;;  %v11157_v48 = vld [vmem:[%s15008_s3 + $0x58] sm:$0xff]  ;;  %v11164_v16 = vld [vmem:[%s15008_s3 + $0x60] sm:$0xff] }
 0x5f3   :  { %v2608_v37 = vsel %vm830_vm3, %v10996_v23, %v2576_v49  ;;  %v2760_v56 = vsel %vm284_vm2, %v2711_v19, 0.0  ;;  %v11178_v19 = vld [vmem:[%s15008_s3 + $0x70] sm:$0xff]  ;;  %v11185_v49 = vld [vmem:[%s15008_s3 + $0x78] sm:$0xff] }
 0x5f4   :  { %7123 = vst.msk [vmem:[%s15011_s5 + $0x74] sm:$0xf] %vm927_vm1, %v7395_v28  ;;  %v2624_v54 = vmul.f32 0.25, %v2608_v37  ;;  %2761 = vadd.xlane.f32.xlu0 %v2760_v56  ;;  %v11171_v28 = vld [vmem:[%s15008_s3 + $0x68] sm:$0xff]  ;;  %v15584_v37 = vld [vmem:[#allocation59_spill] sm:$0xff] }
 0x5f5   :  { %v15585_v56 = vld [vmem:[#allocation72_spill] sm:$0xff] }
 0x5f6   :  { %v7397_v57 = vpack.c.bf16 %v2624_v54, %v2624_v54  ;;  %v2715_v7 = vpop.permute.xlu0 %2714  ;;  %v2709_v44 = vpop.permute.xlu1 %2708  ;;  %v15586_v54 = vld [vmem:[#allocation58_spill] sm:$0xff] }
 0x5f7   :  { %v2757_v13 = vsel %vm284_vm2, %v2709_v44, 0.0  ;;  %v2766_v59 = vsel %vm284_vm2, %v2715_v7, 0.0  ;;  %v15588_v7 = vld [vmem:[#allocation69_spill] sm:$0xff] }
 0x5f8   :  { %7125 = vst.msk [vmem:[%s15011_s5 + $0x7c] sm:$0xf] %vm927_vm1, %v7397_v57  ;;  %2758 = vadd.xlane.f32.xlu1 %v2757_v13  ;;  %v15587_v57 = vld [vmem:[#allocation100_spill] sm:$0xff]  ;;  %v15589_v44 = vld [vmem:[#allocation105_spill] sm:$0xff] }
 0x5f9   :  { %v15590_v13 = vld [vmem:[#allocation97_spill] sm:$0xff] }
 0x5fa   :  { %v2719_v23 = vpop.permute.xlu0 %2718  ;;  %v2713_v27 = vpop.permute.xlu1 %2712 }
 0x5fb   :  { %v2763_v14 = vsel %vm284_vm2, %v2713_v27, 0.0  ;;  %v2772_v29 = vsel %vm284_vm2, %v2719_v23, 0.0  ;;  %v15591_v23 = vld [vmem:[#allocation55_spill] sm:$0xff] }
 0x5fc   :  { %2764 = vadd.xlane.f32.xlu0 %v2763_v14  ;;  %v15592_v27 = vld [vmem:[#allocation51_spill] sm:$0xff]  ;;  %v15593_v14 = vld [vmem:[#allocation32_spill] sm:$0xff] }
 0x5fe   :  { %v2723_v35 = vpop.permute.xlu0 %2722  ;;  %v2717_v53 = vpop.permute.xlu1 %2716 }
 0x5ff   :  { %v2769_v4 = vsel %vm284_vm2, %v2717_v53, 0.0  ;;  %v2778_v62 = vsel %vm284_vm2, %v2723_v35, 0.0  ;;  %v15594_v35 = vld [vmem:[#allocation108_spill] sm:$0xff] }
 0x600   :  { %2767 = vadd.xlane.f32.xlu0 %v2766_v59  ;;  %2770 = vadd.xlane.f32.xlu1 %v2769_v4  ;;  %v15595_v53 = vld [vmem:[#allocation56_spill] sm:$0xff]  ;;  %v15596_v59 = vld [vmem:[#allocation43_spill] sm:$0xff] }
 0x601   :  { %v15597_v4 = vld [vmem:[#allocation44_spill] sm:$0xff] }
 0x602   :  { %v2721_v20 = vpop.permute.xlu1 %2720  ;;  %v2727_v43 = vpop.permute.xlu0 %2726 }
 0x603   :  { %v2775_v22 = vsel %vm284_vm2, %v2721_v20, 0.0  ;;  %v2784_v25 = vsel %vm284_vm2, %v2727_v43, 0.0  ;;  %v15598_v20 = vld [vmem:[#allocation53_spill] sm:$0xff] }
 0x604   :  { %2773 = vadd.xlane.f32.xlu0 %v2772_v29  ;;  %2776 = vadd.xlane.f32.xlu1 %v2775_v22  ;;  %v15599_v29 = vld [vmem:[#allocation57_spill] sm:$0xff] }
 0x606   :  { %v2725_v58 = vpop.permute.xlu1 %2724  ;;  %v2731_v30 = vpop.permute.xlu0 %2730 }
 0x607   :  { %v2781_v51 = vsel %vm284_vm2, %v2725_v58, 0.0  ;;  %v2790_v31 = vsel %vm284_vm2, %v2731_v30, 0.0 }
 0x608   :  { %2779 = vadd.xlane.f32.xlu0 %v2778_v62  ;;  %2782 = vadd.xlane.f32.xlu1 %v2781_v51 }
 0x60a   :  { %v2729_v47 = vpop.permute.xlu1 %2728  ;;  %v2735_v33 = vpop.permute.xlu0 %2734 }
 0x60b   :  { %v2787_v60 = vsel %vm284_vm2, %v2729_v47, 0.0  ;;  %v2796_v50 = vsel %vm284_vm2, %v2735_v33, 0.0 }
 0x60c   :  { %2785 = vadd.xlane.f32.xlu0 %v2784_v25  ;;  %2788 = vadd.xlane.f32.xlu1 %v2787_v60 }
 0x60e   :  { %v2733_v9 = vpop.permute.xlu1 %2732 }
 0x60f   :  { %v2793_v40 = vsel %vm284_vm2, %v2733_v9, 0.0 }
 0x610   :  { %2791 = vadd.xlane.f32.xlu0 %v2790_v31  ;;  %2794 = vadd.xlane.f32.xlu1 %v2793_v40 }
 0x612   :  { %v2737_v1 = vpop.permute.xlu1 %2736 }
 0x613   :  { %v2799_v15 = vsel %vm284_vm2, %v2737_v1, 0.0 }
 0x614   :  { %2797 = vadd.xlane.f32.xlu0 %v2796_v50  ;;  %2800 = vadd.xlane.f32.xlu1 %v2799_v15 }
 0x625   :  { %2868 = vrot.lane.b32.xlu1 %v15580_v55, %s8311_s15 }
 0x629   :  { %2870 = vrot.lane.b32.xlu1 %v11102_v0, %s8311_s15 }
 0x62a   :  { %2866 = vrot.lane.b32.xlu0 %v15581_v21, %s8311_s15 }
 0x62d   :  { %2872 = vrot.lane.b32.xlu1 %v11111_v24, %s8311_s15 }
 0x62e   :  { %2874 = vrot.lane.b32.xlu0 %v11118_v34, %s8311_s15 }
 0x631   :  { %2876 = vrot.lane.b32.xlu1 %v11125_v5, %s8311_s15 }
 0x632   :  { %2878 = vrot.lane.b32.xlu0 %v11132_v8, %s8311_s15 }
 0x635   :  { %2880 = vrot.lane.b32.xlu1 %v11139_v61, %s8311_s15 }
 0x636   :  { %2882 = vrot.lane.b32.xlu0 %v15582_v52, %s8311_s15 }
 0x639   :  { %2884 = vrot.lane.b32.xlu1 %v15583_v46, %s8311_s15 }
 0x63a   :  { %2886 = vrot.lane.b32.xlu0 %v11150_v6, %s8311_s15 }
 0x63d   :  { %2888 = vrot.lane.b32.xlu1 %v11157_v48, %s8311_s15 }
 0x63e   :  { %2890 = vrot.lane.b32.xlu0 %v11164_v16, %s8311_s15 }
 0x641   :  { %2892 = vrot.lane.b32.xlu1 %v11171_v28, %s8311_s15 }
 0x642   :  { %2894 = vrot.lane.b32.xlu0 %v11178_v19, %s8311_s15 }
 0x645   :  { %2896 = vrot.lane.b32.xlu1 %v11185_v49, %s8311_s15 }
 0x646   :  { %2930 = vrot.lane.b32.xlu0 %v15584_v37, %s8312_s22 }
 0x649   :  { %2932 = vrot.lane.b32.xlu1 %v15585_v56, %s8312_s22 }
 0x64a   :  { %2934 = vrot.lane.b32.xlu0 %v15586_v54, %s8312_s22 }
 0x64d   :  { %2936 = vrot.lane.b32.xlu1 %v15587_v57, %s8312_s22 }
 0x64e   :  { %2938 = vrot.lane.b32.xlu0 %v15588_v7, %s8312_s22 }
 0x651   :  { %2940 = vrot.lane.b32.xlu1 %v15589_v44, %s8312_s22 }
 0x652   :  { %2942 = vrot.lane.b32.xlu0 %v15590_v13, %s8312_s22 }
 0x655   :  { %2944 = vrot.lane.b32.xlu1 %v15591_v23, %s8312_s22 }
 0x656   :  { %2946 = vrot.lane.b32.xlu0 %v15592_v27, %s8312_s22 }
 0x659   :  { %2948 = vrot.lane.b32.xlu1 %v15593_v14, %s8312_s22 }
 0x65a   :  { %2950 = vrot.lane.b32.xlu0 %v15594_v35, %s8312_s22 }
 0x65d   :  { %2952 = vrot.lane.b32.xlu1 %v15595_v53, %s8312_s22 }
 0x65e   :  { %2954 = vrot.lane.b32.xlu0 %v15596_v59, %s8312_s22 }
 0x661   :  { %2956 = vrot.lane.b32.xlu1 %v15597_v4, %s8312_s22 }
 0x662   :  { %2958 = vrot.lane.b32.xlu0 %v15598_v20, %s8312_s22 }
 0x665   :  { %2960 = vrot.lane.b32.xlu1 %v15599_v29, %s8312_s22 }
 0x67d   :  { %v2756_v22 = vpop.xlane.xlu0 %2755 }
 0x67e   :  { %v2802_v37 = vmul.f32 0.0625, %v2756_v22 }
 0x680   :  { %v2818_v57 = vadd.f32 1.1920929e-07, %v2802_v37 }
 0x681   :  { %v2762_v43 = vpop.xlane.xlu0 %2761 }
 0x682   :  { %v2804_v7 = vmul.f32 0.0625, %v2762_v43  ;;  %7930 = vrsqrt.f32 %v2818_v57 }
 0x684   :  { %v2820_v27 = vadd.f32 1.1920929e-07, %v2804_v7 }
 0x685   :  { %v2759_v58 = vpop.xlane.xlu1 %2758 }
 0x686   :  { %v2803_v23 = vmul.f32 0.0625, %v2759_v58  ;;  %7932 = vrsqrt.f32 %v2820_v27 }
 0x688   :  { %v2819_v59 = vadd.f32 1.1920929e-07, %v2803_v23 }
 0x689   :  { %v2765_v62 = vpop.xlane.xlu0 %2764 }
 0x68a   :  { %v2805_v4 = vmul.f32 0.0625, %v2765_v62  ;;  %7934 = vrsqrt.f32 %v2819_v59 }
 0x68c   :  { %v2821_v37 = vadd.f32 1.1920929e-07, %v2805_v4 }
 0x68d   :  { %v2768_v51 = vpop.xlane.xlu0 %2767  ;;  %v2771_v30 = vpop.xlane.xlu1 %2770 }
 0x68e   :  { %v2806_v14 = vmul.f32 0.0625, %v2768_v51  ;;  %v2807_v17 = vmul.f32 0.0625, %v2771_v30  ;;  %v7931_v51 = vpop.eup %7930 }
 0x690   :  { %v2822_v20 = vadd.f32 1.1920929e-07, %v2806_v14  ;;  %v2823_v62 = vadd.f32 1.1920929e-07, %v2807_v17  ;;  %v15600_v14 = vld [vmem:[#allocation3_spill] sm:$0xff]  ;;  %v7933_v59 = vpop.eup %7932 }
 0x691   :  { %v2774_v47 = vpop.xlane.xlu0 %2773  ;;  %v2777_v25 = vpop.xlane.xlu1 %2776  ;;  %v11256_v42 = vmul.f32 %v7931_v51, %v15600_v14 }
 0x692   :  { %v2808_v29 = vmul.f32 0.0625, %v2774_v47  ;;  %7936 = vrsqrt.f32 %v2822_v20  ;;  %v2809_v23 = vmul.f32 0.0625, %v2777_v25  ;;  %v15601_v25 = vld [vmem:[#allocation15_spill] sm:$0xff] }
 0x693   :  { %7938 = vrsqrt.f32 %v2821_v37 }
 0x694   :  { %v2824_v58 = vadd.f32 1.1920929e-07, %v2808_v29  ;;  %v7935_v17 = vpop.eup %7934 }
 0x695   :  { %v2780_v60 = vpop.xlane.xlu0 %2779  ;;  %v2783_v9 = vpop.xlane.xlu1 %2782 }
 0x696   :  { %v2810_v57 = vmul.f32 0.0625, %v2780_v60  ;;  %7940 = vrsqrt.f32 %v2824_v58  ;;  %v2825_v60 = vadd.f32 1.1920929e-07, %v2809_v23  ;;  %v2811_v20 = vmul.f32 0.0625, %v2783_v9 }
 0x697   :  { %7942 = vrsqrt.f32 %v2823_v62  ;;  %v11262_v58 = vmul.f32 %v7933_v59, %v15601_v25  ;;  %v15603_v59 = vld [vmem:[#allocation23_spill] sm:$0xff] }
 0x698   :  { %v2826_v47 = vadd.f32 1.1920929e-07, %v2810_v57  ;;  %v2827_v14 = vadd.f32 1.1920929e-07, %v2811_v20 }
 0x699   :  { %v2786_v31 = vpop.xlane.xlu0 %2785  ;;  %v2789_v40 = vpop.xlane.xlu1 %2788 }
 0x69a   :  { %v2812_v27 = vmul.f32 0.0625, %v2786_v31  ;;  %7944 = vrsqrt.f32 %v2826_v47  ;;  %v2813_v62 = vmul.f32 0.0625, %v2789_v40 }
 0x69b   :  { %7946 = vrsqrt.f32 %v2825_v60 }
 0x69c   :  { %v2828_v10 = vadd.f32 1.1920929e-07, %v2812_v27  ;;  %v7937_v31 = vpop.eup %7936  ;;  %v15602_v27 = vld [vmem:[#allocation6_spill] sm:$0xff]  ;;  %v2829_v40 = vadd.f32 1.1920929e-07, %v2813_v62 }
 0x69d   :  { %v2792_v33 = vpop.xlane.xlu0 %2791  ;;  %v11221_v1 = vpop.xlane.xlu1 %2794  ;;  %v11273_v25 = vmul.f32 %v7937_v31, %v15603_v59  ;;  %v15605_v31 = vld [vmem:[#allocation17_spill] sm:$0xff] }
 0x69e   :  { %v2814_v37 = vmul.f32 0.0625, %v2792_v33  ;;  %7948 = vrsqrt.f32 %v2828_v10  ;;  %v7939_v33 = vpop.eup %7938 }
 0x69f   :  { %7950 = vrsqrt.f32 %v2827_v14  ;;  %v11283_v59 = vmul.f32 %v7939_v33, %v15605_v31  ;;  %v15608_v31 = vld [vmem:[#allocation16_spill] sm:$0xff] }
 0x6a0   :  { %v2830_v23 = vadd.f32 1.1920929e-07, %v2814_v37 }
 0x6a1   :  { %v11223_v50 = vpop.xlane.xlu0 %2797  ;;  %v11225_v15 = vpop.xlane.xlu1 %2800 }
 0x6a2   :  { %v2816_v47 = vmul.f32 0.0625, %v11223_v50  ;;  %7952 = vrsqrt.f32 %v2830_v23  ;;  %v2815_v50 = vmul.f32 0.0625, %v11221_v1 }
 0x6a3   :  { %7954 = vrsqrt.f32 %v2829_v40 }
 0x6a4   :  { %v2832_v37 = vadd.f32 1.1920929e-07, %v2816_v47  ;;  %v2831_v23 = vadd.f32 1.1920929e-07, %v2815_v50  ;;  %v2817_v47 = vmul.f32 0.0625, %v11225_v15 }
 0x6a5   :  { %v11227_v55 = vpop.permute.xlu0 %2866  ;;  %v11229_v21 = vpop.permute.xlu1 %2868 }
 0x6a6   :  { %7956 = vrsqrt.f32 %v2832_v37  ;;  %v2833_v15 = vadd.f32 1.1920929e-07, %v2817_v47  ;;  %v15610_v47 = vld [vmem:[#allocation25_spill] sm:$0xff] }
 0x6a7   :  { %7958 = vrsqrt.f32 %v2831_v23 }
 0x6a8   :  { %7960 = vrsqrt.f32 %v2833_v15 }
 0x6a9   :  { %v11231_v52 = vpop.permute.xlu0 %2874  ;;  %v11233_v46 = vpop.permute.xlu1 %2870 }
 0x6ad   :  { %v11235_v56 = vpop.permute.xlu0 %2878  ;;  %v11237_v54 = vpop.permute.xlu1 %2872 }
 0x6b1   :  { %v11239_v44 = vpop.permute.xlu0 %2882  ;;  %v11241_v13 = vpop.permute.xlu1 %2876 }
 0x6b5   :  { %v11243_v35 = vpop.permute.xlu0 %2886  ;;  %v11245_v53 = vpop.permute.xlu1 %2880 }
 0x6b9   :  { %v11247_v22 = vpop.permute.xlu0 %2890  ;;  %v11249_v43 = vpop.permute.xlu1 %2884 }
 0x6bd   :  { %v11251_v7 = vpop.permute.xlu0 %2894  ;;  %v11253_v45 = vpop.permute.xlu1 %2888 }
 0x6c1   :  { %v2931_v4 = vpop.permute.xlu0 %2930  ;;  %v11258_v30 = vpop.permute.xlu1 %2892 }
 0x6c2   :  { %v2978_v29 = vmul.f32 %v2931_v4, %v11256_v42  ;;  %v11270_v4 = vmul.f32 %v7935_v17, %v15602_v27 }
 0x6c4   :  { %3010 = vrot.lane.b32.xlu0 %v2978_v29, %s8307_s9  ;;  %v7941_v29 = vpop.eup %7940 }
 0x6c5   :  { %v2935_v57 = vpop.permute.xlu0 %2934  ;;  %v11265_v51 = vpop.permute.xlu1 %2896 }
 0x6c6   :  { %v2980_v9 = vmul.f32 %v2935_v57, %v11262_v58  ;;  %v7943_v17 = vpop.eup %7942  ;;  %v15604_v57 = vld [vmem:[#allocation35_spill] sm:$0xff] }
 0x6c7   :  { %v11280_v27 = vmul.f32 %v7941_v29, %v15604_v57  ;;  %v7945_v14 = vpop.eup %7944  ;;  %v15607_v57 = vld [vmem:[#allocation24_spill] sm:$0xff] }
 0x6c8   :  { %3014 = vrot.lane.b32.xlu0 %v2980_v9, %s8307_s9  ;;  %v7947_v29 = vpop.eup %7946 }
 0x6c9   :  { %v2939_v3 = vpop.permute.xlu0 %2938  ;;  %v2933_v60 = vpop.permute.xlu1 %2932 }
 0x6ca   :  { %v2982_v20 = vmul.f32 %v2939_v3, %v11273_v25  ;;  %v2979_v10 = vmul.f32 %v2933_v60, %v11270_v4  ;;  %v15606_v60 = vld [vmem:[#allocation4_spill] sm:$0xff]  ;;  %v7949_v40 = vpop.eup %7948 }
 0x6cb   :  { %v11291_v33 = vmul.f32 %v7945_v14, %v15606_v60  ;;  %v7951_v37 = vpop.eup %7950  ;;  %v11301_v14 = vmul.f32 %v7949_v40, %v15608_v31  ;;  %v15609_v60 = vld [vmem:[#allocation37_spill] sm:$0xff]  ;;  %v15611_v40 = vld [vmem:[#allocation7_spill] sm:$0xff] }
 0x6cc   :  { %3018 = vrot.lane.b32.xlu0 %v2982_v20, %s8307_s9  ;;  %3012 = vrot.lane.b32.xlu1 %v2979_v10, %s8307_s9  ;;  %v11294_v20 = vmul.f32 %v7943_v17, %v15607_v57  ;;  %v11304_v17 = vmul.f32 %v7947_v29, %v15609_v60  ;;  %v11314_v31 = vmul.f32 %v7951_v37, %v15611_v40 }
 0x6cd   :  { %v2943_v62 = vpop.permute.xlu0 %2942  ;;  %v2937_v3 = vpop.permute.xlu1 %2936 }
 0x6ce   :  { %v2984_v9 = vmul.f32 %v2943_v62, %v11280_v27  ;;  %v2981_v1 = vmul.f32 %v2937_v3, %v11283_v59 }
 0x6d0   :  { %3022 = vrot.lane.b32.xlu0 %v2984_v9, %s8307_s9  ;;  %3016 = vrot.lane.b32.xlu1 %v2981_v1, %s8307_s9  ;;  %v7953_v9 = vpop.eup %7952 }
 0x6d1   :  { %v2947_v10 = vpop.permute.xlu0 %2946  ;;  %v2941_v62 = vpop.permute.xlu1 %2940  ;;  %v11311_v11 = vmul.f32 %v7953_v9, %v15610_v47 }
 0x6d2   :  { %v2986_v3 = vmul.f32 %v2947_v10, %v11291_v33  ;;  %v2983_v50 = vmul.f32 %v2941_v62, %v11294_v20  ;;  %v7955_v23 = vpop.eup %7954 }
 0x6d3   :  { %v7957_v29 = vpop.eup %7956  ;;  %v11324_v9 = vmul.f32 %v7955_v23, %v15613_v26  ;;  %v11422_v26 = vld [vmem:[%s15006_s4 + $0x48] sm:$0xff] }
 0x6d4   :  { %3026 = vrot.lane.b32.xlu0 %v2986_v3, %s8307_s9  ;;  %3020 = vrot.lane.b32.xlu1 %v2983_v50, %s8307_s9  ;;  %v7959_v37 = vpop.eup %7958  ;;  %15627 = vst [vmem:[#allocation106_spill] sm:$0xff] %v11422_v26 }
 0x6d5   :  { %v2951_v1 = vpop.permute.xlu0 %2950  ;;  %v2945_v57 = vpop.permute.xlu1 %2944 }
 0x6d6   :  { %v2988_v10 = vmul.f32 %v2951_v1, %v11301_v14  ;;  %v2985_v62 = vmul.f32 %v2945_v57, %v11304_v17  ;;  %v15612_v57 = vld [vmem:[#allocation39_spill] sm:$0xff]  ;;  %v7961_v23 = vpop.eup %7960 }
 0x6d7   :  { %v11321_v15 = vmul.f32 %v7957_v29, %v15612_v57  ;;  %v11415_v57 = vld [vmem:[%s15006_s4 + $0x60] sm:$0xff] }
 0x6d8   :  { %3030 = vrot.lane.b32.xlu0 %v2988_v10, %s8307_s9  ;;  %3024 = vrot.lane.b32.xlu1 %v2985_v62, %s8307_s9  ;;  %15626 = vst [vmem:[#allocation103_spill] sm:$0xff] %v11415_v57 }
 0x6d9   :  { %v2955_v3 = vpop.permute.xlu0 %2954  ;;  %v2949_v50 = vpop.permute.xlu1 %2948 }
 0x6da   :  { %v2990_v60 = vmul.f32 %v2955_v3, %v11311_v11  ;;  %v2987_v1 = vmul.f32 %v2949_v50, %v11314_v31  ;;  %v15614_v3 = vld [vmem:[#allocation27_spill] sm:$0xff]  ;;  %v15615_v50 = vld [vmem:[#allocation42_spill] sm:$0xff] }
 0x6db   :  { %v11331_v39 = vmul.f32 %v7959_v37, %v15614_v3  ;;  %v11351_v37 = vld [vmem:[%s15006_s4 + $0x10] sm:$0xff]  ;;  %v11408_v3 = vld [vmem:[%s15006_s4 + $0x38] sm:$0xff] }
 0x6dc   :  { %3034 = vrot.lane.b32.xlu0 %v2990_v60, %s8307_s9  ;;  %3028 = vrot.lane.b32.xlu1 %v2987_v1, %s8307_s9  ;;  %v11337_v1 = vmul.f32 %v7961_v23, %v15615_v50  ;;  %15617 = vst [vmem:[#allocation109_spill] sm:$0xff] %v11351_v37  ;;  %v11366_v23 = vld [vmem:[%s15006_s4 + $0x8] sm:$0xff]  ;;  %v11401_v50 = vld [vmem:[%s15006_s4 + $0x50] sm:$0xff]  ;;  %15625 = vst [vmem:[#allocation78_spill] sm:$0xff] %v11408_v3 }
 0x6dd   :  { %v2959_v10 = vpop.permute.xlu0 %2958  ;;  %v2953_v62 = vpop.permute.xlu1 %2952  ;;  %15619 = vst [vmem:[#allocation79_spill] sm:$0xff] %v11366_v23  ;;  %15624 = vst [vmem:[#allocation83_spill] sm:$0xff] %v11401_v50 }
 0x6de   :  { %v2992_v47 = vmul.f32 %v2959_v10, %v11321_v15  ;;  %v2989_v40 = vmul.f32 %v2953_v62, %v11324_v9  ;;  %v11342_v10 = vld [vmem:[%s15006_s4] sm:$0xff] }
 0x6df   :  { %15616 = vst [vmem:[#allocation104_spill] sm:$0xff] %v11342_v10  ;;  %v11359_v62 = vld [vmem:[%s15006_s4 + $0x20] sm:$0xff] }
 0x6e0   :  { %3038 = vrot.lane.b32.xlu0 %v2992_v47, %s8307_s9  ;;  %3032 = vrot.lane.b32.xlu1 %v2989_v40, %s8307_s9  ;;  %15618 = vst [vmem:[#allocation112_spill] sm:$0xff] %v11359_v62 }
 0x6e1   :  { %v2957_v29 = vpop.permute.xlu1 %2956 }
 0x6e2   :  { %v2991_v60 = vmul.f32 %v2957_v29, %v11331_v39  ;;  %v11373_v29 = vld [vmem:[%s15006_s4 + $0x30] sm:$0xff] }
 0x6e3   :  { %15620 = vst [vmem:[#allocation66_spill] sm:$0xff] %v11373_v29 }
 0x6e4   :  { %3090 = vrot.lane.b32.xlu0 %v11342_v10, %s8311_s15  ;;  %3036 = vrot.lane.b32.xlu1 %v2991_v60, %s8307_s9  ;;  %v11380_v60 = vld [vmem:[%s15006_s4 + $0x18] sm:$0xff] }
 0x6e5   :  { %v2961_v47 = vpop.permute.xlu1 %2960  ;;  %15621 = vst [vmem:[#allocation70_spill] sm:$0xff] %v11380_v60 }
 0x6e6   :  { %v2993_v40 = vmul.f32 %v2961_v47, %v11337_v1  ;;  %v11387_v47 = vld [vmem:[%s15006_s4 + $0x40] sm:$0xff] }
 0x6e7   :  { %15622 = vst [vmem:[#allocation119_spill] sm:$0xff] %v11387_v47 }
 0x6e8   :  { %3094 = vrot.lane.b32.xlu0 %v11351_v37, %s8311_s15  ;;  %3040 = vrot.lane.b32.xlu1 %v2993_v40, %s8307_s9  ;;  %v11394_v40 = vld [vmem:[%s15006_s4 + $0x28] sm:$0xff] }
 0x6e9   :  { %15623 = vst [vmem:[#allocation75_spill] sm:$0xff] %v11394_v40 }
 0x6ec   :  { %3098 = vrot.lane.b32.xlu0 %v11359_v62, %s8311_s15  ;;  %3092 = vrot.lane.b32.xlu1 %v11366_v23, %s8311_s15 }
 0x6f0   :  { %3102 = vrot.lane.b32.xlu0 %v11373_v29, %s8311_s15  ;;  %3096 = vrot.lane.b32.xlu1 %v11380_v60, %s8311_s15 }
 0x6f4   :  { %3106 = vrot.lane.b32.xlu0 %v11387_v47, %s8311_s15  ;;  %3100 = vrot.lane.b32.xlu1 %v11394_v40, %s8311_s15  ;;  %v11468_v47 = vld [vmem:[%s15008_s3 + $0x8] sm:$0xff] }
 0x6f5   :  { %15633 = vst [vmem:[#allocation50_spill] sm:$0xff] %v11468_v47 }
 0x6f8   :  { %3110 = vrot.lane.b32.xlu0 %v11401_v50, %s8311_s15  ;;  %3104 = vrot.lane.b32.xlu1 %v11408_v3, %s8311_s15  ;;  %v11429_v50 = vld [vmem:[%s15006_s4 + $0x70] sm:$0xff] }
 0x6f9   :  { %15628 = vst [vmem:[#allocation36_spill] sm:$0xff] %v11429_v50 }
 0x6fc   :  { %3114 = vrot.lane.b32.xlu0 %v11415_v57, %s8311_s15  ;;  %3108 = vrot.lane.b32.xlu1 %v11422_v26, %s8311_s15  ;;  %v11436_v57 = vld [vmem:[%s15006_s4 + $0x58] sm:$0xff]  ;;  %v11443_v26 = vld [vmem:[%s15008_s3] sm:$0xff] }
 0x6fd   :  { %15629 = vst [vmem:[#allocation111_spill] sm:$0xff] %v11436_v57  ;;  %15630 = vst [vmem:[#allocation113_spill] sm:$0xff] %v11443_v26 }
 0x700   :  { %3118 = vrot.lane.b32.xlu0 %v11429_v50, %s8311_s15  ;;  %3112 = vrot.lane.b32.xlu1 %v11436_v57, %s8311_s15  ;;  %v11450_v50 = vld [vmem:[%s15006_s4 + $0x68] sm:$0xff]  ;;  %v11459_v57 = vld [vmem:[%s15006_s4 + $0x78] sm:$0xff] }
 0x701   :  { %15631 = vst [vmem:[#allocation114_spill] sm:$0xff] %v11450_v50  ;;  %15632 = vst [vmem:[#allocation31_spill] sm:$0xff] %v11459_v57 }
 0x704   :  { %3154 = vrot.lane.b32.xlu0 %v11443_v26, %s8312_s22  ;;  %3116 = vrot.lane.b32.xlu1 %v11450_v50, %s8311_s15 }
 0x708   :  { %3158 = vrot.lane.b32.xlu0 %v11102_v0, %s8312_s22  ;;  %3120 = vrot.lane.b32.xlu1 %v11459_v57, %s8311_s15  ;;  %v11479_v0 = vld [vmem:[%s15008_s3 + $0x40] sm:$0xff] }
 0x709   :  { %15634 = vst [vmem:[#allocation93_spill] sm:$0xff] %v11479_v0 }
 0x70c   :  { %3162 = vrot.lane.b32.xlu0 %v11118_v34, %s8312_s22  ;;  %3156 = vrot.lane.b32.xlu1 %v11468_v47, %s8312_s22 }
 0x710   :  { %3166 = vrot.lane.b32.xlu0 %v11132_v8, %s8312_s22  ;;  %3160 = vrot.lane.b32.xlu1 %v11111_v24, %s8312_s22  ;;  %v11494_v24 = vld [vmem:[%s15008_s3 + $0x48] sm:$0xff] }
 0x711   :  { %15635 = vst [vmem:[#allocation84_spill] sm:$0xff] %v11494_v24 }
 0x714   :  { %3170 = vrot.lane.b32.xlu0 %v11479_v0, %s8312_s22  ;;  %3164 = vrot.lane.b32.xlu1 %v11125_v5, %s8312_s22 }
 0x718   :  { %3174 = vrot.lane.b32.xlu0 %v11150_v6, %s8312_s22  ;;  %3168 = vrot.lane.b32.xlu1 %v11139_v61, %s8312_s22 }
 0x71c   :  { %3178 = vrot.lane.b32.xlu0 %v11164_v16, %s8312_s22  ;;  %3172 = vrot.lane.b32.xlu1 %v11494_v24, %s8312_s22 }
 0x720   :  { %3182 = vrot.lane.b32.xlu0 %v11178_v19, %s8312_s22  ;;  %3176 = vrot.lane.b32.xlu1 %v11157_v48, %s8312_s22 }
 0x724   :  { %3180 = vrot.lane.b32.xlu1 %v11171_v28, %s8312_s22 }
 0x728   :  { %3184 = vrot.lane.b32.xlu1 %v11185_v49, %s8312_s22 }
 0x736   :  { %v11506_v34 = vpop.permute.xlu0 %3010 }
 0x73a   :  { %v11508_v5 = vpop.permute.xlu0 %3014 }
 0x73e   :  { %v11510_v8 = vpop.permute.xlu0 %3018  ;;  %v11512_v61 = vpop.permute.xlu1 %3012 }
 0x742   :  { %v11514_v6 = vpop.permute.xlu0 %3022  ;;  %v11516_v16 = vpop.permute.xlu1 %3016 }
 0x746   :  { %v11518_v19 = vpop.permute.xlu0 %3026  ;;  %v11520_v48 = vpop.permute.xlu1 %3020 }
 0x74a   :  { %v11522_v28 = vpop.permute.xlu0 %3030  ;;  %v11524_v57 = vpop.permute.xlu1 %3024 }
 0x74e   :  { %v11526_v49 = vpop.permute.xlu0 %3034  ;;  %v11528_v50 = vpop.permute.xlu1 %3028 }
 0x752   :  { %v11530_v3 = vpop.permute.xlu0 %3038  ;;  %v11532_v29 = vpop.permute.xlu1 %3032 }
 0x756   :  { %v11534_v40 = vpop.permute.xlu0 %3090  ;;  %v11536_v62 = vpop.permute.xlu1 %3036 }
 0x75a   :  { %v11538_v60 = vpop.permute.xlu0 %3094  ;;  %v11540_v37 = vpop.permute.xlu1 %3040 }
 0x75e   :  { %v11542_v23 = vpop.permute.xlu0 %3098  ;;  %v11544_v10 = vpop.permute.xlu1 %3092 }
 0x762   :  { %v11546_v24 = vpop.permute.xlu0 %3102  ;;  %v11548_v0 = vpop.permute.xlu1 %3096 }
 0x763   :  { %15636 = vst [vmem:[#allocation38_spill] sm:$0xff] %v11546_v24 }
 0x766   :  { %v11550_v26 = vpop.permute.xlu0 %3106  ;;  %v11552_v47 = vpop.permute.xlu1 %3100 }
 0x767   :  { %15637 = vst [vmem:[#allocation118_spill] sm:$0xff] %v11550_v26  ;;  %15638 = vst [vmem:[#allocation52_spill] sm:$0xff] %v11552_v47 }
 0x76a   :  { %v11554_v12 = vpop.permute.xlu0 %3110  ;;  %v11556_v32 = vpop.permute.xlu1 %3104 }
 0x76b   :  { %15639 = vst [vmem:[#allocation77_spill] sm:$0xff] %v11554_v12 }
 0x76e   :  { %v11558_v63 = vpop.permute.xlu0 %3114  ;;  %v11560_v41 = vpop.permute.xlu1 %3108 }
 0x76f   :  { %15640 = vst [vmem:[#allocation85_spill] sm:$0xff] %v11558_v63  ;;  %15641 = vst [vmem:[#allocation115_spill] sm:$0xff] %v11560_v41 }
 0x772   :  { %v11562_v2 = vpop.permute.xlu0 %3118  ;;  %v11564_v36 = vpop.permute.xlu1 %3112 }
 0x773   :  { %15642 = vst [vmem:[#allocation82_spill] sm:$0xff] %v11562_v2  ;;  %15643 = vst [vmem:[#allocation81_spill] sm:$0xff] %v11564_v36 }
 0x776   :  { %v3155_v18 = vpop.permute.xlu0 %3154  ;;  %v11566_v38 = vpop.permute.xlu1 %3116 }
 0x777   :  { %15644 = vst [vmem:[#allocation96_spill] sm:$0xff] %v11566_v38  ;;  %v3202_v24 = vmul.f32 %v3155_v18, %v11256_v42 }
 0x779   :  { %3234 = vrot.lane.b32.xlu0 %v3202_v24, %s8307_s9 }
 0x77a   :  { %v3159_v26 = vpop.permute.xlu0 %3158  ;;  %v11570_v47 = vpop.permute.xlu1 %3120 }
 0x77b   :  { %15645 = vst [vmem:[#allocation87_spill] sm:$0xff] %v11570_v47  ;;  %v3204_v12 = vmul.f32 %v3159_v26, %v11262_v58 }
 0x77d   :  { %3238 = vrot.lane.b32.xlu0 %v3204_v12, %s8307_s9 }
 0x77e   :  { %v3163_v63 = vpop.permute.xlu0 %3162  ;;  %v3157_v41 = vpop.permute.xlu1 %3156 }
 0x77f   :  { %v3206_v2 = vmul.f32 %v3163_v63, %v11273_v25  ;;  %v3203_v36 = vmul.f32 %v3157_v41, %v11270_v4 }
 0x781   :  { %3242 = vrot.lane.b32.xlu0 %v3206_v2, %s8307_s9  ;;  %3236 = vrot.lane.b32.xlu1 %v3203_v36, %s8307_s9 }
 0x782   :  { %v3167_v18 = vpop.permute.xlu0 %3166  ;;  %v3161_v38 = vpop.permute.xlu1 %3160 }
 0x783   :  { %v3208_v24 = vmul.f32 %v3167_v18, %v11280_v27  ;;  %v3205_v47 = vmul.f32 %v3161_v38, %v11283_v59 }
 0x785   :  { %3246 = vrot.lane.b32.xlu0 %v3208_v24, %s8307_s9  ;;  %3240 = vrot.lane.b32.xlu1 %v3205_v47, %s8307_s9 }
 0x786   :  { %v3171_v12 = vpop.permute.xlu0 %3170  ;;  %v3165_v26 = vpop.permute.xlu1 %3164 }
 0x787   :  { %v3210_v63 = vmul.f32 %v3171_v12, %v11291_v33  ;;  %v3207_v41 = vmul.f32 %v3165_v26, %v11294_v20 }
 0x789   :  { %3250 = vrot.lane.b32.xlu0 %v3210_v63, %s8307_s9  ;;  %3244 = vrot.lane.b32.xlu1 %v3207_v41, %s8307_s9  ;;  %v2915_v63 = vmul.f32 %v11229_v21, %v11270_v4 }
 0x78a   :  { %v3175_v36 = vpop.permute.xlu0 %3174  ;;  %v3169_v2 = vpop.permute.xlu1 %3168 }
 0x78b   :  { %v3212_v18 = vmul.f32 %v3175_v36, %v11301_v14  ;;  %v3209_v38 = vmul.f32 %v3169_v2, %v11304_v17  ;;  %v2914_v2 = vmul.f32 %v11227_v55, %v11256_v42 }
 0x78d   :  { %3254 = vrot.lane.b32.xlu0 %v3212_v18, %s8307_s9  ;;  %3248 = vrot.lane.b32.xlu1 %v3209_v38, %s8307_s9  ;;  %v3059_v18 = vadd.f32 %v11512_v61, %v2915_v63  ;;  %v3058_v21 = vadd.f32 %v11506_v34, %v2914_v2 }
 0x78e   :  { %v3179_v47 = vpop.permute.xlu0 %3178  ;;  %v3173_v24 = vpop.permute.xlu1 %3172 }
 0x78f   :  { %v3214_v12 = vmul.f32 %v3179_v47, %v11311_v11  ;;  %v3211_v26 = vmul.f32 %v3173_v24, %v11314_v31  ;;  %v2919_v24 = vmul.f32 %v11241_v13, %v11294_v20  ;;  %v7582_v55 = vpack.i.bf16 %v3059_v18, %v3058_v21 }
 0x790   :  { %v2923_v13 = vmul.f32 %v11249_v43, %v11314_v31 }
 0x791   :  { %3258 = vrot.lane.b32.xlu0 %v3214_v12, %s8307_s9  ;;  %3252 = vrot.lane.b32.xlu1 %v3211_v26, %s8307_s9  ;;  %v2918_v26 = vmul.f32 %v11231_v52, %v11273_v25  ;;  %v3063_v61 = vadd.f32 %v11520_v48, %v2919_v24  ;;  %v2916_v52 = vmul.f32 %v11233_v46, %v11262_v58 }
 0x792   :  { %v3183_v41 = vpop.permute.xlu0 %3182  ;;  %v3177_v36 = vpop.permute.xlu1 %3176  ;;  %v2922_v48 = vmul.f32 %v11239_v44, %v11291_v33  ;;  %v2920_v44 = vmul.f32 %v11235_v56, %v11280_v27  ;;  %v2924_v56 = vmul.f32 %v11243_v35, %v11301_v14 }
 0x793   :  { %v3216_v38 = vmul.f32 %v3183_v41, %v11321_v15  ;;  %v3213_v47 = vmul.f32 %v3177_v36, %v11324_v9  ;;  %v2917_v41 = vmul.f32 %v11237_v54, %v11283_v59  ;;  %v3062_v34 = vadd.f32 %v11510_v8, %v2918_v26 }
 0x794   :  { %v3067_v54 = vadd.f32 %v11528_v50, %v2923_v13  ;;  %v2921_v8 = vmul.f32 %v11245_v53, %v11304_v17  ;;  %v3066_v46 = vadd.f32 %v11518_v19, %v2922_v48  ;;  %v2926_v50 = vmul.f32 %v11247_v22, %v11311_v11 }
 0x795   :  { %3262 = vrot.lane.b32.xlu0 %v3216_v38, %s8307_s9  ;;  %3256 = vrot.lane.b32.xlu1 %v3213_v47, %s8307_s9  ;;  %v3061_v2 = vadd.f32 %v11516_v16, %v2917_v41  ;;  %v7592_v18 = vpack.i.bf16 %v3063_v61, %v3062_v34  ;;  %v2927_v38 = vmul.f32 %v11258_v30, %v11331_v39  ;;  %v3075_v61 = vsub.f32 0.0, %v11270_v4 }
 0x796   :  { %v3181_v12 = vpop.permute.xlu1 %3180  ;;  %v3060_v47 = vadd.f32 %v11508_v5, %v2916_v52  ;;  %v3065_v53 = vadd.f32 %v11524_v57, %v2921_v8  ;;  %v7602_v24 = vpack.i.bf16 %v3067_v54, %v3066_v46  ;;  %v2925_v5 = vmul.f32 %v11253_v45, %v11324_v9 }
 0x797   :  { %v3215_v63 = vmul.f32 %v3181_v12, %v11331_v39  ;;  %v3071_v30 = vadd.f32 %v11536_v62, %v2927_v38  ;;  %v3064_v19 = vadd.f32 %v11514_v6, %v2920_v44  ;;  %v3070_v21 = vadd.f32 %v11526_v49, %v2926_v50 }
 0x798   :  { %v7587_v16 = vpack.i.bf16 %v3061_v2, %v3060_v47  ;;  %v3069_v57 = vadd.f32 %v11532_v29, %v2925_v5  ;;  %v2929_v62 = vmul.f32 %v11265_v51, %v11337_v1  ;;  %v3068_v45 = vadd.f32 %v11522_v28, %v2924_v56 }
 0x799   :  { %7583 = vrot.lane.b32.xlu0 %v7582_v55, %s8310_s26  ;;  %3260 = vrot.lane.b32.xlu1 %v3215_v63, %s8307_s9  ;;  %v7597_v22 = vpack.i.bf16 %v3065_v53, %v3064_v19  ;;  %v7612_v12 = vpack.i.bf16 %v3071_v30, %v3070_v21  ;;  %v2928_v6 = vmul.f32 %v11251_v7, %v11321_v15  ;;  %v3074_v28 = vsub.f32 0.0, %v11256_v42  ;;  %v15649_v21 = vld [vmem:[#allocation115_spill] sm:$0xff] }
 0x79a   :  { %v3185_v36 = vpop.permute.xlu1 %3184  ;;  %v7607_v49 = vpack.i.bf16 %v3069_v57, %v3068_v45  ;;  %v3073_v26 = vadd.f32 %v11540_v37, %v2929_v62  ;;  %v3139_v7 = vmul.f32 %v11544_v10, %v3075_v61  ;;  %v3076_v37 = vsub.f32 0.0, %v11262_v58 }
 0x79b   :  { %v3217_v43 = vmul.f32 %v3185_v36, %v11337_v1  ;;  %v3072_v35 = vadd.f32 %v11530_v3, %v2928_v6  ;;  %v3138_v63 = vmul.f32 %v11534_v40, %v3074_v28  ;;  %v3077_v3 = vsub.f32 0.0, %v11283_v59  ;;  %v15646_v59 = vld [vmem:[#allocation52_spill] sm:$0xff]  ;;  %v15651_v6 = vld [vmem:[#allocation81_spill] sm:$0xff] }
 0x79c   :  { %v3140_v48 = vmul.f32 %v11538_v60, %v3076_v37  ;;  %v3078_v4 = vsub.f32 0.0, %v11273_v25  ;;  %v3079_v40 = vsub.f32 0.0, %v11294_v20  ;;  %v3081_v47 = vsub.f32 0.0, %v11304_v17  ;;  %v15647_v20 = vld [vmem:[#allocation38_spill] sm:$0xff] }
 0x79d   :  { %7593 = vrot.lane.b32.xlu0 %v7592_v18, %s8310_s26  ;;  %3264 = vrot.lane.b32.xlu1 %v3217_v43, %s8307_s9  ;;  %v7617_v29 = vpack.i.bf16 %v3073_v26, %v3072_v35  ;;  %v3141_v36 = vmul.f32 %v11548_v0, %v3077_v3  ;;  %v3080_v0 = vsub.f32 0.0, %v11280_v27  ;;  %v15648_v17 = vld [vmem:[#allocation118_spill] sm:$0xff]  ;;  %v3088_v37 = vsub.f32 0.0, %v11321_v15 }
 0x79e   :  { %v3142_v58 = vmul.f32 %v11542_v23, %v3078_v4  ;;  %v3143_v43 = vmul.f32 %v15646_v59, %v3079_v40  ;;  %v3145_v50 = vmul.f32 %v11556_v32, %v3081_v47  ;;  %v3082_v23 = vsub.f32 0.0, %v11291_v33  ;;  %v15656_v15 = vld [vmem:[#allocation10_spill] sm:$0xff]  ;;  %v15666_v47 = vld [vmem:[#allocation20_spill] sm:$0xff] }
 0x79f   :  { %v3144_v44 = vmul.f32 %v15647_v20, %v3080_v0  ;;  %v3085_v32 = vsub.f32 0.0, %v11324_v9  ;;  %v3089_v3 = vsub.f32 0.0, %v11337_v1  ;;  %v15657_v1 = vld [vmem:[#allocation12_spill] sm:$0xff]  ;;  %v15660_v59 = vld [vmem:[#allocation26_spill] sm:$0xff]  ;;  %v15665_v0 = vld [vmem:[#allocation13_spill] sm:$0xff] }
 0x7a0   :  { %v3146_v19 = vmul.f32 %v15648_v17, %v3082_v23  ;;  %v15669_v20 = vld [vmem:[#allocation30_spill] sm:$0xff]  ;;  %v15679_v17 = vld [vmem:[#allocation88_spill] sm:$0xff] }
 0x7a1   :  { %7603 = vrot.lane.b32.xlu0 %v7602_v24, %s8310_s26  ;;  %7588 = vrot.lane.b32.xlu1 %v7587_v16, %s8310_s26  ;;  %v3083_v24 = vsub.f32 0.0, %v11314_v31  ;;  %v15650_v31 = vld [vmem:[#allocation77_spill] sm:$0xff]  ;;  %v15674_v23 = vld [vmem:[#allocation34_spill] sm:$0xff] }
 0x7a3   :  { %v3147_v56 = vmul.f32 %v15649_v21, %v3083_v24  ;;  %v15675_v24 = vld [vmem:[#allocation47_spill] sm:$0xff]  ;;  %v15681_v21 = vld [vmem:[#allocation14_spill] sm:$0xff] }
 0x7a5   :  { %7613 = vrot.lane.b32.xlu0 %v7612_v12, %s8310_s26  ;;  %7598 = vrot.lane.b32.xlu1 %v7597_v22, %s8310_s26  ;;  %v3084_v12 = vsub.f32 0.0, %v11301_v14  ;;  %v15652_v14 = vld [vmem:[#allocation85_spill] sm:$0xff] }
 0x7a7   :  { %v3148_v33 = vmul.f32 %v15650_v31, %v3084_v12  ;;  %v15685_v12 = vld [vmem:[#allocation67_spill] sm:$0xff] }
 0x7a9   :  { %7608 = vrot.lane.b32.xlu1 %v7607_v49, %s8310_s26  ;;  %v3149_v49 = vmul.f32 %v15651_v6, %v3085_v32  ;;  %v15686_v32 = vld [vmem:[#allocation89_spill] sm:$0xff] }
 0x7ad   :  { %7618 = vrot.lane.b32.xlu1 %v7617_v29, %s8310_s26 }
 0x7eb   :  { %v3235_v51 = vpop.permute.xlu0 %3234 }
 0x7ec   :  { %v3282_v34 = vadd.f32 %v3235_v51, %v3138_v63  ;;  %v3086_v51 = vsub.f32 0.0, %v11311_v11  ;;  %v15653_v63 = vld [vmem:[#allocation96_spill] sm:$0xff] }
 0x7ee   :  { %v3150_v9 = vmul.f32 %v15652_v14, %v3086_v51 }
 0x7ef   :  { %v3239_v55 = vpop.permute.xlu0 %3238 }
 0x7f0   :  { %v3284_v10 = vadd.f32 %v3239_v55, %v3140_v48  ;;  %v3087_v55 = vsub.f32 0.0, %v11331_v39  ;;  %v15654_v39 = vld [vmem:[#allocation82_spill] sm:$0xff] }
 0x7f1   :  { %v3152_v48 = vmul.f32 %v15654_v39, %v3088_v37 }
 0x7f3   :  { %v3243_v41 = vpop.permute.xlu0 %3242  ;;  %v3237_v13 = vpop.permute.xlu1 %3236 }
 0x7f4   :  { %v3283_v52 = vadd.f32 %v3237_v13, %v3139_v7  ;;  %v3286_v46 = vadd.f32 %v3243_v41, %v3142_v58  ;;  %v3151_v7 = vmul.f32 %v15653_v63, %v3087_v55  ;;  %v15659_v58 = vld [vmem:[#allocation21_spill] sm:$0xff] }
 0x7f6   :  { %v7622_v2 = vpack.i.bf16 %v3283_v52, %v3282_v34 }
 0x7f7   :  { %v3247_v42 = vpop.permute.xlu0 %3246  ;;  %v3241_v18 = vpop.permute.xlu1 %3240 }
 0x7f8   :  { %v3285_v54 = vadd.f32 %v3241_v18, %v3141_v36  ;;  %7623 = vrot.lane.b32.xlu0 %v7622_v2, %s8313_s24  ;;  %v3288_v30 = vadd.f32 %v3247_v42, %v3144_v44  ;;  %v15655_v36 = vld [vmem:[#allocation87_spill] sm:$0xff]  ;;  %v15670_v44 = vld [vmem:[#allocation45_spill] sm:$0xff] }
 0x7f9   :  { %v3153_v2 = vmul.f32 %v15655_v36, %v3089_v3 }
 0x7fa   :  { %v7627_v8 = vpack.i.bf16 %v3285_v54, %v3284_v10  ;;  %v15658_v54 = vld [vmem:[#allocation19_spill] sm:$0xff] }
 0x7fb   :  { %v3251_v60 = vpop.permute.xlu0 %3250  ;;  %v3245_v38 = vpop.permute.xlu1 %3244 }
 0x7fc   :  { %v3287_v25 = vadd.f32 %v3245_v38, %v3143_v43  ;;  %7628 = vrot.lane.b32.xlu1 %v7627_v8, %s8313_s24  ;;  %v3290_v62 = vadd.f32 %v3251_v60, %v3146_v19  ;;  %v15661_v43 = vld [vmem:[#allocation28_spill] sm:$0xff]  ;;  %v15663_v60 = vld [vmem:[#allocation41_spill] sm:$0xff]  ;;  %v15664_v38 = vld [vmem:[#allocation11_spill] sm:$0xff] }
 0x7fd   :  { %v15662_v8 = vld [vmem:[#allocation40_spill] sm:$0xff] }
 0x7fe   :  { %v7632_v16 = vpack.i.bf16 %v3287_v25, %v3286_v46  ;;  %v15667_v46 = vld [vmem:[#allocation22_spill] sm:$0xff]  ;;  %v15668_v25 = vld [vmem:[#allocation29_spill] sm:$0xff]  ;;  %v15680_v19 = vld [vmem:[#allocation8_spill] sm:$0xff] }
 0x7ff   :  { %v3249_v53 = vpop.permute.xlu1 %3248  ;;  %v3255_v27 = vpop.permute.xlu0 %3254 }
 0x800   :  { %v3289_v5 = vadd.f32 %v3249_v53, %v3145_v50  ;;  %7633 = vrot.lane.b32.xlu0 %v7632_v16, %s8313_s24  ;;  %v3292_v28 = vadd.f32 %v3255_v27, %v3148_v33  ;;  %v15671_v50 = vld [vmem:[#allocation46_spill] sm:$0xff]  ;;  %v15672_v16 = vld [vmem:[#allocation5_spill] sm:$0xff] }
 0x801   :  { %v15673_v53 = vld [vmem:[#allocation9_spill] sm:$0xff]  ;;  %v15678_v27 = vld [vmem:[#allocation86_spill] sm:$0xff] }
 0x802   :  { %v7637_v22 = vpack.i.bf16 %v3289_v5, %v3288_v30  ;;  %v15676_v30 = vld [vmem:[#allocation61_spill] sm:$0xff]  ;;  %v15677_v5 = vld [vmem:[#allocation64_spill] sm:$0xff] }
 0x803   :  { %v3253_v57 = vpop.permute.xlu1 %3252  ;;  %v3259_v35 = vpop.permute.xlu0 %3258 }
 0x804   :  { %v3291_v45 = vadd.f32 %v3253_v57, %v3147_v56  ;;  %7638 = vrot.lane.b32.xlu1 %v7637_v22, %s8313_s24  ;;  %v3294_v34 = vadd.f32 %v3259_v35, %v3150_v9  ;;  %v15682_v56 = vld [vmem:[#allocation49_spill] sm:$0xff]  ;;  %v15683_v22 = vld [vmem:[#allocation48_spill] sm:$0xff] }
 0x805   :  { %v15684_v57 = vld [vmem:[#allocation65_spill] sm:$0xff] }
 0x806   :  { %v7642_v26 = vpack.i.bf16 %v3291_v45, %v3290_v62  ;;  %v15687_v45 = vld [vmem:[#allocation91_spill] sm:$0xff] }
 0x807   :  { %v3257_v29 = vpop.permute.xlu1 %3256  ;;  %v3263_v11 = vpop.permute.xlu0 %3262 }
 0x808   :  { %v3293_v61 = vadd.f32 %v3257_v29, %v3149_v49  ;;  %7643 = vrot.lane.b32.xlu0 %v7642_v26, %s8313_s24  ;;  %v3296_v4 = vadd.f32 %v3263_v11, %v3152_v48 }
 0x80a   :  { %v7647_v41 = vpack.i.bf16 %v3293_v61, %v3292_v28 }
 0x80b   :  { %v3261_v13 = vpop.permute.xlu1 %3260  ;;  %v7584_v62 = vpop.permute.xlu0 %7583 }
 0x80c   :  { %v3295_v52 = vadd.f32 %v3261_v13, %v3151_v7  ;;  %7648 = vrot.lane.b32.xlu1 %v7647_v41, %s8313_s24  ;;  %v7586_v55 = vunpack.i.h.bf16 %v7584_v62  ;;  %v7585_v28 = vunpack.i.l.bf16 %v7584_v62 }
 0x80e   :  { %v7652_v42 = vpack.i.bf16 %v3295_v52, %v3294_v34 }
 0x80f   :  { %v3265_v18 = vpop.permute.xlu1 %3264  ;;  %v7594_v33 = vpop.permute.xlu0 %7593 }
 0x810   :  { %v3297_v40 = vadd.f32 %v3265_v18, %v3153_v2  ;;  %7653 = vrot.lane.b32.xlu0 %v7652_v42, %s8313_s24  ;;  %v7596_v42 = vunpack.i.h.bf16 %v7594_v33  ;;  %v7595_v18 = vunpack.i.l.bf16 %v7594_v33 }
 0x812   :  { %v7657_v10 = vpack.i.bf16 %v3297_v40, %v3296_v4 }
 0x813   :  { %v7589_v31 = vpop.permute.xlu1 %7588  ;;  %v7604_v49 = vpop.permute.xlu0 %7603 }
 0x814   :  { %7658 = vrot.lane.b32.xlu1 %v7657_v10, %s8313_s24  ;;  %3523 = vrot.lane.b32.xlu0 %v15656_v15, %s8306_s8  ;;  %v7591_v37 = vunpack.i.h.bf16 %v7589_v31  ;;  %v7590_v3 = vunpack.i.l.bf16 %v7589_v31 }
 0x817   :  { %v7599_v6 = vpop.permute.xlu1 %7598  ;;  %v11764_v35 = vpop.permute.xlu0 %7613 }
 0x818   :  { %3525 = vrot.lane.b32.xlu1 %v15657_v1, %s8306_s8  ;;  %3527 = vrot.lane.b32.xlu0 %v15658_v54, %s8306_s8  ;;  %v7601_v33 = vunpack.i.h.bf16 %v7599_v6 }
 0x81b   :  { %v11762_v26 = vpop.permute.xlu1 %7608 }
 0x81c   :  { %3529 = vrot.lane.b32.xlu1 %v15659_v58, %s8306_s8  ;;  %3531 = vrot.lane.b32.xlu0 %v15660_v59, %s8306_s8 }
 0x81f   :  { %v11766_v29 = vpop.permute.xlu1 %7618 }
 0x820   :  { %3533 = vrot.lane.b32.xlu1 %v15661_v43, %s8306_s8  ;;  %3535 = vrot.lane.b32.xlu0 %v15662_v8, %s8306_s8 }
 0x824   :  { %3537 = vrot.lane.b32.xlu1 %v15663_v60, %s8306_s8  ;;  %3539 = vrot.lane.b32.xlu0 %v15664_v38, %s8306_s8 }
 0x828   :  { %3541 = vrot.lane.b32.xlu1 %v15665_v0, %s8306_s8  ;;  %3543 = vrot.lane.b32.xlu0 %v15666_v47, %s8306_s8 }
 0x82c   :  { %3545 = vrot.lane.b32.xlu1 %v15667_v46, %s8306_s8  ;;  %3547 = vrot.lane.b32.xlu0 %v15668_v25, %s8306_s8 }
 0x830   :  { %3549 = vrot.lane.b32.xlu1 %v15669_v20, %s8306_s8  ;;  %3551 = vrot.lane.b32.xlu0 %v15670_v44, %s8306_s8 }
 0x834   :  { %3553 = vrot.lane.b32.xlu1 %v15671_v50, %s8306_s8  ;;  %3588 = vrot.lane.b32.xlu0 %v15672_v16, %s8314_s25 }
 0x838   :  { %3590 = vrot.lane.b32.xlu1 %v15673_v53, %s8314_s25  ;;  %3592 = vrot.lane.b32.xlu0 %v15674_v23, %s8314_s25 }
 0x83c   :  { %3594 = vrot.lane.b32.xlu1 %v15675_v24, %s8314_s25  ;;  %3596 = vrot.lane.b32.xlu0 %v15676_v30, %s8314_s25 }
 0x840   :  { %3598 = vrot.lane.b32.xlu1 %v15677_v5, %s8314_s25  ;;  %3600 = vrot.lane.b32.xlu0 %v15678_v27, %s8314_s25 }
 0x844   :  { %3602 = vrot.lane.b32.xlu1 %v15679_v17, %s8314_s25  ;;  %3604 = vrot.lane.b32.xlu0 %v15680_v19, %s8314_s25 }
 0x848   :  { %3606 = vrot.lane.b32.xlu1 %v15681_v21, %s8314_s25  ;;  %3608 = vrot.lane.b32.xlu0 %v15682_v56, %s8314_s25  ;;  %v15721_v56 = vld [vmem:[#allocation39_spill] sm:$0xff] }
 0x84c   :  { %3610 = vrot.lane.b32.xlu1 %v15683_v22, %s8314_s25  ;;  %3612 = vrot.lane.b32.xlu0 %v15684_v57, %s8314_s25 }
 0x850   :  { %3614 = vrot.lane.b32.xlu1 %v15685_v12, %s8314_s25  ;;  %3616 = vrot.lane.b32.xlu0 %v15686_v32, %s8314_s25 }
 0x854   :  { %3618 = vrot.lane.b32.xlu1 %v15687_v45, %s8314_s25 }
 0x86a   :  { %v7624_v51 = vpop.permute.xlu0 %7623 }
 0x86b   :  { %v7626_v61 = vunpack.i.h.bf16 %v7624_v51  ;;  %v7625_v14 = vunpack.i.l.bf16 %v7624_v51 }
 0x86d   :  { %v3427_v9 = vsel %vm830_vm3, %v7586_v55, %v7626_v61  ;;  %v3426_v63 = vsel %vm830_vm3, %v7585_v28, %v7625_v14  ;;  %v7600_v28 = vunpack.i.l.bf16 %v7599_v6  ;;  %v7606_v6 = vunpack.i.h.bf16 %v7604_v49 }
 0x86e   :  { %v7399_v7 = vpack.c.bf16 %v3427_v9, %v3427_v9  ;;  %v7398_v41 = vpack.c.bf16 %v3426_v63, %v3426_v63  ;;  %v7629_v13 = vpop.permute.xlu1 %7628 }
 0x86f   :  { %v7631_v34 = vunpack.i.h.bf16 %v7629_v13  ;;  %v7630_v52 = vunpack.i.l.bf16 %v7629_v13 }
 0x870   :  { %7143 = vst.msk [vmem:[%s15012_s6 + $0x44] sm:$0xf] %vm927_vm1, %v7399_v7  ;;  %7142 = vst.msk [vmem:[%s15012_s6 + $0x40] sm:$0xf] %vm927_vm1, %v7398_v41 }
 0x871   :  { %v3428_v11 = vsel %vm830_vm3, %v7590_v3, %v7630_v52  ;;  %v3429_v39 = vsel %vm830_vm3, %v7591_v37, %v7631_v34  ;;  %v7605_v37 = vunpack.i.l.bf16 %v7604_v49  ;;  %v7611_v49 = vunpack.i.h.bf16 %v11762_v26 }
 0x872   :  { %v7400_v48 = vpack.c.bf16 %v3428_v11, %v3428_v11  ;;  %v7401_v36 = vpack.c.bf16 %v3429_v39, %v3429_v39  ;;  %v7634_v2 = vpop.permute.xlu0 %7633 }
 0x873   :  { %v7636_v4 = vunpack.i.h.bf16 %v7634_v2  ;;  %v7635_v40 = vunpack.i.l.bf16 %v7634_v2  ;;  %v7610_v2 = vunpack.i.l.bf16 %v11762_v26  ;;  %v7616_v26 = vunpack.i.h.bf16 %v11764_v35 }
 0x874   :  { %7144 = vst.msk [vmem:[%s15012_s6 + $0x48] sm:$0xf] %vm927_vm1, %v7400_v48  ;;  %7145 = vst.msk [vmem:[%s15012_s6 + $0x4c] sm:$0xf] %vm927_vm1, %v7401_v36 }
 0x875   :  { %v3431_v10 = vsel %vm830_vm3, %v7596_v42, %v7636_v4  ;;  %v3430_v62 = vsel %vm830_vm3, %v7595_v18, %v7635_v40 }
 0x876   :  { %v7403_v31 = vpack.c.bf16 %v3431_v10, %v3431_v10  ;;  %v7402_v51 = vpack.c.bf16 %v3430_v62, %v3430_v62  ;;  %v7639_v55 = vpop.permute.xlu1 %7638 }
 0x877   :  { %v7641_v61 = vunpack.i.h.bf16 %v7639_v55  ;;  %v7640_v14 = vunpack.i.l.bf16 %v7639_v55 }
 0x878   :  { %7147 = vst.msk [vmem:[%s15012_s6 + $0x54] sm:$0xf] %vm927_vm1, %v7403_v31  ;;  %7146 = vst.msk [vmem:[%s15012_s6 + $0x50] sm:$0xf] %vm927_vm1, %v7402_v51  ;;  %v7615_v51 = vunpack.i.l.bf16 %v11764_v35 }
 0x879   :  { %v3432_v9 = vsel %vm830_vm3, %v7600_v28, %v7640_v14  ;;  %v3433_v63 = vsel %vm830_vm3, %v7601_v33, %v7641_v61 }
 0x87a   :  { %v7404_v7 = vpack.c.bf16 %v3432_v9, %v3432_v9  ;;  %v7405_v41 = vpack.c.bf16 %v3433_v63, %v3433_v63  ;;  %v7644_v13 = vpop.permute.xlu0 %7643 }
 0x87b   :  { %v7646_v3 = vunpack.i.h.bf16 %v7644_v13  ;;  %v7645_v34 = vunpack.i.l.bf16 %v7644_v13 }
 0x87c   :  { %7148 = vst.msk [vmem:[%s15012_s6 + $0x58] sm:$0xf] %vm927_vm1, %v7404_v7  ;;  %7149 = vst.msk [vmem:[%s15012_s6 + $0x5c] sm:$0xf] %vm927_vm1, %v7405_v41  ;;  %v7621_v7 = vunpack.i.h.bf16 %v11766_v29  ;;  %v7620_v41 = vunpack.i.l.bf16 %v11766_v29 }
 0x87d   :  { %v3435_v52 = vsel %vm830_vm3, %v7606_v6, %v7646_v3  ;;  %v3434_v11 = vsel %vm830_vm3, %v7605_v37, %v7645_v34 }
 0x87e   :  { %v7407_v39 = vpack.c.bf16 %v3435_v52, %v3435_v52  ;;  %v7406_v48 = vpack.c.bf16 %v3434_v11, %v3434_v11  ;;  %v7649_v36 = vpop.permute.xlu1 %7648 }
 0x87f   :  { %v7651_v42 = vunpack.i.h.bf16 %v7649_v36  ;;  %v7650_v18 = vunpack.i.l.bf16 %v7649_v36 }
 0x880   :  { %7151 = vst.msk [vmem:[%s15012_s6 + $0x64] sm:$0xf] %vm927_vm1, %v7407_v39  ;;  %7150 = vst.msk [vmem:[%s15012_s6 + $0x60] sm:$0xf] %vm927_vm1, %v7406_v48 }
 0x881   :  { %v3436_v4 = vsel %vm830_vm3, %v7610_v2, %v7650_v18  ;;  %v3437_v40 = vsel %vm830_vm3, %v7611_v49, %v7651_v42 }
 0x882   :  { %v7408_v10 = vpack.c.bf16 %v3436_v4, %v3436_v4  ;;  %v7409_v62 = vpack.c.bf16 %v3437_v40, %v3437_v40  ;;  %v7654_v31 = vpop.permute.xlu0 %7653 }
 0x883   :  { %v7656_v55 = vunpack.i.h.bf16 %v7654_v31  ;;  %v7655_v33 = vunpack.i.l.bf16 %v7654_v31 }
 0x884   :  { %7152 = vst.msk [vmem:[%s15012_s6 + $0x68] sm:$0xf] %vm927_vm1, %v7408_v10  ;;  %7153 = vst.msk [vmem:[%s15012_s6 + $0x6c] sm:$0xf] %vm927_vm1, %v7409_v62 }
 0x885   :  { %v3439_v28 = vsel %vm830_vm3, %v7616_v26, %v7656_v55  ;;  %v3438_v61 = vsel %vm830_vm3, %v7615_v51, %v7655_v33 }
 0x886   :  { %v7411_v14 = vpack.c.bf16 %v3439_v28, %v3439_v28  ;;  %v7410_v9 = vpack.c.bf16 %v3438_v61, %v3438_v61  ;;  %v7659_v63 = vpop.permute.xlu1 %7658  ;;  %v3524_v35 = vpop.permute.xlu0 %3523 }
 0x887   :  { %v7661_v13 = vunpack.i.h.bf16 %v7659_v63  ;;  %v7660_v6 = vunpack.i.l.bf16 %v7659_v63  ;;  %7158 = vst.msk [vmem:[%s15010_s7 + $0x40] sm:$0xf] %vm927_vm1, %v3524_v35 }
 0x888   :  { %7155 = vst.msk [vmem:[%s15012_s6 + $0x74] sm:$0xf] %vm927_vm1, %v7411_v14  ;;  %7154 = vst.msk [vmem:[%s15012_s6 + $0x70] sm:$0xf] %vm927_vm1, %v7410_v9 }
 0x889   :  { %v3440_v37 = vsel %vm830_vm3, %v7620_v41, %v7660_v6  ;;  %v3441_v29 = vsel %vm830_vm3, %v7621_v7, %v7661_v13 }
 0x88a   :  { %v7412_v3 = vpack.c.bf16 %v3440_v37, %v3440_v37  ;;  %v7413_v34 = vpack.c.bf16 %v3441_v29, %v3441_v29  ;;  %v3526_v52 = vpop.permute.xlu1 %3525  ;;  %v3528_v11 = vpop.permute.xlu0 %3527 }
 0x88b   :  { %7159 = vst.msk [vmem:[%s15010_s7 + $0x44] sm:$0xf] %vm927_vm1, %v3526_v52  ;;  %7160 = vst.msk [vmem:[%s15010_s7 + $0x48] sm:$0xf] %vm927_vm1, %v3528_v11 }
 0x88c   :  { %7156 = vst.msk [vmem:[%s15012_s6 + $0x78] sm:$0xf] %vm927_vm1, %v7412_v3  ;;  %7157 = vst.msk [vmem:[%s15012_s6 + $0x7c] sm:$0xf] %vm927_vm1, %v7413_v34 }
 0x88e   :  { %v3530_v39 = vpop.permute.xlu1 %3529  ;;  %v3532_v48 = vpop.permute.xlu0 %3531 }
 0x88f   :  { %7161 = vst.msk [vmem:[%s15010_s7 + $0x4c] sm:$0xf] %vm927_vm1, %v3530_v39  ;;  %7162 = vst.msk [vmem:[%s15010_s7 + $0x50] sm:$0xf] %vm927_vm1, %v3532_v48 }
 0x892   :  { %v3534_v36 = vpop.permute.xlu1 %3533  ;;  %v3536_v49 = vpop.permute.xlu0 %3535 }
 0x893   :  { %7163 = vst.msk [vmem:[%s15010_s7 + $0x54] sm:$0xf] %vm927_vm1, %v3534_v36  ;;  %7164 = vst.msk [vmem:[%s15010_s7 + $0x58] sm:$0xf] %vm927_vm1, %v3536_v49 }
 0x896   :  { %v3538_v2 = vpop.permute.xlu1 %3537  ;;  %v3540_v42 = vpop.permute.xlu0 %3539 }
 0x897   :  { %7165 = vst.msk [vmem:[%s15010_s7 + $0x5c] sm:$0xf] %vm927_vm1, %v3538_v2  ;;  %7166 = vst.msk [vmem:[%s15010_s7 + $0x60] sm:$0xf] %vm927_vm1, %v3540_v42 }
 0x89a   :  { %v3542_v18 = vpop.permute.xlu1 %3541  ;;  %v3544_v4 = vpop.permute.xlu0 %3543 }
 0x89b   :  { %7167 = vst.msk [vmem:[%s15010_s7 + $0x64] sm:$0xf] %vm927_vm1, %v3542_v18  ;;  %7168 = vst.msk [vmem:[%s15010_s7 + $0x68] sm:$0xf] %vm927_vm1, %v3544_v4 }
 0x89e   :  { %v3546_v40 = vpop.permute.xlu1 %3545  ;;  %v3548_v10 = vpop.permute.xlu0 %3547 }
 0x89f   :  { %7169 = vst.msk [vmem:[%s15010_s7 + $0x6c] sm:$0xf] %vm927_vm1, %v3546_v40  ;;  %7170 = vst.msk [vmem:[%s15010_s7 + $0x70] sm:$0xf] %vm927_vm1, %v3548_v10 }
 0x8a2   :  { %v3550_v62 = vpop.permute.xlu1 %3549  ;;  %v3552_v31 = vpop.permute.xlu0 %3551 }
 0x8a3   :  { %7171 = vst.msk [vmem:[%s15010_s7 + $0x74] sm:$0xf] %vm927_vm1, %v3550_v62  ;;  %7172 = vst.msk [vmem:[%s15010_s7 + $0x78] sm:$0xf] %vm927_vm1, %v3552_v31 }
 0x8a6   :  { %v3554_v26 = vpop.permute.xlu1 %3553  ;;  %v3589_v51 = vpop.permute.xlu0 %3588 }
 0x8a7   :  { %7173 = vst.msk [vmem:[%s15010_s7 + $0x7c] sm:$0xf] %vm927_vm1, %v3554_v26  ;;  %v3636_v55 = vsel %vm284_vm2, %v3589_v51, 0.0  ;;  %v15688_v51 = vld [vmem:[#allocation50_spill] sm:$0xff] }
 0x8a8   :  { %3637 = vadd.xlane.f32.xlu0 %v3636_v55  ;;  %v11939_v55 = vld [vmem:[%s15008_s3 + $0x10] sm:$0xff] }
 0x8aa   :  { %v3591_v33 = vpop.permute.xlu1 %3590  ;;  %v3593_v28 = vpop.permute.xlu0 %3592 }
 0x8ab   :  { %v3639_v61 = vsel %vm284_vm2, %v3591_v33, 0.0  ;;  %v3642_v14 = vsel %vm284_vm2, %v3593_v28, 0.0  ;;  %v15689_v33 = vld [vmem:[#allocation113_spill] sm:$0xff]  ;;  %v11948_v28 = vld [vmem:[%s15008_s3 + $0x18] sm:$0xff] }
 0x8ac   :  { %3640 = vadd.xlane.f32.xlu1 %v3639_v61  ;;  %3643 = vadd.xlane.f32.xlu0 %v3642_v14  ;;  %v11955_v61 = vld [vmem:[%s15008_s3 + $0x20] sm:$0xff]  ;;  %v11962_v14 = vld [vmem:[%s15008_s3 + $0x28] sm:$0xff] }
 0x8ae   :  { %v3595_v9 = vpop.permute.xlu1 %3594  ;;  %v3597_v63 = vpop.permute.xlu0 %3596 }
 0x8af   :  { %v3645_v35 = vsel %vm284_vm2, %v3595_v9, 0.0  ;;  %v3648_v6 = vsel %vm284_vm2, %v3597_v63, 0.0  ;;  %v11969_v9 = vld [vmem:[%s15008_s3 + $0x30] sm:$0xff]  ;;  %v11976_v63 = vld [vmem:[%s15008_s3 + $0x38] sm:$0xff] }
 0x8b0   :  { %3646 = vadd.xlane.f32.xlu0 %v3645_v35  ;;  %v15690_v35 = vld [vmem:[#allocation93_spill] sm:$0xff] }
 0x8b2   :  { %v3599_v7 = vpop.permute.xlu1 %3598  ;;  %v3601_v41 = vpop.permute.xlu0 %3600 }
 0x8b3   :  { %v3651_v13 = vsel %vm284_vm2, %v3599_v7, 0.0  ;;  %v3654_v34 = vsel %vm284_vm2, %v3601_v41, 0.0  ;;  %v15691_v7 = vld [vmem:[#allocation84_spill] sm:$0xff]  ;;  %v11987_v41 = vld [vmem:[%s15008_s3 + $0x50] sm:$0xff] }
 0x8b4   :  { %3652 = vadd.xlane.f32.xlu1 %v3651_v13  ;;  %3649 = vadd.xlane.f32.xlu0 %v3648_v6  ;;  %v11994_v13 = vld [vmem:[%s15008_s3 + $0x58] sm:$0xff]  ;;  %v12001_v6 = vld [vmem:[%s15008_s3 + $0x60] sm:$0xff] }
 0x8b6   :  { %v3603_v37 = vpop.permute.xlu1 %3602  ;;  %v3605_v29 = vpop.permute.xlu0 %3604 }
 0x8b7   :  { %v3657_v3 = vsel %vm284_vm2, %v3603_v37, 0.0  ;;  %v3660_v48 = vsel %vm284_vm2, %v3605_v29, 0.0  ;;  %v12008_v37 = vld [vmem:[%s15008_s3 + $0x68] sm:$0xff]  ;;  %v12015_v29 = vld [vmem:[%s15008_s3 + $0x70] sm:$0xff] }
 0x8b8   :  { %3658 = vadd.xlane.f32.xlu1 %v3657_v3  ;;  %3655 = vadd.xlane.f32.xlu0 %v3654_v34  ;;  %v12022_v3 = vld [vmem:[%s15008_s3 + $0x78] sm:$0xff]  ;;  %v15692_v34 = vld [vmem:[#allocation104_spill] sm:$0xff] }
 0x8ba   :  { %v3607_v52 = vpop.permute.xlu1 %3606  ;;  %v3609_v11 = vpop.permute.xlu0 %3608 }
 0x8bb   :  { %v3663_v39 = vsel %vm284_vm2, %v3607_v52, 0.0  ;;  %v3666_v42 = vsel %vm284_vm2, %v3609_v11, 0.0  ;;  %v15693_v52 = vld [vmem:[#allocation79_spill] sm:$0xff]  ;;  %v15694_v11 = vld [vmem:[#allocation109_spill] sm:$0xff] }
 0x8bc   :  { %3664 = vadd.xlane.f32.xlu1 %v3663_v39  ;;  %3661 = vadd.xlane.f32.xlu0 %v3660_v48  ;;  %v15695_v39 = vld [vmem:[#allocation70_spill] sm:$0xff]  ;;  %v15696_v48 = vld [vmem:[#allocation112_spill] sm:$0xff] }
 0x8be   :  { %v3611_v36 = vpop.permute.xlu1 %3610  ;;  %v3613_v49 = vpop.permute.xlu0 %3612 }
 0x8bf   :  { %v3669_v2 = vsel %vm284_vm2, %v3611_v36, 0.0  ;;  %v3672_v40 = vsel %vm284_vm2, %v3613_v49, 0.0  ;;  %v15697_v36 = vld [vmem:[#allocation75_spill] sm:$0xff]  ;;  %v15698_v49 = vld [vmem:[#allocation66_spill] sm:$0xff] }
 0x8c0   :  { %3670 = vadd.xlane.f32.xlu1 %v3669_v2  ;;  %3667 = vadd.xlane.f32.xlu0 %v3666_v42  ;;  %v15699_v2 = vld [vmem:[#allocation78_spill] sm:$0xff]  ;;  %v15700_v42 = vld [vmem:[#allocation119_spill] sm:$0xff] }
 0x8c2   :  { %v3615_v18 = vpop.permute.xlu1 %3614  ;;  %v3617_v10 = vpop.permute.xlu0 %3616 }
 0x8c3   :  { %v3675_v4 = vsel %vm284_vm2, %v3615_v18, 0.0  ;;  %v3678_v26 = vsel %vm284_vm2, %v3617_v10, 0.0  ;;  %v15701_v18 = vld [vmem:[#allocation106_spill] sm:$0xff]  ;;  %v15704_v10 = vld [vmem:[#allocation103_spill] sm:$0xff] }
 0x8c4   :  { %3676 = vadd.xlane.f32.xlu1 %v3675_v4  ;;  %3673 = vadd.xlane.f32.xlu0 %v3672_v40  ;;  %v15702_v4 = vld [vmem:[#allocation83_spill] sm:$0xff] }
 0x8c5   :  { %v15703_v40 = vld [vmem:[#allocation111_spill] sm:$0xff] }
 0x8c6   :  { %v3619_v62 = vpop.permute.xlu1 %3618 }
 0x8c7   :  { %v3681_v31 = vsel %vm284_vm2, %v3619_v62, 0.0  ;;  %v15705_v62 = vld [vmem:[#allocation114_spill] sm:$0xff] }
 0x8c8   :  { %3682 = vadd.xlane.f32.xlu1 %v3681_v31  ;;  %3679 = vadd.xlane.f32.xlu0 %v3678_v26  ;;  %v15706_v31 = vld [vmem:[#allocation36_spill] sm:$0xff]  ;;  %v15707_v26 = vld [vmem:[#allocation31_spill] sm:$0xff] }
 0x8d9   :  { %3750 = vrot.lane.b32.xlu1 %v15688_v51, %s8315_s16 }
 0x8dd   :  { %3752 = vrot.lane.b32.xlu1 %v11939_v55, %s8315_s16 }
 0x8de   :  { %3748 = vrot.lane.b32.xlu0 %v15689_v33, %s8315_s16 }
 0x8e1   :  { %3754 = vrot.lane.b32.xlu1 %v11948_v28, %s8315_s16 }
 0x8e2   :  { %3756 = vrot.lane.b32.xlu0 %v11955_v61, %s8315_s16 }
 0x8e5   :  { %3758 = vrot.lane.b32.xlu1 %v11962_v14, %s8315_s16 }
 0x8e6   :  { %3760 = vrot.lane.b32.xlu0 %v11969_v9, %s8315_s16 }
 0x8e9   :  { %3762 = vrot.lane.b32.xlu1 %v11976_v63, %s8315_s16 }
 0x8ea   :  { %3764 = vrot.lane.b32.xlu0 %v15690_v35, %s8315_s16 }
 0x8ed   :  { %3766 = vrot.lane.b32.xlu1 %v15691_v7, %s8315_s16 }
 0x8ee   :  { %3768 = vrot.lane.b32.xlu0 %v11987_v41, %s8315_s16 }
 0x8f1   :  { %3770 = vrot.lane.b32.xlu1 %v11994_v13, %s8315_s16 }
 0x8f2   :  { %3772 = vrot.lane.b32.xlu0 %v12001_v6, %s8315_s16 }
 0x8f5   :  { %3774 = vrot.lane.b32.xlu1 %v12008_v37, %s8315_s16 }
 0x8f6   :  { %3776 = vrot.lane.b32.xlu0 %v12015_v29, %s8315_s16 }
 0x8f9   :  { %3778 = vrot.lane.b32.xlu1 %v12022_v3, %s8315_s16 }
 0x8fa   :  { %3812 = vrot.lane.b32.xlu0 %v15692_v34, %s8316_s30 }
 0x8fd   :  { %3814 = vrot.lane.b32.xlu1 %v15693_v52, %s8316_s30 }
 0x8fe   :  { %3816 = vrot.lane.b32.xlu0 %v15694_v11, %s8316_s30 }
 0x901   :  { %3818 = vrot.lane.b32.xlu1 %v15695_v39, %s8316_s30 }
 0x902   :  { %3820 = vrot.lane.b32.xlu0 %v15696_v48, %s8316_s30 }
 0x905   :  { %3822 = vrot.lane.b32.xlu1 %v15697_v36, %s8316_s30 }
 0x906   :  { %3824 = vrot.lane.b32.xlu0 %v15698_v49, %s8316_s30 }
 0x909   :  { %3826 = vrot.lane.b32.xlu1 %v15699_v2, %s8316_s30 }
 0x90a   :  { %3828 = vrot.lane.b32.xlu0 %v15700_v42, %s8316_s30 }
 0x90d   :  { %3830 = vrot.lane.b32.xlu1 %v15701_v18, %s8316_s30 }
 0x90e   :  { %3832 = vrot.lane.b32.xlu0 %v15702_v4, %s8316_s30 }
 0x911   :  { %3834 = vrot.lane.b32.xlu1 %v15703_v40, %s8316_s30 }
 0x912   :  { %3836 = vrot.lane.b32.xlu0 %v15704_v10, %s8316_s30 }
 0x915   :  { %3838 = vrot.lane.b32.xlu1 %v15705_v62, %s8316_s30 }
 0x916   :  { %3840 = vrot.lane.b32.xlu0 %v15706_v31, %s8316_s30 }
 0x919   :  { %3842 = vrot.lane.b32.xlu1 %v15707_v26, %s8316_s30 }
 0x935   :  { %v3638_v51 = vpop.xlane.xlu0 %3637 }
 0x936   :  { %v3684_v50 = vmul.f32 0.0625, %v3638_v51 }
 0x938   :  { %v3700_v46 = vadd.f32 1.1920929e-07, %v3684_v50 }
 0x939   :  { %v3644_v33 = vpop.xlane.xlu0 %3643  ;;  %v3641_v35 = vpop.xlane.xlu1 %3640 }
 0x93a   :  { %v3686_v25 = vmul.f32 0.0625, %v3644_v33  ;;  %v3685_v60 = vmul.f32 0.0625, %v3641_v35  ;;  %7962 = vrsqrt.f32 %v3700_v46 }
 0x93c   :  { %v3702_v38 = vadd.f32 1.1920929e-07, %v3686_v25  ;;  %v3701_v59 = vadd.f32 1.1920929e-07, %v3685_v60 }
 0x93d   :  { %v3647_v7 = vpop.xlane.xlu0 %3646 }
 0x93e   :  { %v3687_v51 = vmul.f32 0.0625, %v3647_v7  ;;  %7964 = vrsqrt.f32 %v3702_v38 }
 0x93f   :  { %7966 = vrsqrt.f32 %v3701_v59 }
 0x940   :  { %v3703_v33 = vadd.f32 1.1920929e-07, %v3687_v51 }
 0x941   :  { %v3653_v34 = vpop.xlane.xlu1 %3652  ;;  %v3650_v52 = vpop.xlane.xlu0 %3649 }
 0x942   :  { %v3688_v43 = vmul.f32 0.0625, %v3650_v52  ;;  %v3689_v45 = vmul.f32 0.0625, %v3653_v34 }
 0x944   :  { %v3704_v1 = vadd.f32 1.1920929e-07, %v3688_v43  ;;  %v7963_v35 = vpop.eup %7962  ;;  %v3705_v60 = vadd.f32 1.1920929e-07, %v3689_v45 }
 0x945   :  { %v3659_v11 = vpop.xlane.xlu1 %3658  ;;  %v3656_v39 = vpop.xlane.xlu0 %3655 }
 0x946   :  { %v3690_v54 = vmul.f32 0.0625, %v3656_v39  ;;  %7968 = vrsqrt.f32 %v3704_v1  ;;  %v3691_v38 = vmul.f32 0.0625, %v3659_v11  ;;  %v15708_v39 = vld [vmem:[#allocation3_spill] sm:$0xff] }
 0x947   :  { %7970 = vrsqrt.f32 %v3703_v33  ;;  %v12093_v32 = vmul.f32 %v7963_v35, %v15708_v39  ;;  %v15709_v11 = vld [vmem:[#allocation15_spill] sm:$0xff] }
 0x948   :  { %v3706_v46 = vadd.f32 1.1920929e-07, %v3690_v54  ;;  %v7965_v59 = vpop.eup %7964  ;;  %v3707_v54 = vadd.f32 1.1920929e-07, %v3691_v38 }
 0x949   :  { %v3665_v48 = vpop.xlane.xlu1 %3664  ;;  %v3662_v36 = vpop.xlane.xlu0 %3661 }
 0x94a   :  { %v3692_v25 = vmul.f32 0.0625, %v3662_v36  ;;  %7972 = vrsqrt.f32 %v3706_v46  ;;  %v3693_v34 = vmul.f32 0.0625, %v3665_v48  ;;  %v7967_v45 = vpop.eup %7966  ;;  %v12099_v46 = vmul.f32 %v7965_v59, %v15709_v11  ;;  %v15711_v59 = vld [vmem:[#allocation23_spill] sm:$0xff] }
 0x94b   :  { %7974 = vrsqrt.f32 %v3705_v60 }
 0x94c   :  { %v3708_v43 = vadd.f32 1.1920929e-07, %v3692_v25  ;;  %v3709_v39 = vadd.f32 1.1920929e-07, %v3693_v34 }
 0x94d   :  { %v12058_v49 = vpop.xlane.xlu1 %3670  ;;  %v3668_v2 = vpop.xlane.xlu0 %3667 }
 0x94e   :  { %v3694_v7 = vmul.f32 0.0625, %v3668_v2  ;;  %7976 = vrsqrt.f32 %v3708_v43  ;;  %v3695_v60 = vmul.f32 0.0625, %v12058_v49 }
 0x94f   :  { %7978 = vrsqrt.f32 %v3707_v54 }
 0x950   :  { %v3710_v22 = vadd.f32 1.1920929e-07, %v3694_v7  ;;  %v7969_v2 = vpop.eup %7968  ;;  %v15710_v7 = vld [vmem:[#allocation6_spill] sm:$0xff]  ;;  %v3711_v34 = vadd.f32 1.1920929e-07, %v3695_v60 }
 0x951   :  { %v12060_v42 = vpop.xlane.xlu1 %3676  ;;  %v3674_v18 = vpop.xlane.xlu0 %3673  ;;  %v12110_v11 = vmul.f32 %v7969_v2, %v15711_v59  ;;  %v15713_v2 = vld [vmem:[#allocation35_spill] sm:$0xff] }
 0x952   :  { %v3696_v33 = vmul.f32 0.0625, %v3674_v18  ;;  %7980 = vrsqrt.f32 %v3710_v22  ;;  %v7971_v18 = vpop.eup %7970 }
 0x953   :  { %7982 = vrsqrt.f32 %v3709_v39 }
 0x954   :  { %v3712_v38 = vadd.f32 1.1920929e-07, %v3696_v33 }
 0x955   :  { %v12062_v4 = vpop.xlane.xlu1 %3682  ;;  %v3680_v40 = vpop.xlane.xlu0 %3679 }
 0x956   :  { %v3698_v43 = vmul.f32 0.0625, %v3680_v40  ;;  %v3697_v40 = vmul.f32 0.0625, %v12060_v42  ;;  %7984 = vrsqrt.f32 %v3712_v38 }
 0x957   :  { %7986 = vrsqrt.f32 %v3711_v34 }
 0x958   :  { %v3714_v33 = vadd.f32 1.1920929e-07, %v3698_v43  ;;  %v3713_v38 = vadd.f32 1.1920929e-07, %v3697_v40  ;;  %v3699_v43 = vmul.f32 0.0625, %v12062_v4 }
 0x959   :  { %v12064_v10 = vpop.permute.xlu1 %3750  ;;  %v12066_v62 = vpop.permute.xlu0 %3748 }
 0x95a   :  { %7988 = vrsqrt.f32 %v3714_v33  ;;  %v3715_v4 = vadd.f32 1.1920929e-07, %v3699_v43  ;;  %v15718_v43 = vld [vmem:[#allocation7_spill] sm:$0xff] }
 0x95b   :  { %7990 = vrsqrt.f32 %v3713_v38 }
 0x95c   :  { %7992 = vrsqrt.f32 %v3715_v4 }
 0x95d   :  { %v12068_v31 = vpop.permute.xlu1 %3752  ;;  %v12070_v26 = vpop.permute.xlu0 %3756 }
 0x961   :  { %v12072_v20 = vpop.permute.xlu1 %3754  ;;  %v12074_v44 = vpop.permute.xlu0 %3760 }
 0x965   :  { %v12076_v0 = vpop.permute.xlu1 %3758  ;;  %v12078_v47 = vpop.permute.xlu0 %3764 }
 0x969   :  { %v12080_v8 = vpop.permute.xlu1 %3762  ;;  %v12082_v58 = vpop.permute.xlu0 %3768 }
 0x96d   :  { %v12084_v15 = vpop.permute.xlu1 %3766  ;;  %v12086_v50 = vpop.permute.xlu0 %3772 }
 0x971   :  { %v12088_v52 = vpop.permute.xlu1 %3770  ;;  %v12090_v12 = vpop.permute.xlu0 %3776 }
 0x975   :  { %v12095_v51 = vpop.permute.xlu1 %3774  ;;  %v3813_v1 = vpop.permute.xlu0 %3812 }
 0x976   :  { %v3860_v36 = vmul.f32 %v3813_v1, %v12093_v32  ;;  %v12107_v1 = vmul.f32 %v7967_v45, %v15710_v7 }
 0x978   :  { %3892 = vrot.lane.b32.xlu0 %v3860_v36, %s8307_s9  ;;  %v7973_v36 = vpop.eup %7972 }
 0x979   :  { %v12102_v25 = vpop.permute.xlu1 %3778  ;;  %v3817_v35 = vpop.permute.xlu0 %3816  ;;  %v12120_v59 = vmul.f32 %v7973_v36, %v15713_v2  ;;  %v15715_v2 = vld [vmem:[#allocation4_spill] sm:$0xff] }
 0x97a   :  { %v3862_v48 = vmul.f32 %v3817_v35, %v12099_v46  ;;  %v7975_v45 = vpop.eup %7974  ;;  %v15712_v35 = vld [vmem:[#allocation17_spill] sm:$0xff] }
 0x97b   :  { %v12117_v7 = vmul.f32 %v7971_v18, %v15712_v35  ;;  %v7977_v39 = vpop.eup %7976  ;;  %v15716_v35 = vld [vmem:[#allocation37_spill] sm:$0xff] }
 0x97c   :  { %3896 = vrot.lane.b32.xlu0 %v3862_v48, %s8307_s9  ;;  %v7979_v18 = vpop.eup %7978 }
 0x97d   :  { %v3815_v57 = vpop.permute.xlu1 %3814  ;;  %v3821_v54 = vpop.permute.xlu0 %3820 }
 0x97e   :  { %v3861_v49 = vmul.f32 %v3815_v57, %v12107_v1  ;;  %v3864_v22 = vmul.f32 %v3821_v54, %v12110_v11  ;;  %v15714_v54 = vld [vmem:[#allocation24_spill] sm:$0xff]  ;;  %v7981_v34 = vpop.eup %7980 }
 0x97f   :  { %v12128_v36 = vmul.f32 %v7975_v45, %v15714_v54  ;;  %v7983_v33 = vpop.eup %7982  ;;  %v12138_v45 = vmul.f32 %v7979_v18, %v15716_v35  ;;  %v15717_v54 = vld [vmem:[#allocation16_spill] sm:$0xff]  ;;  %v15719_v18 = vld [vmem:[#allocation25_spill] sm:$0xff] }
 0x980   :  { %3894 = vrot.lane.b32.xlu1 %v3861_v49, %s8307_s9  ;;  %3900 = vrot.lane.b32.xlu0 %v3864_v22, %s8307_s9  ;;  %v12131_v49 = vmul.f32 %v7977_v39, %v15715_v2  ;;  %v12141_v39 = vmul.f32 %v7981_v34, %v15717_v54  ;;  %v12148_v21 = vmul.f32 %v7983_v33, %v15718_v43 }
 0x981   :  { %v3819_v60 = vpop.permute.xlu1 %3818  ;;  %v3825_v57 = vpop.permute.xlu0 %3824 }
 0x982   :  { %v3863_v48 = vmul.f32 %v3819_v60, %v12117_v7  ;;  %v3866_v42 = vmul.f32 %v3825_v57, %v12120_v59 }
 0x984   :  { %3898 = vrot.lane.b32.xlu1 %v3863_v48, %s8307_s9  ;;  %3904 = vrot.lane.b32.xlu0 %v3866_v42, %s8307_s9  ;;  %v7985_v48 = vpop.eup %7984 }
 0x985   :  { %v3823_v22 = vpop.permute.xlu1 %3822  ;;  %v3829_v60 = vpop.permute.xlu0 %3828  ;;  %v12151_v35 = vmul.f32 %v7985_v48, %v15719_v18 }
 0x986   :  { %v3865_v57 = vmul.f32 %v3823_v22, %v12128_v36  ;;  %v3868_v40 = vmul.f32 %v3829_v60, %v12131_v49  ;;  %v7987_v38 = vpop.eup %7986 }
 0x987   :  { %v7989_v34 = vpop.eup %7988 }
 0x988   :  { %3902 = vrot.lane.b32.xlu1 %v3865_v57, %s8307_s9  ;;  %3908 = vrot.lane.b32.xlu0 %v3868_v40, %s8307_s9  ;;  %v12161_v33 = vmul.f32 %v7989_v34, %v15721_v56  ;;  %v7991_v48 = vpop.eup %7990  ;;  %v12252_v56 = vld [vmem:[%s15006_s4 + $0x48] sm:$0xff] }
 0x989   :  { %v3827_v42 = vpop.permute.xlu1 %3826  ;;  %v3833_v2 = vpop.permute.xlu0 %3832  ;;  %15734 = vst [vmem:[#allocation99_spill] sm:$0xff] %v12252_v56 }
 0x98a   :  { %v3867_v22 = vmul.f32 %v3827_v42, %v12138_v45  ;;  %v3870_v60 = vmul.f32 %v3833_v2, %v12141_v39  ;;  %v15720_v2 = vld [vmem:[#allocation18_spill] sm:$0xff] }
 0x98b   :  { %v12158_v4 = vmul.f32 %v7987_v38, %v15720_v2  ;;  %v7993_v38 = vpop.eup %7992  ;;  %v12259_v2 = vld [vmem:[%s15006_s4 + $0x60] sm:$0xff] }
 0x98c   :  { %3906 = vrot.lane.b32.xlu1 %v3867_v22, %s8307_s9  ;;  %3912 = vrot.lane.b32.xlu0 %v3870_v60, %s8307_s9  ;;  %15735 = vst [vmem:[#allocation102_spill] sm:$0xff] %v12259_v2 }
 0x98d   :  { %v3831_v57 = vpop.permute.xlu1 %3830  ;;  %v3837_v40 = vpop.permute.xlu0 %3836 }
 0x98e   :  { %v3869_v54 = vmul.f32 %v3831_v57, %v12148_v21  ;;  %v3872_v42 = vmul.f32 %v3837_v40, %v12151_v35  ;;  %v15722_v57 = vld [vmem:[#allocation27_spill] sm:$0xff]  ;;  %v15723_v40 = vld [vmem:[#allocation42_spill] sm:$0xff] }
 0x98f   :  { %v12168_v17 = vmul.f32 %v7991_v48, %v15722_v57  ;;  %v12189_v48 = vld [vmem:[%s15006_s4 + $0x10] sm:$0xff] }
 0x990   :  { %3910 = vrot.lane.b32.xlu1 %v3869_v54, %s8307_s9  ;;  %3916 = vrot.lane.b32.xlu0 %v3872_v42, %s8307_s9  ;;  %v12174_v42 = vmul.f32 %v7993_v38, %v15723_v40  ;;  %15725 = vst [vmem:[#allocation80_spill] sm:$0xff] %v12189_v48  ;;  %v12203_v38 = vld [vmem:[%s15006_s4 + $0x20] sm:$0xff]  ;;  %v12238_v40 = vld [vmem:[%s15006_s4 + $0x38] sm:$0xff] }
 0x991   :  { %v3835_v22 = vpop.permute.xlu1 %3834  ;;  %v3841_v60 = vpop.permute.xlu0 %3840  ;;  %15727 = vst [vmem:[#allocation90_spill] sm:$0xff] %v12203_v38  ;;  %15732 = vst [vmem:[#allocation54_spill] sm:$0xff] %v12238_v40  ;;  %v12245_v57 = vld [vmem:[%s15006_s4 + $0x50] sm:$0xff] }
 0x992   :  { %v3871_v18 = vmul.f32 %v3835_v22, %v12158_v4  ;;  %v3874_v43 = vmul.f32 %v3841_v60, %v12161_v33  ;;  %v12180_v22 = vld [vmem:[%s15006_s4] sm:$0xff]  ;;  %v12196_v60 = vld [vmem:[%s15006_s4 + $0x8] sm:$0xff]  ;;  %15733 = vst [vmem:[#allocation74_spill] sm:$0xff] %v12245_v57 }
 0x993   :  { %15724 = vst [vmem:[#allocation95_spill] sm:$0xff] %v12180_v22  ;;  %15726 = vst [vmem:[#allocation92_spill] sm:$0xff] %v12196_v60 }
 0x994   :  { %3914 = vrot.lane.b32.xlu1 %v3871_v18, %s8307_s9  ;;  %3920 = vrot.lane.b32.xlu0 %v3874_v43, %s8307_s9 }
 0x995   :  { %v3839_v34 = vpop.permute.xlu1 %3838 }
 0x996   :  { %v3873_v54 = vmul.f32 %v3839_v34, %v12168_v17  ;;  %v12210_v34 = vld [vmem:[%s15006_s4 + $0x18] sm:$0xff] }
 0x997   :  { %15728 = vst [vmem:[#allocation94_spill] sm:$0xff] %v12210_v34 }
 0x998   :  { %3918 = vrot.lane.b32.xlu1 %v3873_v54, %s8307_s9  ;;  %3972 = vrot.lane.b32.xlu0 %v12180_v22, %s8315_s16  ;;  %v12217_v54 = vld [vmem:[%s15006_s4 + $0x30] sm:$0xff] }
 0x999   :  { %v3843_v18 = vpop.permute.xlu1 %3842  ;;  %15729 = vst [vmem:[#allocation116_spill] sm:$0xff] %v12217_v54 }
 0x99a   :  { %v3875_v43 = vmul.f32 %v3843_v18, %v12174_v42  ;;  %v12224_v18 = vld [vmem:[%s15006_s4 + $0x28] sm:$0xff] }
 0x99b   :  { %15730 = vst [vmem:[#allocation117_spill] sm:$0xff] %v12224_v18 }
 0x99c   :  { %3922 = vrot.lane.b32.xlu1 %v3875_v43, %s8307_s9  ;;  %3976 = vrot.lane.b32.xlu0 %v12189_v48, %s8315_s16  ;;  %v12231_v43 = vld [vmem:[%s15006_s4 + $0x40] sm:$0xff] }
 0x99d   :  { %15731 = vst [vmem:[#allocation98_spill] sm:$0xff] %v12231_v43 }
 0x9a0   :  { %3974 = vrot.lane.b32.xlu1 %v12196_v60, %s8315_s16  ;;  %3980 = vrot.lane.b32.xlu0 %v12203_v38, %s8315_s16 }
 0x9a4   :  { %3978 = vrot.lane.b32.xlu1 %v12210_v34, %s8315_s16  ;;  %3984 = vrot.lane.b32.xlu0 %v12217_v54, %s8315_s16 }
 0x9a8   :  { %3982 = vrot.lane.b32.xlu1 %v12224_v18, %s8315_s16  ;;  %3988 = vrot.lane.b32.xlu0 %v12231_v43, %s8315_s16 }
 0x9ac   :  { %3986 = vrot.lane.b32.xlu1 %v12238_v40, %s8315_s16  ;;  %3992 = vrot.lane.b32.xlu0 %v12245_v57, %s8315_s16  ;;  %v12266_v57 = vld [vmem:[%s15006_s4 + $0x58] sm:$0xff] }
 0x9ad   :  { %15736 = vst [vmem:[#allocation107_spill] sm:$0xff] %v12266_v57 }
 0x9b0   :  { %3990 = vrot.lane.b32.xlu1 %v12252_v56, %s8315_s16  ;;  %3996 = vrot.lane.b32.xlu0 %v12259_v2, %s8315_s16  ;;  %v12273_v56 = vld [vmem:[%s15006_s4 + $0x70] sm:$0xff]  ;;  %v12280_v2 = vld [vmem:[%s15006_s4 + $0x68] sm:$0xff] }
 0x9b1   :  { %15737 = vst [vmem:[#allocation110_spill] sm:$0xff] %v12273_v56  ;;  %15738 = vst [vmem:[#allocation62_spill] sm:$0xff] %v12280_v2 }
 0x9b4   :  { %3994 = vrot.lane.b32.xlu1 %v12266_v57, %s8315_s16  ;;  %4000 = vrot.lane.b32.xlu0 %v12273_v56, %s8315_s16  ;;  %v12287_v57 = vld [vmem:[%s15008_s3] sm:$0xff]  ;;  %v12294_v56 = vld [vmem:[%s15006_s4 + $0x78] sm:$0xff] }
 0x9b5   :  { %15739 = vst [vmem:[#allocation68_spill] sm:$0xff] %v12287_v57  ;;  %15740 = vst [vmem:[#allocation73_spill] sm:$0xff] %v12294_v56 }
 0x9b8   :  { %3998 = vrot.lane.b32.xlu1 %v12280_v2, %s8315_s16  ;;  %4036 = vrot.lane.b32.xlu0 %v12287_v57, %s8316_s30  ;;  %v12303_v2 = vld [vmem:[%s15008_s3 + $0x8] sm:$0xff] }
 0x9b9   :  { %15741 = vst [vmem:[#allocation76_spill] sm:$0xff] %v12303_v2 }
 0x9bc   :  { %4002 = vrot.lane.b32.xlu1 %v12294_v56, %s8315_s16  ;;  %4040 = vrot.lane.b32.xlu0 %v11939_v55, %s8316_s30  ;;  %v12318_v55 = vld [vmem:[%s15008_s3 + $0x40] sm:$0xff] }
 0x9bd   :  { %15742 = vst [vmem:[#allocation101_spill] sm:$0xff] %v12318_v55 }
 0x9c0   :  { %4038 = vrot.lane.b32.xlu1 %v12303_v2, %s8316_s30  ;;  %4044 = vrot.lane.b32.xlu0 %v11955_v61, %s8316_s30 }
 0x9c4   :  { %4042 = vrot.lane.b32.xlu1 %v11948_v28, %s8316_s30  ;;  %4048 = vrot.lane.b32.xlu0 %v11969_v9, %s8316_s30  ;;  %v12329_v28 = vld [vmem:[%s15008_s3 + $0x48] sm:$0xff] }
 0x9c5   :  { %15743 = vst [vmem:[#allocation60_spill] sm:$0xff] %v12329_v28 }
 0x9c8   :  { %4046 = vrot.lane.b32.xlu1 %v11962_v14, %s8316_s30  ;;  %4052 = vrot.lane.b32.xlu0 %v12318_v55, %s8316_s30 }
 0x9cc   :  { %4050 = vrot.lane.b32.xlu1 %v11976_v63, %s8316_s30  ;;  %4056 = vrot.lane.b32.xlu0 %v11987_v41, %s8316_s30 }
 0x9d0   :  { %4054 = vrot.lane.b32.xlu1 %v12329_v28, %s8316_s30  ;;  %4060 = vrot.lane.b32.xlu0 %v12001_v6, %s8316_s30 }
 0x9d4   :  { %4058 = vrot.lane.b32.xlu1 %v11994_v13, %s8316_s30  ;;  %4064 = vrot.lane.b32.xlu0 %v12015_v29, %s8316_s30 }
 0x9d8   :  { %4062 = vrot.lane.b32.xlu1 %v12008_v37, %s8316_s30 }
 0x9dc   :  { %4066 = vrot.lane.b32.xlu1 %v12022_v3, %s8316_s30 }
 0x9ea   :  { %v12343_v61 = vpop.permute.xlu0 %3892 }
 0x9ee   :  { %v12345_v14 = vpop.permute.xlu0 %3896 }
 0x9f2   :  { %v12347_v9 = vpop.permute.xlu1 %3894  ;;  %v12349_v63 = vpop.permute.xlu0 %3900 }
 0x9f6   :  { %v12351_v41 = vpop.permute.xlu1 %3898  ;;  %v12353_v13 = vpop.permute.xlu0 %3904 }
 0x9fa   :  { %v12355_v6 = vpop.permute.xlu1 %3902  ;;  %v12357_v29 = vpop.permute.xlu0 %3908 }
 0x9fe   :  { %v12359_v37 = vpop.permute.xlu1 %3906  ;;  %v12361_v56 = vpop.permute.xlu0 %3912 }
 0xa02   :  { %v12363_v3 = vpop.permute.xlu1 %3910  ;;  %v12365_v43 = vpop.permute.xlu0 %3916 }
 0xa06   :  { %v12367_v40 = vpop.permute.xlu1 %3914  ;;  %v12369_v54 = vpop.permute.xlu0 %3920 }
 0xa0a   :  { %v12371_v18 = vpop.permute.xlu1 %3918  ;;  %v12373_v38 = vpop.permute.xlu0 %3972 }
 0xa0e   :  { %v12375_v34 = vpop.permute.xlu1 %3922  ;;  %v12377_v48 = vpop.permute.xlu0 %3976 }
 0xa12   :  { %v12379_v60 = vpop.permute.xlu1 %3974  ;;  %v12381_v22 = vpop.permute.xlu0 %3980 }
 0xa16   :  { %v12383_v28 = vpop.permute.xlu1 %3978  ;;  %v12385_v55 = vpop.permute.xlu0 %3984 }
 0xa17   :  { %15744 = vst [vmem:[#allocation33_spill] sm:$0xff] %v12385_v55 }
 0xa1a   :  { %v12387_v57 = vpop.permute.xlu1 %3982  ;;  %v12389_v2 = vpop.permute.xlu0 %3988 }
 0xa1b   :  { %15745 = vst [vmem:[#allocation63_spill] sm:$0xff] %v12389_v2 }
 0xa1e   :  { %v12391_v19 = vpop.permute.xlu1 %3986  ;;  %v12393_v5 = vpop.permute.xlu0 %3992 }
 0xa1f   :  { %15746 = vst [vmem:[#allocation71_spill] sm:$0xff] %v12391_v19  ;;  %15747 = vst [vmem:[#allocation59_spill] sm:$0xff] %v12393_v5 }
 0xa22   :  { %v12395_v27 = vpop.permute.xlu1 %3990  ;;  %v12397_v24 = vpop.permute.xlu0 %3996 }
 0xa23   :  { %15748 = vst [vmem:[#allocation72_spill] sm:$0xff] %v12395_v27  ;;  %15749 = vst [vmem:[#allocation58_spill] sm:$0xff] %v12397_v24 }
 0xa26   :  { %v12399_v30 = vpop.permute.xlu1 %3994  ;;  %v12401_v53 = vpop.permute.xlu0 %4000 }
 0xa27   :  { %15750 = vst [vmem:[#allocation100_spill] sm:$0xff] %v12399_v30  ;;  %15751 = vst [vmem:[#allocation69_spill] sm:$0xff] %v12401_v53 }
 0xa2a   :  { %v12403_v23 = vpop.permute.xlu1 %3998  ;;  %v4037_v16 = vpop.permute.xlu0 %4036 }
 0xa2b   :  { %15752 = vst [vmem:[#allocation105_spill] sm:$0xff] %v12403_v23  ;;  %v4084_v55 = vmul.f32 %v4037_v16, %v12093_v32 }
 0xa2d   :  { %4116 = vrot.lane.b32.xlu0 %v4084_v55, %s8307_s9 }
 0xa2e   :  { %v12407_v2 = vpop.permute.xlu1 %4002  ;;  %v4041_v19 = vpop.permute.xlu0 %4040 }
 0xa2f   :  { %15753 = vst [vmem:[#allocation97_spill] sm:$0xff] %v12407_v2  ;;  %v4086_v5 = vmul.f32 %v4041_v19, %v12099_v46 }
 0xa31   :  { %4120 = vrot.lane.b32.xlu0 %v4086_v5, %s8307_s9 }
 0xa32   :  { %v4039_v27 = vpop.permute.xlu1 %4038  ;;  %v4045_v24 = vpop.permute.xlu0 %4044 }
 0xa33   :  { %v4085_v30 = vmul.f32 %v4039_v27, %v12107_v1  ;;  %v4088_v53 = vmul.f32 %v4045_v24, %v12110_v11 }
 0xa35   :  { %4118 = vrot.lane.b32.xlu1 %v4085_v30, %s8307_s9  ;;  %4124 = vrot.lane.b32.xlu0 %v4088_v53, %s8307_s9 }
 0xa36   :  { %v4043_v16 = vpop.permute.xlu1 %4042  ;;  %v4049_v23 = vpop.permute.xlu0 %4048 }
 0xa37   :  { %v4087_v55 = vmul.f32 %v4043_v16, %v12117_v7  ;;  %v4090_v2 = vmul.f32 %v4049_v23, %v12120_v59 }
 0xa39   :  { %4122 = vrot.lane.b32.xlu1 %v4087_v55, %s8307_s9  ;;  %4128 = vrot.lane.b32.xlu0 %v4090_v2, %s8307_s9 }
 0xa3a   :  { %v4047_v5 = vpop.permute.xlu1 %4046  ;;  %v4053_v19 = vpop.permute.xlu0 %4052 }
 0xa3b   :  { %v4089_v27 = vmul.f32 %v4047_v5, %v12128_v36  ;;  %v4092_v24 = vmul.f32 %v4053_v19, %v12131_v49 }
 0xa3d   :  { %4126 = vrot.lane.b32.xlu1 %v4089_v27, %s8307_s9  ;;  %4132 = vrot.lane.b32.xlu0 %v4092_v24, %s8307_s9 }
 0xa3e   :  { %v4051_v53 = vpop.permute.xlu1 %4050  ;;  %v4057_v30 = vpop.permute.xlu0 %4056 }
 0xa3f   :  { %v4091_v16 = vmul.f32 %v4051_v53, %v12138_v45  ;;  %v4094_v23 = vmul.f32 %v4057_v30, %v12141_v39 }
 0xa41   :  { %4130 = vrot.lane.b32.xlu1 %v4091_v16, %s8307_s9  ;;  %4136 = vrot.lane.b32.xlu0 %v4094_v23, %s8307_s9  ;;  %v3796_v16 = vmul.f32 %v12066_v62, %v12093_v32 }
 0xa42   :  { %v4055_v2 = vpop.permute.xlu1 %4054  ;;  %v4061_v55 = vpop.permute.xlu0 %4060 }
 0xa43   :  { %v4093_v5 = vmul.f32 %v4055_v2, %v12148_v21  ;;  %v4096_v19 = vmul.f32 %v4061_v55, %v12151_v35  ;;  %v3940_v2 = vadd.f32 %v12343_v61, %v3796_v16  ;;  %v3800_v61 = vmul.f32 %v12070_v26, %v12110_v11 }
 0xa44   :  { %v3801_v16 = vmul.f32 %v12076_v0, %v12128_v36 }
 0xa45   :  { %4134 = vrot.lane.b32.xlu1 %v4093_v5, %s8307_s9  ;;  %4140 = vrot.lane.b32.xlu0 %v4096_v19, %s8307_s9  ;;  %v3798_v5 = vmul.f32 %v12068_v31, %v12099_v46 }
 0xa46   :  { %v4059_v27 = vpop.permute.xlu1 %4058  ;;  %v4065_v24 = vpop.permute.xlu0 %4064 }
 0xa47   :  { %v4095_v53 = vmul.f32 %v4059_v27, %v12158_v4  ;;  %v4098_v30 = vmul.f32 %v4065_v24, %v12161_v33  ;;  %v3942_v27 = vadd.f32 %v12345_v14, %v3798_v5  ;;  %v3797_v24 = vmul.f32 %v12064_v10, %v12107_v1 }
 0xa48   :  { %v3802_v14 = vmul.f32 %v12074_v44, %v12120_v59 }
 0xa49   :  { %4138 = vrot.lane.b32.xlu1 %v4095_v53, %s8307_s9  ;;  %4144 = vrot.lane.b32.xlu0 %v4098_v30, %s8307_s9  ;;  %v3941_v31 = vadd.f32 %v12347_v9, %v3797_v24  ;;  %v3944_v53 = vadd.f32 %v12349_v63, %v3800_v61  ;;  %v3799_v30 = vmul.f32 %v12072_v20, %v12117_v7 }
 0xa4a   :  { %v4063_v23 = vpop.permute.xlu1 %4062  ;;  %v3946_v26 = vadd.f32 %v12353_v13, %v3802_v14  ;;  %v3804_v9 = vmul.f32 %v12078_v47, %v12131_v49  ;;  %v3945_v20 = vadd.f32 %v12355_v6, %v3801_v16  ;;  %v3803_v63 = vmul.f32 %v12080_v8, %v12138_v45 }
 0xa4b   :  { %v4097_v55 = vmul.f32 %v4063_v23, %v12168_v17  ;;  %v3943_v10 = vadd.f32 %v12351_v41, %v3799_v30  ;;  %v3806_v41 = vmul.f32 %v12082_v58, %v12141_v39  ;;  %v3805_v13 = vmul.f32 %v12084_v15, %v12148_v21  ;;  %v15755_v30 = vld [vmem:[#allocation63_spill] sm:$0xff] }
 0xa4c   :  { %v3948_v44 = vadd.f32 %v12357_v29, %v3804_v9  ;;  %v3947_v0 = vadd.f32 %v12359_v37, %v3803_v63  ;;  %v3808_v6 = vmul.f32 %v12086_v50, %v12151_v35  ;;  %v3807_v29 = vmul.f32 %v12088_v52, %v12158_v4 }
 0xa4d   :  { %4142 = vrot.lane.b32.xlu1 %v4097_v55, %s8307_s9  ;;  %4196 = vrot.lane.b32.xlu0 %v3940_v2, %s8314_s25  ;;  %v3950_v47 = vadd.f32 %v12361_v56, %v3806_v41  ;;  %v3949_v58 = vadd.f32 %v12363_v3, %v3805_v13  ;;  %v3810_v56 = vmul.f32 %v12090_v12, %v12161_v33  ;;  %v3958_v3 = vsub.f32 0.0, %v12099_v46 }
 0xa4e   :  { %v4067_v19 = vpop.permute.xlu1 %4066  ;;  %v3952_v8 = vadd.f32 %v12365_v43, %v3808_v6  ;;  %v3951_v15 = vadd.f32 %v12367_v40, %v3807_v29  ;;  %v3809_v37 = vmul.f32 %v12095_v51, %v12168_v17  ;;  %v3811_v12 = vmul.f32 %v12102_v25, %v12174_v42  ;;  %v15758_v6 = vld [vmem:[#allocation72_spill] sm:$0xff] }
 0xa4f   :  { %v4099_v62 = vmul.f32 %v4067_v19, %v12174_v42  ;;  %v3954_v50 = vadd.f32 %v12369_v54, %v3810_v56  ;;  %v3956_v40 = vsub.f32 0.0, %v12093_v32  ;;  %v4022_v2 = vmul.f32 %v12377_v48, %v3958_v3 }
 0xa50   :  { %v3953_v52 = vadd.f32 %v12371_v18, %v3809_v37  ;;  %v3955_v43 = vadd.f32 %v12375_v34, %v3811_v12  ;;  %v3957_v18 = vsub.f32 0.0, %v12107_v1  ;;  %v3960_v34 = vsub.f32 0.0, %v12110_v11  ;;  %v15754_v1 = vld [vmem:[#allocation33_spill] sm:$0xff] }
 0xa51   :  { %4146 = vrot.lane.b32.xlu1 %v4099_v62, %s8307_s9  ;;  %4200 = vrot.lane.b32.xlu0 %v3942_v27, %s8314_s25  ;;  %v4020_v54 = vmul.f32 %v12373_v38, %v3956_v40  ;;  %v3959_v19 = vsub.f32 0.0, %v12117_v7  ;;  %v3962_v48 = vsub.f32 0.0, %v12120_v59  ;;  %v3966_v16 = vsub.f32 0.0, %v12141_v39  ;;  %v15761_v12 = vld [vmem:[#allocation69_spill] sm:$0xff] }
 0xa52   :  { %v4021_v5 = vmul.f32 %v12379_v60, %v3957_v18  ;;  %v4024_v32 = vmul.f32 %v12381_v22, %v3960_v34  ;;  %v3961_v60 = vsub.f32 0.0, %v12128_v36  ;;  %v15763_v34 = vld [vmem:[#allocation97_spill] sm:$0xff] }
 0xa53   :  { %v4023_v24 = vmul.f32 %v12383_v28, %v3959_v19  ;;  %v4026_v61 = vmul.f32 %v15754_v1, %v3962_v48  ;;  %v15768_v19 = vld [vmem:[#allocation47_spill] sm:$0xff]  ;;  %v15769_v48 = vld [vmem:[#allocation86_spill] sm:$0xff]  ;;  %v15773_v1 = vld [vmem:[#allocation49_spill] sm:$0xff] }
 0xa54   :  { %v4025_v59 = vmul.f32 %v12387_v57, %v3961_v60  ;;  %v15777_v60 = vld [vmem:[#allocation89_spill] sm:$0xff] }
 0xa55   :  { %4198 = vrot.lane.b32.xlu1 %v3941_v31, %s8314_s25  ;;  %4204 = vrot.lane.b32.xlu0 %v3944_v53, %s8314_s25  ;;  %v3964_v31 = vsub.f32 0.0, %v12131_v49 }
 0xa57   :  { %v4028_v14 = vmul.f32 %v15755_v30, %v3964_v31  ;;  %v15778_v31 = vld [vmem:[#allocation67_spill] sm:$0xff] }
 0xa59   :  { %4202 = vrot.lane.b32.xlu1 %v3943_v10, %s8314_s25  ;;  %4208 = vrot.lane.b32.xlu0 %v3946_v26, %s8314_s25  ;;  %v3963_v26 = vsub.f32 0.0, %v12138_v45 }
 0xa5d   :  { %4206 = vrot.lane.b32.xlu1 %v3945_v20, %s8314_s25  ;;  %4212 = vrot.lane.b32.xlu0 %v3948_v44, %s8314_s25  ;;  %v15756_v20 = vld [vmem:[#allocation71_spill] sm:$0xff] }
 0xa5e   :  { %v4027_v49 = vmul.f32 %v15756_v20, %v3963_v26  ;;  %v15757_v44 = vld [vmem:[#allocation59_spill] sm:$0xff] }
 0xa5f   :  { %v4030_v63 = vmul.f32 %v15757_v44, %v3966_v16 }
 0xa61   :  { %4210 = vrot.lane.b32.xlu1 %v3947_v0, %s8314_s25  ;;  %4216 = vrot.lane.b32.xlu0 %v3950_v47, %s8314_s25  ;;  %v3965_v0 = vsub.f32 0.0, %v12148_v21  ;;  %v3968_v47 = vsub.f32 0.0, %v12151_v35 }
 0xa63   :  { %v4029_v39 = vmul.f32 %v15758_v6, %v3965_v0 }
 0xa65   :  { %4214 = vrot.lane.b32.xlu1 %v3949_v58, %s8314_s25  ;;  %4220 = vrot.lane.b32.xlu0 %v3952_v8, %s8314_s25  ;;  %v15759_v58 = vld [vmem:[#allocation58_spill] sm:$0xff] }
 0xa66   :  { %v4032_v8 = vmul.f32 %v15759_v58, %v3968_v47 }
 0xa69   :  { %4218 = vrot.lane.b32.xlu1 %v3951_v15, %s8314_s25  ;;  %4224 = vrot.lane.b32.xlu0 %v3954_v50, %s8314_s25  ;;  %v3967_v15 = vsub.f32 0.0, %v12158_v4  ;;  %v3970_v50 = vsub.f32 0.0, %v12161_v33 }
 0xa6d   :  { %4222 = vrot.lane.b32.xlu1 %v3953_v52, %s8314_s25  ;;  %v15760_v52 = vld [vmem:[#allocation100_spill] sm:$0xff] }
 0xa6e   :  { %v4031_v35 = vmul.f32 %v15760_v52, %v3967_v15 }
 0xa71   :  { %4226 = vrot.lane.b32.xlu1 %v3955_v43, %s8314_s25  ;;  %v4034_v43 = vmul.f32 %v15761_v12, %v3970_v50 }
 0xa9f   :  { %v4117_v51 = vpop.permute.xlu0 %4116 }
 0xaa0   :  { %v4164_v23 = vadd.f32 %v4117_v51, %v4020_v54  ;;  %v3969_v51 = vsub.f32 0.0, %v12168_v17 }
 0xaa2   :  { %4260 = vrot.lane.b32.xlu0 %v4164_v23, %s8317_s27 }
 0xaa3   :  { %v4121_v25 = vpop.permute.xlu0 %4120 }
 0xaa4   :  { %v4166_v55 = vadd.f32 %v4121_v25, %v4022_v2  ;;  %v15762_v2 = vld [vmem:[#allocation105_spill] sm:$0xff]  ;;  %v3971_v25 = vsub.f32 0.0, %v12174_v42 }
 0xaa5   :  { %v4033_v4 = vmul.f32 %v15762_v2, %v3969_v51  ;;  %v15767_v42 = vld [vmem:[#allocation61_spill] sm:$0xff] }
 0xaa6   :  { %4264 = vrot.lane.b32.xlu0 %v4166_v55, %s8317_s27  ;;  %v4035_v55 = vmul.f32 %v15763_v34, %v3971_v25 }
 0xaa7   :  { %v4119_v38 = vpop.permute.xlu1 %4118  ;;  %v4125_v46 = vpop.permute.xlu0 %4124 }
 0xaa8   :  { %v4165_v27 = vadd.f32 %v4119_v38, %v4021_v5  ;;  %v4168_v62 = vadd.f32 %v4125_v46, %v4024_v32  ;;  %v15764_v5 = vld [vmem:[#allocation5_spill] sm:$0xff]  ;;  %v15765_v38 = vld [vmem:[#allocation34_spill] sm:$0xff] }
 0xaa9   :  { %v15766_v46 = vld [vmem:[#allocation9_spill] sm:$0xff] }
 0xaaa   :  { %4262 = vrot.lane.b32.xlu1 %v4165_v27, %s8317_s27  ;;  %4268 = vrot.lane.b32.xlu0 %v4168_v62, %s8317_s27  ;;  %v15770_v27 = vld [vmem:[#allocation64_spill] sm:$0xff] }
 0xaab   :  { %v4123_v11 = vpop.permute.xlu1 %4122  ;;  %v4129_v22 = vpop.permute.xlu0 %4128  ;;  %v15771_v62 = vld [vmem:[#allocation8_spill] sm:$0xff] }
 0xaac   :  { %v4167_v53 = vadd.f32 %v4123_v11, %v4023_v24  ;;  %v4170_v7 = vadd.f32 %v4129_v22, %v4026_v61  ;;  %v15772_v24 = vld [vmem:[#allocation88_spill] sm:$0xff]  ;;  %v15774_v61 = vld [vmem:[#allocation14_spill] sm:$0xff]  ;;  %v15775_v11 = vld [vmem:[#allocation65_spill] sm:$0xff] }
 0xaad   :  { %v15776_v22 = vld [vmem:[#allocation48_spill] sm:$0xff] }
 0xaae   :  { %4266 = vrot.lane.b32.xlu1 %v4167_v53, %s8317_s27  ;;  %4272 = vrot.lane.b32.xlu0 %v4170_v7, %s8317_s27  ;;  %v15779_v7 = vld [vmem:[#allocation91_spill] sm:$0xff] }
 0xaaf   :  { %v4127_v28 = vpop.permute.xlu1 %4126  ;;  %v4133_v10 = vpop.permute.xlu0 %4132 }
 0xab0   :  { %v4169_v9 = vadd.f32 %v4127_v28, %v4025_v59  ;;  %v4172_v36 = vadd.f32 %v4133_v10, %v4028_v14 }
 0xab2   :  { %4270 = vrot.lane.b32.xlu1 %v4169_v9, %s8317_s27  ;;  %4276 = vrot.lane.b32.xlu0 %v4172_v36, %s8317_s27 }
 0xab3   :  { %v4131_v57 = vpop.permute.xlu1 %4130  ;;  %v4137_v41 = vpop.permute.xlu0 %4136 }
 0xab4   :  { %v4171_v13 = vadd.f32 %v4131_v57, %v4027_v49  ;;  %v4174_v45 = vadd.f32 %v4137_v41, %v4030_v63 }
 0xab6   :  { %4274 = vrot.lane.b32.xlu1 %v4171_v13, %s8317_s27  ;;  %4280 = vrot.lane.b32.xlu0 %v4174_v45, %s8317_s27 }
 0xab7   :  { %v4135_v29 = vpop.permute.xlu1 %4134  ;;  %v4141_v56 = vpop.permute.xlu0 %4140 }
 0xab8   :  { %v4173_v37 = vadd.f32 %v4135_v29, %v4029_v39  ;;  %v4176_v21 = vadd.f32 %v4141_v56, %v4032_v8 }
 0xaba   :  { %4278 = vrot.lane.b32.xlu1 %v4173_v37, %s8317_s27  ;;  %4284 = vrot.lane.b32.xlu0 %v4176_v21, %s8317_s27 }
 0xabb   :  { %v4139_v40 = vpop.permute.xlu1 %4138  ;;  %v4145_v54 = vpop.permute.xlu0 %4144 }
 0xabc   :  { %v4175_v3 = vadd.f32 %v4139_v40, %v4031_v35  ;;  %v4178_v23 = vadd.f32 %v4145_v54, %v4034_v43 }
 0xabe   :  { %4282 = vrot.lane.b32.xlu1 %v4175_v3, %s8317_s27  ;;  %4288 = vrot.lane.b32.xlu0 %v4178_v23, %s8317_s27 }
 0xabf   :  { %v4143_v33 = vpop.permute.xlu1 %4142  ;;  %v4197_v53 = vpop.permute.xlu0 %4196 }
 0xac0   :  { %v4177_v18 = vadd.f32 %v4143_v33, %v4033_v4 }
 0xac2   :  { %4286 = vrot.lane.b32.xlu1 %v4177_v18, %s8317_s27  ;;  %4421 = vrot.lane.b32.xlu0 %v15764_v5, %s8315_s16 }
 0xac3   :  { %v4147_v17 = vpop.permute.xlu1 %4146  ;;  %v4201_v59 = vpop.permute.xlu0 %4200 }
 0xac4   :  { %v4179_v32 = vadd.f32 %v4147_v17, %v4035_v55 }
 0xac6   :  { %4290 = vrot.lane.b32.xlu1 %v4179_v32, %s8317_s27  ;;  %4425 = vrot.lane.b32.xlu0 %v15765_v38, %s8315_s16 }
 0xac7   :  { %v4199_v30 = vpop.permute.xlu1 %4198  ;;  %v4205_v14 = vpop.permute.xlu0 %4204 }
 0xaca   :  { %4423 = vrot.lane.b32.xlu1 %v15766_v46, %s8315_s16  ;;  %4429 = vrot.lane.b32.xlu0 %v15767_v42, %s8315_s16 }
 0xacb   :  { %v4203_v28 = vpop.permute.xlu1 %4202  ;;  %v4209_v10 = vpop.permute.xlu0 %4208 }
 0xace   :  { %4427 = vrot.lane.b32.xlu1 %v15768_v19, %s8315_s16  ;;  %4433 = vrot.lane.b32.xlu0 %v15769_v48, %s8315_s16 }
 0xacf   :  { %v4207_v26 = vpop.permute.xlu1 %4206  ;;  %v4213_v16 = vpop.permute.xlu0 %4212 }
 0xad2   :  { %4431 = vrot.lane.b32.xlu1 %v15770_v27, %s8315_s16  ;;  %4437 = vrot.lane.b32.xlu0 %v15771_v62, %s8315_s16 }
 0xad3   :  { %v4211_v9 = vpop.permute.xlu1 %4210  ;;  %v4217_v36 = vpop.permute.xlu0 %4216 }
 0xad6   :  { %4435 = vrot.lane.b32.xlu1 %v15772_v24, %s8315_s16  ;;  %4441 = vrot.lane.b32.xlu0 %v15773_v1, %s8315_s16  ;;  %v15813_v1 = vld [vmem:[#allocation39_spill] sm:$0xff] }
 0xad7   :  { %v4215_v20 = vpop.permute.xlu1 %4214  ;;  %v4221_v49 = vpop.permute.xlu0 %4220 }
 0xada   :  { %4439 = vrot.lane.b32.xlu1 %v15774_v61, %s8315_s16  ;;  %4445 = vrot.lane.b32.xlu0 %v15775_v11, %s8315_s16 }
 0xadb   :  { %v12583_v44 = vpop.permute.xlu1 %4218  ;;  %v12585_v63 = vpop.permute.xlu0 %4224 }
 0xade   :  { %4443 = vrot.lane.b32.xlu1 %v15776_v22, %s8315_s16  ;;  %4449 = vrot.lane.b32.xlu0 %v15777_v60, %s8315_s16 }
 0xadf   :  { %v12587_v57 = vpop.permute.xlu1 %4222 }
 0xae2   :  { %4447 = vrot.lane.b32.xlu1 %v15778_v31, %s8315_s16 }
 0xae3   :  { %v12590_v13 = vpop.permute.xlu1 %4226 }
 0xae6   :  { %4451 = vrot.lane.b32.xlu1 %v15779_v7, %s8315_s16 }
 0xb14   :  { %v4261_v41 = vpop.permute.xlu0 %4260 }
 0xb15   :  { %v4308_v0 = vsel %vm830_vm3, %v4197_v53, %v4261_v41 }
 0xb16   :  { %v4324_v47 = vmul.f32 0.25, %v4308_v0 }
 0xb18   :  { %v7414_v45 = vpack.c.bf16 %v4324_v47, %v4324_v47  ;;  %v4265_v6 = vpop.permute.xlu0 %4264 }
 0xb19   :  { %v4310_v39 = vsel %vm830_vm3, %v4201_v59, %v4265_v6 }
 0xb1a   :  { %7190 = vst.msk [vmem:[%s15011_s5 + $0x80] sm:$0xf] %vm927_vm1, %v7414_v45  ;;  %v4326_v58 = vmul.f32 0.25, %v4310_v39 }
 0xb1c   :  { %v7416_v8 = vpack.c.bf16 %v4326_v58, %v4326_v58  ;;  %v4263_v29 = vpop.permute.xlu1 %4262  ;;  %v4269_v56 = vpop.permute.xlu0 %4268 }
 0xb1d   :  { %v4309_v15 = vsel %vm830_vm3, %v4199_v30, %v4263_v29  ;;  %v4312_v50 = vsel %vm830_vm3, %v4205_v14, %v4269_v56 }
 0xb1e   :  { %7192 = vst.msk [vmem:[%s15011_s5 + $0x88] sm:$0xf] %vm927_vm1, %v7416_v8  ;;  %v4325_v37 = vmul.f32 0.25, %v4309_v15  ;;  %v4328_v21 = vmul.f32 0.25, %v4312_v50 }
 0xb20   :  { %v7415_v52 = vpack.c.bf16 %v4325_v37, %v4325_v37  ;;  %v7418_v35 = vpack.c.bf16 %v4328_v21, %v4328_v21  ;;  %v4267_v12 = vpop.permute.xlu1 %4266  ;;  %v4273_v43 = vpop.permute.xlu0 %4272 }
 0xb21   :  { %v4311_v40 = vsel %vm830_vm3, %v4203_v28, %v4267_v12  ;;  %v4314_v54 = vsel %vm830_vm3, %v4209_v10, %v4273_v43 }
 0xb22   :  { %7191 = vst.msk [vmem:[%s15011_s5 + $0x84] sm:$0xf] %vm927_vm1, %v7415_v52  ;;  %7194 = vst.msk [vmem:[%s15011_s5 + $0x90] sm:$0xf] %vm927_vm1, %v7418_v35  ;;  %v4327_v51 = vmul.f32 0.25, %v4311_v40  ;;  %v4330_v3 = vmul.f32 0.25, %v4314_v54 }
 0xb24   :  { %v7417_v23 = vpack.c.bf16 %v4327_v51, %v4327_v51  ;;  %v7420_v2 = vpack.c.bf16 %v4330_v3, %v4330_v3  ;;  %v4271_v4 = vpop.permute.xlu1 %4270  ;;  %v4277_v33 = vpop.permute.xlu0 %4276 }
 0xb25   :  { %v4313_v25 = vsel %vm830_vm3, %v4207_v26, %v4271_v4  ;;  %v4316_v18 = vsel %vm830_vm3, %v4213_v16, %v4277_v33 }
 0xb26   :  { %7193 = vst.msk [vmem:[%s15011_s5 + $0x8c] sm:$0xf] %vm927_vm1, %v7417_v23  ;;  %7196 = vst.msk [vmem:[%s15011_s5 + $0x98] sm:$0xf] %vm927_vm1, %v7420_v2  ;;  %v4329_v34 = vmul.f32 0.25, %v4313_v25  ;;  %v4332_v55 = vmul.f32 0.25, %v4316_v18 }
 0xb28   :  { %v7419_v17 = vpack.c.bf16 %v4329_v34, %v4329_v34  ;;  %v7422_v32 = vpack.c.bf16 %v4332_v55, %v4332_v55  ;;  %v4275_v53 = vpop.permute.xlu1 %4274  ;;  %v4281_v59 = vpop.permute.xlu0 %4280 }
 0xb29   :  { %v4315_v30 = vsel %vm830_vm3, %v4211_v9, %v4275_v53  ;;  %v4318_v14 = vsel %vm830_vm3, %v4217_v36, %v4281_v59 }
 0xb2a   :  { %7195 = vst.msk [vmem:[%s15011_s5 + $0x94] sm:$0xf] %vm927_vm1, %v7419_v17  ;;  %7198 = vst.msk [vmem:[%s15011_s5 + $0xa0] sm:$0xf] %vm927_vm1, %v7422_v32  ;;  %v4331_v28 = vmul.f32 0.25, %v4315_v30  ;;  %v4334_v10 = vmul.f32 0.25, %v4318_v14 }
 0xb2c   :  { %v7421_v26 = vpack.c.bf16 %v4331_v28, %v4331_v28  ;;  %v7424_v16 = vpack.c.bf16 %v4334_v10, %v4334_v10  ;;  %v4279_v41 = vpop.permute.xlu1 %4278  ;;  %v4285_v0 = vpop.permute.xlu0 %4284 }
 0xb2d   :  { %v4317_v9 = vsel %vm830_vm3, %v4215_v20, %v4279_v41  ;;  %v4320_v36 = vsel %vm830_vm3, %v4221_v49, %v4285_v0 }
 0xb2e   :  { %7197 = vst.msk [vmem:[%s15011_s5 + $0x9c] sm:$0xf] %vm927_vm1, %v7421_v26  ;;  %7200 = vst.msk [vmem:[%s15011_s5 + $0xa8] sm:$0xf] %vm927_vm1, %v7424_v16  ;;  %v4333_v47 = vmul.f32 0.25, %v4317_v9  ;;  %v4336_v45 = vmul.f32 0.25, %v4320_v36 }
 0xb30   :  { %v7423_v6 = vpack.c.bf16 %v4333_v47, %v4333_v47  ;;  %v7426_v39 = vpack.c.bf16 %v4336_v45, %v4336_v45  ;;  %v4283_v58 = vpop.permute.xlu1 %4282  ;;  %v4289_v8 = vpop.permute.xlu0 %4288 }
 0xb31   :  { %v4319_v20 = vsel %vm830_vm3, %v12583_v44, %v4283_v58  ;;  %v4322_v49 = vsel %vm830_vm3, %v12585_v63, %v4289_v8  ;;  %v15780_v58 = vld [vmem:[#allocation76_spill] sm:$0xff]  ;;  %v12696_v8 = vld [vmem:[%s15008_s3 + $0x10] sm:$0xff] }
 0xb32   :  { %7199 = vst.msk [vmem:[%s15011_s5 + $0xa4] sm:$0xf] %vm927_vm1, %v7423_v6  ;;  %7202 = vst.msk [vmem:[%s15011_s5 + $0xb0] sm:$0xf] %vm927_vm1, %v7426_v39  ;;  %v4335_v29 = vmul.f32 0.25, %v4319_v20  ;;  %v4338_v56 = vmul.f32 0.25, %v4322_v49 }
 0xb33   :  { %v15781_v20 = vld [vmem:[#allocation68_spill] sm:$0xff]  ;;  %v12705_v49 = vld [vmem:[%s15008_s3 + $0x18] sm:$0xff] }
 0xb34   :  { %v7425_v15 = vpack.c.bf16 %v4335_v29, %v4335_v29  ;;  %v7428_v50 = vpack.c.bf16 %v4338_v56, %v4338_v56  ;;  %v4287_v37 = vpop.permute.xlu1 %4286  ;;  %v4422_v21 = vpop.permute.xlu0 %4421  ;;  %v12712_v29 = vld [vmem:[%s15008_s3 + $0x20] sm:$0xff]  ;;  %v12719_v56 = vld [vmem:[%s15008_s3 + $0x28] sm:$0xff] }
 0xb35   :  { %v4321_v44 = vsel %vm830_vm3, %v12587_v57, %v4287_v37  ;;  %v4469_v63 = vsel %vm284_vm2, %v4422_v21, 0.0  ;;  %v15782_v37 = vld [vmem:[#allocation101_spill] sm:$0xff]  ;;  %v15783_v21 = vld [vmem:[#allocation60_spill] sm:$0xff] }
 0xb36   :  { %7201 = vst.msk [vmem:[%s15011_s5 + $0xac] sm:$0xf] %vm927_vm1, %v7425_v15  ;;  %7204 = vst.msk [vmem:[%s15011_s5 + $0xb8] sm:$0xf] %vm927_vm1, %v7428_v50  ;;  %v4337_v52 = vmul.f32 0.25, %v4321_v44  ;;  %4470 = vadd.xlane.f32.xlu0 %v4469_v63  ;;  %v12726_v15 = vld [vmem:[%s15008_s3 + $0x30] sm:$0xff] }
 0xb37   :  { %v12733_v50 = vld [vmem:[%s15008_s3 + $0x38] sm:$0xff]  ;;  %v12744_v44 = vld [vmem:[%s15008_s3 + $0x50] sm:$0xff] }
 0xb38   :  { %v7427_v35 = vpack.c.bf16 %v4337_v52, %v4337_v52  ;;  %v4291_v12 = vpop.permute.xlu1 %4290  ;;  %v4426_v43 = vpop.permute.xlu0 %4425  ;;  %v12751_v63 = vld [vmem:[%s15008_s3 + $0x58] sm:$0xff]  ;;  %v12758_v52 = vld [vmem:[%s15008_s3 + $0x60] sm:$0xff] }
 0xb39   :  { %v4323_v57 = vsel %vm830_vm3, %v12590_v13, %v4291_v12  ;;  %v4475_v40 = vsel %vm284_vm2, %v4426_v43, 0.0  ;;  %v12772_v12 = vld [vmem:[%s15008_s3 + $0x70] sm:$0xff]  ;;  %v12779_v43 = vld [vmem:[%s15008_s3 + $0x78] sm:$0xff] }
 0xb3a   :  { %7203 = vst.msk [vmem:[%s15011_s5 + $0xb4] sm:$0xf] %vm927_vm1, %v7427_v35  ;;  %v4339_v54 = vmul.f32 0.25, %v4323_v57  ;;  %4476 = vadd.xlane.f32.xlu0 %v4475_v40  ;;  %v12765_v35 = vld [vmem:[%s15008_s3 + $0x68] sm:$0xff]  ;;  %v15784_v57 = vld [vmem:[#allocation95_spill] sm:$0xff] }
 0xb3b   :  { %v15785_v40 = vld [vmem:[#allocation92_spill] sm:$0xff] }
 0xb3c   :  { %v7429_v51 = vpack.c.bf16 %v4339_v54, %v4339_v54  ;;  %v4424_v3 = vpop.permute.xlu1 %4423  ;;  %v4430_v23 = vpop.permute.xlu0 %4429  ;;  %v15786_v54 = vld [vmem:[#allocation80_spill] sm:$0xff] }
 0xb3d   :  { %v4472_v2 = vsel %vm284_vm2, %v4424_v3, 0.0  ;;  %v4481_v55 = vsel %vm284_vm2, %v4430_v23, 0.0  ;;  %v15788_v3 = vld [vmem:[#allocation90_spill] sm:$0xff]  ;;  %v15789_v23 = vld [vmem:[#allocation117_spill] sm:$0xff] }
 0xb3e   :  { %7205 = vst.msk [vmem:[%s15011_s5 + $0xbc] sm:$0xf] %vm927_vm1, %v7429_v51  ;;  %4473 = vadd.xlane.f32.xlu1 %v4472_v2  ;;  %v15787_v51 = vld [vmem:[#allocation94_spill] sm:$0xff]  ;;  %v15790_v2 = vld [vmem:[#allocation116_spill] sm:$0xff] }
 0xb40   :  { %v4428_v13 = vpop.permute.xlu1 %4427  ;;  %v4434_v4 = vpop.permute.xlu0 %4433 }
 0xb41   :  { %v4478_v33 = vsel %vm284_vm2, %v4428_v13, 0.0  ;;  %v4487_v53 = vsel %vm284_vm2, %v4434_v4, 0.0  ;;  %v15791_v13 = vld [vmem:[#allocation54_spill] sm:$0xff] }
 0xb42   :  { %4479 = vadd.xlane.f32.xlu0 %v4478_v33  ;;  %v15792_v4 = vld [vmem:[#allocation98_spill] sm:$0xff]  ;;  %v15793_v33 = vld [vmem:[#allocation99_spill] sm:$0xff] }
 0xb44   :  { %v4432_v25 = vpop.permute.xlu1 %4431  ;;  %v4438_v18 = vpop.permute.xlu0 %4437 }
 0xb45   :  { %v4484_v34 = vsel %vm284_vm2, %v4432_v25, 0.0  ;;  %v4493_v28 = vsel %vm284_vm2, %v4438_v18, 0.0  ;;  %v15794_v25 = vld [vmem:[#allocation74_spill] sm:$0xff]  ;;  %v15795_v18 = vld [vmem:[#allocation107_spill] sm:$0xff] }
 0xb46   :  { %4485 = vadd.xlane.f32.xlu1 %v4484_v34  ;;  %4482 = vadd.xlane.f32.xlu0 %v4481_v55  ;;  %v15796_v34 = vld [vmem:[#allocation102_spill] sm:$0xff] }
 0xb47   :  { %v15797_v55 = vld [vmem:[#allocation62_spill] sm:$0xff] }
 0xb48   :  { %v4436_v17 = vpop.permute.xlu1 %4435  ;;  %v4442_v59 = vpop.permute.xlu0 %4441 }
 0xb49   :  { %v4490_v32 = vsel %vm284_vm2, %v4436_v17, 0.0  ;;  %v4499_v41 = vsel %vm284_vm2, %v4442_v59, 0.0  ;;  %v15798_v17 = vld [vmem:[#allocation110_spill] sm:$0xff] }
 0xb4a   :  { %4491 = vadd.xlane.f32.xlu1 %v4490_v32  ;;  %4488 = vadd.xlane.f32.xlu0 %v4487_v53  ;;  %v15799_v32 = vld [vmem:[#allocation73_spill] sm:$0xff] }
 0xb4c   :  { %v4440_v30 = vpop.permute.xlu1 %4439  ;;  %v4446_v10 = vpop.permute.xlu0 %4445 }
 0xb4d   :  { %v4496_v14 = vsel %vm284_vm2, %v4440_v30, 0.0  ;;  %v4505_v36 = vsel %vm284_vm2, %v4446_v10, 0.0 }
 0xb4e   :  { %4497 = vadd.xlane.f32.xlu1 %v4496_v14  ;;  %4494 = vadd.xlane.f32.xlu0 %v4493_v28 }
 0xb50   :  { %v4444_v26 = vpop.permute.xlu1 %4443  ;;  %v4450_v47 = vpop.permute.xlu0 %4449 }
 0xb51   :  { %v4502_v16 = vsel %vm284_vm2, %v4444_v26, 0.0  ;;  %v4511_v39 = vsel %vm284_vm2, %v4450_v47, 0.0 }
 0xb52   :  { %4503 = vadd.xlane.f32.xlu1 %v4502_v16  ;;  %4500 = vadd.xlane.f32.xlu0 %v4499_v41 }
 0xb54   :  { %v4448_v0 = vpop.permute.xlu1 %4447 }
 0xb55   :  { %v4508_v9 = vsel %vm284_vm2, %v4448_v0, 0.0 }
 0xb56   :  { %4509 = vadd.xlane.f32.xlu1 %v4508_v9  ;;  %4506 = vadd.xlane.f32.xlu0 %v4505_v36 }
 0xb58   :  { %v4452_v45 = vpop.permute.xlu1 %4451 }
 0xb59   :  { %v4514_v6 = vsel %vm284_vm2, %v4452_v45, 0.0 }
 0xb5a   :  { %4515 = vadd.xlane.f32.xlu1 %v4514_v6  ;;  %4512 = vadd.xlane.f32.xlu0 %v4511_v39 }
 0xb6b   :  { %4583 = vrot.lane.b32.xlu1 %v15780_v58, %s8314_s25 }
 0xb6f   :  { %4585 = vrot.lane.b32.xlu1 %v12696_v8, %s8314_s25 }
 0xb70   :  { %4581 = vrot.lane.b32.xlu0 %v15781_v20, %s8314_s25 }
 0xb73   :  { %4587 = vrot.lane.b32.xlu1 %v12705_v49, %s8314_s25 }
 0xb74   :  { %4589 = vrot.lane.b32.xlu0 %v12712_v29, %s8314_s25 }
 0xb77   :  { %4591 = vrot.lane.b32.xlu1 %v12719_v56, %s8314_s25 }
 0xb78   :  { %4593 = vrot.lane.b32.xlu0 %v12726_v15, %s8314_s25 }
 0xb7b   :  { %4595 = vrot.lane.b32.xlu1 %v12733_v50, %s8314_s25 }
 0xb7c   :  { %4597 = vrot.lane.b32.xlu0 %v15782_v37, %s8314_s25 }
 0xb7f   :  { %4599 = vrot.lane.b32.xlu1 %v15783_v21, %s8314_s25 }
 0xb80   :  { %4601 = vrot.lane.b32.xlu0 %v12744_v44, %s8314_s25 }
 0xb83   :  { %4603 = vrot.lane.b32.xlu1 %v12751_v63, %s8314_s25 }
 0xb84   :  { %4605 = vrot.lane.b32.xlu0 %v12758_v52, %s8314_s25 }
 0xb87   :  { %4607 = vrot.lane.b32.xlu1 %v12765_v35, %s8314_s25 }
 0xb88   :  { %4609 = vrot.lane.b32.xlu0 %v12772_v12, %s8314_s25 }
 0xb8b   :  { %4611 = vrot.lane.b32.xlu1 %v12779_v43, %s8314_s25 }
 0xb8c   :  { %4645 = vrot.lane.b32.xlu0 %v15784_v57, %s8317_s27 }
 0xb8f   :  { %4647 = vrot.lane.b32.xlu1 %v15785_v40, %s8317_s27 }
 0xb90   :  { %4649 = vrot.lane.b32.xlu0 %v15786_v54, %s8317_s27 }
 0xb93   :  { %4651 = vrot.lane.b32.xlu1 %v15787_v51, %s8317_s27 }
 0xb94   :  { %4653 = vrot.lane.b32.xlu0 %v15788_v3, %s8317_s27 }
 0xb97   :  { %4655 = vrot.lane.b32.xlu1 %v15789_v23, %s8317_s27 }
 0xb98   :  { %4657 = vrot.lane.b32.xlu0 %v15790_v2, %s8317_s27 }
 0xb9b   :  { %4659 = vrot.lane.b32.xlu1 %v15791_v13, %s8317_s27 }
 0xb9c   :  { %4661 = vrot.lane.b32.xlu0 %v15792_v4, %s8317_s27 }
 0xb9f   :  { %4663 = vrot.lane.b32.xlu1 %v15793_v33, %s8317_s27 }
 0xba0   :  { %4665 = vrot.lane.b32.xlu0 %v15794_v25, %s8317_s27 }
 0xba3   :  { %4667 = vrot.lane.b32.xlu1 %v15795_v18, %s8317_s27 }
 0xba4   :  { %4669 = vrot.lane.b32.xlu0 %v15796_v34, %s8317_s27 }
 0xba7   :  { %4671 = vrot.lane.b32.xlu1 %v15797_v55, %s8317_s27 }
 0xba8   :  { %4673 = vrot.lane.b32.xlu0 %v15798_v17, %s8317_s27 }
 0xbab   :  { %4675 = vrot.lane.b32.xlu1 %v15799_v32, %s8317_s27 }
 0xbc3   :  { %v4471_v53 = vpop.xlane.xlu0 %4470 }
 0xbc4   :  { %v4517_v57 = vmul.f32 0.0625, %v4471_v53 }
 0xbc6   :  { %v4533_v51 = vadd.f32 1.1920929e-07, %v4517_v57 }
 0xbc7   :  { %v4477_v59 = vpop.xlane.xlu0 %4476 }
 0xbc8   :  { %v4519_v3 = vmul.f32 0.0625, %v4477_v59  ;;  %7994 = vrsqrt.f32 %v4533_v51 }
 0xbca   :  { %v4535_v4 = vadd.f32 1.1920929e-07, %v4519_v3 }
 0xbcb   :  { %v4474_v30 = vpop.xlane.xlu1 %4473 }
 0xbcc   :  { %v4518_v13 = vmul.f32 0.0625, %v4474_v30  ;;  %7996 = vrsqrt.f32 %v4535_v4 }
 0xbce   :  { %v4534_v34 = vadd.f32 1.1920929e-07, %v4518_v13 }
 0xbcf   :  { %v4480_v14 = vpop.xlane.xlu0 %4479 }
 0xbd0   :  { %v4520_v55 = vmul.f32 0.0625, %v4480_v14  ;;  %7998 = vrsqrt.f32 %v4534_v34 }
 0xbd2   :  { %v4536_v57 = vadd.f32 1.1920929e-07, %v4520_v55 }
 0xbd3   :  { %v4486_v28 = vpop.xlane.xlu1 %4485  ;;  %v4483_v10 = vpop.xlane.xlu0 %4482 }
 0xbd4   :  { %v4521_v33 = vmul.f32 0.0625, %v4483_v10  ;;  %v4522_v7 = vmul.f32 0.0625, %v4486_v28  ;;  %v7995_v10 = vpop.eup %7994 }
 0xbd6   :  { %v4537_v17 = vadd.f32 1.1920929e-07, %v4521_v33  ;;  %v4538_v14 = vadd.f32 1.1920929e-07, %v4522_v7  ;;  %v15800_v33 = vld [vmem:[#allocation3_spill] sm:$0xff]  ;;  %v7997_v34 = vpop.eup %7996 }
 0xbd7   :  { %v4492_v26 = vpop.xlane.xlu1 %4491  ;;  %v4489_v16 = vpop.xlane.xlu0 %4488  ;;  %v12850_v60 = vmul.f32 %v7995_v10, %v15800_v33 }
 0xbd8   :  { %v4523_v32 = vmul.f32 0.0625, %v4489_v16  ;;  %8000 = vrsqrt.f32 %v4537_v17  ;;  %v4524_v13 = vmul.f32 0.0625, %v4492_v26  ;;  %v15801_v26 = vld [vmem:[#allocation15_spill] sm:$0xff] }
 0xbd9   :  { %8002 = vrsqrt.f32 %v4536_v57 }
 0xbda   :  { %v4539_v30 = vadd.f32 1.1920929e-07, %v4523_v32  ;;  %v7999_v7 = vpop.eup %7998 }
 0xbdb   :  { %v4498_v41 = vpop.xlane.xlu1 %4497  ;;  %v4495_v0 = vpop.xlane.xlu0 %4494 }
 0xbdc   :  { %v4525_v51 = vmul.f32 0.0625, %v4495_v0  ;;  %8004 = vrsqrt.f32 %v4539_v30  ;;  %v4540_v0 = vadd.f32 1.1920929e-07, %v4524_v13  ;;  %v4526_v17 = vmul.f32 0.0625, %v4498_v41 }
 0xbdd   :  { %8006 = vrsqrt.f32 %v4538_v14  ;;  %v12856_v30 = vmul.f32 %v7997_v34, %v15801_v26  ;;  %v15803_v34 = vld [vmem:[#allocation23_spill] sm:$0xff] }
 0xbde   :  { %v4541_v16 = vadd.f32 1.1920929e-07, %v4525_v51  ;;  %v4542_v33 = vadd.f32 1.1920929e-07, %v4526_v17 }
 0xbdf   :  { %v12815_v9 = vpop.xlane.xlu1 %4503  ;;  %v4501_v36 = vpop.xlane.xlu0 %4500 }
 0xbe0   :  { %v4527_v4 = vmul.f32 0.0625, %v4501_v36  ;;  %8008 = vrsqrt.f32 %v4541_v16  ;;  %v4528_v14 = vmul.f32 0.0625, %v12815_v9 }
 0xbe1   :  { %8010 = vrsqrt.f32 %v4540_v0 }
 0xbe2   :  { %v4543_v22 = vadd.f32 1.1920929e-07, %v4527_v4  ;;  %v8001_v36 = vpop.eup %8000  ;;  %v15802_v4 = vld [vmem:[#allocation6_spill] sm:$0xff]  ;;  %v4544_v17 = vadd.f32 1.1920929e-07, %v4528_v14 }
 0xbe3   :  { %v12817_v47 = vpop.xlane.xlu1 %4509  ;;  %v4507_v45 = vpop.xlane.xlu0 %4506  ;;  %v12867_v26 = vmul.f32 %v8001_v36, %v15803_v34  ;;  %v15805_v36 = vld [vmem:[#allocation35_spill] sm:$0xff] }
 0xbe4   :  { %v4529_v57 = vmul.f32 0.0625, %v4507_v45  ;;  %8012 = vrsqrt.f32 %v4543_v22  ;;  %v8003_v45 = vpop.eup %8002 }
 0xbe5   :  { %8014 = vrsqrt.f32 %v4542_v33 }
 0xbe6   :  { %v4545_v13 = vadd.f32 1.1920929e-07, %v4529_v57 }
 0xbe7   :  { %v12819_v6 = vpop.xlane.xlu1 %4515  ;;  %v4513_v39 = vpop.xlane.xlu0 %4512 }
 0xbe8   :  { %v4531_v16 = vmul.f32 0.0625, %v4513_v39  ;;  %v4530_v39 = vmul.f32 0.0625, %v12817_v47  ;;  %8016 = vrsqrt.f32 %v4545_v13 }
 0xbe9   :  { %8018 = vrsqrt.f32 %v4544_v17 }
 0xbea   :  { %v4547_v57 = vadd.f32 1.1920929e-07, %v4531_v16  ;;  %v4546_v13 = vadd.f32 1.1920929e-07, %v4530_v39  ;;  %v4532_v16 = vmul.f32 0.0625, %v12819_v6 }
 0xbeb   :  { %v12821_v58 = vpop.permute.xlu1 %4583  ;;  %v12823_v20 = vpop.permute.xlu0 %4581 }
 0xbec   :  { %8020 = vrsqrt.f32 %v4547_v57  ;;  %v4548_v6 = vadd.f32 1.1920929e-07, %v4532_v16  ;;  %v15810_v16 = vld [vmem:[#allocation7_spill] sm:$0xff] }
 0xbed   :  { %8022 = vrsqrt.f32 %v4546_v13 }
 0xbee   :  { %8024 = vrsqrt.f32 %v4548_v6 }
 0xbef   :  { %v12825_v37 = vpop.permute.xlu1 %4585  ;;  %v12827_v21 = vpop.permute.xlu0 %4589 }
 0xbf3   :  { %v12829_v40 = vpop.permute.xlu1 %4587  ;;  %v12831_v54 = vpop.permute.xlu0 %4593 }
 0xbf7   :  { %v12833_v23 = vpop.permute.xlu1 %4591  ;;  %v12835_v2 = vpop.permute.xlu0 %4597 }
 0xbfb   :  { %v12837_v25 = vpop.permute.xlu1 %4595  ;;  %v12839_v18 = vpop.permute.xlu0 %4601 }
 0xbff   :  { %v12841_v53 = vpop.permute.xlu1 %4599  ;;  %v12843_v59 = vpop.permute.xlu0 %4605 }
 0xc03   :  { %v12845_v3 = vpop.permute.xlu1 %4603  ;;  %v12847_v31 = vpop.permute.xlu0 %4609 }
 0xc07   :  { %v12852_v55 = vpop.permute.xlu1 %4607  ;;  %v4646_v28 = vpop.permute.xlu0 %4645 }
 0xc08   :  { %v4693_v32 = vmul.f32 %v4646_v28, %v12850_v60  ;;  %v12864_v28 = vmul.f32 %v7999_v7, %v15802_v4 }
 0xc0a   :  { %4725 = vrot.lane.b32.xlu0 %v4693_v32, %s8307_s9  ;;  %v8005_v32 = vpop.eup %8004 }
 0xc0b   :  { %v12859_v51 = vpop.permute.xlu1 %4611  ;;  %v4650_v10 = vpop.permute.xlu0 %4649  ;;  %v12877_v34 = vmul.f32 %v8005_v32, %v15805_v36  ;;  %v15807_v36 = vld [vmem:[#allocation4_spill] sm:$0xff] }
 0xc0c   :  { %v4695_v41 = vmul.f32 %v4650_v10, %v12856_v30  ;;  %v8007_v7 = vpop.eup %8006  ;;  %v15804_v10 = vld [vmem:[#allocation17_spill] sm:$0xff] }
 0xc0d   :  { %v12874_v4 = vmul.f32 %v8003_v45, %v15804_v10  ;;  %v8009_v33 = vpop.eup %8008  ;;  %v15808_v10 = vld [vmem:[#allocation37_spill] sm:$0xff] }
 0xc0e   :  { %4729 = vrot.lane.b32.xlu0 %v4695_v41, %s8307_s9  ;;  %v8011_v45 = vpop.eup %8010 }
 0xc0f   :  { %v4648_v11 = vpop.permute.xlu1 %4647  ;;  %v4654_v0 = vpop.permute.xlu0 %4653 }
 0xc10   :  { %v4694_v9 = vmul.f32 %v4648_v11, %v12864_v28  ;;  %v4697_v22 = vmul.f32 %v4654_v0, %v12867_v26  ;;  %v15806_v0 = vld [vmem:[#allocation24_spill] sm:$0xff]  ;;  %v8013_v17 = vpop.eup %8012 }
 0xc11   :  { %v12885_v32 = vmul.f32 %v8007_v7, %v15806_v0  ;;  %v8015_v57 = vpop.eup %8014  ;;  %v12895_v7 = vmul.f32 %v8011_v45, %v15808_v10  ;;  %v15809_v0 = vld [vmem:[#allocation16_spill] sm:$0xff]  ;;  %v15811_v45 = vld [vmem:[#allocation25_spill] sm:$0xff] }
 0xc12   :  { %4727 = vrot.lane.b32.xlu1 %v4694_v9, %s8307_s9  ;;  %4733 = vrot.lane.b32.xlu0 %v4697_v22, %s8307_s9  ;;  %v12888_v9 = vmul.f32 %v8009_v33, %v15807_v36  ;;  %v12898_v33 = vmul.f32 %v8013_v17, %v15809_v0  ;;  %v12905_v61 = vmul.f32 %v8015_v57, %v15810_v16 }
 0xc13   :  { %v4652_v14 = vpop.permute.xlu1 %4651  ;;  %v4658_v11 = vpop.permute.xlu0 %4657 }
 0xc14   :  { %v4696_v41 = vmul.f32 %v4652_v14, %v12874_v4  ;;  %v4699_v47 = vmul.f32 %v4658_v11, %v12877_v34 }
 0xc16   :  { %4731 = vrot.lane.b32.xlu1 %v4696_v41, %s8307_s9  ;;  %4737 = vrot.lane.b32.xlu0 %v4699_v47, %s8307_s9  ;;  %v8017_v41 = vpop.eup %8016 }
 0xc17   :  { %v4656_v22 = vpop.permute.xlu1 %4655  ;;  %v4662_v14 = vpop.permute.xlu0 %4661  ;;  %v12908_v10 = vmul.f32 %v8017_v41, %v15811_v45 }
 0xc18   :  { %v4698_v11 = vmul.f32 %v4656_v22, %v12885_v32  ;;  %v4701_v39 = vmul.f32 %v4662_v14, %v12888_v9  ;;  %v8019_v13 = vpop.eup %8018 }
 0xc19   :  { %v8021_v17 = vpop.eup %8020 }
 0xc1a   :  { %4735 = vrot.lane.b32.xlu1 %v4698_v11, %s8307_s9  ;;  %4741 = vrot.lane.b32.xlu0 %v4701_v39, %s8307_s9  ;;  %v12918_v57 = vmul.f32 %v8021_v17, %v15813_v1  ;;  %v8023_v41 = vpop.eup %8022  ;;  %v13009_v1 = vld [vmem:[%s15006_s4 + $0x48] sm:$0xff] }
 0xc1b   :  { %v4660_v47 = vpop.permute.xlu1 %4659  ;;  %v4666_v36 = vpop.permute.xlu0 %4665  ;;  %15826 = vst [vmem:[#allocation38_spill] sm:$0xff] %v13009_v1 }
 0xc1c   :  { %v4700_v22 = vmul.f32 %v4660_v47, %v12895_v7  ;;  %v4703_v14 = vmul.f32 %v4666_v36, %v12898_v33  ;;  %v15812_v36 = vld [vmem:[#allocation18_spill] sm:$0xff] }
 0xc1d   :  { %v12915_v6 = vmul.f32 %v8019_v13, %v15812_v36  ;;  %v8025_v13 = vpop.eup %8024  ;;  %v13016_v36 = vld [vmem:[%s15006_s4 + $0x60] sm:$0xff] }
 0xc1e   :  { %4739 = vrot.lane.b32.xlu1 %v4700_v22, %s8307_s9  ;;  %4745 = vrot.lane.b32.xlu0 %v4703_v14, %s8307_s9  ;;  %15827 = vst [vmem:[#allocation118_spill] sm:$0xff] %v13016_v36 }
 0xc1f   :  { %v4664_v11 = vpop.permute.xlu1 %4663  ;;  %v4670_v39 = vpop.permute.xlu0 %4669 }
 0xc20   :  { %v4702_v0 = vmul.f32 %v4664_v11, %v12905_v61  ;;  %v4705_v47 = vmul.f32 %v4670_v39, %v12908_v10  ;;  %v15814_v11 = vld [vmem:[#allocation27_spill] sm:$0xff]  ;;  %v15815_v39 = vld [vmem:[#allocation42_spill] sm:$0xff] }
 0xc21   :  { %v12925_v24 = vmul.f32 %v8023_v41, %v15814_v11  ;;  %v12946_v41 = vld [vmem:[%s15006_s4 + $0x10] sm:$0xff] }
 0xc22   :  { %4743 = vrot.lane.b32.xlu1 %v4702_v0, %s8307_s9  ;;  %4749 = vrot.lane.b32.xlu0 %v4705_v47, %s8307_s9  ;;  %v12931_v47 = vmul.f32 %v8025_v13, %v15815_v39  ;;  %15817 = vst [vmem:[#allocation51_spill] sm:$0xff] %v12946_v41  ;;  %v12960_v13 = vld [vmem:[%s15006_s4 + $0x20] sm:$0xff]  ;;  %v12995_v39 = vld [vmem:[%s15006_s4 + $0x38] sm:$0xff] }
 0xc23   :  { %v4668_v22 = vpop.permute.xlu1 %4667  ;;  %v4674_v14 = vpop.permute.xlu0 %4673  ;;  %15819 = vst [vmem:[#allocation108_spill] sm:$0xff] %v12960_v13  ;;  %15824 = vst [vmem:[#allocation57_spill] sm:$0xff] %v12995_v39  ;;  %v13002_v11 = vld [vmem:[%s15006_s4 + $0x50] sm:$0xff] }
 0xc24   :  { %v4704_v45 = vmul.f32 %v4668_v22, %v12915_v6  ;;  %v4707_v16 = vmul.f32 %v4674_v14, %v12918_v57  ;;  %v12937_v22 = vld [vmem:[%s15006_s4] sm:$0xff]  ;;  %v12953_v14 = vld [vmem:[%s15006_s4 + $0x8] sm:$0xff]  ;;  %15825 = vst [vmem:[#allocation52_spill] sm:$0xff] %v13002_v11 }
 0xc25   :  { %15816 = vst [vmem:[#allocation55_spill] sm:$0xff] %v12937_v22  ;;  %15818 = vst [vmem:[#allocation32_spill] sm:$0xff] %v12953_v14 }
 0xc26   :  { %4747 = vrot.lane.b32.xlu1 %v4704_v45, %s8307_s9  ;;  %4753 = vrot.lane.b32.xlu0 %v4707_v16, %s8307_s9 }
 0xc27   :  { %v4672_v17 = vpop.permute.xlu1 %4671 }
 0xc28   :  { %v4706_v0 = vmul.f32 %v4672_v17, %v12925_v24  ;;  %v12967_v17 = vld [vmem:[%s15006_s4 + $0x18] sm:$0xff] }
 0xc29   :  { %15820 = vst [vmem:[#allocation56_spill] sm:$0xff] %v12967_v17 }
 0xc2a   :  { %4751 = vrot.lane.b32.xlu1 %v4706_v0, %s8307_s9  ;;  %4805 = vrot.lane.b32.xlu0 %v12937_v22, %s8314_s25  ;;  %v12974_v0 = vld [vmem:[%s15006_s4 + $0x30] sm:$0xff] }
 0xc2b   :  { %v4676_v45 = vpop.permute.xlu1 %4675  ;;  %15821 = vst [vmem:[#allocation43_spill] sm:$0xff] %v12974_v0 }
 0xc2c   :  { %v4708_v16 = vmul.f32 %v4676_v45, %v12931_v47  ;;  %v12981_v45 = vld [vmem:[%s15006_s4 + $0x28] sm:$0xff] }
 0xc2d   :  { %15822 = vst [vmem:[#allocation44_spill] sm:$0xff] %v12981_v45 }
 0xc2e   :  { %4755 = vrot.lane.b32.xlu1 %v4708_v16, %s8307_s9  ;;  %4809 = vrot.lane.b32.xlu0 %v12946_v41, %s8314_s25  ;;  %v12988_v16 = vld [vmem:[%s15006_s4 + $0x40] sm:$0xff] }
 0xc2f   :  { %15823 = vst [vmem:[#allocation53_spill] sm:$0xff] %v12988_v16 }
 0xc32   :  { %4807 = vrot.lane.b32.xlu1 %v12953_v14, %s8314_s25  ;;  %4813 = vrot.lane.b32.xlu0 %v12960_v13, %s8314_s25 }
 0xc36   :  { %4811 = vrot.lane.b32.xlu1 %v12967_v17, %s8314_s25  ;;  %4817 = vrot.lane.b32.xlu0 %v12974_v0, %s8314_s25 }
 0xc3a   :  { %4815 = vrot.lane.b32.xlu1 %v12981_v45, %s8314_s25  ;;  %4821 = vrot.lane.b32.xlu0 %v12988_v16, %s8314_s25 }
 0xc3e   :  { %4819 = vrot.lane.b32.xlu1 %v12995_v39, %s8314_s25  ;;  %4825 = vrot.lane.b32.xlu0 %v13002_v11, %s8314_s25  ;;  %v13023_v11 = vld [vmem:[%s15006_s4 + $0x58] sm:$0xff] }
 0xc3f   :  { %15828 = vst [vmem:[#allocation115_spill] sm:$0xff] %v13023_v11 }
 0xc42   :  { %4823 = vrot.lane.b32.xlu1 %v13009_v1, %s8314_s25  ;;  %4829 = vrot.lane.b32.xlu0 %v13016_v36, %s8314_s25  ;;  %v13030_v1 = vld [vmem:[%s15006_s4 + $0x70] sm:$0xff]  ;;  %v13037_v36 = vld [vmem:[%s15006_s4 + $0x68] sm:$0xff] }
 0xc43   :  { %15829 = vst [vmem:[#allocation77_spill] sm:$0xff] %v13030_v1  ;;  %15830 = vst [vmem:[#allocation81_spill] sm:$0xff] %v13037_v36 }
 0xc46   :  { %4827 = vrot.lane.b32.xlu1 %v13023_v11, %s8314_s25  ;;  %4833 = vrot.lane.b32.xlu0 %v13030_v1, %s8314_s25  ;;  %v13044_v11 = vld [vmem:[%s15008_s3] sm:$0xff]  ;;  %v13051_v1 = vld [vmem:[%s15006_s4 + $0x78] sm:$0xff] }
 0xc47   :  { %15831 = vst [vmem:[#allocation85_spill] sm:$0xff] %v13044_v11  ;;  %15832 = vst [vmem:[#allocation96_spill] sm:$0xff] %v13051_v1 }
 0xc4a   :  { %4831 = vrot.lane.b32.xlu1 %v13037_v36, %s8314_s25  ;;  %4869 = vrot.lane.b32.xlu0 %v13044_v11, %s8317_s27  ;;  %v13060_v36 = vld [vmem:[%s15008_s3 + $0x8] sm:$0xff] }
 0xc4b   :  { %15833 = vst [vmem:[#allocation82_spill] sm:$0xff] %v13060_v36 }
 0xc4e   :  { %4835 = vrot.lane.b32.xlu1 %v13051_v1, %s8314_s25  ;;  %4873 = vrot.lane.b32.xlu0 %v12696_v8, %s8317_s27  ;;  %v13075_v8 = vld [vmem:[%s15008_s3 + $0x40] sm:$0xff] }
 0xc4f   :  { %15834 = vst [vmem:[#allocation87_spill] sm:$0xff] %v13075_v8 }
 0xc52   :  { %4871 = vrot.lane.b32.xlu1 %v13060_v36, %s8317_s27  ;;  %4877 = vrot.lane.b32.xlu0 %v12712_v29, %s8317_s27 }
 0xc56   :  { %4875 = vrot.lane.b32.xlu1 %v12705_v49, %s8317_s27  ;;  %4881 = vrot.lane.b32.xlu0 %v12726_v15, %s8317_s27  ;;  %v13086_v49 = vld [vmem:[%s15008_s3 + $0x48] sm:$0xff] }
 0xc57   :  { %15835 = vst [vmem:[#allocation50_spill] sm:$0xff] %v13086_v49 }
 0xc5a   :  { %4879 = vrot.lane.b32.xlu1 %v12719_v56, %s8317_s27  ;;  %4885 = vrot.lane.b32.xlu0 %v13075_v8, %s8317_s27 }
 0xc5e   :  { %4883 = vrot.lane.b32.xlu1 %v12733_v50, %s8317_s27  ;;  %4889 = vrot.lane.b32.xlu0 %v12744_v44, %s8317_s27 }
 0xc62   :  { %4887 = vrot.lane.b32.xlu1 %v13086_v49, %s8317_s27  ;;  %4893 = vrot.lane.b32.xlu0 %v12758_v52, %s8317_s27 }
 0xc66   :  { %4891 = vrot.lane.b32.xlu1 %v12751_v63, %s8317_s27  ;;  %4897 = vrot.lane.b32.xlu0 %v12772_v12, %s8317_s27 }
 0xc6a   :  { %4895 = vrot.lane.b32.xlu1 %v12765_v35, %s8317_s27 }
 0xc6e   :  { %4899 = vrot.lane.b32.xlu1 %v12779_v43, %s8317_s27 }
 0xc7c   :  { %v13100_v29 = vpop.permute.xlu0 %4725 }
 0xc80   :  { %v13102_v56 = vpop.permute.xlu0 %4729 }
 0xc84   :  { %v13104_v15 = vpop.permute.xlu1 %4727  ;;  %v13106_v50 = vpop.permute.xlu0 %4733 }
 0xc88   :  { %v13108_v44 = vpop.permute.xlu1 %4731  ;;  %v13110_v63 = vpop.permute.xlu0 %4737 }
 0xc8c   :  { %v13112_v52 = vpop.permute.xlu1 %4735  ;;  %v13114_v12 = vpop.permute.xlu0 %4741 }
 0xc90   :  { %v13116_v35 = vpop.permute.xlu1 %4739  ;;  %v13118_v1 = vpop.permute.xlu0 %4745 }
 0xc94   :  { %v13120_v43 = vpop.permute.xlu1 %4743  ;;  %v13122_v16 = vpop.permute.xlu0 %4749 }
 0xc98   :  { %v13124_v39 = vpop.permute.xlu1 %4747  ;;  %v13126_v0 = vpop.permute.xlu0 %4753 }
 0xc9c   :  { %v13128_v45 = vpop.permute.xlu1 %4751  ;;  %v13130_v13 = vpop.permute.xlu0 %4805 }
 0xca0   :  { %v13132_v17 = vpop.permute.xlu1 %4755  ;;  %v13134_v41 = vpop.permute.xlu0 %4809 }
 0xca4   :  { %v13136_v14 = vpop.permute.xlu1 %4807  ;;  %v13138_v22 = vpop.permute.xlu0 %4813 }
 0xca8   :  { %v13140_v49 = vpop.permute.xlu1 %4811  ;;  %v13142_v8 = vpop.permute.xlu0 %4817 }
 0xca9   :  { %15836 = vst [vmem:[#allocation113_spill] sm:$0xff] %v13142_v8 }
 0xcac   :  { %v13144_v11 = vpop.permute.xlu1 %4815  ;;  %v13146_v36 = vpop.permute.xlu0 %4821 }
 0xcad   :  { %15837 = vst [vmem:[#allocation93_spill] sm:$0xff] %v13146_v36 }
 0xcb0   :  { %v13148_v62 = vpop.permute.xlu1 %4819  ;;  %v13150_v27 = vpop.permute.xlu0 %4825 }
 0xcb1   :  { %15838 = vst [vmem:[#allocation84_spill] sm:$0xff] %v13148_v62  ;;  %15839 = vst [vmem:[#allocation104_spill] sm:$0xff] %v13150_v27 }
 0xcb4   :  { %v13152_v48 = vpop.permute.xlu1 %4823  ;;  %v13154_v19 = vpop.permute.xlu0 %4829 }
 0xcb5   :  { %15840 = vst [vmem:[#allocation79_spill] sm:$0xff] %v13152_v48  ;;  %15841 = vst [vmem:[#allocation109_spill] sm:$0xff] %v13154_v19 }
 0xcb8   :  { %v13156_v42 = vpop.permute.xlu1 %4827  ;;  %v13158_v46 = vpop.permute.xlu0 %4833 }
 0xcb9   :  { %15842 = vst [vmem:[#allocation70_spill] sm:$0xff] %v13156_v42  ;;  %15843 = vst [vmem:[#allocation112_spill] sm:$0xff] %v13158_v46 }
 0xcbc   :  { %v13160_v38 = vpop.permute.xlu1 %4831  ;;  %v4870_v5 = vpop.permute.xlu0 %4869 }
 0xcbd   :  { %15844 = vst [vmem:[#allocation75_spill] sm:$0xff] %v13160_v38  ;;  %v4917_v8 = vmul.f32 %v4870_v5, %v12850_v60 }
 0xcbf   :  { %4949 = vrot.lane.b32.xlu0 %v4917_v8, %s8307_s9 }
 0xcc0   :  { %v13164_v36 = vpop.permute.xlu1 %4835  ;;  %v4874_v62 = vpop.permute.xlu0 %4873 }
 0xcc1   :  { %15845 = vst [vmem:[#allocation66_spill] sm:$0xff] %v13164_v36  ;;  %v4919_v27 = vmul.f32 %v4874_v62, %v12856_v30 }
 0xcc3   :  { %4953 = vrot.lane.b32.xlu0 %v4919_v27, %s8307_s9 }
 0xcc4   :  { %v4872_v48 = vpop.permute.xlu1 %4871  ;;  %v4878_v19 = vpop.permute.xlu0 %4877 }
 0xcc5   :  { %v4918_v42 = vmul.f32 %v4872_v48, %v12864_v28  ;;  %v4921_v46 = vmul.f32 %v4878_v19, %v12867_v26 }
 0xcc7   :  { %4951 = vrot.lane.b32.xlu1 %v4918_v42, %s8307_s9  ;;  %4957 = vrot.lane.b32.xlu0 %v4921_v46, %s8307_s9 }
 0xcc8   :  { %v4876_v5 = vpop.permute.xlu1 %4875  ;;  %v4882_v38 = vpop.permute.xlu0 %4881 }
 0xcc9   :  { %v4920_v8 = vmul.f32 %v4876_v5, %v12874_v4  ;;  %v4923_v36 = vmul.f32 %v4882_v38, %v12877_v34 }
 0xccb   :  { %4955 = vrot.lane.b32.xlu1 %v4920_v8, %s8307_s9  ;;  %4961 = vrot.lane.b32.xlu0 %v4923_v36, %s8307_s9 }
 0xccc   :  { %v4880_v27 = vpop.permute.xlu1 %4879  ;;  %v4886_v62 = vpop.permute.xlu0 %4885 }
 0xccd   :  { %v4922_v48 = vmul.f32 %v4880_v27, %v12885_v32  ;;  %v4925_v19 = vmul.f32 %v4886_v62, %v12888_v9 }
 0xccf   :  { %4959 = vrot.lane.b32.xlu1 %v4922_v48, %s8307_s9  ;;  %4965 = vrot.lane.b32.xlu0 %v4925_v19, %s8307_s9  ;;  %v4630_v48 = vmul.f32 %v12821_v58, %v12864_v28 }
 0xcd0   :  { %v4884_v46 = vpop.permute.xlu1 %4883  ;;  %v4890_v42 = vpop.permute.xlu0 %4889 }
 0xcd1   :  { %v4924_v5 = vmul.f32 %v4884_v46, %v12895_v7  ;;  %v4927_v38 = vmul.f32 %v4890_v42, %v12898_v33  ;;  %v4629_v42 = vmul.f32 %v12823_v20, %v12850_v60 }
 0xcd3   :  { %4963 = vrot.lane.b32.xlu1 %v4924_v5, %s8307_s9  ;;  %4969 = vrot.lane.b32.xlu0 %v4927_v38, %s8307_s9  ;;  %v4774_v5 = vadd.f32 %v13104_v15, %v4630_v48  ;;  %v4773_v58 = vadd.f32 %v13100_v29, %v4629_v42 }
 0xcd4   :  { %v4888_v36 = vpop.permute.xlu1 %4887  ;;  %v4894_v8 = vpop.permute.xlu0 %4893 }
 0xcd5   :  { %v4926_v27 = vmul.f32 %v4888_v36, %v12905_v61  ;;  %v4929_v62 = vmul.f32 %v4894_v8, %v12908_v10  ;;  %v4634_v8 = vmul.f32 %v12833_v23, %v12885_v32  ;;  %v7662_v20 = vpack.i.bf16 %v4774_v5, %v4773_v58 }
 0xcd6   :  { %v4638_v23 = vmul.f32 %v12841_v53, %v12905_v61 }
 0xcd7   :  { %4967 = vrot.lane.b32.xlu1 %v4926_v27, %s8307_s9  ;;  %4973 = vrot.lane.b32.xlu0 %v4929_v62, %s8307_s9  ;;  %v4633_v62 = vmul.f32 %v12827_v21, %v12867_v26  ;;  %v4778_v15 = vadd.f32 %v13112_v52, %v4634_v8  ;;  %v4631_v21 = vmul.f32 %v12825_v37, %v12856_v30 }
 0xcd8   :  { %v4892_v19 = vpop.permute.xlu1 %4891  ;;  %v4898_v46 = vpop.permute.xlu0 %4897  ;;  %v4637_v52 = vmul.f32 %v12835_v2, %v12888_v9  ;;  %v4635_v2 = vmul.f32 %v12831_v54, %v12877_v34  ;;  %v4639_v54 = vmul.f32 %v12839_v18, %v12898_v33 }
 0xcd9   :  { %v4928_v38 = vmul.f32 %v4892_v19, %v12915_v6  ;;  %v4931_v36 = vmul.f32 %v4898_v46, %v12918_v57  ;;  %v4632_v19 = vmul.f32 %v12829_v40, %v12874_v4  ;;  %v4777_v29 = vadd.f32 %v13106_v50, %v4633_v62 }
 0xcda   :  { %v4782_v40 = vadd.f32 %v13120_v43, %v4638_v23  ;;  %v4636_v50 = vmul.f32 %v12837_v25, %v12895_v7  ;;  %v4781_v37 = vadd.f32 %v13114_v12, %v4637_v52  ;;  %v4779_v12 = vadd.f32 %v13110_v63, %v4635_v2  ;;  %v15847_v2 = vld [vmem:[#allocation84_spill] sm:$0xff] }
 0xcdb   :  { %4971 = vrot.lane.b32.xlu1 %v4928_v38, %s8307_s9  ;;  %4977 = vrot.lane.b32.xlu0 %v4931_v36, %s8307_s9  ;;  %v4776_v42 = vadd.f32 %v13108_v44, %v4632_v19  ;;  %v7672_v5 = vpack.i.bf16 %v4778_v15, %v4777_v29  ;;  %v4642_v38 = vmul.f32 %v12852_v55, %v12925_v24  ;;  %v4790_v15 = vsub.f32 0.0, %v12864_v28 }
 0xcdc   :  { %v4896_v27 = vpop.permute.xlu1 %4895  ;;  %v4775_v36 = vadd.f32 %v13102_v56, %v4631_v21  ;;  %v4641_v44 = vmul.f32 %v12843_v59, %v12908_v10  ;;  %v4780_v25 = vadd.f32 %v13116_v35, %v4636_v50  ;;  %v7682_v8 = vpack.i.bf16 %v4782_v40, %v4781_v37 }
 0xcdd   :  { %v4930_v48 = vmul.f32 %v4896_v27, %v12925_v24  ;;  %v4786_v55 = vadd.f32 %v13128_v45, %v4642_v38  ;;  %v4640_v56 = vmul.f32 %v12845_v3, %v12915_v6  ;;  %v4644_v45 = vmul.f32 %v12859_v51, %v12931_v47 }
 0xcde   :  { %v7667_v43 = vpack.i.bf16 %v4776_v42, %v4775_v36  ;;  %v4785_v58 = vadd.f32 %v13122_v16, %v4641_v44  ;;  %v7677_v59 = vpack.i.bf16 %v4780_v25, %v4779_v12  ;;  %v4783_v3 = vadd.f32 %v13118_v1, %v4639_v54  ;;  %v15849_v12 = vld [vmem:[#allocation79_spill] sm:$0xff] }
 0xcdf   :  { %4975 = vrot.lane.b32.xlu1 %v4930_v48, %s8307_s9  ;;  %7663 = vrot.lane.b32.xlu0 %v7662_v20, %s8315_s16  ;;  %v4784_v35 = vadd.f32 %v13124_v39, %v4640_v56  ;;  %v4643_v16 = vmul.f32 %v12847_v31, %v12918_v57  ;;  %v4788_v62 = vadd.f32 %v13132_v17, %v4644_v45  ;;  %v4789_v1 = vsub.f32 0.0, %v12850_v60 }
 0xce0   :  { %v4900_v46 = vpop.permute.xlu1 %4899  ;;  %v7692_v27 = vpack.i.bf16 %v4786_v55, %v4785_v58  ;;  %v4854_v31 = vmul.f32 %v13136_v14, %v4790_v15  ;;  %v4791_v17 = vsub.f32 0.0, %v12856_v30  ;;  %v4793_v28 = vsub.f32 0.0, %v12867_v26  ;;  %v15846_v26 = vld [vmem:[#allocation113_spill] sm:$0xff] }
 0xce1   :  { %v4932_v53 = vmul.f32 %v4900_v46, %v12931_v47  ;;  %v7687_v63 = vpack.i.bf16 %v4784_v35, %v4783_v3  ;;  %v4787_v18 = vadd.f32 %v13126_v0, %v4643_v16  ;;  %v4853_v48 = vmul.f32 %v13130_v13, %v4789_v1  ;;  %v15851_v16 = vld [vmem:[#allocation70_spill] sm:$0xff] }
 0xce2   :  { %v4792_v0 = vsub.f32 0.0, %v12874_v4  ;;  %v4855_v52 = vmul.f32 %v13134_v41, %v4791_v17  ;;  %v4794_v13 = vsub.f32 0.0, %v12885_v32  ;;  %v4857_v30 = vmul.f32 %v13138_v22, %v4793_v28 }
 0xce3   :  { %4979 = vrot.lane.b32.xlu1 %v4932_v53, %s8307_s9  ;;  %7673 = vrot.lane.b32.xlu0 %v7672_v5, %s8315_s16  ;;  %v7697_v39 = vpack.i.bf16 %v4788_v62, %v4787_v18  ;;  %v4796_v38 = vsub.f32 0.0, %v12895_v7  ;;  %v4797_v22 = vsub.f32 0.0, %v12888_v9  ;;  %v15848_v7 = vld [vmem:[#allocation93_spill] sm:$0xff]  ;;  %v4799_v35 = vsub.f32 0.0, %v12898_v33 }
 0xce4   :  { %v4856_v46 = vmul.f32 %v13140_v49, %v4792_v0  ;;  %v4858_v4 = vmul.f32 %v13144_v11, %v4794_v13  ;;  %v4795_v49 = vsub.f32 0.0, %v12877_v34  ;;  %v4798_v11 = vsub.f32 0.0, %v12905_v61  ;;  %v15850_v61 = vld [vmem:[#allocation104_spill] sm:$0xff]  ;;  %v15852_v33 = vld [vmem:[#allocation109_spill] sm:$0xff] }
 0xce5   :  { %v4860_v44 = vmul.f32 %v15847_v2, %v4796_v38  ;;  %v4861_v56 = vmul.f32 %v15848_v7, %v4797_v22  ;;  %v4863_v9 = vmul.f32 %v15850_v61, %v4799_v35  ;;  %v4803_v17 = vsub.f32 0.0, %v12918_v57  ;;  %v15856_v57 = vld [vmem:[#allocation10_spill] sm:$0xff]  ;;  %v15865_v38 = vld [vmem:[#allocation20_spill] sm:$0xff]  ;;  %v15874_v22 = vld [vmem:[#allocation9_spill] sm:$0xff] }
 0xce6   :  { %v4859_v32 = vmul.f32 %v15846_v26, %v4795_v49  ;;  %v4862_v58 = vmul.f32 %v15849_v12, %v4798_v11  ;;  %v4804_v0 = vsub.f32 0.0, %v12931_v47  ;;  %v15857_v47 = vld [vmem:[#allocation19_spill] sm:$0xff]  ;;  %v15864_v49 = vld [vmem:[#allocation41_spill] sm:$0xff]  ;;  %v15868_v26 = vld [vmem:[#allocation22_spill] sm:$0xff] }
 0xce7   :  { %7668 = vrot.lane.b32.xlu1 %v7667_v43, %s8315_s16  ;;  %7683 = vrot.lane.b32.xlu0 %v7682_v8, %s8315_s16  ;;  %v15870_v2 = vld [vmem:[#allocation30_spill] sm:$0xff]  ;;  %v15875_v11 = vld [vmem:[#allocation61_spill] sm:$0xff]  ;;  %v15879_v7 = vld [vmem:[#allocation8_spill] sm:$0xff] }
 0xce8   :  { %v15881_v12 = vld [vmem:[#allocation49_spill] sm:$0xff] }
 0xce9   :  { %v15885_v35 = vld [vmem:[#allocation89_spill] sm:$0xff] }
 0xceb   :  { %7678 = vrot.lane.b32.xlu1 %v7677_v59, %s8315_s16  ;;  %7693 = vrot.lane.b32.xlu0 %v7692_v27, %s8315_s16  ;;  %v4800_v27 = vsub.f32 0.0, %v12915_v6 }
 0xcef   :  { %7688 = vrot.lane.b32.xlu1 %v7687_v63, %s8315_s16  ;;  %v4864_v63 = vmul.f32 %v15851_v16, %v4800_v27  ;;  %v15886_v27 = vld [vmem:[#allocation67_spill] sm:$0xff] }
 0xcf3   :  { %7698 = vrot.lane.b32.xlu1 %v7697_v39, %s8315_s16 }
 0xd31   :  { %v4950_v51 = vpop.permute.xlu0 %4949 }
 0xd32   :  { %v4997_v29 = vadd.f32 %v4950_v51, %v4853_v48  ;;  %v4801_v51 = vsub.f32 0.0, %v12908_v10  ;;  %v15853_v48 = vld [vmem:[#allocation75_spill] sm:$0xff] }
 0xd34   :  { %v4865_v6 = vmul.f32 %v15852_v33, %v4801_v51 }
 0xd35   :  { %v4954_v20 = vpop.permute.xlu0 %4953 }
 0xd36   :  { %v4999_v14 = vadd.f32 %v4954_v20, %v4855_v52  ;;  %v4802_v20 = vsub.f32 0.0, %v12925_v24  ;;  %v15854_v24 = vld [vmem:[#allocation112_spill] sm:$0xff] }
 0xd37   :  { %v4867_v52 = vmul.f32 %v15854_v24, %v4803_v17 }
 0xd39   :  { %v4952_v19 = vpop.permute.xlu1 %4951  ;;  %v4958_v23 = vpop.permute.xlu0 %4957 }
 0xd3a   :  { %v4998_v21 = vadd.f32 %v4952_v19, %v4854_v31  ;;  %v5001_v36 = vadd.f32 %v4958_v23, %v4857_v30  ;;  %v4866_v31 = vmul.f32 %v15853_v48, %v4802_v20  ;;  %v15859_v30 = vld [vmem:[#allocation26_spill] sm:$0xff] }
 0xd3c   :  { %v7702_v42 = vpack.i.bf16 %v4998_v21, %v4997_v29 }
 0xd3d   :  { %v4956_v60 = vpop.permute.xlu1 %4955  ;;  %v4962_v5 = vpop.permute.xlu0 %4961 }
 0xd3e   :  { %v5000_v40 = vadd.f32 %v4956_v60, %v4856_v46  ;;  %7703 = vrot.lane.b32.xlu0 %v7702_v42, %s8316_s30  ;;  %v5003_v8 = vadd.f32 %v4962_v5, %v4859_v32  ;;  %v15855_v46 = vld [vmem:[#allocation66_spill] sm:$0xff]  ;;  %v15869_v32 = vld [vmem:[#allocation45_spill] sm:$0xff] }
 0xd3f   :  { %v4868_v42 = vmul.f32 %v15855_v46, %v4804_v0 }
 0xd40   :  { %v7707_v53 = vpack.i.bf16 %v5000_v40, %v4999_v14  ;;  %v15858_v40 = vld [vmem:[#allocation12_spill] sm:$0xff] }
 0xd41   :  { %v4960_v50 = vpop.permute.xlu1 %4959  ;;  %v4966_v41 = vpop.permute.xlu0 %4965 }
 0xd42   :  { %v5002_v37 = vadd.f32 %v4960_v50, %v4858_v4  ;;  %7708 = vrot.lane.b32.xlu1 %v7707_v53, %s8316_s30  ;;  %v5005_v45 = vadd.f32 %v4966_v41, %v4861_v56  ;;  %v15860_v4 = vld [vmem:[#allocation21_spill] sm:$0xff]  ;;  %v15861_v53 = vld [vmem:[#allocation40_spill] sm:$0xff]  ;;  %v15863_v41 = vld [vmem:[#allocation11_spill] sm:$0xff] }
 0xd43   :  { %v15862_v50 = vld [vmem:[#allocation28_spill] sm:$0xff] }
 0xd44   :  { %v7712_v43 = vpack.i.bf16 %v5002_v37, %v5001_v36  ;;  %v15866_v36 = vld [vmem:[#allocation13_spill] sm:$0xff]  ;;  %v15880_v56 = vld [vmem:[#allocation88_spill] sm:$0xff] }
 0xd45   :  { %v4964_v25 = vpop.permute.xlu1 %4963  ;;  %v4970_v34 = vpop.permute.xlu0 %4969  ;;  %v15867_v37 = vld [vmem:[#allocation29_spill] sm:$0xff] }
 0xd46   :  { %v5004_v55 = vadd.f32 %v4964_v25, %v4860_v44  ;;  %7713 = vrot.lane.b32.xlu0 %v7712_v43, %s8316_s30  ;;  %v5007_v1 = vadd.f32 %v4970_v34, %v4863_v9  ;;  %v15871_v44 = vld [vmem:[#allocation5_spill] sm:$0xff]  ;;  %v15872_v43 = vld [vmem:[#allocation46_spill] sm:$0xff]  ;;  %v15878_v34 = vld [vmem:[#allocation64_spill] sm:$0xff] }
 0xd47   :  { %v15873_v25 = vld [vmem:[#allocation34_spill] sm:$0xff] }
 0xd48   :  { %v7717_v54 = vpack.i.bf16 %v5004_v55, %v5003_v8  ;;  %v15876_v8 = vld [vmem:[#allocation47_spill] sm:$0xff]  ;;  %v15877_v55 = vld [vmem:[#allocation86_spill] sm:$0xff] }
 0xd49   :  { %v4968_v59 = vpop.permute.xlu1 %4967  ;;  %v4974_v18 = vpop.permute.xlu0 %4973 }
 0xd4a   :  { %v5006_v3 = vadd.f32 %v4968_v59, %v4862_v58  ;;  %7718 = vrot.lane.b32.xlu1 %v7717_v54, %s8316_s30  ;;  %v5009_v29 = vadd.f32 %v4974_v18, %v4865_v6  ;;  %v15882_v58 = vld [vmem:[#allocation14_spill] sm:$0xff]  ;;  %v15883_v54 = vld [vmem:[#allocation65_spill] sm:$0xff]  ;;  %v15884_v59 = vld [vmem:[#allocation48_spill] sm:$0xff] }
 0xd4c   :  { %v7722_v62 = vpack.i.bf16 %v5006_v3, %v5005_v45  ;;  %v15887_v3 = vld [vmem:[#allocation91_spill] sm:$0xff] }
 0xd4d   :  { %v4972_v39 = vpop.permute.xlu1 %4971  ;;  %v4978_v10 = vpop.permute.xlu0 %4977 }
 0xd4e   :  { %v5008_v15 = vadd.f32 %v4972_v39, %v4864_v63  ;;  %7723 = vrot.lane.b32.xlu0 %v7722_v62, %s8316_s30  ;;  %v5011_v28 = vadd.f32 %v4978_v10, %v4867_v52 }
 0xd50   :  { %v7727_v19 = vpack.i.bf16 %v5008_v15, %v5007_v1 }
 0xd51   :  { %v4976_v23 = vpop.permute.xlu1 %4975  ;;  %v7664_v45 = vpop.permute.xlu0 %7663 }
 0xd52   :  { %v5010_v21 = vadd.f32 %v4976_v23, %v4866_v31  ;;  %7728 = vrot.lane.b32.xlu1 %v7727_v19, %s8316_s30  ;;  %v7666_v20 = vunpack.i.h.bf16 %v7664_v45  ;;  %v7665_v1 = vunpack.i.l.bf16 %v7664_v45 }
 0xd54   :  { %v7732_v60 = vpack.i.bf16 %v5010_v21, %v5009_v29 }
 0xd55   :  { %v4980_v5 = vpop.permute.xlu1 %4979  ;;  %v7674_v9 = vpop.permute.xlu0 %7673 }
 0xd56   :  { %v5012_v13 = vadd.f32 %v4980_v5, %v4868_v42  ;;  %7733 = vrot.lane.b32.xlu0 %v7732_v60, %s8316_s30  ;;  %v7676_v60 = vunpack.i.h.bf16 %v7674_v9  ;;  %v7675_v5 = vunpack.i.l.bf16 %v7674_v9 }
 0xd58   :  { %v7737_v14 = vpack.i.bf16 %v5012_v13, %v5011_v28 }
 0xd59   :  { %v7669_v61 = vpop.permute.xlu1 %7668  ;;  %v7684_v63 = vpop.permute.xlu0 %7683 }
 0xd5a   :  { %5238 = vrot.lane.b32.xlu0 %v15856_v57, %s8314_s25  ;;  %7738 = vrot.lane.b32.xlu1 %v7737_v14, %s8316_s30  ;;  %v7671_v17 = vunpack.i.h.bf16 %v7669_v61  ;;  %v7670_v0 = vunpack.i.l.bf16 %v7669_v61 }
 0xd5d   :  { %v7679_v16 = vpop.permute.xlu1 %7678  ;;  %v13358_v18 = vpop.permute.xlu0 %7693 }
 0xd5e   :  { %5242 = vrot.lane.b32.xlu0 %v15857_v47, %s8314_s25  ;;  %5240 = vrot.lane.b32.xlu1 %v15858_v40, %s8314_s25  ;;  %v7681_v9 = vunpack.i.h.bf16 %v7679_v16 }
 0xd61   :  { %v13356_v62 = vpop.permute.xlu1 %7688 }
 0xd62   :  { %5246 = vrot.lane.b32.xlu0 %v15859_v30, %s8314_s25  ;;  %5244 = vrot.lane.b32.xlu1 %v15860_v4, %s8314_s25 }
 0xd65   :  { %v13360_v39 = vpop.permute.xlu1 %7698 }
 0xd66   :  { %5250 = vrot.lane.b32.xlu0 %v15861_v53, %s8314_s25  ;;  %5248 = vrot.lane.b32.xlu1 %v15862_v50, %s8314_s25 }
 0xd6a   :  { %5254 = vrot.lane.b32.xlu0 %v15863_v41, %s8314_s25  ;;  %5252 = vrot.lane.b32.xlu1 %v15864_v49, %s8314_s25 }
 0xd6e   :  { %5258 = vrot.lane.b32.xlu0 %v15865_v38, %s8314_s25  ;;  %5256 = vrot.lane.b32.xlu1 %v15866_v36, %s8314_s25 }
 0xd72   :  { %5262 = vrot.lane.b32.xlu0 %v15867_v37, %s8314_s25  ;;  %5260 = vrot.lane.b32.xlu1 %v15868_v26, %s8314_s25 }
 0xd76   :  { %5266 = vrot.lane.b32.xlu0 %v15869_v32, %s8314_s25  ;;  %5264 = vrot.lane.b32.xlu1 %v15870_v2, %s8314_s25 }
 0xd7a   :  { %5303 = vrot.lane.b32.xlu0 %v15871_v44, %s8311_s15  ;;  %5268 = vrot.lane.b32.xlu1 %v15872_v43, %s8314_s25 }
 0xd7e   :  { %5307 = vrot.lane.b32.xlu0 %v15873_v25, %s8311_s15  ;;  %5305 = vrot.lane.b32.xlu1 %v15874_v22, %s8311_s15 }
 0xd82   :  { %5311 = vrot.lane.b32.xlu0 %v15875_v11, %s8311_s15  ;;  %5309 = vrot.lane.b32.xlu1 %v15876_v8, %s8311_s15 }
 0xd86   :  { %5315 = vrot.lane.b32.xlu0 %v15877_v55, %s8311_s15  ;;  %5313 = vrot.lane.b32.xlu1 %v15878_v34, %s8311_s15 }
 0xd8a   :  { %5319 = vrot.lane.b32.xlu0 %v15879_v7, %s8311_s15  ;;  %5317 = vrot.lane.b32.xlu1 %v15880_v56, %s8311_s15 }
 0xd8e   :  { %5323 = vrot.lane.b32.xlu0 %v15881_v12, %s8311_s15  ;;  %5321 = vrot.lane.b32.xlu1 %v15882_v58, %s8311_s15  ;;  %v15921_v12 = vld [vmem:[#allocation39_spill] sm:$0xff] }
 0xd92   :  { %5327 = vrot.lane.b32.xlu0 %v15883_v54, %s8311_s15  ;;  %5325 = vrot.lane.b32.xlu1 %v15884_v59, %s8311_s15 }
 0xd96   :  { %5331 = vrot.lane.b32.xlu0 %v15885_v35, %s8311_s15  ;;  %5329 = vrot.lane.b32.xlu1 %v15886_v27, %s8311_s15 }
 0xd9a   :  { %5333 = vrot.lane.b32.xlu1 %v15887_v3, %s8311_s15 }
 0xdb0   :  { %v7704_v51 = vpop.permute.xlu0 %7703 }
 0xdb1   :  { %v7706_v15 = vunpack.i.h.bf16 %v7704_v51  ;;  %v7705_v33 = vunpack.i.l.bf16 %v7704_v51 }
 0xdb3   :  { %v5141_v6 = vsel %vm830_vm3, %v7665_v1, %v7705_v33  ;;  %v5142_v48 = vsel %vm830_vm3, %v7666_v20, %v7706_v15  ;;  %v7680_v1 = vunpack.i.l.bf16 %v7679_v16  ;;  %v7686_v16 = vunpack.i.h.bf16 %v7684_v63 }
 0xdb4   :  { %v7430_v31 = vpack.c.bf16 %v5141_v6, %v5141_v6  ;;  %v7431_v19 = vpack.c.bf16 %v5142_v48, %v5142_v48  ;;  %v7709_v23 = vpop.permute.xlu1 %7708 }
 0xdb5   :  { %v7711_v29 = vunpack.i.h.bf16 %v7709_v23  ;;  %v7710_v21 = vunpack.i.l.bf16 %v7709_v23 }
 0xdb6   :  { %7222 = vst.msk [vmem:[%s15012_s6 + $0x80] sm:$0xf] %vm927_vm1, %v7430_v31  ;;  %7223 = vst.msk [vmem:[%s15012_s6 + $0x84] sm:$0xf] %vm927_vm1, %v7431_v19 }
 0xdb7   :  { %v5144_v10 = vsel %vm830_vm3, %v7671_v17, %v7711_v29  ;;  %v5143_v24 = vsel %vm830_vm3, %v7670_v0, %v7710_v21  ;;  %v7685_v17 = vunpack.i.l.bf16 %v7684_v63  ;;  %v7691_v63 = vunpack.i.h.bf16 %v13356_v62 }
 0xdb8   :  { %v7433_v52 = vpack.c.bf16 %v5144_v10, %v5144_v10  ;;  %v7432_v46 = vpack.c.bf16 %v5143_v24, %v5143_v24  ;;  %v7714_v42 = vpop.permute.xlu0 %7713 }
 0xdb9   :  { %v7716_v28 = vunpack.i.h.bf16 %v7714_v42  ;;  %v7715_v13 = vunpack.i.l.bf16 %v7714_v42  ;;  %v7690_v42 = vunpack.i.l.bf16 %v13356_v62  ;;  %v7696_v62 = vunpack.i.h.bf16 %v13358_v18 }
 0xdba   :  { %7225 = vst.msk [vmem:[%s15012_s6 + $0x8c] sm:$0xf] %vm927_vm1, %v7433_v52  ;;  %7224 = vst.msk [vmem:[%s15012_s6 + $0x88] sm:$0xf] %vm927_vm1, %v7432_v46 }
 0xdbb   :  { %v5145_v14 = vsel %vm830_vm3, %v7675_v5, %v7715_v13  ;;  %v5146_v45 = vsel %vm830_vm3, %v7676_v60, %v7716_v28 }
 0xdbc   :  { %v7434_v61 = vpack.c.bf16 %v5145_v14, %v5145_v14  ;;  %v7435_v51 = vpack.c.bf16 %v5146_v45, %v5146_v45  ;;  %v7719_v20 = vpop.permute.xlu1 %7718 }
 0xdbd   :  { %v7721_v15 = vunpack.i.h.bf16 %v7719_v20  ;;  %v7720_v33 = vunpack.i.l.bf16 %v7719_v20 }
 0xdbe   :  { %7226 = vst.msk [vmem:[%s15012_s6 + $0x90] sm:$0xf] %vm927_vm1, %v7434_v61  ;;  %7227 = vst.msk [vmem:[%s15012_s6 + $0x94] sm:$0xf] %vm927_vm1, %v7435_v51  ;;  %v7695_v51 = vunpack.i.l.bf16 %v13358_v18 }
 0xdbf   :  { %v5148_v6 = vsel %vm830_vm3, %v7681_v9, %v7721_v15  ;;  %v5147_v48 = vsel %vm830_vm3, %v7680_v1, %v7720_v33 }
 0xdc0   :  { %v7437_v31 = vpack.c.bf16 %v5148_v6, %v5148_v6  ;;  %v7436_v19 = vpack.c.bf16 %v5147_v48, %v5147_v48  ;;  %v7724_v23 = vpop.permute.xlu0 %7723 }
 0xdc1   :  { %v7726_v0 = vunpack.i.h.bf16 %v7724_v23  ;;  %v7725_v29 = vunpack.i.l.bf16 %v7724_v23 }
 0xdc2   :  { %7229 = vst.msk [vmem:[%s15012_s6 + $0x9c] sm:$0xf] %vm927_vm1, %v7437_v31  ;;  %7228 = vst.msk [vmem:[%s15012_s6 + $0x98] sm:$0xf] %vm927_vm1, %v7436_v19  ;;  %v7701_v31 = vunpack.i.h.bf16 %v13360_v39  ;;  %v7700_v19 = vunpack.i.l.bf16 %v13360_v39 }
 0xdc3   :  { %v5149_v21 = vsel %vm830_vm3, %v7685_v17, %v7725_v29  ;;  %v5150_v10 = vsel %vm830_vm3, %v7686_v16, %v7726_v0 }
 0xdc4   :  { %v7438_v24 = vpack.c.bf16 %v5149_v21, %v5149_v21  ;;  %v7439_v52 = vpack.c.bf16 %v5150_v10, %v5150_v10  ;;  %v7729_v46 = vpop.permute.xlu1 %7728 }
 0xdc5   :  { %v7731_v60 = vunpack.i.h.bf16 %v7729_v46  ;;  %v7730_v5 = vunpack.i.l.bf16 %v7729_v46 }
 0xdc6   :  { %7230 = vst.msk [vmem:[%s15012_s6 + $0xa0] sm:$0xf] %vm927_vm1, %v7438_v24  ;;  %7231 = vst.msk [vmem:[%s15012_s6 + $0xa4] sm:$0xf] %vm927_vm1, %v7439_v52 }
 0xdc7   :  { %v5152_v28 = vsel %vm830_vm3, %v7691_v63, %v7731_v60  ;;  %v5151_v13 = vsel %vm830_vm3, %v7690_v42, %v7730_v5 }
 0xdc8   :  { %v7441_v14 = vpack.c.bf16 %v5152_v28, %v5152_v28  ;;  %v7440_v45 = vpack.c.bf16 %v5151_v13, %v5151_v13  ;;  %v7734_v61 = vpop.permute.xlu0 %7733 }
 0xdc9   :  { %v7736_v20 = vunpack.i.h.bf16 %v7734_v61  ;;  %v7735_v9 = vunpack.i.l.bf16 %v7734_v61 }
 0xdca   :  { %7233 = vst.msk [vmem:[%s15012_s6 + $0xac] sm:$0xf] %vm927_vm1, %v7441_v14  ;;  %7232 = vst.msk [vmem:[%s15012_s6 + $0xa8] sm:$0xf] %vm927_vm1, %v7440_v45 }
 0xdcb   :  { %v5153_v1 = vsel %vm830_vm3, %v7695_v51, %v7735_v9  ;;  %v5154_v15 = vsel %vm830_vm3, %v7696_v62, %v7736_v20 }
 0xdcc   :  { %v7442_v33 = vpack.c.bf16 %v5153_v1, %v5153_v1  ;;  %v7443_v6 = vpack.c.bf16 %v5154_v15, %v5154_v15  ;;  %v7739_v48 = vpop.permute.xlu1 %7738  ;;  %v5239_v18 = vpop.permute.xlu0 %5238 }
 0xdcd   :  { %v7741_v23 = vunpack.i.h.bf16 %v7739_v48  ;;  %v7740_v16 = vunpack.i.l.bf16 %v7739_v48  ;;  %7238 = vst.msk [vmem:[%s15010_s7 + $0x80] sm:$0xf] %vm927_vm1, %v5239_v18 }
 0xdce   :  { %7234 = vst.msk [vmem:[%s15012_s6 + $0xb0] sm:$0xf] %vm927_vm1, %v7442_v33  ;;  %7235 = vst.msk [vmem:[%s15012_s6 + $0xb4] sm:$0xf] %vm927_vm1, %v7443_v6 }
 0xdcf   :  { %v5156_v17 = vsel %vm830_vm3, %v7701_v31, %v7741_v23  ;;  %v5155_v39 = vsel %vm830_vm3, %v7700_v19, %v7740_v16 }
 0xdd0   :  { %v7445_v0 = vpack.c.bf16 %v5156_v17, %v5156_v17  ;;  %v7444_v29 = vpack.c.bf16 %v5155_v39, %v5155_v39  ;;  %v5241_v21 = vpop.permute.xlu1 %5240  ;;  %v5243_v10 = vpop.permute.xlu0 %5242 }
 0xdd1   :  { %7239 = vst.msk [vmem:[%s15010_s7 + $0x84] sm:$0xf] %vm927_vm1, %v5241_v21  ;;  %7240 = vst.msk [vmem:[%s15010_s7 + $0x88] sm:$0xf] %vm927_vm1, %v5243_v10 }
 0xdd2   :  { %7237 = vst.msk [vmem:[%s15012_s6 + $0xbc] sm:$0xf] %vm927_vm1, %v7445_v0  ;;  %7236 = vst.msk [vmem:[%s15012_s6 + $0xb8] sm:$0xf] %vm927_vm1, %v7444_v29 }
 0xdd4   :  { %v5245_v24 = vpop.permute.xlu1 %5244  ;;  %v5247_v52 = vpop.permute.xlu0 %5246 }
 0xdd5   :  { %7241 = vst.msk [vmem:[%s15010_s7 + $0x8c] sm:$0xf] %vm927_vm1, %v5245_v24  ;;  %7242 = vst.msk [vmem:[%s15010_s7 + $0x90] sm:$0xf] %vm927_vm1, %v5247_v52 }
 0xdd8   :  { %v5249_v46 = vpop.permute.xlu1 %5248  ;;  %v5251_v63 = vpop.permute.xlu0 %5250 }
 0xdd9   :  { %7243 = vst.msk [vmem:[%s15010_s7 + $0x94] sm:$0xf] %vm927_vm1, %v5249_v46  ;;  %7244 = vst.msk [vmem:[%s15010_s7 + $0x98] sm:$0xf] %vm927_vm1, %v5251_v63 }
 0xddc   :  { %v5253_v42 = vpop.permute.xlu1 %5252  ;;  %v5255_v60 = vpop.permute.xlu0 %5254 }
 0xddd   :  { %7245 = vst.msk [vmem:[%s15010_s7 + $0x9c] sm:$0xf] %vm927_vm1, %v5253_v42  ;;  %7246 = vst.msk [vmem:[%s15010_s7 + $0xa0] sm:$0xf] %vm927_vm1, %v5255_v60 }
 0xde0   :  { %v5257_v5 = vpop.permute.xlu1 %5256  ;;  %v5259_v28 = vpop.permute.xlu0 %5258 }
 0xde1   :  { %7247 = vst.msk [vmem:[%s15010_s7 + $0xa4] sm:$0xf] %vm927_vm1, %v5257_v5  ;;  %7248 = vst.msk [vmem:[%s15010_s7 + $0xa8] sm:$0xf] %vm927_vm1, %v5259_v28 }
 0xde4   :  { %v5261_v13 = vpop.permute.xlu1 %5260  ;;  %v5263_v14 = vpop.permute.xlu0 %5262 }
 0xde5   :  { %7249 = vst.msk [vmem:[%s15010_s7 + $0xac] sm:$0xf] %vm927_vm1, %v5261_v13  ;;  %7250 = vst.msk [vmem:[%s15010_s7 + $0xb0] sm:$0xf] %vm927_vm1, %v5263_v14 }
 0xde8   :  { %v5265_v45 = vpop.permute.xlu1 %5264  ;;  %v5267_v61 = vpop.permute.xlu0 %5266 }
 0xde9   :  { %7251 = vst.msk [vmem:[%s15010_s7 + $0xb4] sm:$0xf] %vm927_vm1, %v5265_v45  ;;  %7252 = vst.msk [vmem:[%s15010_s7 + $0xb8] sm:$0xf] %vm927_vm1, %v5267_v61 }
 0xdec   :  { %v5269_v62 = vpop.permute.xlu1 %5268  ;;  %v5304_v51 = vpop.permute.xlu0 %5303 }
 0xded   :  { %7253 = vst.msk [vmem:[%s15010_s7 + $0xbc] sm:$0xf] %vm927_vm1, %v5269_v62  ;;  %v5351_v20 = vsel %vm284_vm2, %v5304_v51, 0.0  ;;  %v15888_v51 = vld [vmem:[#allocation82_spill] sm:$0xff] }
 0xdee   :  { %5352 = vadd.xlane.f32.xlu0 %v5351_v20  ;;  %v13533_v20 = vld [vmem:[%s15008_s3 + $0x10] sm:$0xff] }
 0xdf0   :  { %v5306_v9 = vpop.permute.xlu1 %5305  ;;  %v5308_v1 = vpop.permute.xlu0 %5307 }
 0xdf1   :  { %v5354_v15 = vsel %vm284_vm2, %v5306_v9, 0.0  ;;  %v5357_v33 = vsel %vm284_vm2, %v5308_v1, 0.0  ;;  %v15889_v9 = vld [vmem:[#allocation85_spill] sm:$0xff]  ;;  %v13542_v1 = vld [vmem:[%s15008_s3 + $0x18] sm:$0xff] }
 0xdf2   :  { %5355 = vadd.xlane.f32.xlu1 %v5354_v15  ;;  %5358 = vadd.xlane.f32.xlu0 %v5357_v33  ;;  %v13549_v15 = vld [vmem:[%s15008_s3 + $0x20] sm:$0xff]  ;;  %v13556_v33 = vld [vmem:[%s15008_s3 + $0x28] sm:$0xff] }
 0xdf4   :  { %v5310_v6 = vpop.permute.xlu1 %5309  ;;  %v5312_v48 = vpop.permute.xlu0 %5311 }
 0xdf5   :  { %v5360_v18 = vsel %vm284_vm2, %v5310_v6, 0.0  ;;  %v5363_v16 = vsel %vm284_vm2, %v5312_v48, 0.0  ;;  %v13563_v6 = vld [vmem:[%s15008_s3 + $0x30] sm:$0xff]  ;;  %v13570_v48 = vld [vmem:[%s15008_s3 + $0x38] sm:$0xff] }
 0xdf6   :  { %5361 = vadd.xlane.f32.xlu0 %v5360_v18  ;;  %v15890_v18 = vld [vmem:[#allocation87_spill] sm:$0xff] }
 0xdf8   :  { %v5314_v31 = vpop.permute.xlu1 %5313  ;;  %v5316_v19 = vpop.permute.xlu0 %5315 }
 0xdf9   :  { %v5366_v23 = vsel %vm284_vm2, %v5314_v31, 0.0  ;;  %v5369_v29 = vsel %vm284_vm2, %v5316_v19, 0.0  ;;  %v15891_v31 = vld [vmem:[#allocation50_spill] sm:$0xff]  ;;  %v13581_v19 = vld [vmem:[%s15008_s3 + $0x50] sm:$0xff] }
 0xdfa   :  { %5367 = vadd.xlane.f32.xlu1 %v5366_v23  ;;  %5364 = vadd.xlane.f32.xlu0 %v5363_v16  ;;  %v13588_v23 = vld [vmem:[%s15008_s3 + $0x58] sm:$0xff]  ;;  %v13595_v16 = vld [vmem:[%s15008_s3 + $0x60] sm:$0xff] }
 0xdfc   :  { %v5318_v17 = vpop.permute.xlu1 %5317  ;;  %v5320_v39 = vpop.permute.xlu0 %5319 }
 0xdfd   :  { %v5372_v0 = vsel %vm284_vm2, %v5318_v17, 0.0  ;;  %v5375_v52 = vsel %vm284_vm2, %v5320_v39, 0.0  ;;  %v13602_v17 = vld [vmem:[%s15008_s3 + $0x68] sm:$0xff]  ;;  %v13609_v39 = vld [vmem:[%s15008_s3 + $0x70] sm:$0xff] }
 0xdfe   :  { %5373 = vadd.xlane.f32.xlu1 %v5372_v0  ;;  %5370 = vadd.xlane.f32.xlu0 %v5369_v29  ;;  %v13616_v0 = vld [vmem:[%s15008_s3 + $0x78] sm:$0xff]  ;;  %v15892_v29 = vld [vmem:[#allocation55_spill] sm:$0xff] }
 0xe00   :  { %v5322_v21 = vpop.permute.xlu1 %5321  ;;  %v5324_v10 = vpop.permute.xlu0 %5323 }
 0xe01   :  { %v5378_v24 = vsel %vm284_vm2, %v5322_v21, 0.0  ;;  %v5381_v60 = vsel %vm284_vm2, %v5324_v10, 0.0  ;;  %v15893_v21 = vld [vmem:[#allocation32_spill] sm:$0xff]  ;;  %v15894_v10 = vld [vmem:[#allocation51_spill] sm:$0xff] }
 0xe02   :  { %5379 = vadd.xlane.f32.xlu1 %v5378_v24  ;;  %5376 = vadd.xlane.f32.xlu0 %v5375_v52  ;;  %v15895_v24 = vld [vmem:[#allocation56_spill] sm:$0xff] }
 0xe03   :  { %v15896_v52 = vld [vmem:[#allocation108_spill] sm:$0xff] }
 0xe04   :  { %v5326_v46 = vpop.permute.xlu1 %5325  ;;  %v5328_v63 = vpop.permute.xlu0 %5327 }
 0xe05   :  { %v5384_v42 = vsel %vm284_vm2, %v5326_v46, 0.0  ;;  %v5387_v13 = vsel %vm284_vm2, %v5328_v63, 0.0  ;;  %v15897_v46 = vld [vmem:[#allocation44_spill] sm:$0xff]  ;;  %v15898_v63 = vld [vmem:[#allocation43_spill] sm:$0xff] }
 0xe06   :  { %5385 = vadd.xlane.f32.xlu1 %v5384_v42  ;;  %5382 = vadd.xlane.f32.xlu0 %v5381_v60  ;;  %v15899_v42 = vld [vmem:[#allocation57_spill] sm:$0xff] }
 0xe07   :  { %v15900_v60 = vld [vmem:[#allocation53_spill] sm:$0xff] }
 0xe08   :  { %v5330_v5 = vpop.permute.xlu1 %5329  ;;  %v5332_v14 = vpop.permute.xlu0 %5331 }
 0xe09   :  { %v5390_v28 = vsel %vm284_vm2, %v5330_v5, 0.0  ;;  %v5393_v62 = vsel %vm284_vm2, %v5332_v14, 0.0  ;;  %v15901_v5 = vld [vmem:[#allocation38_spill] sm:$0xff] }
 0xe0a   :  { %5391 = vadd.xlane.f32.xlu1 %v5390_v28  ;;  %5388 = vadd.xlane.f32.xlu0 %v5387_v13  ;;  %v15902_v28 = vld [vmem:[#allocation52_spill] sm:$0xff]  ;;  %v15903_v13 = vld [vmem:[#allocation115_spill] sm:$0xff]  ;;  %v15904_v14 = vld [vmem:[#allocation118_spill] sm:$0xff] }
 0xe0c   :  { %v5334_v45 = vpop.permute.xlu1 %5333 }
 0xe0d   :  { %v5396_v61 = vsel %vm284_vm2, %v5334_v45, 0.0  ;;  %v15905_v45 = vld [vmem:[#allocation81_spill] sm:$0xff] }
 0xe0e   :  { %5397 = vadd.xlane.f32.xlu1 %v5396_v61  ;;  %5394 = vadd.xlane.f32.xlu0 %v5393_v62  ;;  %v15906_v61 = vld [vmem:[#allocation77_spill] sm:$0xff]  ;;  %v15907_v62 = vld [vmem:[#allocation96_spill] sm:$0xff] }
 0xe1f   :  { %5465 = vrot.lane.b32.xlu1 %v15888_v51, %s8310_s26 }
 0xe23   :  { %5467 = vrot.lane.b32.xlu1 %v13533_v20, %s8310_s26 }
 0xe24   :  { %5463 = vrot.lane.b32.xlu0 %v15889_v9, %s8310_s26 }
 0xe27   :  { %5469 = vrot.lane.b32.xlu1 %v13542_v1, %s8310_s26 }
 0xe28   :  { %5471 = vrot.lane.b32.xlu0 %v13549_v15, %s8310_s26 }
 0xe2b   :  { %5473 = vrot.lane.b32.xlu1 %v13556_v33, %s8310_s26 }
 0xe2c   :  { %5475 = vrot.lane.b32.xlu0 %v13563_v6, %s8310_s26 }
 0xe2f   :  { %5477 = vrot.lane.b32.xlu1 %v13570_v48, %s8310_s26 }
 0xe30   :  { %5479 = vrot.lane.b32.xlu0 %v15890_v18, %s8310_s26 }
 0xe33   :  { %5481 = vrot.lane.b32.xlu1 %v15891_v31, %s8310_s26 }
 0xe34   :  { %5483 = vrot.lane.b32.xlu0 %v13581_v19, %s8310_s26 }
 0xe37   :  { %5485 = vrot.lane.b32.xlu1 %v13588_v23, %s8310_s26 }
 0xe38   :  { %5487 = vrot.lane.b32.xlu0 %v13595_v16, %s8310_s26 }
 0xe3b   :  { %5489 = vrot.lane.b32.xlu1 %v13602_v17, %s8310_s26 }
 0xe3c   :  { %5491 = vrot.lane.b32.xlu0 %v13609_v39, %s8310_s26 }
 0xe3f   :  { %5493 = vrot.lane.b32.xlu1 %v13616_v0, %s8310_s26 }
 0xe40   :  { %5527 = vrot.lane.b32.xlu0 %v15892_v29, %s8313_s24 }
 0xe43   :  { %5529 = vrot.lane.b32.xlu1 %v15893_v21, %s8313_s24 }
 0xe44   :  { %5531 = vrot.lane.b32.xlu0 %v15894_v10, %s8313_s24 }
 0xe47   :  { %5533 = vrot.lane.b32.xlu1 %v15895_v24, %s8313_s24 }
 0xe48   :  { %5535 = vrot.lane.b32.xlu0 %v15896_v52, %s8313_s24 }
 0xe4b   :  { %5537 = vrot.lane.b32.xlu1 %v15897_v46, %s8313_s24 }
 0xe4c   :  { %5539 = vrot.lane.b32.xlu0 %v15898_v63, %s8313_s24 }
 0xe4f   :  { %5541 = vrot.lane.b32.xlu1 %v15899_v42, %s8313_s24 }
 0xe50   :  { %5543 = vrot.lane.b32.xlu0 %v15900_v60, %s8313_s24 }
 0xe53   :  { %5545 = vrot.lane.b32.xlu1 %v15901_v5, %s8313_s24 }
 0xe54   :  { %5547 = vrot.lane.b32.xlu0 %v15902_v28, %s8313_s24 }
 0xe57   :  { %5549 = vrot.lane.b32.xlu1 %v15903_v13, %s8313_s24 }
 0xe58   :  { %5551 = vrot.lane.b32.xlu0 %v15904_v14, %s8313_s24 }
 0xe5b   :  { %5553 = vrot.lane.b32.xlu1 %v15905_v45, %s8313_s24 }
 0xe5c   :  { %5555 = vrot.lane.b32.xlu0 %v15906_v61, %s8313_s24 }
 0xe5f   :  { %5557 = vrot.lane.b32.xlu1 %v15907_v62, %s8313_s24 }
 0xe7b   :  { %v5353_v51 = vpop.xlane.xlu0 %5352 }
 0xe7c   :  { %v5399_v43 = vmul.f32 0.0625, %v5353_v51 }
 0xe7e   :  { %v5415_v26 = vadd.f32 1.1920929e-07, %v5399_v43 }
 0xe7f   :  { %v5359_v9 = vpop.xlane.xlu0 %5358  ;;  %v5356_v18 = vpop.xlane.xlu1 %5355 }
 0xe80   :  { %v5401_v37 = vmul.f32 0.0625, %v5359_v9  ;;  %v5400_v49 = vmul.f32 0.0625, %v5356_v18  ;;  %8026 = vrsqrt.f32 %v5415_v26 }
 0xe82   :  { %v5417_v41 = vadd.f32 1.1920929e-07, %v5401_v37  ;;  %v5416_v30 = vadd.f32 1.1920929e-07, %v5400_v49 }
 0xe83   :  { %v5362_v31 = vpop.xlane.xlu0 %5361 }
 0xe84   :  { %v5402_v51 = vmul.f32 0.0625, %v5362_v31  ;;  %8028 = vrsqrt.f32 %v5417_v41 }
 0xe85   :  { %8030 = vrsqrt.f32 %v5416_v30 }
 0xe86   :  { %v5418_v9 = vadd.f32 1.1920929e-07, %v5402_v51 }
 0xe87   :  { %v5368_v29 = vpop.xlane.xlu1 %5367  ;;  %v5365_v21 = vpop.xlane.xlu0 %5364 }
 0xe88   :  { %v5403_v50 = vmul.f32 0.0625, %v5365_v21  ;;  %v5404_v3 = vmul.f32 0.0625, %v5368_v29 }
 0xe8a   :  { %v5419_v40 = vadd.f32 1.1920929e-07, %v5403_v50  ;;  %v8027_v18 = vpop.eup %8026  ;;  %v5420_v49 = vadd.f32 1.1920929e-07, %v5404_v3 }
 0xe8b   :  { %v5374_v10 = vpop.xlane.xlu1 %5373  ;;  %v5371_v24 = vpop.xlane.xlu0 %5370 }
 0xe8c   :  { %v5405_v47 = vmul.f32 0.0625, %v5371_v24  ;;  %8032 = vrsqrt.f32 %v5419_v40  ;;  %v5406_v41 = vmul.f32 0.0625, %v5374_v10  ;;  %v15908_v24 = vld [vmem:[#allocation3_spill] sm:$0xff] }
 0xe8d   :  { %8034 = vrsqrt.f32 %v5418_v9  ;;  %v13687_v35 = vmul.f32 %v8027_v18, %v15908_v24  ;;  %v15909_v10 = vld [vmem:[#allocation15_spill] sm:$0xff] }
 0xe8e   :  { %v5421_v26 = vadd.f32 1.1920929e-07, %v5405_v47  ;;  %v8029_v30 = vpop.eup %8028  ;;  %v5422_v47 = vadd.f32 1.1920929e-07, %v5406_v41 }
 0xe8f   :  { %v5380_v52 = vpop.xlane.xlu1 %5379  ;;  %v5377_v46 = vpop.xlane.xlu0 %5376 }
 0xe90   :  { %v5407_v37 = vmul.f32 0.0625, %v5377_v46  ;;  %8036 = vrsqrt.f32 %v5421_v26  ;;  %v5408_v29 = vmul.f32 0.0625, %v5380_v52  ;;  %v8031_v3 = vpop.eup %8030  ;;  %v13693_v26 = vmul.f32 %v8029_v30, %v15909_v10  ;;  %v15911_v30 = vld [vmem:[#allocation23_spill] sm:$0xff] }
 0xe91   :  { %8038 = vrsqrt.f32 %v5420_v49 }
 0xe92   :  { %v5423_v50 = vadd.f32 1.1920929e-07, %v5407_v37  ;;  %v5424_v24 = vadd.f32 1.1920929e-07, %v5408_v29 }
 0xe93   :  { %v13652_v63 = vpop.xlane.xlu1 %5385  ;;  %v5383_v42 = vpop.xlane.xlu0 %5382 }
 0xe94   :  { %v5409_v31 = vmul.f32 0.0625, %v5383_v42  ;;  %8040 = vrsqrt.f32 %v5423_v50  ;;  %v5410_v49 = vmul.f32 0.0625, %v13652_v63 }
 0xe95   :  { %8042 = vrsqrt.f32 %v5422_v47 }
 0xe96   :  { %v5425_v59 = vadd.f32 1.1920929e-07, %v5409_v31  ;;  %v8033_v42 = vpop.eup %8032  ;;  %v15910_v31 = vld [vmem:[#allocation6_spill] sm:$0xff]  ;;  %v5426_v29 = vadd.f32 1.1920929e-07, %v5410_v49 }
 0xe97   :  { %v13654_v60 = vpop.xlane.xlu1 %5391  ;;  %v5389_v5 = vpop.xlane.xlu0 %5388  ;;  %v13704_v10 = vmul.f32 %v8033_v42, %v15911_v30  ;;  %v15913_v42 = vld [vmem:[#allocation35_spill] sm:$0xff] }
 0xe98   :  { %v5411_v9 = vmul.f32 0.0625, %v5389_v5  ;;  %8044 = vrsqrt.f32 %v5425_v59  ;;  %v8035_v5 = vpop.eup %8034 }
 0xe99   :  { %8046 = vrsqrt.f32 %v5424_v24 }
 0xe9a   :  { %v5427_v41 = vadd.f32 1.1920929e-07, %v5411_v9 }
 0xe9b   :  { %v13656_v28 = vpop.xlane.xlu1 %5397  ;;  %v5395_v13 = vpop.xlane.xlu0 %5394 }
 0xe9c   :  { %v5413_v50 = vmul.f32 0.0625, %v5395_v13  ;;  %v5412_v13 = vmul.f32 0.0625, %v13654_v60  ;;  %8048 = vrsqrt.f32 %v5427_v41 }
 0xe9d   :  { %8050 = vrsqrt.f32 %v5426_v29 }
 0xe9e   :  { %v5429_v9 = vadd.f32 1.1920929e-07, %v5413_v50  ;;  %v5428_v41 = vadd.f32 1.1920929e-07, %v5412_v13  ;;  %v5414_v50 = vmul.f32 0.0625, %v13656_v28 }
 0xe9f   :  { %v13658_v14 = vpop.permute.xlu1 %5465  ;;  %v13660_v45 = vpop.permute.xlu0 %5463 }
 0xea0   :  { %8052 = vrsqrt.f32 %v5429_v9  ;;  %v5430_v28 = vadd.f32 1.1920929e-07, %v5414_v50  ;;  %v15918_v50 = vld [vmem:[#allocation7_spill] sm:$0xff] }
 0xea1   :  { %8054 = vrsqrt.f32 %v5428_v41 }
 0xea2   :  { %8056 = vrsqrt.f32 %v5430_v28 }
 0xea3   :  { %v13662_v61 = vpop.permute.xlu1 %5467  ;;  %v13664_v62 = vpop.permute.xlu0 %5471 }
 0xea7   :  { %v13666_v2 = vpop.permute.xlu1 %5469  ;;  %v13668_v32 = vpop.permute.xlu0 %5475 }
 0xeab   :  { %v13670_v36 = vpop.permute.xlu1 %5473  ;;  %v13672_v38 = vpop.permute.xlu0 %5479 }
 0xeaf   :  { %v13674_v53 = vpop.permute.xlu1 %5477  ;;  %v13676_v4 = vpop.permute.xlu0 %5483 }
 0xeb3   :  { %v13678_v57 = vpop.permute.xlu1 %5481  ;;  %v13680_v43 = vpop.permute.xlu0 %5487 }
 0xeb7   :  { %v13682_v21 = vpop.permute.xlu1 %5485  ;;  %v13684_v27 = vpop.permute.xlu0 %5491 }
 0xebb   :  { %v13689_v51 = vpop.permute.xlu1 %5489  ;;  %v5528_v40 = vpop.permute.xlu0 %5527 }
 0xebc   :  { %v5575_v46 = vmul.f32 %v5528_v40, %v13687_v35  ;;  %v13701_v40 = vmul.f32 %v8031_v3, %v15910_v31 }
 0xebe   :  { %5607 = vrot.lane.b32.xlu0 %v5575_v46, %s8307_s9  ;;  %v8037_v46 = vpop.eup %8036 }
 0xebf   :  { %v13696_v37 = vpop.permute.xlu1 %5493  ;;  %v5532_v18 = vpop.permute.xlu0 %5531  ;;  %v13714_v30 = vmul.f32 %v8037_v46, %v15913_v42  ;;  %v15915_v42 = vld [vmem:[#allocation4_spill] sm:$0xff] }
 0xec0   :  { %v5577_v52 = vmul.f32 %v5532_v18, %v13693_v26  ;;  %v8039_v3 = vpop.eup %8038  ;;  %v15912_v18 = vld [vmem:[#allocation17_spill] sm:$0xff] }
 0xec1   :  { %v13711_v31 = vmul.f32 %v8035_v5, %v15912_v18  ;;  %v8041_v24 = vpop.eup %8040  ;;  %v15916_v18 = vld [vmem:[#allocation37_spill] sm:$0xff] }
 0xec2   :  { %5611 = vrot.lane.b32.xlu0 %v5577_v52, %s8307_s9  ;;  %v8043_v5 = vpop.eup %8042 }
 0xec3   :  { %v5530_v54 = vpop.permute.xlu1 %5529  ;;  %v5536_v47 = vpop.permute.xlu0 %5535 }
 0xec4   :  { %v5576_v63 = vmul.f32 %v5530_v54, %v13701_v40  ;;  %v5579_v59 = vmul.f32 %v5536_v47, %v13704_v10  ;;  %v15914_v47 = vld [vmem:[#allocation24_spill] sm:$0xff]  ;;  %v8045_v29 = vpop.eup %8044 }
 0xec5   :  { %v13722_v46 = vmul.f32 %v8039_v3, %v15914_v47  ;;  %v8047_v9 = vpop.eup %8046  ;;  %v13732_v3 = vmul.f32 %v8043_v5, %v15916_v18  ;;  %v15917_v47 = vld [vmem:[#allocation16_spill] sm:$0xff]  ;;  %v15919_v5 = vld [vmem:[#allocation25_spill] sm:$0xff] }
 0xec6   :  { %5609 = vrot.lane.b32.xlu1 %v5576_v63, %s8307_s9  ;;  %5615 = vrot.lane.b32.xlu0 %v5579_v59, %s8307_s9  ;;  %v13725_v63 = vmul.f32 %v8041_v24, %v15915_v42  ;;  %v13735_v24 = vmul.f32 %v8045_v29, %v15917_v47  ;;  %v13742_v58 = vmul.f32 %v8047_v9, %v15918_v50 }
 0xec7   :  { %v5534_v49 = vpop.permute.xlu1 %5533  ;;  %v5540_v54 = vpop.permute.xlu0 %5539 }
 0xec8   :  { %v5578_v52 = vmul.f32 %v5534_v49, %v13711_v31  ;;  %v5581_v60 = vmul.f32 %v5540_v54, %v13714_v30 }
 0xeca   :  { %5613 = vrot.lane.b32.xlu1 %v5578_v52, %s8307_s9  ;;  %5619 = vrot.lane.b32.xlu0 %v5581_v60, %s8307_s9  ;;  %v8049_v52 = vpop.eup %8048 }
 0xecb   :  { %v5538_v59 = vpop.permute.xlu1 %5537  ;;  %v5544_v49 = vpop.permute.xlu0 %5543  ;;  %v13745_v18 = vmul.f32 %v8049_v52, %v15919_v5 }
 0xecc   :  { %v5580_v54 = vmul.f32 %v5538_v59, %v13722_v46  ;;  %v5583_v13 = vmul.f32 %v5544_v49, %v13725_v63  ;;  %v8051_v41 = vpop.eup %8050 }
 0xecd   :  { %v8053_v29 = vpop.eup %8052 }
 0xece   :  { %5617 = vrot.lane.b32.xlu1 %v5580_v54, %s8307_s9  ;;  %5623 = vrot.lane.b32.xlu0 %v5583_v13, %s8307_s9  ;;  %v13755_v9 = vmul.f32 %v8053_v29, %v15921_v12  ;;  %v8055_v52 = vpop.eup %8054  ;;  %v13846_v12 = vld [vmem:[%s15006_s4 + $0x48] sm:$0xff] }
 0xecf   :  { %v5542_v60 = vpop.permute.xlu1 %5541  ;;  %v5548_v42 = vpop.permute.xlu0 %5547  ;;  %15934 = vst [vmem:[#allocation63_spill] sm:$0xff] %v13846_v12 }
 0xed0   :  { %v5582_v59 = vmul.f32 %v5542_v60, %v13732_v3  ;;  %v5585_v49 = vmul.f32 %v5548_v42, %v13735_v24  ;;  %v15920_v42 = vld [vmem:[#allocation18_spill] sm:$0xff] }
 0xed1   :  { %v13752_v28 = vmul.f32 %v8051_v41, %v15920_v42  ;;  %v8057_v41 = vpop.eup %8056  ;;  %v13853_v42 = vld [vmem:[%s15006_s4 + $0x60] sm:$0xff] }
 0xed2   :  { %5621 = vrot.lane.b32.xlu1 %v5582_v59, %s8307_s9  ;;  %5627 = vrot.lane.b32.xlu0 %v5585_v49, %s8307_s9  ;;  %15935 = vst [vmem:[#allocation71_spill] sm:$0xff] %v13853_v42 }
 0xed3   :  { %v5546_v54 = vpop.permute.xlu1 %5545  ;;  %v5552_v13 = vpop.permute.xlu0 %5551 }
 0xed4   :  { %v5584_v47 = vmul.f32 %v5546_v54, %v13742_v58  ;;  %v5587_v60 = vmul.f32 %v5552_v13, %v13745_v18  ;;  %v15922_v54 = vld [vmem:[#allocation27_spill] sm:$0xff]  ;;  %v15923_v13 = vld [vmem:[#allocation42_spill] sm:$0xff] }
 0xed5   :  { %v13762_v56 = vmul.f32 %v8055_v52, %v15922_v54  ;;  %v13783_v52 = vld [vmem:[%s15006_s4 + $0x10] sm:$0xff] }
 0xed6   :  { %5625 = vrot.lane.b32.xlu1 %v5584_v47, %s8307_s9  ;;  %5631 = vrot.lane.b32.xlu0 %v5587_v60, %s8307_s9  ;;  %v13768_v60 = vmul.f32 %v8057_v41, %v15923_v13  ;;  %15925 = vst [vmem:[#allocation119_spill] sm:$0xff] %v13783_v52  ;;  %v13797_v41 = vld [vmem:[%s15006_s4 + $0x20] sm:$0xff]  ;;  %v13832_v13 = vld [vmem:[%s15006_s4 + $0x38] sm:$0xff] }
 0xed7   :  { %v5550_v59 = vpop.permute.xlu1 %5549  ;;  %v5556_v49 = vpop.permute.xlu0 %5555  ;;  %15927 = vst [vmem:[#allocation83_spill] sm:$0xff] %v13797_v41  ;;  %15932 = vst [vmem:[#allocation31_spill] sm:$0xff] %v13832_v13  ;;  %v13839_v54 = vld [vmem:[%s15006_s4 + $0x50] sm:$0xff] }
 0xed8   :  { %v5586_v5 = vmul.f32 %v5550_v59, %v13752_v28  ;;  %v5589_v50 = vmul.f32 %v5556_v49, %v13755_v9  ;;  %v13774_v59 = vld [vmem:[%s15006_s4] sm:$0xff]  ;;  %v13790_v49 = vld [vmem:[%s15006_s4 + $0x8] sm:$0xff]  ;;  %15933 = vst [vmem:[#allocation33_spill] sm:$0xff] %v13839_v54 }
 0xed9   :  { %15924 = vst [vmem:[#allocation78_spill] sm:$0xff] %v13774_v59  ;;  %15926 = vst [vmem:[#allocation106_spill] sm:$0xff] %v13790_v49 }
 0xeda   :  { %5629 = vrot.lane.b32.xlu1 %v5586_v5, %s8307_s9  ;;  %5635 = vrot.lane.b32.xlu0 %v5589_v50, %s8307_s9 }
 0xedb   :  { %v5554_v29 = vpop.permute.xlu1 %5553 }
 0xedc   :  { %v5588_v47 = vmul.f32 %v5554_v29, %v13762_v56  ;;  %v13804_v29 = vld [vmem:[%s15006_s4 + $0x18] sm:$0xff] }
 0xedd   :  { %15928 = vst [vmem:[#allocation111_spill] sm:$0xff] %v13804_v29 }
 0xede   :  { %5633 = vrot.lane.b32.xlu1 %v5588_v47, %s8307_s9  ;;  %5687 = vrot.lane.b32.xlu0 %v13774_v59, %s8310_s26  ;;  %v13811_v47 = vld [vmem:[%s15006_s4 + $0x30] sm:$0xff] }
 0xedf   :  { %v5558_v5 = vpop.permute.xlu1 %5557  ;;  %15929 = vst [vmem:[#allocation103_spill] sm:$0xff] %v13811_v47 }
 0xee0   :  { %v5590_v50 = vmul.f32 %v5558_v5, %v13768_v60  ;;  %v13818_v5 = vld [vmem:[%s15006_s4 + $0x28] sm:$0xff] }
 0xee1   :  { %15930 = vst [vmem:[#allocation114_spill] sm:$0xff] %v13818_v5 }
 0xee2   :  { %5637 = vrot.lane.b32.xlu1 %v5590_v50, %s8307_s9  ;;  %5691 = vrot.lane.b32.xlu0 %v13783_v52, %s8310_s26  ;;  %v13825_v50 = vld [vmem:[%s15006_s4 + $0x40] sm:$0xff] }
 0xee3   :  { %15931 = vst [vmem:[#allocation36_spill] sm:$0xff] %v13825_v50 }
 0xee6   :  { %5689 = vrot.lane.b32.xlu1 %v13790_v49, %s8310_s26  ;;  %5695 = vrot.lane.b32.xlu0 %v13797_v41, %s8310_s26 }
 0xeea   :  { %5693 = vrot.lane.b32.xlu1 %v13804_v29, %s8310_s26  ;;  %5699 = vrot.lane.b32.xlu0 %v13811_v47, %s8310_s26 }
 0xeee   :  { %5697 = vrot.lane.b32.xlu1 %v13818_v5, %s8310_s26  ;;  %5703 = vrot.lane.b32.xlu0 %v13825_v50, %s8310_s26 }
 0xef2   :  { %5701 = vrot.lane.b32.xlu1 %v13832_v13, %s8310_s26  ;;  %5707 = vrot.lane.b32.xlu0 %v13839_v54, %s8310_s26  ;;  %v13860_v54 = vld [vmem:[%s15006_s4 + $0x58] sm:$0xff] }
 0xef3   :  { %15936 = vst [vmem:[#allocation59_spill] sm:$0xff] %v13860_v54 }
 0xef6   :  { %5705 = vrot.lane.b32.xlu1 %v13846_v12, %s8310_s26  ;;  %5711 = vrot.lane.b32.xlu0 %v13853_v42, %s8310_s26  ;;  %v13867_v12 = vld [vmem:[%s15006_s4 + $0x70] sm:$0xff]  ;;  %v13874_v42 = vld [vmem:[%s15006_s4 + $0x68] sm:$0xff] }
 0xef7   :  { %15937 = vst [vmem:[#allocation72_spill] sm:$0xff] %v13867_v12  ;;  %15938 = vst [vmem:[#allocation58_spill] sm:$0xff] %v13874_v42 }
 0xefa   :  { %5709 = vrot.lane.b32.xlu1 %v13860_v54, %s8310_s26  ;;  %5715 = vrot.lane.b32.xlu0 %v13867_v12, %s8310_s26  ;;  %v13881_v54 = vld [vmem:[%s15008_s3] sm:$0xff]  ;;  %v13888_v12 = vld [vmem:[%s15006_s4 + $0x78] sm:$0xff] }
 0xefb   :  { %15939 = vst [vmem:[#allocation100_spill] sm:$0xff] %v13881_v54  ;;  %15940 = vst [vmem:[#allocation69_spill] sm:$0xff] %v13888_v12 }
 0xefe   :  { %5713 = vrot.lane.b32.xlu1 %v13874_v42, %s8310_s26  ;;  %5751 = vrot.lane.b32.xlu0 %v13881_v54, %s8313_s24  ;;  %v13897_v42 = vld [vmem:[%s15008_s3 + $0x8] sm:$0xff] }
 0xeff   :  { %15941 = vst [vmem:[#allocation105_spill] sm:$0xff] %v13897_v42 }
 0xf02   :  { %5717 = vrot.lane.b32.xlu1 %v13888_v12, %s8310_s26  ;;  %5755 = vrot.lane.b32.xlu0 %v13533_v20, %s8313_s24  ;;  %v13912_v20 = vld [vmem:[%s15008_s3 + $0x40] sm:$0xff] }
 0xf03   :  { %15942 = vst [vmem:[#allocation97_spill] sm:$0xff] %v13912_v20 }
 0xf06   :  { %5753 = vrot.lane.b32.xlu1 %v13897_v42, %s8313_s24  ;;  %5759 = vrot.lane.b32.xlu0 %v13549_v15, %s8313_s24 }
 0xf0a   :  { %5757 = vrot.lane.b32.xlu1 %v13542_v1, %s8313_s24  ;;  %5763 = vrot.lane.b32.xlu0 %v13563_v6, %s8313_s24  ;;  %v13923_v1 = vld [vmem:[%s15008_s3 + $0x48] sm:$0xff] }
 0xf0b   :  { %15943 = vst [vmem:[#allocation76_spill] sm:$0xff] %v13923_v1 }
 0xf0e   :  { %5761 = vrot.lane.b32.xlu1 %v13556_v33, %s8313_s24  ;;  %5767 = vrot.lane.b32.xlu0 %v13912_v20, %s8313_s24 }
 0xf12   :  { %5765 = vrot.lane.b32.xlu1 %v13570_v48, %s8313_s24  ;;  %5771 = vrot.lane.b32.xlu0 %v13581_v19, %s8313_s24 }
 0xf16   :  { %5769 = vrot.lane.b32.xlu1 %v13923_v1, %s8313_s24  ;;  %5775 = vrot.lane.b32.xlu0 %v13595_v16, %s8313_s24 }
 0xf1a   :  { %5773 = vrot.lane.b32.xlu1 %v13588_v23, %s8313_s24  ;;  %5779 = vrot.lane.b32.xlu0 %v13609_v39, %s8313_s24 }
 0xf1e   :  { %5777 = vrot.lane.b32.xlu1 %v13602_v17, %s8313_s24 }
 0xf22   :  { %5781 = vrot.lane.b32.xlu1 %v13616_v0, %s8313_s24 }
 0xf30   :  { %v13937_v15 = vpop.permute.xlu0 %5607 }
 0xf34   :  { %v13939_v33 = vpop.permute.xlu0 %5611 }
 0xf38   :  { %v13941_v6 = vpop.permute.xlu1 %5609  ;;  %v13943_v48 = vpop.permute.xlu0 %5615 }
 0xf3c   :  { %v13945_v19 = vpop.permute.xlu1 %5613  ;;  %v13947_v23 = vpop.permute.xlu0 %5619 }
 0xf40   :  { %v13949_v16 = vpop.permute.xlu1 %5617  ;;  %v13951_v39 = vpop.permute.xlu0 %5623 }
 0xf44   :  { %v13953_v17 = vpop.permute.xlu1 %5621  ;;  %v13955_v12 = vpop.permute.xlu0 %5627 }
 0xf48   :  { %v13957_v0 = vpop.permute.xlu1 %5625  ;;  %v13959_v50 = vpop.permute.xlu0 %5631 }
 0xf4c   :  { %v13961_v13 = vpop.permute.xlu1 %5629  ;;  %v13963_v47 = vpop.permute.xlu0 %5635 }
 0xf50   :  { %v13965_v5 = vpop.permute.xlu1 %5633  ;;  %v13967_v41 = vpop.permute.xlu0 %5687 }
 0xf54   :  { %v13969_v29 = vpop.permute.xlu1 %5637  ;;  %v13971_v52 = vpop.permute.xlu0 %5691 }
 0xf58   :  { %v13973_v49 = vpop.permute.xlu1 %5689  ;;  %v13975_v59 = vpop.permute.xlu0 %5695 }
 0xf5c   :  { %v13977_v1 = vpop.permute.xlu1 %5693  ;;  %v13979_v20 = vpop.permute.xlu0 %5699 }
 0xf5d   :  { %15944 = vst [vmem:[#allocation68_spill] sm:$0xff] %v13979_v20 }
 0xf60   :  { %v13981_v54 = vpop.permute.xlu1 %5697  ;;  %v13983_v42 = vpop.permute.xlu0 %5703 }
 0xf61   :  { %15945 = vst [vmem:[#allocation101_spill] sm:$0xff] %v13983_v42 }
 0xf64   :  { %v13985_v7 = vpop.permute.xlu1 %5701  ;;  %v13987_v34 = vpop.permute.xlu0 %5707 }
 0xf65   :  { %15946 = vst [vmem:[#allocation60_spill] sm:$0xff] %v13985_v7  ;;  %15947 = vst [vmem:[#allocation95_spill] sm:$0xff] %v13987_v34 }
 0xf68   :  { %v13989_v55 = vpop.permute.xlu1 %5705  ;;  %v13991_v8 = vpop.permute.xlu0 %5711 }
 0xf69   :  { %15948 = vst [vmem:[#allocation92_spill] sm:$0xff] %v13989_v55  ;;  %15949 = vst [vmem:[#allocation80_spill] sm:$0xff] %v13991_v8 }
 0xf6c   :  { %v13993_v11 = vpop.permute.xlu1 %5709  ;;  %v13995_v22 = vpop.permute.xlu0 %5715 }
 0xf6d   :  { %15950 = vst [vmem:[#allocation94_spill] sm:$0xff] %v13993_v11  ;;  %15951 = vst [vmem:[#allocation90_spill] sm:$0xff] %v13995_v22 }
 0xf70   :  { %v13997_v25 = vpop.permute.xlu1 %5713  ;;  %v5752_v44 = vpop.permute.xlu0 %5751 }
 0xf71   :  { %15952 = vst [vmem:[#allocation117_spill] sm:$0xff] %v13997_v25  ;;  %v5799_v20 = vmul.f32 %v5752_v44, %v13687_v35 }
 0xf73   :  { %5831 = vrot.lane.b32.xlu0 %v5799_v20, %s8307_s9 }
 0xf74   :  { %v14001_v42 = vpop.permute.xlu1 %5717  ;;  %v5756_v7 = vpop.permute.xlu0 %5755 }
 0xf75   :  { %15953 = vst [vmem:[#allocation116_spill] sm:$0xff] %v14001_v42  ;;  %v5801_v34 = vmul.f32 %v5756_v7, %v13693_v26 }
 0xf77   :  { %5835 = vrot.lane.b32.xlu0 %v5801_v34, %s8307_s9 }
 0xf78   :  { %v5754_v55 = vpop.permute.xlu1 %5753  ;;  %v5760_v8 = vpop.permute.xlu0 %5759 }
 0xf79   :  { %v5800_v11 = vmul.f32 %v5754_v55, %v13701_v40  ;;  %v5803_v22 = vmul.f32 %v5760_v8, %v13704_v10 }
 0xf7b   :  { %5833 = vrot.lane.b32.xlu1 %v5800_v11, %s8307_s9  ;;  %5839 = vrot.lane.b32.xlu0 %v5803_v22, %s8307_s9 }
 0xf7c   :  { %v5758_v44 = vpop.permute.xlu1 %5757  ;;  %v5764_v25 = vpop.permute.xlu0 %5763 }
 0xf7d   :  { %v5802_v20 = vmul.f32 %v5758_v44, %v13711_v31  ;;  %v5805_v42 = vmul.f32 %v5764_v25, %v13714_v30 }
 0xf7f   :  { %5837 = vrot.lane.b32.xlu1 %v5802_v20, %s8307_s9  ;;  %5843 = vrot.lane.b32.xlu0 %v5805_v42, %s8307_s9 }
 0xf80   :  { %v5762_v34 = vpop.permute.xlu1 %5761  ;;  %v5768_v7 = vpop.permute.xlu0 %5767 }
 0xf81   :  { %v5804_v55 = vmul.f32 %v5762_v34, %v13722_v46  ;;  %v5807_v8 = vmul.f32 %v5768_v7, %v13725_v63 }
 0xf83   :  { %5841 = vrot.lane.b32.xlu1 %v5804_v55, %s8307_s9  ;;  %5847 = vrot.lane.b32.xlu0 %v5807_v8, %s8307_s9 }
 0xf84   :  { %v5766_v22 = vpop.permute.xlu1 %5765  ;;  %v5772_v11 = vpop.permute.xlu0 %5771 }
 0xf85   :  { %v5806_v44 = vmul.f32 %v5766_v22, %v13732_v3  ;;  %v5809_v25 = vmul.f32 %v5772_v11, %v13735_v24 }
 0xf87   :  { %5845 = vrot.lane.b32.xlu1 %v5806_v44, %s8307_s9  ;;  %5851 = vrot.lane.b32.xlu0 %v5809_v25, %s8307_s9  ;;  %v5511_v44 = vmul.f32 %v13660_v45, %v13687_v35 }
 0xf88   :  { %v5770_v42 = vpop.permute.xlu1 %5769  ;;  %v5776_v20 = vpop.permute.xlu0 %5775 }
 0xf89   :  { %v5808_v34 = vmul.f32 %v5770_v42, %v13742_v58  ;;  %v5811_v7 = vmul.f32 %v5776_v20, %v13745_v18  ;;  %v5655_v42 = vadd.f32 %v13937_v15, %v5511_v44  ;;  %v5515_v15 = vmul.f32 %v13664_v62, %v13704_v10 }
 0xf8a   :  { %v5516_v44 = vmul.f32 %v13670_v36, %v13722_v46 }
 0xf8b   :  { %5849 = vrot.lane.b32.xlu1 %v5808_v34, %s8307_s9  ;;  %5855 = vrot.lane.b32.xlu0 %v5811_v7, %s8307_s9  ;;  %v5513_v34 = vmul.f32 %v13662_v61, %v13693_v26 }
 0xf8c   :  { %v5774_v55 = vpop.permute.xlu1 %5773  ;;  %v5780_v8 = vpop.permute.xlu0 %5779 }
 0xf8d   :  { %v5810_v22 = vmul.f32 %v5774_v55, %v13752_v28  ;;  %v5813_v11 = vmul.f32 %v5780_v8, %v13755_v9  ;;  %v5657_v55 = vadd.f32 %v13939_v33, %v5513_v34  ;;  %v5512_v8 = vmul.f32 %v13658_v14, %v13701_v40 }
 0xf8e   :  { %v5517_v33 = vmul.f32 %v13668_v32, %v13714_v30  ;;  %v5660_v32 = vadd.f32 %v13949_v16, %v5516_v44  ;;  %v5523_v16 = vmul.f32 %v13680_v43, %v13745_v18  ;;  %v5681_v44 = vsub.f32 0.0, %v13735_v24 }
 0xf8f   :  { %5853 = vrot.lane.b32.xlu1 %v5810_v22, %s8307_s9  ;;  %5859 = vrot.lane.b32.xlu0 %v5813_v11, %s8307_s9  ;;  %v5656_v61 = vadd.f32 %v13941_v6, %v5512_v8  ;;  %v5659_v22 = vadd.f32 %v13943_v48, %v5515_v15  ;;  %v5514_v11 = vmul.f32 %v13666_v2, %v13711_v31 }
 0xf90   :  { %v5778_v25 = vpop.permute.xlu1 %5777  ;;  %v5661_v62 = vadd.f32 %v13947_v23, %v5517_v33  ;;  %v5519_v6 = vmul.f32 %v13672_v38, %v13725_v63  ;;  %v5518_v48 = vmul.f32 %v13674_v53, %v13732_v3  ;;  %v5520_v23 = vmul.f32 %v13678_v57, %v13742_v58 }
 0xf91   :  { %v5812_v20 = vmul.f32 %v5778_v25, %v13762_v56  ;;  %v5658_v14 = vadd.f32 %v13945_v19, %v5514_v11  ;;  %v5521_v19 = vmul.f32 %v13676_v4, %v13735_v24  ;;  %v5667_v53 = vadd.f32 %v13959_v50, %v5523_v16  ;;  %v15955_v11 = vld [vmem:[#allocation101_spill] sm:$0xff]  ;;  %v15958_v16 = vld [vmem:[#allocation92_spill] sm:$0xff] }
 0xf92   :  { %v5663_v2 = vadd.f32 %v13951_v39, %v5519_v6  ;;  %v5662_v38 = vadd.f32 %v13953_v17, %v5518_v48  ;;  %v5664_v4 = vadd.f32 %v13957_v0, %v5520_v23  ;;  %v5522_v39 = vmul.f32 %v13682_v21, %v13752_v28 }
 0xf93   :  { %5857 = vrot.lane.b32.xlu1 %v5812_v20, %s8307_s9  ;;  %5911 = vrot.lane.b32.xlu0 %v5655_v42, %s8311_s15  ;;  %v5665_v36 = vadd.f32 %v13955_v12, %v5521_v19  ;;  %v5525_v12 = vmul.f32 %v13684_v27, %v13755_v9  ;;  %v5524_v17 = vmul.f32 %v13689_v51, %v13762_v56  ;;  %v5673_v0 = vsub.f32 0.0, %v13693_v26 }
 0xf94   :  { %v5782_v7 = vpop.permute.xlu1 %5781  ;;  %v5666_v57 = vadd.f32 %v13961_v13, %v5522_v39  ;;  %v5526_v27 = vmul.f32 %v13696_v37, %v13768_v60  ;;  %v5671_v13 = vsub.f32 0.0, %v13687_v35  ;;  %v5672_v37 = vsub.f32 0.0, %v13701_v40  ;;  %v15954_v40 = vld [vmem:[#allocation68_spill] sm:$0xff] }
 0xf95   :  { %v5814_v45 = vmul.f32 %v5782_v7, %v13768_v60  ;;  %v5669_v43 = vadd.f32 %v13963_v47, %v5525_v12  ;;  %v5668_v21 = vadd.f32 %v13965_v5, %v5524_v17  ;;  %v5737_v42 = vmul.f32 %v13971_v52, %v5673_v0 }
 0xf96   :  { %v5670_v50 = vadd.f32 %v13969_v29, %v5526_v27  ;;  %v5735_v47 = vmul.f32 %v13967_v41, %v5671_v13  ;;  %v5675_v20 = vsub.f32 0.0, %v13704_v10  ;;  %v5736_v34 = vmul.f32 %v13973_v49, %v5672_v37  ;;  %v15961_v27 = vld [vmem:[#allocation90_spill] sm:$0xff] }
 0xf97   :  { %5861 = vrot.lane.b32.xlu1 %v5814_v45, %s8307_s9  ;;  %5915 = vrot.lane.b32.xlu0 %v5657_v55, %s8311_s15  ;;  %v5674_v26 = vsub.f32 0.0, %v13711_v31  ;;  %v5677_v52 = vsub.f32 0.0, %v13714_v30  ;;  %v5676_v49 = vsub.f32 0.0, %v13722_v46 }
 0xf98   :  { %v5739_v35 = vmul.f32 %v13975_v59, %v5675_v20  ;;  %v15963_v20 = vld [vmem:[#allocation116_spill] sm:$0xff] }
 0xf99   :  { %v5738_v8 = vmul.f32 %v13977_v1, %v5674_v26  ;;  %v5741_v15 = vmul.f32 %v15954_v40, %v5677_v52  ;;  %v5740_v30 = vmul.f32 %v13981_v54, %v5676_v49  ;;  %v15968_v26 = vld [vmem:[#allocation47_spill] sm:$0xff]  ;;  %v15969_v52 = vld [vmem:[#allocation86_spill] sm:$0xff]  ;;  %v15973_v40 = vld [vmem:[#allocation49_spill] sm:$0xff] }
 0xf9a   :  { %v15977_v49 = vld [vmem:[#allocation89_spill] sm:$0xff] }
 0xf9b   :  { %5913 = vrot.lane.b32.xlu1 %v5656_v61, %s8311_s15  ;;  %5919 = vrot.lane.b32.xlu0 %v5659_v22, %s8311_s15  ;;  %v5679_v61 = vsub.f32 0.0, %v13725_v63 }
 0xf9d   :  { %v5743_v33 = vmul.f32 %v15955_v11, %v5679_v61  ;;  %v15978_v61 = vld [vmem:[#allocation67_spill] sm:$0xff] }
 0xf9f   :  { %5917 = vrot.lane.b32.xlu1 %v5658_v14, %s8311_s15  ;;  %5923 = vrot.lane.b32.xlu0 %v5661_v62, %s8311_s15  ;;  %v5678_v62 = vsub.f32 0.0, %v13732_v3 }
 0xfa3   :  { %5921 = vrot.lane.b32.xlu1 %v5660_v32, %s8311_s15  ;;  %5927 = vrot.lane.b32.xlu0 %v5663_v2, %s8311_s15  ;;  %v15956_v32 = vld [vmem:[#allocation60_spill] sm:$0xff]  ;;  %v15957_v2 = vld [vmem:[#allocation95_spill] sm:$0xff] }
 0xfa4   :  { %v5742_v63 = vmul.f32 %v15956_v32, %v5678_v62  ;;  %v5745_v48 = vmul.f32 %v15957_v2, %v5681_v44 }
 0xfa7   :  { %5925 = vrot.lane.b32.xlu1 %v5662_v38, %s8311_s15  ;;  %5931 = vrot.lane.b32.xlu0 %v5665_v36, %s8311_s15  ;;  %v5680_v38 = vsub.f32 0.0, %v13742_v58  ;;  %v5683_v36 = vsub.f32 0.0, %v13745_v18 }
 0xfa9   :  { %v5744_v24 = vmul.f32 %v15958_v16, %v5680_v38 }
 0xfab   :  { %5929 = vrot.lane.b32.xlu1 %v5664_v4, %s8311_s15  ;;  %5935 = vrot.lane.b32.xlu0 %v5667_v53, %s8311_s15  ;;  %v15959_v4 = vld [vmem:[#allocation80_spill] sm:$0xff] }
 0xfac   :  { %v5747_v53 = vmul.f32 %v15959_v4, %v5683_v36 }
 0xfaf   :  { %5933 = vrot.lane.b32.xlu1 %v5666_v57, %s8311_s15  ;;  %5939 = vrot.lane.b32.xlu0 %v5669_v43, %s8311_s15  ;;  %v5682_v57 = vsub.f32 0.0, %v13752_v28  ;;  %v5685_v43 = vsub.f32 0.0, %v13755_v9 }
 0xfb3   :  { %5937 = vrot.lane.b32.xlu1 %v5668_v21, %s8311_s15  ;;  %v15960_v21 = vld [vmem:[#allocation94_spill] sm:$0xff] }
 0xfb4   :  { %v5746_v18 = vmul.f32 %v15960_v21, %v5682_v57 }
 0xfb7   :  { %5941 = vrot.lane.b32.xlu1 %v5670_v50, %s8311_s15  ;;  %v5749_v50 = vmul.f32 %v15961_v27, %v5685_v43 }
 0xfe5   :  { %v5832_v51 = vpop.permute.xlu0 %5831 }
 0xfe6   :  { %v5879_v25 = vadd.f32 %v5832_v51, %v5735_v47  ;;  %v5684_v51 = vsub.f32 0.0, %v13762_v56 }
 0xfe8   :  { %5975 = vrot.lane.b32.xlu0 %v5879_v25, %s8312_s22 }
 0xfe9   :  { %v5836_v5 = vpop.permute.xlu0 %5835 }
 0xfea   :  { %v5881_v29 = vadd.f32 %v5836_v5, %v5737_v42  ;;  %v15962_v42 = vld [vmem:[#allocation117_spill] sm:$0xff]  ;;  %v5686_v5 = vsub.f32 0.0, %v13768_v60 }
 0xfeb   :  { %v5748_v28 = vmul.f32 %v15962_v42, %v5684_v51  ;;  %v15967_v60 = vld [vmem:[#allocation61_spill] sm:$0xff] }
 0xfec   :  { %5979 = vrot.lane.b32.xlu0 %v5881_v29, %s8312_s22  ;;  %v5750_v29 = vmul.f32 %v15963_v20, %v5686_v5 }
 0xfed   :  { %v5834_v41 = vpop.permute.xlu1 %5833  ;;  %v5840_v7 = vpop.permute.xlu0 %5839 }
 0xfee   :  { %v5880_v55 = vadd.f32 %v5834_v41, %v5736_v34  ;;  %v5883_v45 = vadd.f32 %v5840_v7, %v5739_v35  ;;  %v15964_v34 = vld [vmem:[#allocation5_spill] sm:$0xff]  ;;  %v15965_v41 = vld [vmem:[#allocation34_spill] sm:$0xff] }
 0xfef   :  { %v15966_v7 = vld [vmem:[#allocation9_spill] sm:$0xff] }
 0xff0   :  { %5977 = vrot.lane.b32.xlu1 %v5880_v55, %s8312_s22  ;;  %5983 = vrot.lane.b32.xlu0 %v5883_v45, %s8312_s22  ;;  %v15970_v55 = vld [vmem:[#allocation64_spill] sm:$0xff] }
 0xff1   :  { %v5838_v10 = vpop.permute.xlu1 %5837  ;;  %v5844_v59 = vpop.permute.xlu0 %5843  ;;  %v15971_v45 = vld [vmem:[#allocation8_spill] sm:$0xff] }
 0xff2   :  { %v5882_v22 = vadd.f32 %v5838_v10, %v5738_v8  ;;  %v5885_v31 = vadd.f32 %v5844_v59, %v5741_v15  ;;  %v15972_v8 = vld [vmem:[#allocation88_spill] sm:$0xff]  ;;  %v15974_v15 = vld [vmem:[#allocation14_spill] sm:$0xff]  ;;  %v15975_v10 = vld [vmem:[#allocation65_spill] sm:$0xff] }
 0xff3   :  { %v15976_v59 = vld [vmem:[#allocation48_spill] sm:$0xff] }
 0xff4   :  { %5981 = vrot.lane.b32.xlu1 %v5882_v22, %s8312_s22  ;;  %5987 = vrot.lane.b32.xlu0 %v5885_v31, %s8312_s22  ;;  %v15979_v31 = vld [vmem:[#allocation91_spill] sm:$0xff] }
 0xff5   :  { %v5842_v1 = vpop.permute.xlu1 %5841  ;;  %v5848_v14 = vpop.permute.xlu0 %5847 }
 0xff6   :  { %v5884_v6 = vadd.f32 %v5842_v1, %v5740_v30  ;;  %v5887_v46 = vadd.f32 %v5848_v14, %v5743_v33 }
 0xff8   :  { %5985 = vrot.lane.b32.xlu1 %v5884_v6, %s8312_s22  ;;  %5991 = vrot.lane.b32.xlu0 %v5887_v46, %s8312_s22 }
 0xff9   :  { %v5846_v54 = vpop.permute.xlu1 %5845  ;;  %v5852_v19 = vpop.permute.xlu0 %5851 }
 0xffa   :  { %v5886_v23 = vadd.f32 %v5846_v54, %v5742_v63  ;;  %v5889_v3 = vadd.f32 %v5852_v19, %v5745_v48 }
 0xffc   :  { %5989 = vrot.lane.b32.xlu1 %v5886_v23, %s8312_s22  ;;  %5995 = vrot.lane.b32.xlu0 %v5889_v3, %s8312_s22 }
 0xffd   :  { %v5850_v39 = vpop.permute.xlu1 %5849  ;;  %v5856_v12 = vpop.permute.xlu0 %5855 }
 0xffe   :  { %v5888_v17 = vadd.f32 %v5850_v39, %v5744_v24  ;;  %v5891_v58 = vadd.f32 %v5856_v12, %v5747_v53 }
0x1000   :  { %5993 = vrot.lane.b32.xlu1 %v5888_v17, %s8312_s22  ;;  %5999 = vrot.lane.b32.xlu0 %v5891_v58, %s8312_s22 }
0x1001   :  { %v5854_v13 = vpop.permute.xlu1 %5853  ;;  %v5860_v47 = vpop.permute.xlu0 %5859 }
0x1002   :  { %v5890_v0 = vadd.f32 %v5854_v13, %v5746_v18  ;;  %v5893_v25 = vadd.f32 %v5860_v47, %v5749_v50 }
0x1004   :  { %5997 = vrot.lane.b32.xlu1 %v5890_v0, %s8312_s22  ;;  %6003 = vrot.lane.b32.xlu0 %v5893_v25, %s8312_s22 }
0x1005   :  { %v5858_v9 = vpop.permute.xlu1 %5857  ;;  %v5912_v22 = vpop.permute.xlu0 %5911 }
0x1006   :  { %v5892_v37 = vadd.f32 %v5858_v9, %v5748_v28 }
0x1008   :  { %6001 = vrot.lane.b32.xlu1 %v5892_v37, %s8312_s22  ;;  %6136 = vrot.lane.b32.xlu0 %v15964_v34, %s8308_s0 }
0x1009   :  { %v5862_v56 = vpop.permute.xlu1 %5861  ;;  %v5916_v30 = vpop.permute.xlu0 %5915 }
0x100a   :  { %v5894_v35 = vadd.f32 %v5862_v56, %v5750_v29 }
0x100c   :  { %6005 = vrot.lane.b32.xlu1 %v5894_v35, %s8312_s22  ;;  %6140 = vrot.lane.b32.xlu0 %v15965_v41, %s8308_s0 }
0x100d   :  { %v5914_v11 = vpop.permute.xlu1 %5913  ;;  %v5920_v33 = vpop.permute.xlu0 %5919 }
0x1010   :  { %6138 = vrot.lane.b32.xlu1 %v15966_v7, %s8308_s0  ;;  %6144 = vrot.lane.b32.xlu0 %v15967_v60, %s8308_s0 }
0x1011   :  { %v5918_v1 = vpop.permute.xlu1 %5917  ;;  %v5924_v14 = vpop.permute.xlu0 %5923 }
0x1014   :  { %6142 = vrot.lane.b32.xlu1 %v15968_v26, %s8308_s0  ;;  %6148 = vrot.lane.b32.xlu0 %v15969_v52, %s8308_s0 }
0x1015   :  { %v5922_v62 = vpop.permute.xlu1 %5921  ;;  %v5928_v44 = vpop.permute.xlu0 %5927 }
0x1018   :  { %6146 = vrot.lane.b32.xlu1 %v15970_v55, %s8308_s0  ;;  %6152 = vrot.lane.b32.xlu0 %v15971_v45, %s8308_s0 }
0x1019   :  { %v5926_v6 = vpop.permute.xlu1 %5925  ;;  %v5932_v46 = vpop.permute.xlu0 %5931 }
0x101c   :  { %6150 = vrot.lane.b32.xlu1 %v15972_v8, %s8308_s0  ;;  %6156 = vrot.lane.b32.xlu0 %v15973_v40, %s8308_s0 }
0x101d   :  { %v5930_v32 = vpop.permute.xlu1 %5929  ;;  %v5936_v63 = vpop.permute.xlu0 %5935 }
0x1020   :  { %6154 = vrot.lane.b32.xlu1 %v15974_v15, %s8308_s0  ;;  %6160 = vrot.lane.b32.xlu0 %v15975_v10, %s8308_s0 }
0x1021   :  { %v14177_v2 = vpop.permute.xlu1 %5933  ;;  %v14179_v48 = vpop.permute.xlu0 %5939 }
0x1024   :  { %6158 = vrot.lane.b32.xlu1 %v15976_v59, %s8308_s0  ;;  %6164 = vrot.lane.b32.xlu0 %v15977_v49, %s8308_s0 }
0x1025   :  { %v14181_v54 = vpop.permute.xlu1 %5937 }
0x1028   :  { %6162 = vrot.lane.b32.xlu1 %v15978_v61, %s8308_s0 }
0x1029   :  { %v14184_v23 = vpop.permute.xlu1 %5941 }
0x102c   :  { %6166 = vrot.lane.b32.xlu1 %v15979_v31, %s8308_s0 }
0x105a   :  { %v5976_v19 = vpop.permute.xlu0 %5975 }
0x105b   :  { %v6023_v38 = vsel %vm830_vm3, %v5912_v22, %v5976_v19 }
0x105c   :  { %v6039_v36 = vmul.f32 0.25, %v6023_v38 }
0x105e   :  { %v7446_v3 = vpack.c.bf16 %v6039_v36, %v6039_v36  ;;  %v5980_v16 = vpop.permute.xlu0 %5979 }
0x105f   :  { %v6025_v24 = vsel %vm830_vm3, %v5916_v30, %v5980_v16 }
0x1060   :  { %7270 = vst.msk [vmem:[%s15011_s5 + $0xc0] sm:$0xf] %vm927_vm1, %v7446_v3  ;;  %v6041_v4 = vmul.f32 0.25, %v6025_v24 }
0x1062   :  { %v7448_v53 = vpack.c.bf16 %v6041_v4, %v6041_v4  ;;  %v5978_v39 = vpop.permute.xlu1 %5977  ;;  %v5984_v12 = vpop.permute.xlu0 %5983 }
0x1063   :  { %v6024_v57 = vsel %vm830_vm3, %v5914_v11, %v5978_v39  ;;  %v6027_v43 = vsel %vm830_vm3, %v5920_v33, %v5984_v12 }
0x1064   :  { %7272 = vst.msk [vmem:[%s15011_s5 + $0xc8] sm:$0xf] %vm927_vm1, %v7448_v53  ;;  %v6040_v17 = vmul.f32 0.25, %v6024_v57  ;;  %v6043_v58 = vmul.f32 0.25, %v6027_v43 }
0x1066   :  { %v7447_v21 = vpack.c.bf16 %v6040_v17, %v6040_v17  ;;  %v7450_v18 = vpack.c.bf16 %v6043_v58, %v6043_v58  ;;  %v5982_v27 = vpop.permute.xlu1 %5981  ;;  %v5988_v50 = vpop.permute.xlu0 %5987 }
0x1067   :  { %v6026_v13 = vsel %vm830_vm3, %v5918_v1, %v5982_v27  ;;  %v6029_v47 = vsel %vm830_vm3, %v5924_v14, %v5988_v50 }
0x1068   :  { %7271 = vst.msk [vmem:[%s15011_s5 + $0xc4] sm:$0xf] %vm927_vm1, %v7447_v21  ;;  %7274 = vst.msk [vmem:[%s15011_s5 + $0xd0] sm:$0xf] %vm927_vm1, %v7450_v18  ;;  %v6042_v51 = vmul.f32 0.25, %v6026_v13  ;;  %v6045_v0 = vmul.f32 0.25, %v6029_v47 }
0x106a   :  { %v7449_v25 = vpack.c.bf16 %v6042_v51, %v6042_v51  ;;  %v7452_v42 = vpack.c.bf16 %v6045_v0, %v6045_v0  ;;  %v5986_v28 = vpop.permute.xlu1 %5985  ;;  %v5992_v9 = vpop.permute.xlu0 %5991 }
0x106b   :  { %v6028_v5 = vsel %vm830_vm3, %v5922_v62, %v5986_v28  ;;  %v6031_v37 = vsel %vm830_vm3, %v5928_v44, %v5992_v9 }
0x106c   :  { %7273 = vst.msk [vmem:[%s15011_s5 + $0xcc] sm:$0xf] %vm927_vm1, %v7449_v25  ;;  %7276 = vst.msk [vmem:[%s15011_s5 + $0xd8] sm:$0xf] %vm927_vm1, %v7452_v42  ;;  %v6044_v20 = vmul.f32 0.25, %v6028_v5  ;;  %v6047_v29 = vmul.f32 0.25, %v6031_v37 }
0x106e   :  { %v7451_v34 = vpack.c.bf16 %v6044_v20, %v6044_v20  ;;  %v7454_v56 = vpack.c.bf16 %v6047_v29, %v6047_v29  ;;  %v5990_v35 = vpop.permute.xlu1 %5989  ;;  %v5996_v41 = vpop.permute.xlu0 %5995 }
0x106f   :  { %v6030_v7 = vsel %vm830_vm3, %v5926_v6, %v5990_v35  ;;  %v6033_v60 = vsel %vm830_vm3, %v5932_v46, %v5996_v41  ;;  %v15980_v35 = vld [vmem:[#allocation105_spill] sm:$0xff] }
0x1070   :  { %7275 = vst.msk [vmem:[%s15011_s5 + $0xd4] sm:$0xf] %vm927_vm1, %v7451_v34  ;;  %7278 = vst.msk [vmem:[%s15011_s5 + $0xe0] sm:$0xf] %vm927_vm1, %v7454_v56  ;;  %v6046_v26 = vmul.f32 0.25, %v6030_v7  ;;  %v6049_v52 = vmul.f32 0.25, %v6033_v60 }
0x1071   :  { %v14290_v41 = vld [vmem:[%s15008_s3 + $0x10] sm:$0xff]  ;;  %v15981_v7 = vld [vmem:[#allocation100_spill] sm:$0xff]  ;;  %v14299_v60 = vld [vmem:[%s15008_s3 + $0x18] sm:$0xff] }
0x1072   :  { %v7453_v55 = vpack.c.bf16 %v6046_v26, %v6046_v26  ;;  %v7456_v45 = vpack.c.bf16 %v6049_v52, %v6049_v52  ;;  %v5994_v8 = vpop.permute.xlu1 %5993  ;;  %v6000_v40 = vpop.permute.xlu0 %5999  ;;  %v14306_v26 = vld [vmem:[%s15008_s3 + $0x20] sm:$0xff]  ;;  %v14313_v52 = vld [vmem:[%s15008_s3 + $0x28] sm:$0xff] }
0x1073   :  { %v6032_v15 = vsel %vm830_vm3, %v5930_v32, %v5994_v8  ;;  %v6035_v10 = vsel %vm830_vm3, %v5936_v63, %v6000_v40  ;;  %v15982_v8 = vld [vmem:[#allocation97_spill] sm:$0xff]  ;;  %v15983_v40 = vld [vmem:[#allocation76_spill] sm:$0xff] }
0x1074   :  { %7277 = vst.msk [vmem:[%s15011_s5 + $0xdc] sm:$0xf] %vm927_vm1, %v7453_v55  ;;  %7280 = vst.msk [vmem:[%s15011_s5 + $0xe8] sm:$0xf] %vm927_vm1, %v7456_v45  ;;  %v6048_v59 = vmul.f32 0.25, %v6032_v15  ;;  %v6051_v49 = vmul.f32 0.25, %v6035_v10 }
0x1075   :  { %v14320_v55 = vld [vmem:[%s15008_s3 + $0x30] sm:$0xff]  ;;  %v14327_v45 = vld [vmem:[%s15008_s3 + $0x38] sm:$0xff] }
0x1076   :  { %v7455_v61 = vpack.c.bf16 %v6048_v59, %v6048_v59  ;;  %v7458_v22 = vpack.c.bf16 %v6051_v49, %v6051_v49  ;;  %v5998_v31 = vpop.permute.xlu1 %5997  ;;  %v6004_v30 = vpop.permute.xlu0 %6003  ;;  %v14338_v15 = vld [vmem:[%s15008_s3 + $0x50] sm:$0xff]  ;;  %v14345_v10 = vld [vmem:[%s15008_s3 + $0x58] sm:$0xff]  ;;  %v14352_v59 = vld [vmem:[%s15008_s3 + $0x60] sm:$0xff] }
0x1077   :  { %v6034_v11 = vsel %vm830_vm3, %v14177_v2, %v5998_v31  ;;  %v6037_v33 = vsel %vm830_vm3, %v14179_v48, %v6004_v30  ;;  %v14359_v49 = vld [vmem:[%s15008_s3 + $0x68] sm:$0xff]  ;;  %v15984_v31 = vld [vmem:[#allocation78_spill] sm:$0xff] }
0x1078   :  { %7279 = vst.msk [vmem:[%s15011_s5 + $0xe4] sm:$0xf] %vm927_vm1, %v7455_v61  ;;  %7282 = vst.msk [vmem:[%s15011_s5 + $0xf0] sm:$0xf] %vm927_vm1, %v7458_v22  ;;  %v6050_v1 = vmul.f32 0.25, %v6034_v11  ;;  %v6053_v14 = vmul.f32 0.25, %v6037_v33 }
0x1079   :  { %v14366_v61 = vld [vmem:[%s15008_s3 + $0x70] sm:$0xff]  ;;  %v14373_v22 = vld [vmem:[%s15008_s3 + $0x78] sm:$0xff]  ;;  %v15986_v11 = vld [vmem:[#allocation119_spill] sm:$0xff] }
0x107a   :  { %v7457_v62 = vpack.c.bf16 %v6050_v1, %v6050_v1  ;;  %v7460_v44 = vpack.c.bf16 %v6053_v14, %v6053_v14  ;;  %v6002_v6 = vpop.permute.xlu1 %6001  ;;  %v6137_v46 = vpop.permute.xlu0 %6136  ;;  %v15985_v30 = vld [vmem:[#allocation106_spill] sm:$0xff]  ;;  %v15987_v33 = vld [vmem:[#allocation111_spill] sm:$0xff] }
0x107b   :  { %v6036_v32 = vsel %vm830_vm3, %v14181_v54, %v6002_v6  ;;  %v6184_v63 = vsel %vm284_vm2, %v6137_v46, 0.0  ;;  %v15988_v1 = vld [vmem:[#allocation83_spill] sm:$0xff]  ;;  %v15989_v14 = vld [vmem:[#allocation114_spill] sm:$0xff]  ;;  %v15992_v6 = vld [vmem:[#allocation36_spill] sm:$0xff] }
0x107c   :  { %7281 = vst.msk [vmem:[%s15011_s5 + $0xec] sm:$0xf] %vm927_vm1, %v7457_v62  ;;  %7284 = vst.msk [vmem:[%s15011_s5 + $0xf8] sm:$0xf] %vm927_vm1, %v7460_v44  ;;  %v6052_v2 = vmul.f32 0.25, %v6036_v32  ;;  %6185 = vadd.xlane.f32.xlu0 %v6184_v63  ;;  %v15990_v62 = vld [vmem:[#allocation103_spill] sm:$0xff] }
0x107d   :  { %v15991_v44 = vld [vmem:[#allocation31_spill] sm:$0xff]  ;;  %v15994_v32 = vld [vmem:[#allocation33_spill] sm:$0xff] }
0x107e   :  { %v7459_v48 = vpack.c.bf16 %v6052_v2, %v6052_v2  ;;  %v6006_v19 = vpop.permute.xlu1 %6005  ;;  %v6141_v38 = vpop.permute.xlu0 %6140  ;;  %v15993_v46 = vld [vmem:[#allocation63_spill] sm:$0xff] }
0x107f   :  { %v6038_v54 = vsel %vm830_vm3, %v14184_v23, %v6006_v19  ;;  %v6190_v36 = vsel %vm284_vm2, %v6141_v38, 0.0  ;;  %v15995_v63 = vld [vmem:[#allocation59_spill] sm:$0xff]  ;;  %v15998_v19 = vld [vmem:[#allocation72_spill] sm:$0xff]  ;;  %v15999_v38 = vld [vmem:[#allocation69_spill] sm:$0xff] }
0x1080   :  { %7283 = vst.msk [vmem:[%s15011_s5 + $0xf4] sm:$0xf] %vm927_vm1, %v7459_v48  ;;  %v6054_v3 = vmul.f32 0.25, %v6038_v54  ;;  %6191 = vadd.xlane.f32.xlu0 %v6190_v36  ;;  %v15996_v2 = vld [vmem:[#allocation71_spill] sm:$0xff]  ;;  %v15997_v48 = vld [vmem:[#allocation58_spill] sm:$0xff] }
0x1082   :  { %v7461_v16 = vpack.c.bf16 %v6054_v3, %v6054_v3  ;;  %v6139_v24 = vpop.permute.xlu1 %6138  ;;  %v6145_v4 = vpop.permute.xlu0 %6144 }
0x1083   :  { %v6187_v53 = vsel %vm284_vm2, %v6139_v24, 0.0  ;;  %v6196_v58 = vsel %vm284_vm2, %v6145_v4, 0.0 }
0x1084   :  { %7285 = vst.msk [vmem:[%s15011_s5 + $0xfc] sm:$0xf] %vm927_vm1, %v7461_v16  ;;  %6188 = vadd.xlane.f32.xlu1 %v6187_v53 }
0x1086   :  { %v6143_v23 = vpop.permute.xlu1 %6142  ;;  %v6149_v39 = vpop.permute.xlu0 %6148 }
0x1087   :  { %v6193_v12 = vsel %vm284_vm2, %v6143_v23, 0.0  ;;  %v6202_v27 = vsel %vm284_vm2, %v6149_v39, 0.0 }
0x1088   :  { %6194 = vadd.xlane.f32.xlu0 %v6193_v12 }
0x108a   :  { %v6147_v57 = vpop.permute.xlu1 %6146  ;;  %v6153_v43 = vpop.permute.xlu0 %6152 }
0x108b   :  { %v6199_v17 = vsel %vm284_vm2, %v6147_v57, 0.0  ;;  %v6208_v51 = vsel %vm284_vm2, %v6153_v43, 0.0 }
0x108c   :  { %6200 = vadd.xlane.f32.xlu1 %v6199_v17  ;;  %6197 = vadd.xlane.f32.xlu0 %v6196_v58 }
0x108e   :  { %v6151_v21 = vpop.permute.xlu1 %6150  ;;  %v6157_v50 = vpop.permute.xlu0 %6156 }
0x108f   :  { %v6205_v18 = vsel %vm284_vm2, %v6151_v21, 0.0  ;;  %v6214_v28 = vsel %vm284_vm2, %v6157_v50, 0.0 }
0x1090   :  { %6206 = vadd.xlane.f32.xlu1 %v6205_v18  ;;  %6203 = vadd.xlane.f32.xlu0 %v6202_v27 }
0x1092   :  { %v6155_v13 = vpop.permute.xlu1 %6154  ;;  %v6161_v0 = vpop.permute.xlu0 %6160 }
0x1093   :  { %v6211_v47 = vsel %vm284_vm2, %v6155_v13, 0.0  ;;  %v6220_v37 = vsel %vm284_vm2, %v6161_v0, 0.0 }
0x1094   :  { %6212 = vadd.xlane.f32.xlu1 %v6211_v47  ;;  %6209 = vadd.xlane.f32.xlu0 %v6208_v51 }
0x1096   :  { %v6159_v25 = vpop.permute.xlu1 %6158  ;;  %v6165_v20 = vpop.permute.xlu0 %6164 }
0x1097   :  { %v6217_v42 = vsel %vm284_vm2, %v6159_v25, 0.0  ;;  %v6226_v56 = vsel %vm284_vm2, %v6165_v20, 0.0 }
0x1098   :  { %6218 = vadd.xlane.f32.xlu1 %v6217_v42  ;;  %6215 = vadd.xlane.f32.xlu0 %v6214_v28 }
0x109a   :  { %v6163_v9 = vpop.permute.xlu1 %6162 }
0x109b   :  { %v6223_v5 = vsel %vm284_vm2, %v6163_v9, 0.0 }
0x109c   :  { %6224 = vadd.xlane.f32.xlu1 %v6223_v5  ;;  %6221 = vadd.xlane.f32.xlu0 %v6220_v37 }
0x109e   :  { %v6167_v29 = vpop.permute.xlu1 %6166 }
0x109f   :  { %v6229_v34 = vsel %vm284_vm2, %v6167_v29, 0.0 }
0x10a0   :  { %6230 = vadd.xlane.f32.xlu1 %v6229_v34  ;;  %6227 = vadd.xlane.f32.xlu0 %v6226_v56 }
0x10b1   :  { %6298 = vrot.lane.b32.xlu1 %v15980_v35, %s8306_s8 }
0x10b5   :  { %6300 = vrot.lane.b32.xlu1 %v14290_v41, %s8306_s8 }
0x10b6   :  { %6296 = vrot.lane.b32.xlu0 %v15981_v7, %s8306_s8 }
0x10b9   :  { %6302 = vrot.lane.b32.xlu1 %v14299_v60, %s8306_s8 }
0x10ba   :  { %6304 = vrot.lane.b32.xlu0 %v14306_v26, %s8306_s8 }
0x10bd   :  { %6306 = vrot.lane.b32.xlu1 %v14313_v52, %s8306_s8 }
0x10be   :  { %6308 = vrot.lane.b32.xlu0 %v14320_v55, %s8306_s8 }
0x10c1   :  { %6310 = vrot.lane.b32.xlu1 %v14327_v45, %s8306_s8 }
0x10c2   :  { %6312 = vrot.lane.b32.xlu0 %v15982_v8, %s8306_s8 }
0x10c5   :  { %6314 = vrot.lane.b32.xlu1 %v15983_v40, %s8306_s8 }
0x10c6   :  { %6316 = vrot.lane.b32.xlu0 %v14338_v15, %s8306_s8 }
0x10c9   :  { %6318 = vrot.lane.b32.xlu1 %v14345_v10, %s8306_s8 }
0x10ca   :  { %6320 = vrot.lane.b32.xlu0 %v14352_v59, %s8306_s8 }
0x10cd   :  { %6322 = vrot.lane.b32.xlu1 %v14359_v49, %s8306_s8 }
0x10ce   :  { %6324 = vrot.lane.b32.xlu0 %v14366_v61, %s8306_s8 }
0x10d1   :  { %6326 = vrot.lane.b32.xlu1 %v14373_v22, %s8306_s8 }
0x10d2   :  { %6360 = vrot.lane.b32.xlu0 %v15984_v31, %s8307_s9 }
0x10d5   :  { %6362 = vrot.lane.b32.xlu1 %v15985_v30, %s8307_s9 }
0x10d6   :  { %6364 = vrot.lane.b32.xlu0 %v15986_v11, %s8307_s9 }
0x10d9   :  { %6366 = vrot.lane.b32.xlu1 %v15987_v33, %s8307_s9 }
0x10da   :  { %6368 = vrot.lane.b32.xlu0 %v15988_v1, %s8307_s9 }
0x10dd   :  { %6370 = vrot.lane.b32.xlu1 %v15989_v14, %s8307_s9 }
0x10de   :  { %6372 = vrot.lane.b32.xlu0 %v15990_v62, %s8307_s9 }
0x10e1   :  { %6374 = vrot.lane.b32.xlu1 %v15991_v44, %s8307_s9 }
0x10e2   :  { %6376 = vrot.lane.b32.xlu0 %v15992_v6, %s8307_s9 }
0x10e5   :  { %6378 = vrot.lane.b32.xlu1 %v15993_v46, %s8307_s9 }
0x10e6   :  { %6380 = vrot.lane.b32.xlu0 %v15994_v32, %s8307_s9 }
0x10e9   :  { %6382 = vrot.lane.b32.xlu1 %v15995_v63, %s8307_s9 }
0x10ea   :  { %6384 = vrot.lane.b32.xlu0 %v15996_v2, %s8307_s9 }
0x10ed   :  { %6386 = vrot.lane.b32.xlu1 %v15997_v48, %s8307_s9  ;;  %v16000_v48 = vld [vmem:[#allocation3_spill] sm:$0xff] }
0x10ee   :  { %6388 = vrot.lane.b32.xlu0 %v15998_v19, %s8307_s9 }
0x10f1   :  { %6390 = vrot.lane.b32.xlu1 %v15999_v38, %s8307_s9 }
0x1109   :  { %v6186_v54 = vpop.xlane.xlu0 %6185 }
0x110a   :  { %v6232_v51 = vmul.f32 0.0625, %v6186_v54 }
0x110c   :  { %v6248_v42 = vadd.f32 1.1920929e-07, %v6232_v51 }
0x110d   :  { %v6192_v36 = vpop.xlane.xlu0 %6191 }
0x110e   :  { %v6234_v28 = vmul.f32 0.0625, %v6192_v36  ;;  %8058 = vrsqrt.f32 %v6248_v42 }
0x1110   :  { %v6250_v20 = vadd.f32 1.1920929e-07, %v6234_v28 }
0x1111   :  { %v6189_v3 = vpop.xlane.xlu1 %6188 }
0x1112   :  { %v6233_v37 = vmul.f32 0.0625, %v6189_v3  ;;  %8060 = vrsqrt.f32 %v6250_v20 }
0x1114   :  { %v6249_v35 = vadd.f32 1.1920929e-07, %v6233_v37 }
0x1115   :  { %v6195_v16 = vpop.xlane.xlu0 %6194 }
0x1116   :  { %v6235_v7 = vmul.f32 0.0625, %v6195_v16  ;;  %8062 = vrsqrt.f32 %v6249_v35 }
0x1118   :  { %v6251_v11 = vadd.f32 1.1920929e-07, %v6235_v7  ;;  %v8059_v62 = vpop.eup %8058  ;;  %v16002_v7 = vld [vmem:[#allocation6_spill] sm:$0xff] }
0x1119   :  { %v6201_v24 = vpop.xlane.xlu1 %6200  ;;  %v6198_v4 = vpop.xlane.xlu0 %6197  ;;  %v14444_v19 = vmul.f32 %v8059_v62, %v16000_v48 }
0x111a   :  { %v6236_v29 = vmul.f32 0.0625, %v6198_v4  ;;  %v6237_v33 = vmul.f32 0.0625, %v6201_v24 }
0x111c   :  { %v6252_v8 = vadd.f32 1.1920929e-07, %v6236_v29  ;;  %v6253_v46 = vadd.f32 1.1920929e-07, %v6237_v33  ;;  %v8061_v38 = vpop.eup %8060 }
0x111d   :  { %v6207_v53 = vpop.xlane.xlu1 %6206  ;;  %v6204_v23 = vpop.xlane.xlu0 %6203 }
0x111e   :  { %v6238_v40 = vmul.f32 0.0625, %v6204_v23  ;;  %8064 = vrsqrt.f32 %v6252_v8  ;;  %v6239_v32 = vmul.f32 0.0625, %v6207_v53  ;;  %v16001_v53 = vld [vmem:[#allocation15_spill] sm:$0xff] }
0x111f   :  { %8066 = vrsqrt.f32 %v6251_v11  ;;  %v14450_v51 = vmul.f32 %v8061_v38, %v16001_v53  ;;  %v16005_v38 = vld [vmem:[#allocation35_spill] sm:$0xff] }
0x1120   :  { %v6254_v1 = vadd.f32 1.1920929e-07, %v6238_v40  ;;  %v6255_v3 = vadd.f32 1.1920929e-07, %v6239_v32  ;;  %v16003_v40 = vld [vmem:[#allocation23_spill] sm:$0xff] }
0x1121   :  { %v6213_v39 = vpop.xlane.xlu1 %6212  ;;  %v6210_v12 = vpop.xlane.xlu0 %6209 }
0x1122   :  { %v6240_v14 = vmul.f32 0.0625, %v6210_v12  ;;  %8068 = vrsqrt.f32 %v6254_v1  ;;  %v6241_v16 = vmul.f32 0.0625, %v6213_v39  ;;  %v8063_v12 = vpop.eup %8062 }
0x1123   :  { %8070 = vrsqrt.f32 %v6253_v46  ;;  %v14458_v8 = vmul.f32 %v8063_v12, %v16002_v7 }
0x1124   :  { %v6256_v63 = vadd.f32 1.1920929e-07, %v6240_v14  ;;  %v6257_v37 = vadd.f32 1.1920929e-07, %v6241_v16 }
0x1125   :  { %v14409_v57 = vpop.xlane.xlu1 %6218  ;;  %v6216_v43 = vpop.xlane.xlu0 %6215 }
0x1126   :  { %v6242_v2 = vmul.f32 0.0625, %v6216_v43  ;;  %8072 = vrsqrt.f32 %v6256_v63  ;;  %v6243_v20 = vmul.f32 0.0625, %v14409_v57 }
0x1127   :  { %8074 = vrsqrt.f32 %v6255_v3 }
0x1128   :  { %v6258_v4 = vadd.f32 1.1920929e-07, %v6242_v2  ;;  %v8065_v43 = vpop.eup %8064  ;;  %v6259_v62 = vadd.f32 1.1920929e-07, %v6243_v20  ;;  %v16004_v2 = vld [vmem:[#allocation17_spill] sm:$0xff] }
0x1129   :  { %v14411_v17 = vpop.xlane.xlu1 %6224  ;;  %v6222_v58 = vpop.xlane.xlu0 %6221  ;;  %v14461_v11 = vmul.f32 %v8065_v43, %v16003_v40  ;;  %v16006_v43 = vld [vmem:[#allocation24_spill] sm:$0xff] }
0x112a   :  { %v6244_v23 = vmul.f32 0.0625, %v6222_v58  ;;  %8076 = vrsqrt.f32 %v6258_v4  ;;  %v8067_v58 = vpop.eup %8066 }
0x112b   :  { %8078 = vrsqrt.f32 %v6257_v37  ;;  %v14468_v48 = vmul.f32 %v8067_v58, %v16004_v2  ;;  %v16007_v37 = vld [vmem:[#allocation4_spill] sm:$0xff] }
0x112c   :  { %v6260_v29 = vadd.f32 1.1920929e-07, %v6244_v23  ;;  %v8069_v33 = vpop.eup %8068 }
0x112d   :  { %v14413_v21 = vpop.xlane.xlu1 %6230  ;;  %v6228_v18 = vpop.xlane.xlu0 %6227 }
0x112e   :  { %v6246_v35 = vmul.f32 0.0625, %v6228_v18  ;;  %v6245_v18 = vmul.f32 0.0625, %v14411_v17  ;;  %8080 = vrsqrt.f32 %v6260_v29  ;;  %v8071_v63 = vpop.eup %8070  ;;  %v6247_v12 = vmul.f32 0.0625, %v14413_v21 }
0x112f   :  { %8082 = vrsqrt.f32 %v6259_v62 }
0x1130   :  { %v6262_v32 = vadd.f32 1.1920929e-07, %v6246_v35  ;;  %v8073_v3 = vpop.eup %8072  ;;  %v6261_v23 = vadd.f32 1.1920929e-07, %v6245_v18  ;;  %v6263_v21 = vadd.f32 1.1920929e-07, %v6247_v12 }
0x1131   :  { %v14415_v27 = vpop.permute.xlu1 %6298  ;;  %v14417_v50 = vpop.permute.xlu0 %6296  ;;  %v14482_v20 = vmul.f32 %v8073_v3, %v16007_v37 }
0x1132   :  { %8084 = vrsqrt.f32 %v6262_v32  ;;  %v8075_v53 = vpop.eup %8074 }
0x1133   :  { %8086 = vrsqrt.f32 %v6261_v23 }
0x1134   :  { %8088 = vrsqrt.f32 %v6263_v21 }
0x1135   :  { %v14419_v13 = vpop.permute.xlu1 %6300  ;;  %v14421_v47 = vpop.permute.xlu0 %6304 }
0x1139   :  { %v14423_v0 = vpop.permute.xlu1 %6302  ;;  %v14425_v25 = vpop.permute.xlu0 %6308 }
0x113d   :  { %v14427_v9 = vpop.permute.xlu1 %6306  ;;  %v14429_v5 = vpop.permute.xlu0 %6312 }
0x1141   :  { %v14431_v34 = vpop.permute.xlu1 %6310  ;;  %v14433_v56 = vpop.permute.xlu0 %6316 }
0x1145   :  { %v14435_v31 = vpop.permute.xlu1 %6314  ;;  %v14437_v30 = vpop.permute.xlu0 %6320 }
0x1149   :  { %v14439_v44 = vpop.permute.xlu1 %6318  ;;  %v14441_v6 = vpop.permute.xlu0 %6324 }
0x114d   :  { %v14446_v54 = vpop.permute.xlu1 %6322  ;;  %v6361_v36 = vpop.permute.xlu0 %6360 }
0x114e   :  { %v6408_v24 = vmul.f32 %v6361_v36, %v14444_v19  ;;  %v14471_v36 = vmul.f32 %v8069_v33, %v16005_v38  ;;  %v16008_v33 = vld [vmem:[#allocation37_spill] sm:$0xff]  ;;  %v16010_v38 = vld [vmem:[#allocation7_spill] sm:$0xff] }
0x1150   :  { %6440 = vrot.lane.b32.xlu0 %v6408_v24, %s8307_s9 }
0x1151   :  { %v14453_v42 = vpop.permute.xlu1 %6326  ;;  %v6365_v28 = vpop.permute.xlu0 %6364 }
0x1152   :  { %v6410_v39 = vmul.f32 %v6365_v28, %v14450_v51  ;;  %v14479_v28 = vmul.f32 %v8071_v63, %v16006_v43  ;;  %v16012_v43 = vld [vmem:[#allocation18_spill] sm:$0xff] }
0x1154   :  { %6444 = vrot.lane.b32.xlu0 %v6410_v39, %s8307_s9  ;;  %v8077_v39 = vpop.eup %8076 }
0x1155   :  { %v6363_v1 = vpop.permute.xlu1 %6362  ;;  %v6369_v14 = vpop.permute.xlu0 %6368 }
0x1156   :  { %v6409_v57 = vmul.f32 %v6363_v1, %v14458_v8  ;;  %v6412_v46 = vmul.f32 %v6369_v14, %v14461_v11  ;;  %v8079_v40 = vpop.eup %8078  ;;  %v14489_v1 = vmul.f32 %v8075_v53, %v16008_v33  ;;  %v16009_v14 = vld [vmem:[#allocation16_spill] sm:$0xff]  ;;  %v16014_v33 = vld [vmem:[#allocation27_spill] sm:$0xff] }
0x1157   :  { %v14492_v62 = vmul.f32 %v8077_v39, %v16009_v14  ;;  %v14499_v3 = vmul.f32 %v8079_v40, %v16010_v38  ;;  %v16013_v39 = vld [vmem:[#allocation39_spill] sm:$0xff] }
0x1158   :  { %6442 = vrot.lane.b32.xlu1 %v6409_v57, %s8307_s9  ;;  %6448 = vrot.lane.b32.xlu0 %v6412_v46, %s8307_s9  ;;  %v8081_v57 = vpop.eup %8080 }
0x1159   :  { %v6367_v16 = vpop.permute.xlu1 %6366  ;;  %v6373_v24 = vpop.permute.xlu0 %6372 }
0x115a   :  { %v6411_v4 = vmul.f32 %v6367_v16, %v14468_v48  ;;  %v6414_v17 = vmul.f32 %v6373_v24, %v14471_v36  ;;  %v8083_v2 = vpop.eup %8082  ;;  %v16011_v16 = vld [vmem:[#allocation25_spill] sm:$0xff] }
0x115b   :  { %v14502_v24 = vmul.f32 %v8081_v57, %v16011_v16  ;;  %v14509_v37 = vmul.f32 %v8083_v2, %v16012_v43  ;;  %v8282_v2 = vld [vmem:[%s15006_s4] sm:$0xff]  ;;  %v8288_v43 = vld [vmem:[%s15006_s4 + $0x28] sm:$0xff] }
0x115c   :  { %6446 = vrot.lane.b32.xlu1 %v6411_v4, %s8307_s9  ;;  %6452 = vrot.lane.b32.xlu0 %v6414_v17, %s8307_s9  ;;  %v8085_v4 = vpop.eup %8084 }
0x115d   :  { %v6371_v29 = vpop.permute.xlu1 %6370  ;;  %v6377_v35 = vpop.permute.xlu0 %6376 }
0x115e   :  { %v6413_v58 = vmul.f32 %v6371_v29, %v14479_v28  ;;  %v6416_v7 = vmul.f32 %v6377_v35, %v14482_v20  ;;  %v14512_v29 = vmul.f32 %v8085_v4, %v16013_v39  ;;  %v8087_v35 = vpop.eup %8086  ;;  %v8283_v4 = vld [vmem:[%s15006_s4 + $0x10] sm:$0xff]  ;;  %v8289_v39 = vld [vmem:[%s15008_s3 + $0x8] sm:$0xff] }
0x115f   :  { %v14519_v14 = vmul.f32 %v8087_v35, %v16014_v33  ;;  %v8089_v57 = vpop.eup %8088 }
0x1160   :  { %6450 = vrot.lane.b32.xlu1 %v6413_v58, %s8307_s9  ;;  %6456 = vrot.lane.b32.xlu0 %v6416_v7, %s8307_s9 }
0x1161   :  { %v6375_v46 = vpop.permute.xlu1 %6374  ;;  %v6381_v18 = vpop.permute.xlu0 %6380 }
0x1162   :  { %v6415_v32 = vmul.f32 %v6375_v46, %v14489_v1  ;;  %v6418_v63 = vmul.f32 %v6381_v18, %v14492_v62 }
0x1164   :  { %6454 = vrot.lane.b32.xlu1 %v6415_v32, %s8307_s9  ;;  %6460 = vrot.lane.b32.xlu0 %v6418_v63, %s8307_s9  ;;  %v16015_v32 = vld [vmem:[#allocation42_spill] sm:$0xff] }
0x1165   :  { %v6379_v17 = vpop.permute.xlu1 %6378  ;;  %v6385_v23 = vpop.permute.xlu0 %6384  ;;  %v14525_v63 = vmul.f32 %v8089_v57, %v16015_v32  ;;  %v6347_v32 = vmul.f32 %v14423_v0, %v14468_v48  ;;  %v6351_v0 = vmul.f32 %v14431_v34, %v14489_v1 }
0x1166   :  { %v6417_v12 = vmul.f32 %v6379_v17, %v14499_v3  ;;  %v6420_v53 = vmul.f32 %v6385_v23, %v14502_v24  ;;  %v8284_v17 = vld [vmem:[%s15006_s4 + $0x8] sm:$0xff]  ;;  %v8285_v23 = vld [vmem:[%s15006_s4 + $0x20] sm:$0xff] }
0x1168   :  { %6458 = vrot.lane.b32.xlu1 %v6417_v12, %s8307_s9  ;;  %6464 = vrot.lane.b32.xlu0 %v6420_v53, %s8307_s9  ;;  %v8286_v12 = vld [vmem:[%s15006_s4 + $0x18] sm:$0xff]  ;;  %v8287_v53 = vld [vmem:[%s15008_s3] sm:$0xff] }
0x1169   :  { %v6383_v58 = vpop.permute.xlu1 %6382  ;;  %v6389_v7 = vpop.permute.xlu0 %6388 }
0x116a   :  { %v6419_v21 = vmul.f32 %v6383_v58, %v14509_v37  ;;  %v6422_v40 = vmul.f32 %v6389_v7, %v14512_v29  ;;  %v6345_v7 = vmul.f32 %v14415_v27, %v14458_v8 }
0x116c   :  { %6462 = vrot.lane.b32.xlu1 %v6419_v21, %s8307_s9  ;;  %6468 = vrot.lane.b32.xlu0 %v6422_v40, %s8307_s9  ;;  %v6344_v21 = vmul.f32 %v14417_v50, %v14444_v19 }
0x116d   :  { %v6387_v46 = vpop.permute.xlu1 %6386 }
0x116e   :  { %v6421_v18 = vmul.f32 %v6387_v46, %v14519_v14 }
0x1170   :  { %6466 = vrot.lane.b32.xlu1 %v6421_v18, %s8307_s9  ;;  %6520 = vrot.lane.b32.xlu0 %v8282_v2, %s8306_s8  ;;  %v6346_v18 = vmul.f32 %v14419_v13, %v14450_v51  ;;  %v6350_v13 = vmul.f32 %v14425_v25, %v14471_v36 }
0x1171   :  { %v6391_v38 = vpop.permute.xlu1 %6390 }
0x1172   :  { %v6423_v16 = vmul.f32 %v6391_v38, %v14525_v63 }
0x1174   :  { %6470 = vrot.lane.b32.xlu1 %v6423_v16, %s8307_s9  ;;  %6524 = vrot.lane.b32.xlu0 %v8283_v4, %s8306_s8 }
0x1178   :  { %6522 = vrot.lane.b32.xlu1 %v8284_v17, %s8306_s8  ;;  %6528 = vrot.lane.b32.xlu0 %v8285_v23, %s8306_s8 }
0x117c   :  { %6526 = vrot.lane.b32.xlu1 %v8286_v12, %s8306_s8  ;;  %6584 = vrot.lane.b32.xlu0 %v8287_v53, %s8307_s9 }
0x1180   :  { %6530 = vrot.lane.b32.xlu1 %v8288_v43, %s8306_s8  ;;  %6588 = vrot.lane.b32.xlu0 %v14290_v41, %s8307_s9  ;;  %v8290_v41 = vld [vmem:[%s15008_s3 + $0x40] sm:$0xff] }
0x1184   :  { %6586 = vrot.lane.b32.xlu1 %v8289_v39, %s8307_s9  ;;  %6592 = vrot.lane.b32.xlu0 %v14306_v26, %s8307_s9  ;;  %v8292_v26 = vld [vmem:[%s15006_s4 + $0x30] sm:$0xff] }
0x1188   :  { %6590 = vrot.lane.b32.xlu1 %v14299_v60, %s8307_s9  ;;  %6596 = vrot.lane.b32.xlu0 %v14320_v55, %s8307_s9  ;;  %v8291_v60 = vld [vmem:[%s15008_s3 + $0x48] sm:$0xff]  ;;  %v8294_v55 = vld [vmem:[%s15006_s4 + $0x38] sm:$0xff] }
0x118c   :  { %6594 = vrot.lane.b32.xlu1 %v14313_v52, %s8307_s9  ;;  %6600 = vrot.lane.b32.xlu0 %v8290_v41, %s8307_s9  ;;  %v8293_v52 = vld [vmem:[%s15006_s4 + $0x40] sm:$0xff] }
0x1190   :  { %6598 = vrot.lane.b32.xlu1 %v14327_v45, %s8307_s9  ;;  %6604 = vrot.lane.b32.xlu0 %v14338_v15, %s8307_s9  ;;  %v8295_v45 = vld [vmem:[%s15006_s4 + $0x50] sm:$0xff]  ;;  %v8296_v15 = vld [vmem:[%s15006_s4 + $0x48] sm:$0xff] }
0x1194   :  { %6602 = vrot.lane.b32.xlu1 %v8291_v60, %s8307_s9  ;;  %6608 = vrot.lane.b32.xlu0 %v14352_v59, %s8307_s9  ;;  %v8298_v59 = vld [vmem:[%s15006_s4 + $0x58] sm:$0xff] }
0x1198   :  { %6606 = vrot.lane.b32.xlu1 %v14345_v10, %s8307_s9  ;;  %6612 = vrot.lane.b32.xlu0 %v14366_v61, %s8307_s9  ;;  %v8297_v10 = vld [vmem:[%s15006_s4 + $0x60] sm:$0xff]  ;;  %v8300_v61 = vld [vmem:[%s15006_s4 + $0x68] sm:$0xff] }
0x119c   :  { %6610 = vrot.lane.b32.xlu1 %v14359_v49, %s8307_s9  ;;  %6532 = vrot.lane.b32.xlu0 %v8292_v26, %s8306_s8  ;;  %v8299_v49 = vld [vmem:[%s15006_s4 + $0x70] sm:$0xff] }
0x11a0   :  { %6614 = vrot.lane.b32.xlu1 %v14373_v22, %s8307_s9  ;;  %6536 = vrot.lane.b32.xlu0 %v8293_v52, %s8306_s8  ;;  %v8301_v22 = vld [vmem:[%s15006_s4 + $0x78] sm:$0xff] }
0x11a4   :  { %6534 = vrot.lane.b32.xlu1 %v8294_v55, %s8306_s8  ;;  %6540 = vrot.lane.b32.xlu0 %v8295_v45, %s8306_s8 }
0x11a8   :  { %6538 = vrot.lane.b32.xlu1 %v8296_v15, %s8306_s8  ;;  %6544 = vrot.lane.b32.xlu0 %v8297_v10, %s8306_s8 }
0x11ac   :  { %6542 = vrot.lane.b32.xlu1 %v8298_v59, %s8306_s8  ;;  %6548 = vrot.lane.b32.xlu0 %v8299_v49, %s8306_s8 }
0x11b0   :  { %6546 = vrot.lane.b32.xlu1 %v8300_v61, %s8306_s8 }
0x11b4   :  { %6550 = vrot.lane.b32.xlu1 %v8301_v22, %s8306_s8 }
0x11c2   :  { %v6441_v35 = vpop.permute.xlu0 %6440 }
0x11c3   :  { %v14640_v57 = vadd.f32 %v6441_v35, %v6344_v21 }
0x11c6   :  { %v6445_v58 = vpop.permute.xlu0 %6444 }
0x11c7   :  { %v14650_v16 = vadd.f32 %v6445_v58, %v6346_v18 }
0x11ca   :  { %v6443_v40 = vpop.permute.xlu1 %6442  ;;  %v14638_v33 = vpop.permute.xlu0 %6448 }
0x11cb   :  { %v14642_v46 = vadd.f32 %v6443_v40, %v6345_v7 }
0x11cd   :  { %v7742_v2 = vpack.i.bf16 %v14642_v46, %v14640_v57  ;;  %v6356_v57 = vmul.f32 %v14437_v30, %v14502_v24 }
0x11ce   :  { %v6447_v27 = vpop.permute.xlu1 %6446  ;;  %v6453_v38 = vpop.permute.xlu0 %6452 }
0x11cf   :  { %v14652_v50 = vadd.f32 %v6447_v27, %v6347_v32  ;;  %v14666_v43 = vadd.f32 %v6453_v38, %v6350_v13 }
0x11d1   :  { %v7747_v4 = vpack.i.bf16 %v14652_v50, %v14650_v16  ;;  %v6358_v16 = vmul.f32 %v14441_v6, %v14512_v29 }
0x11d2   :  { %v14656_v17 = vpop.permute.xlu1 %6450  ;;  %v14658_v23 = vpop.permute.xlu0 %6456 }
0x11d6   :  { %v6455_v12 = vpop.permute.xlu1 %6454  ;;  %v14664_v53 = vpop.permute.xlu0 %6460 }
0x11d7   :  { %v14668_v39 = vadd.f32 %v6455_v12, %v6351_v0 }
0x11d9   :  { %v7757_v41 = vpack.i.bf16 %v14668_v39, %v14666_v43 }
0x11da   :  { %v14672_v60 = vpop.permute.xlu1 %6458  ;;  %v14674_v26 = vpop.permute.xlu0 %6464 }
0x11de   :  { %v14676_v52 = vpop.permute.xlu1 %6462  ;;  %v14678_v25 = vpop.permute.xlu0 %6468 }
0x11e2   :  { %v14680_v55 = vpop.permute.xlu1 %6466  ;;  %v14682_v34 = vpop.permute.xlu0 %6520 }
0x11e6   :  { %v14684_v45 = vpop.permute.xlu1 %6470  ;;  %v14686_v15 = vpop.permute.xlu0 %6524 }
0x11ea   :  { %v14688_v10 = vpop.permute.xlu1 %6522  ;;  %v14690_v59 = vpop.permute.xlu0 %6528 }
0x11ee   :  { %v14692_v49 = vpop.permute.xlu1 %6526  ;;  %v6585_v61 = vpop.permute.xlu0 %6584 }
0x11ef   :  { %v6632_v22 = vmul.f32 %v6585_v61, %v14444_v19 }
0x11f1   :  { %6664 = vrot.lane.b32.xlu0 %v6632_v22, %s8307_s9 }
0x11f2   :  { %v14696_v35 = vpop.permute.xlu1 %6530  ;;  %v6589_v58 = vpop.permute.xlu0 %6588 }
0x11f3   :  { %v6634_v7 = vmul.f32 %v6589_v58, %v14450_v51 }
0x11f5   :  { %6668 = vrot.lane.b32.xlu0 %v6634_v7, %s8307_s9 }
0x11f6   :  { %v6587_v21 = vpop.permute.xlu1 %6586  ;;  %v6593_v40 = vpop.permute.xlu0 %6592 }
0x11f7   :  { %v6633_v18 = vmul.f32 %v6587_v21, %v14458_v8  ;;  %v6636_v32 = vmul.f32 %v6593_v40, %v14461_v11 }
0x11f9   :  { %6666 = vrot.lane.b32.xlu1 %v6633_v18, %s8307_s9  ;;  %6672 = vrot.lane.b32.xlu0 %v6636_v32, %s8307_s9 }
0x11fa   :  { %v6591_v27 = vpop.permute.xlu1 %6590  ;;  %v6597_v38 = vpop.permute.xlu0 %6596 }
0x11fb   :  { %v6635_v13 = vmul.f32 %v6591_v27, %v14468_v48  ;;  %v6638_v0 = vmul.f32 %v6597_v38, %v14471_v36 }
0x11fd   :  { %6670 = vrot.lane.b32.xlu1 %v6635_v13, %s8307_s9  ;;  %6676 = vrot.lane.b32.xlu0 %v6638_v0, %s8307_s9 }
0x11fe   :  { %v6595_v12 = vpop.permute.xlu1 %6594  ;;  %v6601_v61 = vpop.permute.xlu0 %6600 }
0x11ff   :  { %v6637_v22 = vmul.f32 %v6595_v12, %v14479_v28  ;;  %v6640_v58 = vmul.f32 %v6601_v61, %v14482_v20 }
0x1201   :  { %6674 = vrot.lane.b32.xlu1 %v6637_v22, %s8307_s9  ;;  %6680 = vrot.lane.b32.xlu0 %v6640_v58, %s8307_s9  ;;  %v6349_v58 = vmul.f32 %v14427_v9, %v14479_v28 }
0x1202   :  { %v6599_v7 = vpop.permute.xlu1 %6598  ;;  %v6605_v21 = vpop.permute.xlu0 %6604 }
0x1203   :  { %v6639_v40 = vmul.f32 %v6599_v7, %v14489_v1  ;;  %v6642_v18 = vmul.f32 %v6605_v21, %v14492_v62  ;;  %v6348_v21 = vmul.f32 %v14421_v47, %v14461_v11  ;;  %v6352_v47 = vmul.f32 %v14429_v5, %v14482_v20 }
0x1205   :  { %6678 = vrot.lane.b32.xlu1 %v6639_v40, %s8307_s9  ;;  %6684 = vrot.lane.b32.xlu0 %v6642_v18, %s8307_s9  ;;  %v6493_v40 = vadd.f32 %v14656_v17, %v6349_v58  ;;  %v6505_v58 = vsub.f32 0.0, %v14458_v8  ;;  %v6508_v8 = vsub.f32 0.0, %v14461_v11 }
0x1206   :  { %v6603_v32 = vpop.permute.xlu1 %6602  ;;  %v6609_v27 = vpop.permute.xlu0 %6608 }
0x1207   :  { %v6641_v38 = vmul.f32 %v6603_v32, %v14499_v3  ;;  %v6644_v13 = vmul.f32 %v6609_v27, %v14502_v24  ;;  %v6353_v32 = vmul.f32 %v14435_v31, %v14499_v3  ;;  %v6492_v27 = vadd.f32 %v14638_v33, %v6348_v21 }
0x1208   :  { %v6357_v31 = vmul.f32 %v14446_v54, %v14519_v14  ;;  %v6496_v33 = vadd.f32 %v14658_v23, %v6352_v47  ;;  %v6354_v54 = vmul.f32 %v14433_v56, %v14492_v62  ;;  %v6569_v21 = vmul.f32 %v14688_v10, %v6505_v58 }
0x1209   :  { %6682 = vrot.lane.b32.xlu1 %v6641_v38, %s8307_s9  ;;  %6688 = vrot.lane.b32.xlu0 %v6644_v13, %s8307_s9  ;;  %v7752_v38 = vpack.i.bf16 %v6493_v40, %v6492_v27  ;;  %v6497_v17 = vadd.f32 %v14672_v60, %v6353_v32  ;;  %v6500_v60 = vadd.f32 %v14674_v26, %v6356_v57  ;;  %v6506_v32 = vsub.f32 0.0, %v14450_v51 }
0x120a   :  { %v6607_v0 = vpop.permute.xlu1 %6606  ;;  %v6613_v12 = vpop.permute.xlu0 %6612  ;;  %v6501_v5 = vadd.f32 %v14680_v55, %v6357_v31  ;;  %v6359_v55 = vmul.f32 %v14453_v42, %v14525_v63  ;;  %v6507_v27 = vsub.f32 0.0, %v14468_v48  ;;  %v6572_v51 = vmul.f32 %v14690_v59, %v6508_v8  ;;  %v16025_v8 = vld [vmem:[#allocation20_spill] sm:$0xff] }
0x120b   :  { %v6643_v61 = vmul.f32 %v6607_v0, %v14509_v37  ;;  %v6646_v22 = vmul.f32 %v6613_v12, %v14512_v29  ;;  %v7762_v46 = vpack.i.bf16 %v6497_v17, %v6496_v33  ;;  %v6513_v59 = vsub.f32 0.0, %v14499_v3 }
0x120c   :  { %v7772_v23 = vpack.i.bf16 %v6501_v5, %v6500_v60  ;;  %v6503_v56 = vadd.f32 %v14684_v45, %v6359_v55  ;;  %v6571_v17 = vmul.f32 %v14692_v49, %v6507_v27  ;;  %v6510_v49 = vsub.f32 0.0, %v14471_v36 }
0x120d   :  { %6686 = vrot.lane.b32.xlu1 %v6643_v61, %s8307_s9  ;;  %6692 = vrot.lane.b32.xlu0 %v6646_v22, %s8307_s9  ;;  %v6504_v22 = vsub.f32 0.0, %v14444_v19  ;;  %v6511_v5 = vsub.f32 0.0, %v14489_v1 }
0x120e   :  { %v6611_v7 = vpop.permute.xlu1 %6610 }
0x120f   :  { %v6645_v18 = vmul.f32 %v6611_v7, %v14519_v14  ;;  %v6568_v7 = vmul.f32 %v14682_v34, %v6504_v22  ;;  %v6509_v34 = vsub.f32 0.0, %v14479_v28  ;;  %v6516_v22 = vsub.f32 0.0, %v14502_v24 }
0x1211   :  { %6690 = vrot.lane.b32.xlu1 %v6645_v18, %s8307_s9  ;;  %7743 = vrot.lane.b32.xlu0 %v7742_v2, %s8308_s0  ;;  %v6355_v2 = vmul.f32 %v14439_v44, %v14509_v37  ;;  %v6498_v44 = vadd.f32 %v14664_v53, %v6354_v54  ;;  %v6533_v53 = vpop.permute.xlu0 %6532  ;;  %v6573_v48 = vmul.f32 %v14696_v35, %v6509_v34  ;;  %v16026_v34 = vld [vmem:[#allocation13_spill] sm:$0xff] }
0x1212   :  { %v6615_v9 = vpop.permute.xlu1 %6614  ;;  %v6574_v11 = vmul.f32 %v6533_v53, %v6510_v49 }
0x1213   :  { %v6647_v13 = vmul.f32 %v6615_v9, %v14525_v63  ;;  %v6499_v30 = vadd.f32 %v14676_v52, %v6355_v2 }
0x1215   :  { %6694 = vrot.lane.b32.xlu1 %v6647_v13, %s8307_s9  ;;  %7753 = vrot.lane.b32.xlu0 %v7752_v38, %s8308_s0  ;;  %v7767_v50 = vpack.i.bf16 %v6499_v30, %v6498_v44  ;;  %v6537_v26 = vpop.permute.xlu0 %6536  ;;  %v6570_v38 = vmul.f32 %v14686_v15, %v6506_v32 }
0x1216   :  { %v6535_v52 = vpop.permute.xlu1 %6534 }
0x1217   :  { %v6575_v28 = vmul.f32 %v6535_v52, %v6511_v5 }
0x1219   :  { %7748 = vrot.lane.b32.xlu1 %v7747_v4, %s8308_s0  ;;  %7763 = vrot.lane.b32.xlu0 %v7762_v46, %s8308_s0  ;;  %v6502_v4 = vadd.f32 %v14678_v25, %v6358_v16  ;;  %v6541_v43 = vpop.permute.xlu0 %6540 }
0x121a   :  { %v6539_v39 = vpop.permute.xlu1 %6538 }
0x121b   :  { %v7777_v42 = vpack.i.bf16 %v6503_v56, %v6502_v4  ;;  %v6577_v16 = vmul.f32 %v6539_v39, %v6513_v59  ;;  %v6514_v56 = vsub.f32 0.0, %v14492_v62  ;;  %v6515_v4 = vsub.f32 0.0, %v14509_v37 }
0x121d   :  { %7758 = vrot.lane.b32.xlu1 %v7757_v41, %s8308_s0  ;;  %7773 = vrot.lane.b32.xlu0 %v7772_v23, %s8308_s0  ;;  %v14775_v41 = vpop.permute.xlu0 %6544  ;;  %v6512_v23 = vsub.f32 0.0, %v14482_v20  ;;  %v6578_v20 = vmul.f32 %v6541_v43, %v6514_v56  ;;  %v6518_v43 = vsub.f32 0.0, %v14512_v29  ;;  %v16016_v29 = vld [vmem:[#allocation10_spill] sm:$0xff] }
0x121e   :  { %v6543_v0 = vpop.permute.xlu1 %6542  ;;  %v6580_v62 = vmul.f32 %v14775_v41, %v6516_v22 }
0x121f   :  { %v6576_v36 = vmul.f32 %v6537_v26, %v6512_v23  ;;  %v6579_v52 = vmul.f32 %v6543_v0, %v6515_v4  ;;  %v6517_v26 = vsub.f32 0.0, %v14519_v14  ;;  %v6519_v0 = vsub.f32 0.0, %v14525_v63  ;;  %v16017_v63 = vld [vmem:[#allocation19_spill] sm:$0xff] }
0x1221   :  { %7768 = vrot.lane.b32.xlu1 %v7767_v50, %s8308_s0  ;;  %v14777_v12 = vpop.permute.xlu0 %6548 }
0x1222   :  { %v14779_v6 = vpop.permute.xlu1 %6546  ;;  %v6582_v14 = vmul.f32 %v14777_v12, %v6518_v43  ;;  %v16019_v12 = vld [vmem:[#allocation26_spill] sm:$0xff] }
0x1223   :  { %v6581_v37 = vmul.f32 %v14779_v6, %v6517_v26 }
0x1225   :  { %7778 = vrot.lane.b32.xlu1 %v7777_v42, %s8308_s0 }
0x1226   :  { %v14781_v61 = vpop.permute.xlu1 %6550 }
0x1227   :  { %v6583_v32 = vmul.f32 %v14781_v61, %v6519_v0  ;;  %v16020_v61 = vld [vmem:[#allocation21_spill] sm:$0xff] }
0x1263   :  { %v6665_v45 = vpop.permute.xlu0 %6664 }
0x1264   :  { %v6712_v9 = vadd.f32 %v6665_v45, %v6568_v7 }
0x1267   :  { %v6669_v25 = vpop.permute.xlu0 %6668 }
0x1268   :  { %v6714_v10 = vadd.f32 %v6669_v25, %v6570_v38  ;;  %v16018_v38 = vld [vmem:[#allocation12_spill] sm:$0xff] }
0x126b   :  { %v6667_v40 = vpop.permute.xlu1 %6666  ;;  %v6673_v18 = vpop.permute.xlu0 %6672 }
0x126c   :  { %v6713_v47 = vadd.f32 %v6667_v40, %v6569_v21  ;;  %v6716_v2 = vadd.f32 %v6673_v18, %v6572_v51  ;;  %v16029_v51 = vld [vmem:[#allocation45_spill] sm:$0xff] }
0x126e   :  { %v7782_v13 = vpack.i.bf16 %v6713_v47, %v6712_v9 }
0x126f   :  { %v6671_v19 = vpop.permute.xlu1 %6670  ;;  %v6677_v31 = vpop.permute.xlu0 %6676 }
0x1270   :  { %v6715_v33 = vadd.f32 %v6671_v19, %v6571_v17  ;;  %7783 = vrot.lane.b32.xlu0 %v7782_v13, %s8309_s18  ;;  %v6718_v35 = vadd.f32 %v6677_v31, %v6574_v11  ;;  %v16021_v17 = vld [vmem:[#allocation40_spill] sm:$0xff]  ;;  %v16023_v19 = vld [vmem:[#allocation11_spill] sm:$0xff]  ;;  %v16024_v31 = vld [vmem:[#allocation41_spill] sm:$0xff] }
0x1271   :  { %v16022_v13 = vld [vmem:[#allocation28_spill] sm:$0xff] }
0x1272   :  { %v7787_v57 = vpack.i.bf16 %v6715_v33, %v6714_v10  ;;  %v16027_v10 = vld [vmem:[#allocation29_spill] sm:$0xff]  ;;  %v16028_v33 = vld [vmem:[#allocation22_spill] sm:$0xff] }
0x1273   :  { %v6675_v46 = vpop.permute.xlu1 %6674  ;;  %v6681_v15 = vpop.permute.xlu0 %6680 }
0x1274   :  { %v6717_v60 = vadd.f32 %v6675_v46, %v6573_v48  ;;  %7788 = vrot.lane.b32.xlu1 %v7787_v57, %s8309_s18  ;;  %v6720_v42 = vadd.f32 %v6681_v15, %v6576_v36  ;;  %v16030_v48 = vld [vmem:[#allocation30_spill] sm:$0xff] }
0x1275   :  { %v16031_v57 = vld [vmem:[#allocation46_spill] sm:$0xff] }
0x1276   :  { %v7792_v54 = vpack.i.bf16 %v6717_v60, %v6716_v2 }
0x1277   :  { %v6679_v30 = vpop.permute.xlu1 %6678  ;;  %v6685_v44 = vpop.permute.xlu0 %6684 }
0x1278   :  { %v6719_v55 = vadd.f32 %v6679_v30, %v6575_v28  ;;  %7793 = vrot.lane.b32.xlu0 %v7792_v54, %s8309_s18  ;;  %v6722_v39 = vadd.f32 %v6685_v44, %v6578_v20 }
0x127a   :  { %v7797_v1 = vpack.i.bf16 %v6719_v55, %v6718_v35 }
0x127b   :  { %v6683_v50 = vpop.permute.xlu1 %6682  ;;  %v6689_v45 = vpop.permute.xlu0 %6688 }
0x127c   :  { %v6721_v53 = vadd.f32 %v6683_v50, %v6577_v16  ;;  %7798 = vrot.lane.b32.xlu1 %v7797_v1, %s8309_s18  ;;  %v6724_v40 = vadd.f32 %v6689_v45, %v6580_v62 }
0x127e   :  { %v7802_v3 = vpack.i.bf16 %v6721_v53, %v6720_v42 }
0x127f   :  { %v6687_v25 = vpop.permute.xlu1 %6686  ;;  %v6693_v24 = vpop.permute.xlu0 %6692 }
0x1280   :  { %v6723_v58 = vadd.f32 %v6687_v25, %v6579_v52  ;;  %7803 = vrot.lane.b32.xlu0 %v7802_v3, %s8309_s18  ;;  %v6726_v41 = vadd.f32 %v6693_v24, %v6582_v14 }
0x1282   :  { %v7807_v7 = vpack.i.bf16 %v6723_v58, %v6722_v39 }
0x1283   :  { %v6691_v21 = vpop.permute.xlu1 %6690  ;;  %v7744_v46 = vpop.permute.xlu0 %7743 }
0x1284   :  { %v6725_v18 = vadd.f32 %v6691_v21, %v6581_v37  ;;  %7808 = vrot.lane.b32.xlu1 %v7807_v7, %s8309_s18  ;;  %v7746_v30 = vunpack.i.h.bf16 %v7744_v46  ;;  %v7745_v23 = vunpack.i.l.bf16 %v7744_v46 }
0x1286   :  { %v7812_v27 = vpack.i.bf16 %v6725_v18, %v6724_v40 }
0x1287   :  { %v6695_v9 = vpop.permute.xlu1 %6694  ;;  %v7754_v49 = vpop.permute.xlu0 %7753 }
0x1288   :  { %v6727_v47 = vadd.f32 %v6695_v9, %v6583_v32  ;;  %7813 = vrot.lane.b32.xlu0 %v7812_v27, %s8309_s18  ;;  %v7756_v25 = vunpack.i.h.bf16 %v7754_v49  ;;  %v7755_v22 = vunpack.i.l.bf16 %v7754_v49 }
0x128a   :  { %v7817_v6 = vpack.i.bf16 %v6727_v47, %v6726_v41 }
0x128b   :  { %v7749_v15 = vpop.permute.xlu1 %7748  ;;  %v7764_v2 = vpop.permute.xlu0 %7763 }
0x128c   :  { %6953 = vrot.lane.b32.xlu0 %v16016_v29, %s8311_s15  ;;  %7818 = vrot.lane.b32.xlu1 %v7817_v6, %s8309_s18  ;;  %v7751_v50 = vunpack.i.h.bf16 %v7749_v15  ;;  %v7750_v56 = vunpack.i.l.bf16 %v7749_v15  ;;  %v7766_v41 = vunpack.i.h.bf16 %v7764_v2  ;;  %v7765_v47 = vunpack.i.l.bf16 %v7764_v2 }
0x128f   :  { %v7759_v5 = vpop.permute.xlu1 %7758  ;;  %v14851_v11 = vpop.permute.xlu0 %7773 }
0x1290   :  { %6957 = vrot.lane.b32.xlu0 %v16017_v63, %s8311_s15  ;;  %6955 = vrot.lane.b32.xlu1 %v16018_v38, %s8311_s15  ;;  %v7761_v43 = vunpack.i.h.bf16 %v7759_v5  ;;  %v7760_v0 = vunpack.i.l.bf16 %v7759_v5  ;;  %v7775_v46 = vunpack.i.l.bf16 %v14851_v11 }
0x1293   :  { %v14849_v60 = vpop.permute.xlu1 %7768 }
0x1294   :  { %6961 = vrot.lane.b32.xlu0 %v16019_v12, %s8311_s15  ;;  %6959 = vrot.lane.b32.xlu1 %v16020_v61, %s8311_s15 }
0x1297   :  { %v14853_v28 = vpop.permute.xlu1 %7778 }
0x1298   :  { %6965 = vrot.lane.b32.xlu0 %v16021_v17, %s8311_s15  ;;  %6963 = vrot.lane.b32.xlu1 %v16022_v13, %s8311_s15  ;;  %v7771_v13 = vunpack.i.h.bf16 %v14849_v60 }
0x129c   :  { %6969 = vrot.lane.b32.xlu0 %v16023_v19, %s8311_s15  ;;  %6967 = vrot.lane.b32.xlu1 %v16024_v31, %s8311_s15  ;;  %v7770_v19 = vunpack.i.l.bf16 %v14849_v60 }
0x12a0   :  { %6973 = vrot.lane.b32.xlu0 %v16025_v8, %s8311_s15  ;;  %6971 = vrot.lane.b32.xlu1 %v16026_v34, %s8311_s15 }
0x12a4   :  { %6977 = vrot.lane.b32.xlu0 %v16027_v10, %s8311_s15  ;;  %6975 = vrot.lane.b32.xlu1 %v16028_v33, %s8311_s15 }
0x12a8   :  { %6981 = vrot.lane.b32.xlu0 %v16029_v51, %s8311_s15  ;;  %6979 = vrot.lane.b32.xlu1 %v16030_v48, %s8311_s15 }
0x12ac   :  { %6983 = vrot.lane.b32.xlu1 %v16031_v57, %s8311_s15  ;;  %v7776_v57 = vunpack.i.h.bf16 %v14851_v11 }
0x12e2   :  { %v7784_v54 = vpop.permute.xlu0 %7783 }
0x12e3   :  { %v7786_v59 = vunpack.i.h.bf16 %v7784_v54  ;;  %v7785_v35 = vunpack.i.l.bf16 %v7784_v54 }
0x12e5   :  { %v6856_v55 = vsel %vm830_vm3, %v7745_v23, %v7785_v35  ;;  %v6857_v44 = vsel %vm830_vm3, %v7746_v30, %v7786_v59  ;;  %v7781_v23 = vunpack.i.h.bf16 %v14853_v28  ;;  %v7780_v59 = vunpack.i.l.bf16 %v14853_v28 }
0x12e6   :  { %v7462_v36 = vpack.c.bf16 %v6856_v55, %v6856_v55  ;;  %v7463_v16 = vpack.c.bf16 %v6857_v44, %v6857_v44  ;;  %v7789_v1 = vpop.permute.xlu1 %7788 }
0x12e7   :  { %v7791_v4 = vunpack.i.h.bf16 %v7789_v1  ;;  %v7790_v42 = vunpack.i.l.bf16 %v7789_v1 }
0x12e8   :  { %7302 = vst.msk [vmem:[%s15012_s6 + $0xc0] sm:$0xf] %vm927_vm1, %v7462_v36  ;;  %7303 = vst.msk [vmem:[%s15012_s6 + $0xc4] sm:$0xf] %vm927_vm1, %v7463_v16 }
0x12e9   :  { %v6859_v53 = vsel %vm830_vm3, %v7751_v50, %v7791_v4  ;;  %v6858_v20 = vsel %vm830_vm3, %v7750_v56, %v7790_v42 }
0x12ea   :  { %v7465_v52 = vpack.c.bf16 %v6859_v53, %v6859_v53  ;;  %v7464_v3 = vpack.c.bf16 %v6858_v20, %v6858_v20  ;;  %v7794_v45 = vpop.permute.xlu0 %7793 }
0x12eb   :  { %v7796_v26 = vunpack.i.h.bf16 %v7794_v45  ;;  %v7795_v39 = vunpack.i.l.bf16 %v7794_v45 }
0x12ec   :  { %7305 = vst.msk [vmem:[%s15012_s6 + $0xcc] sm:$0xf] %vm927_vm1, %v7465_v52  ;;  %7304 = vst.msk [vmem:[%s15012_s6 + $0xc8] sm:$0xf] %vm927_vm1, %v7464_v3 }
0x12ed   :  { %v6860_v58 = vsel %vm830_vm3, %v7755_v22, %v7795_v39  ;;  %v6861_v62 = vsel %vm830_vm3, %v7756_v25, %v7796_v26 }
0x12ee   :  { %v7466_v37 = vpack.c.bf16 %v6860_v58, %v6860_v58  ;;  %v7467_v7 = vpack.c.bf16 %v6861_v62, %v6861_v62  ;;  %v7799_v21 = vpop.permute.xlu1 %7798 }
0x12ef   :  { %v7801_v40 = vunpack.i.h.bf16 %v7799_v21  ;;  %v7800_v18 = vunpack.i.l.bf16 %v7799_v21 }
0x12f0   :  { %7306 = vst.msk [vmem:[%s15012_s6 + $0xd0] sm:$0xf] %vm927_vm1, %v7466_v37  ;;  %7307 = vst.msk [vmem:[%s15012_s6 + $0xd4] sm:$0xf] %vm927_vm1, %v7467_v7 }
0x12f1   :  { %v6863_v24 = vsel %vm830_vm3, %v7761_v43, %v7801_v40  ;;  %v6862_v14 = vsel %vm830_vm3, %v7760_v0, %v7800_v18 }
0x12f2   :  { %v7469_v32 = vpack.c.bf16 %v6863_v24, %v6863_v24  ;;  %v7468_v27 = vpack.c.bf16 %v6862_v14, %v6862_v14  ;;  %v7804_v9 = vpop.permute.xlu0 %7803 }
0x12f3   :  { %v7806_v6 = vunpack.i.h.bf16 %v7804_v9  ;;  %v7805_v29 = vunpack.i.l.bf16 %v7804_v9 }
0x12f4   :  { %7309 = vst.msk [vmem:[%s15012_s6 + $0xdc] sm:$0xf] %vm927_vm1, %v7469_v32  ;;  %7308 = vst.msk [vmem:[%s15012_s6 + $0xd8] sm:$0xf] %vm927_vm1, %v7468_v27 }
0x12f5   :  { %v6864_v63 = vsel %vm830_vm3, %v7765_v47, %v7805_v29  ;;  %v6865_v38 = vsel %vm830_vm3, %v7766_v41, %v7806_v6 }
0x12f6   :  { %v7470_v12 = vpack.c.bf16 %v6864_v63, %v6864_v63  ;;  %v7471_v61 = vpack.c.bf16 %v6865_v38, %v6865_v38  ;;  %v7809_v17 = vpop.permute.xlu1 %7808 }
0x12f7   :  { %v7811_v31 = vunpack.i.h.bf16 %v7809_v17  ;;  %v7810_v8 = vunpack.i.l.bf16 %v7809_v17 }
0x12f8   :  { %7310 = vst.msk [vmem:[%s15012_s6 + $0xe0] sm:$0xf] %vm927_vm1, %v7470_v12  ;;  %7311 = vst.msk [vmem:[%s15012_s6 + $0xe4] sm:$0xf] %vm927_vm1, %v7471_v61 }
0x12f9   :  { %v6867_v34 = vsel %vm830_vm3, %v7771_v13, %v7811_v31  ;;  %v6866_v10 = vsel %vm830_vm3, %v7770_v19, %v7810_v8 }
0x12fa   :  { %v7473_v33 = vpack.c.bf16 %v6867_v34, %v6867_v34  ;;  %v7472_v51 = vpack.c.bf16 %v6866_v10, %v6866_v10  ;;  %v7814_v48 = vpop.permute.xlu0 %7813 }
0x12fb   :  { %v7816_v15 = vunpack.i.h.bf16 %v7814_v48  ;;  %v7815_v49 = vunpack.i.l.bf16 %v7814_v48 }
0x12fc   :  { %7313 = vst.msk [vmem:[%s15012_s6 + $0xec] sm:$0xf] %vm927_vm1, %v7473_v33  ;;  %7312 = vst.msk [vmem:[%s15012_s6 + $0xe8] sm:$0xf] %vm927_vm1, %v7472_v51 }
0x12fd   :  { %v6868_v5 = vsel %vm830_vm3, %v7775_v46, %v7815_v49  ;;  %v6869_v2 = vsel %vm830_vm3, %v7776_v57, %v7816_v15 }
0x12fe   :  { %v7474_v60 = vpack.c.bf16 %v6868_v5, %v6868_v5  ;;  %v7475_v54 = vpack.c.bf16 %v6869_v2, %v6869_v2  ;;  %v7819_v30 = vpop.permute.xlu1 %7818  ;;  %v6954_v11 = vpop.permute.xlu0 %6953 }
0x12ff   :  { %v7821_v35 = vunpack.i.h.bf16 %v7819_v30  ;;  %v7820_v55 = vunpack.i.l.bf16 %v7819_v30  ;;  %7318 = vst.msk [vmem:[%s15010_s7 + $0xc0] sm:$0xf] %vm927_vm1, %v6954_v11 }
0x1300   :  { %7314 = vst.msk [vmem:[%s15012_s6 + $0xf0] sm:$0xf] %vm927_vm1, %v7474_v60  ;;  %7315 = vst.msk [vmem:[%s15012_s6 + $0xf4] sm:$0xf] %vm927_vm1, %v7475_v54 }
0x1301   :  { %v6871_v44 = vsel %vm830_vm3, %v7781_v23, %v7821_v35  ;;  %v6870_v28 = vsel %vm830_vm3, %v7780_v59, %v7820_v55 }
0x1302   :  { %v7477_v36 = vpack.c.bf16 %v6871_v44, %v6871_v44  ;;  %v7476_v16 = vpack.c.bf16 %v6870_v28, %v6870_v28  ;;  %v6956_v1 = vpop.permute.xlu1 %6955  ;;  %v6958_v50 = vpop.permute.xlu0 %6957 }
0x1303   :  { %7319 = vst.msk [vmem:[%s15010_s7 + $0xc4] sm:$0xf] %vm927_vm1, %v6956_v1  ;;  %7320 = vst.msk [vmem:[%s15010_s7 + $0xc8] sm:$0xf] %vm927_vm1, %v6958_v50 }
0x1304   :  { %7317 = vst.msk [vmem:[%s15012_s6 + $0xfc] sm:$0xf] %vm927_vm1, %v7477_v36  ;;  %7316 = vst.msk [vmem:[%s15012_s6 + $0xf8] sm:$0xf] %vm927_vm1, %v7476_v16 }
0x1306   :  { %v6960_v56 = vpop.permute.xlu1 %6959  ;;  %v6962_v4 = vpop.permute.xlu0 %6961 }
0x1307   :  { %7321 = vst.msk [vmem:[%s15010_s7 + $0xcc] sm:$0xf] %vm927_vm1, %v6960_v56  ;;  %7322 = vst.msk [vmem:[%s15010_s7 + $0xd0] sm:$0xf] %vm927_vm1, %v6962_v4 }
0x130a   :  { %v6964_v42 = vpop.permute.xlu1 %6963  ;;  %v6966_v53 = vpop.permute.xlu0 %6965 }
0x130b   :  { %7323 = vst.msk [vmem:[%s15010_s7 + $0xd4] sm:$0xf] %vm927_vm1, %v6964_v42  ;;  %7324 = vst.msk [vmem:[%s15010_s7 + $0xd8] sm:$0xf] %vm927_vm1, %v6966_v53 }
0x130e   :  { %v6968_v20 = vpop.permute.xlu1 %6967  ;;  %v6970_v52 = vpop.permute.xlu0 %6969 }
0x130f   :  { %7325 = vst.msk [vmem:[%s15010_s7 + $0xdc] sm:$0xf] %vm927_vm1, %v6968_v20  ;;  %7326 = vst.msk [vmem:[%s15010_s7 + $0xe0] sm:$0xf] %vm927_vm1, %v6970_v52 }
0x1312   :  { %v6972_v3 = vpop.permute.xlu1 %6971  ;;  %v6974_v45 = vpop.permute.xlu0 %6973 }
0x1313   :  { %7327 = vst.msk [vmem:[%s15010_s7 + $0xe4] sm:$0xf] %vm927_vm1, %v6972_v3  ;;  %7328 = vst.msk [vmem:[%s15010_s7 + $0xe8] sm:$0xf] %vm927_vm1, %v6974_v45 }
0x1316   :  { %v6976_v25 = vpop.permute.xlu1 %6975  ;;  %v6978_v22 = vpop.permute.xlu0 %6977 }
0x1317   :  { %7329 = vst.msk [vmem:[%s15010_s7 + $0xec] sm:$0xf] %vm927_vm1, %v6976_v25  ;;  %7330 = vst.msk [vmem:[%s15010_s7 + $0xf0] sm:$0xf] %vm927_vm1, %v6978_v22 }
0x131a   :  { %v6980_v26 = vpop.permute.xlu1 %6979  ;;  %v6982_v39 = vpop.permute.xlu0 %6981 }
0x131b   :  { %7331 = vst.msk [vmem:[%s15010_s7 + $0xf4] sm:$0xf] %vm927_vm1, %v6980_v26  ;;  %7332 = vst.msk [vmem:[%s15010_s7 + $0xf8] sm:$0xf] %vm927_vm1, %v6982_v39 }
0x131e   :  { %v6984_v58 = vpop.permute.xlu1 %6983 }
0x131f   :  { %7333 = vst.msk [vmem:[%s15010_s7 + $0xfc] sm:$0xf] %vm927_vm1, %v6984_v58 }

</bundles_post_ra>
